<compile_context>
chip_gen: v6e
topology: v6e:2x2x1
jax: 0.10.0
libtpu: 0.0.40
codegen_flags: <defaults>
</compile_context>

<pallas_src>
import functools

import jax
import jax.numpy as jnp
import numpy as np
from jax.experimental import pallas as pl
from jax.experimental.pallas import tpu as pltpu


def _discrim_last_block_kernel(
    x_ref,        # (S, C)        bf16 activations, rows = (h*W + w)*TB + b
    sd_ref,       # (TB, 1)       f32 per-sample minibatch stddev
    tapsum_ref,   # (HW, C)       f32 sum of valid stddev-channel conv taps per pos
    bconv_ref,    # (1, C)        f32 conv bias
    wtap_ref,     # (9, C, C)     bf16 conv weight per tap, (Cin, Cout), EqLR-scaled
    w1r_ref,      # (HW, C, MID)  bf16 linear-1 weight regrouped per spatial position
    b1_ref,       # (1, MID)      f32
    w2_ref,       # (1, MID)      f32 linear-2 weight (row)
    b2_ref,       # (1, 1)        f32
    o_ref,        # (TB, 1)
    *, H, W, tb,
):
    C = x_ref.shape[-1]
    MID = b1_ref.shape[-1]
    TB = tb
    WROW = W * TB                     # rows of one spatial h-row (w, b) per block
    WPROW = (W + 2) * TB              # same, width-padded

    x = x_ref[...]                                            # bf16 (S, C)
    sd = sd_ref[...].astype(jnp.float32)                      # (TB, 1)

    # Width-padded activation slab: rows = (h*(W+2) + wp)*TB + b, zeros at
    # wp = 0 and wp = W+1.  All pieces are TB-row aligned 2-D concatenations.
    zb1 = jnp.zeros((TB, C), x.dtype)
    zb2 = jnp.zeros((2 * TB, C), x.dtype)
    parts = [zb1]
    for h in range(H):
        parts.append(x[h * WROW:(h + 1) * WROW, :])
        parts.append(zb2 if h < H - 1 else zb1)
    xw = jnp.concatenate(parts, axis=0)                       # (H*(W+2)*TB, C)

    z = jnp.zeros((TB, MID), jnp.float32)                     # linear-1 accumulator

    for h in range(H):
        # ---- 3x3 conv, output row h: shifted MXU matmuls, plain accumulation ----
        conv = None
        for dy in (-1, 0, 1):
            hin = h + dy
            if not (0 <= hin < H):
                continue                                      # zero pad row: skip
            for dx in (-1, 0, 1):
                t = (dy + 1) * 3 + (dx + 1)
                start = hin * WPROW + (1 + dx) * TB           # aligned static slice
                d = jnp.dot(xw[start:start + WROW, :], wtap_ref[t],
                            preferred_element_type=jnp.float32)
                conv = d if conv is None else conv + d        # (WROW, C) f32

        # ---- bias + stddev-channel fold, LeakyReLU, flatten -> linear-1 ----
        for w in range(W):
            p = h * W + w
            a = (conv[w * TB:(w + 1) * TB, :]
                 + bconv_ref[...]
                 + sd * tapsum_ref[p:p + 1, :])                # (TB, C) f32
            a = jnp.where(a >= 0, a, 0.2 * a)                  # LeakyReLU(0.2)
            z = z + jnp.dot(a.astype(x.dtype), w1r_ref[p],
                            preferred_element_type=jnp.float32)

    z = z + b1_ref[...]
    z = jnp.where(z >= 0, z, 0.2 * z)                          # LeakyReLU(0.2)

    # ---- linear-2 (N=1) on the VPU/XLU instead of the MXU ---------------------
    out = jnp.sum(z * w2_ref[...], axis=-1, keepdims=True) + b2_ref[...]
    o_ref[...] = out.astype(o_ref.dtype)


def discrim_last_block_stylegan(x, wc, bc, w1, b1, w2, b2,
                                *, group_size=4, batch_tile=64):
    """x: (B, C, H, W); wc: (C, C+1, 3, 3); bc: (C,);
    w1: (MID, C*H*W); b1: (MID,); w2: (1, MID); b2: (1,).  Returns (B, 1)."""
    B, C, H, W = x.shape
    HW = H * W
    MID = w1.shape[0]
    assert w1.shape[1] == C * HW
    f32 = jnp.float32
    bf16 = jnp.bfloat16

    # ---- batch tiling: TB multiple of 16, pad B up to a multiple of TB --------
    TB = max(16, (int(batch_tile) // 16) * 16)
    if B < TB:
        TB = ((B + 15) // 16) * 16
    B_pad = ((B + TB - 1) // TB) * TB
    nb = B_pad // TB
    S = HW * TB

    # ---- minibatch stddev scalar per sample (AddStandardDeviationGrouped) -----
    # TODO(synk): exact AddStandardDeviationGrouped source not given; standard
    # StyleGAN convention assumed (group reshape, biased var, eps=1e-8 in sqrt,
    # mean over C,H,W, replicated across the group).
    G = min(group_size, B)
    assert B % G == 0, "batch must be divisible by the stddev group size"
    y = x.reshape(G, B // G, C, H, W).astype(f32)
    y = y - jnp.mean(y, axis=0, keepdims=True)
    y = jnp.sqrt(jnp.mean(y * y, axis=0) + 1e-8)
    sd = jnp.tile(jnp.mean(y, axis=(1, 2, 3)), G)              # (B,)

    # ---- equalized-LR runtime scales (gain=sqrt(2), bias unscaled) -------------
    # TODO(synk): EqualizedLR* source not given; standard wscale trick assumed.
    cs = float(np.sqrt(2.0 / ((C + 1) * 9)))
    s1 = float(np.sqrt(2.0 / (C * HW)))
    s2 = float(np.sqrt(2.0 / MID))

    wcs = wc.astype(f32) * cs
    w_taps = jnp.transpose(wcs[:, :C], (2, 3, 1, 0)).reshape(9, C, C).astype(bf16)
    w_sd = wcs[:, C].reshape(C, 9)                             # (Cout, tap)

    valid = np.zeros((HW, 9), np.float32)                      # zero-padding pattern
    for hh in range(H):
        for ww in range(W):
            for kh in range(3):
                for kw in range(3):
                    if 0 <= hh + kh - 1 < H and 0 <= ww + kw - 1 < W:
                        valid[hh * W + ww, kh * 3 + kw] = 1.0
    tapsum = (jnp.asarray(valid) @ w_sd.T).astype(f32)         # (HW, C)

    bconv = bc.astype(f32).reshape(1, C)
    w1r = jnp.transpose((w1.astype(f32) * s1).reshape(MID, C, HW),
                        (2, 1, 0)).astype(bf16)                # (HW, C, MID)
    b1r = b1.astype(f32).reshape(1, MID)
    w2r = (w2.astype(f32) * s2).reshape(1, MID)
    b2r = b2.astype(f32).reshape(1, 1)

    # ---- activation layout: rows = (h*W + w)*TB + b, channels on lanes, bf16 ---
    xpb = jnp.pad(x, ((0, B_pad - B), (0, 0), (0, 0), (0, 0)))
    x_t = jnp.transpose(xpb, (0, 2, 3, 1)).reshape(nb, TB, HW, C)
    x_sm = jnp.transpose(x_t, (0, 2, 1, 3)).reshape(nb * S, C).astype(bf16)
    sd_p = jnp.pad(sd, (0, B_pad - B)).reshape(B_pad, 1).astype(f32)

    kernel = functools.partial(_discrim_last_block_kernel, H=H, W=W, tb=TB)

    # VMEM budget hint (weights single-buffered + pipelined activations + temps).
    weight_bytes = (9 * C * C + HW * C * MID) * 2 + (HW * C + 2 * C + 2 * MID + 2) * 4
    act_bytes = S * max(C, 128) * 2 + 2 * TB * 128 * 4
    tmp_bytes = H * (W + 2) * TB * C * 2 + W * TB * C * 4 + TB * max(MID, 128) * 4
    est = 2 * weight_bytes + 2 * act_bytes + 2 * tmp_bytes
    vmem_limit = int(min(max(est, 32 << 20), 56 << 20))

    def const_spec(shape, buffered):
        idx = lambda i, _n=len(shape): (0,) * _n
        if buffered:
            # grid-invariant input: no need to double-buffer it in VMEM
            return pl.BlockSpec(shape, idx, pipeline_mode=pl.Buffered(1))
        return pl.BlockSpec(shape, idx)

    def build(buffered):
        in_specs = [
            pl.BlockSpec((S, C), lambda i: (i, 0)),            # x (per batch tile)
            pl.BlockSpec((TB, 1), lambda i: (i, 0)),           # stddev scalar
            const_spec((HW, C), buffered),                     # stddev-chan tapsum
            const_spec((1, C), buffered),                      # conv bias
            const_spec((9, C, C), buffered),                   # conv taps (bf16)
            const_spec((HW, C, MID), buffered),                # linear-1 W (bf16)
            const_spec((1, MID), buffered),                    # linear-1 b
            const_spec((1, MID), buffered),                    # linear-2 W row
            const_spec((1, 1), buffered),                      # linear-2 b
        ]
        return pl.pallas_call(
            kernel,
            out_shape=jax.ShapeDtypeStruct((B_pad, 1), x.dtype),
            grid_spec=pltpu.PrefetchScalarGridSpec(
                num_scalar_prefetch=0,
                grid=(nb,),
                in_specs=in_specs,
                out_specs=pl.BlockSpec((TB, 1), lambda i: (i, 0)),
            ),
            compiler_params=pltpu.CompilerParams(
                dimension_semantics=("parallel",),
                vmem_limit_bytes=vmem_limit),
        )(x_sm, sd_p, tapsum, bconv, w_taps, w1r, b1r, w2r, b2r)

    try:
        out = build(True)
    except Exception:
        # older / stricter Pallas: fall back to default (double) buffering
        out = build(False)

    return out[:B]


def _reference(x, wc, bc, w1, b1, w2, b2, group_size=4):
    """Plain-JAX reference of the PyTorch forward (NCHW)."""
    B, C, H, W = x.shape
    f32 = jnp.float32
    xf = x.astype(f32)

    G = min(group_size, B)
    y = xf.reshape(G, B // G, C, H, W)
    y = y - jnp.mean(y, axis=0, keepdims=True)
    y = jnp.sqrt(jnp.mean(y * y, axis=0) + 1e-8)
    y = jnp.tile(jnp.mean(y, axis=(1, 2, 3)), G).reshape(B, 1, 1, 1)
    y = jnp.broadcast_to(y, (B, 1, H, W))
    xa = jnp.concatenate([xf, y], axis=1)                      # (B, C+1, H, W)

    cs = jnp.sqrt(2.0 / ((C + 1) * 9))
    h = jax.lax.conv_general_dilated(
        xa, wc.astype(f32) * cs, window_strides=(1, 1), padding="SAME",
        dimension_numbers=("NCHW", "OIHW", "NCHW"))
    h = h + bc.astype(f32).reshape(1, C, 1, 1)
    h = jnp.where(h >= 0, h, 0.2 * h)

    f = h.reshape(B, C * H * W)
    s1 = jnp.sqrt(2.0 / (C * H * W))
    z = f @ (w1.astype(f32) * s1).T + b1.astype(f32)
    z = jnp.where(z >= 0, z, 0.2 * z)
    s2 = jnp.sqrt(2.0 / w1.shape[0])
    return (z @ (w2.astype(f32) * s2).T + b2.astype(f32)).astype(x.dtype)


if __name__ == "__main__":
    # small shapes consistent with the module: last block => 4x4 spatial
    B, C, H, W, MID = 32, 8, 4, 4, 32

    key = jax.random.PRNGKey(0)
    kx, kc, kbc, k1, kb1, k2, kb2 = jax.random.split(key, 7)

    x = jax.random.normal(kx, (B, C, H, W), dtype=jnp.float32)
    wc = jax.random.normal(kc, (C, C + 1, 3, 3), dtype=jnp.float32)   # EqLR conv weight
    bc = 0.1 * jax.random.normal(kbc, (C,), dtype=jnp.float32)
    w1 = jax.random.normal(k1, (MID, C * H * W), dtype=jnp.float32)    # EqLR linear 1
    b1 = 0.1 * jax.random.normal(kb1, (MID,), dtype=jnp.float32)
    w2 = jax.random.normal(k2, (1, MID), dtype=jnp.float32)            # EqLR linear 2
    b2 = 0.1 * jax.random.normal(kb2, (1,), dtype=jnp.float32)

    # main test: two grid steps (TB=16, nb=2)
    out = discrim_last_block_stylegan(x, wc, bc, w1, b1, w2, b2, batch_tile=16)
    out = jax.block_until_ready(out)
    ref = _reference(x, wc, bc, w1, b1, w2, b2)
    assert out.shape == (B, 1)
    err = float(jnp.max(jnp.abs(out - ref)))
    assert jnp.allclose(out, ref, atol=3e-2, rtol=3e-2), f"mismatch vs reference: {err}"

    # padded-batch test: B=24 is padded up to 32, padded outputs dropped
    Bp = 24
    xp = x[:Bp]
    outp = discrim_last_block_stylegan(xp, wc, bc, w1, b1, w2, b2, batch_tile=16)
    outp = jax.block_until_ready(outp)
    refp = _reference(xp, wc, bc, w1, b1, w2, b2)
    assert outp.shape == (Bp, 1)
    errp = float(jnp.max(jnp.abs(outp - refp)))
    assert jnp.allclose(outp, refp, atol=3e-2, rtol=3e-2), f"padded mismatch: {errp}"

    print("KERNEL_OK")
</pallas_src>

<mosaic_0001>
module attributes {stable_mosaic.version = 11 : i64} {
  func.func @_discrim_last_block_kernel(%arg0: i32, %arg1: memref<256x8xbf16, #tpu.memory_space<vmem>>, %arg2: memref<16x1xf32, #tpu.memory_space<vmem>>, %arg3: memref<16x8xf32, #tpu.memory_space<vmem>>, %arg4: memref<1x8xf32, #tpu.memory_space<vmem>>, %arg5: memref<9x8x8xbf16, #tpu.memory_space<vmem>>, %arg6: memref<16x8x32xbf16, #tpu.memory_space<vmem>>, %arg7: memref<1x32xf32, #tpu.memory_space<vmem>>, %arg8: memref<1x32xf32, #tpu.memory_space<vmem>>, %arg9: memref<1x1xf32, #tpu.memory_space<vmem>>, %arg10: memref<16x1xf32, #tpu.memory_space<vmem>>) attributes {dimension_semantics = [#tpu.dimension_semantics<parallel>], iteration_bounds = array<i64: 2>, scalar_prefetch = 0 : i64, scratch_operands = 0 : i64, tpu.core_type = #tpu.core_type<tc>, window_params = [{transform_indices = @transform_0, window_bounds = array<i64: 256, 8>}, {transform_indices = @transform_1, window_bounds = array<i64: 16, 1>}, {pipeline_mode = #tpu.pipeline_mode<synchronous>, transform_indices = @transform_2, window_bounds = array<i64: 16, 8>}, {pipeline_mode = #tpu.pipeline_mode<synchronous>, transform_indices = @transform_3, window_bounds = array<i64: 1, 8>}, {pipeline_mode = #tpu.pipeline_mode<synchronous>, transform_indices = @transform_4, window_bounds = array<i64: 9, 8, 8>}, {pipeline_mode = #tpu.pipeline_mode<synchronous>, transform_indices = @transform_5, window_bounds = array<i64: 16, 8, 32>}, {pipeline_mode = #tpu.pipeline_mode<synchronous>, transform_indices = @transform_6, window_bounds = array<i64: 1, 32>}, {pipeline_mode = #tpu.pipeline_mode<synchronous>, transform_indices = @transform_7, window_bounds = array<i64: 1, 32>}, {pipeline_mode = #tpu.pipeline_mode<synchronous>, transform_indices = @transform_8, window_bounds = array<i64: 1, 1>}, {transform_indices = @transform_9, window_bounds = array<i64: 16, 1>}]} {
    %c0 = arith.constant 0 : index
    %c0_0 = arith.constant 0 : index
    %0 = vector.load %arg1[%c0, %c0_0] : memref<256x8xbf16, #tpu.memory_space<vmem>>, vector<256x8xbf16>
    %c0_1 = arith.constant 0 : index
    %c0_2 = arith.constant 0 : index
    %1 = vector.load %arg2[%c0_1, %c0_2] : memref<16x1xf32, #tpu.memory_space<vmem>>, vector<16x1xf32>
    %cst = arith.constant 0.000000e+00 : bf16
    %2 = vector.broadcast %cst : bf16 to vector<16x8xbf16>
    %cst_3 = arith.constant 0.000000e+00 : bf16
    %3 = vector.broadcast %cst_3 : bf16 to vector<32x8xbf16>
    %4 = vector.extract_strided_slice %0 {offsets = [0, 0], sizes = [64, 8], strides = [1, 1]} : vector<256x8xbf16> to vector<64x8xbf16>
    %5 = vector.extract_strided_slice %0 {offsets = [64, 0], sizes = [64, 8], strides = [1, 1]} : vector<256x8xbf16> to vector<64x8xbf16>
    %6 = vector.extract_strided_slice %0 {offsets = [128, 0], sizes = [64, 8], strides = [1, 1]} : vector<256x8xbf16> to vector<64x8xbf16>
    %7 = vector.extract_strided_slice %0 {offsets = [192, 0], sizes = [64, 8], strides = [1, 1]} : vector<256x8xbf16> to vector<64x8xbf16>
    %8 = tpu.concatenate %2, %4, %3, %5, %3, %6, %3, %7, %2 in 0 : vector<16x8xbf16>, vector<64x8xbf16>, vector<32x8xbf16>, vector<64x8xbf16>, vector<32x8xbf16>, vector<64x8xbf16>, vector<32x8xbf16>, vector<64x8xbf16>, vector<16x8xbf16> -> vector<384x8xbf16>
    %cst_4 = arith.constant 0.000000e+00 : f32
    %9 = vector.broadcast %cst_4 : f32 to vector<16x32xf32>
    %10 = vector.extract_strided_slice %8 {offsets = [0, 0], sizes = [64, 8], strides = [1, 1]} : vector<384x8xbf16> to vector<64x8xbf16>
    %c3 = arith.constant 3 : index
    %c0_5 = arith.constant 0 : index
    %c0_6 = arith.constant 0 : index
    %11 = vector.load %arg5[%c3, %c0_5, %c0_6] : memref<9x8x8xbf16, #tpu.memory_space<vmem>>, vector<1x8x8xbf16>
    %12 = vector.shape_cast %11 : vector<1x8x8xbf16> to vector<8x8xbf16>
    %cst_7 = arith.constant dense<0.000000e+00> : vector<64x8xf32>
    %13 = tpu.matmul %10, %12, %cst_7 {dimension_numbers = #tpu.dot_dimension_numbers<[1], [0], [0], [1], [0, 0, 1, 1], [], []>} : vector<64x8xbf16>, vector<8x8xbf16>, vector<64x8xf32> -> vector<64x8xf32>
    %14 = vector.extract_strided_slice %8 {offsets = [16, 0], sizes = [64, 8], strides = [1, 1]} : vector<384x8xbf16> to vector<64x8xbf16>
    %c4 = arith.constant 4 : index
    %c0_8 = arith.constant 0 : index
    %c0_9 = arith.constant 0 : index
    %15 = vector.load %arg5[%c4, %c0_8, %c0_9] : memref<9x8x8xbf16, #tpu.memory_space<vmem>>, vector<1x8x8xbf16>
    %16 = vector.shape_cast %15 : vector<1x8x8xbf16> to vector<8x8xbf16>
    %cst_10 = arith.constant dense<0.000000e+00> : vector<64x8xf32>
    %17 = tpu.matmul %14, %16, %cst_10 {dimension_numbers = #tpu.dot_dimension_numbers<[1], [0], [0], [1], [0, 0, 1, 1], [], []>} : vector<64x8xbf16>, vector<8x8xbf16>, vector<64x8xf32> -> vector<64x8xf32>
    %18 = arith.addf %13, %17 : vector<64x8xf32>
    %19 = vector.extract_strided_slice %8 {offsets = [32, 0], sizes = [64, 8], strides = [1, 1]} : vector<384x8xbf16> to vector<64x8xbf16>
    %c5 = arith.constant 5 : index
    %c0_11 = arith.constant 0 : index
    %c0_12 = arith.constant 0 : index
    %20 = vector.load %arg5[%c5, %c0_11, %c0_12] : memref<9x8x8xbf16, #tpu.memory_space<vmem>>, vector<1x8x8xbf16>
    %21 = vector.shape_cast %20 : vector<1x8x8xbf16> to vector<8x8xbf16>
    %cst_13 = arith.constant dense<0.000000e+00> : vector<64x8xf32>
    %22 = tpu.matmul %19, %21, %cst_13 {dimension_numbers = #tpu.dot_dimension_numbers<[1], [0], [0], [1], [0, 0, 1, 1], [], []>} : vector<64x8xbf16>, vector<8x8xbf16>, vector<64x8xf32> -> vector<64x8xf32>
    %23 = arith.addf %18, %22 : vector<64x8xf32>
    %24 = vector.extract_strided_slice %8 {offsets = [96, 0], sizes = [64, 8], strides = [1, 1]} : vector<384x8xbf16> to vector<64x8xbf16>
    %c6 = arith.constant 6 : index
    %c0_14 = arith.constant 0 : index
    %c0_15 = arith.constant 0 : index
    %25 = vector.load %arg5[%c6, %c0_14, %c0_15] : memref<9x8x8xbf16, #tpu.memory_space<vmem>>, vector<1x8x8xbf16>
    %26 = vector.shape_cast %25 : vector<1x8x8xbf16> to vector<8x8xbf16>
    %cst_16 = arith.constant dense<0.000000e+00> : vector<64x8xf32>
    %27 = tpu.matmul %24, %26, %cst_16 {dimension_numbers = #tpu.dot_dimension_numbers<[1], [0], [0], [1], [0, 0, 1, 1], [], []>} : vector<64x8xbf16>, vector<8x8xbf16>, vector<64x8xf32> -> vector<64x8xf32>
    %28 = arith.addf %23, %27 : vector<64x8xf32>
    %29 = vector.extract_strided_slice %8 {offsets = [112, 0], sizes = [64, 8], strides = [1, 1]} : vector<384x8xbf16> to vector<64x8xbf16>
    %c7 = arith.constant 7 : index
    %c0_17 = arith.constant 0 : index
    %c0_18 = arith.constant 0 : index
    %30 = vector.load %arg5[%c7, %c0_17, %c0_18] : memref<9x8x8xbf16, #tpu.memory_space<vmem>>, vector<1x8x8xbf16>
    %31 = vector.shape_cast %30 : vector<1x8x8xbf16> to vector<8x8xbf16>
    %cst_19 = arith.constant dense<0.000000e+00> : vector<64x8xf32>
    %32 = tpu.matmul %29, %31, %cst_19 {dimension_numbers = #tpu.dot_dimension_numbers<[1], [0], [0], [1], [0, 0, 1, 1], [], []>} : vector<64x8xbf16>, vector<8x8xbf16>, vector<64x8xf32> -> vector<64x8xf32>
    %33 = arith.addf %28, %32 : vector<64x8xf32>
    %34 = vector.extract_strided_slice %8 {offsets = [128, 0], sizes = [64, 8], strides = [1, 1]} : vector<384x8xbf16> to vector<64x8xbf16>
    %c8 = arith.constant 8 : index
    %c0_20 = arith.constant 0 : index
    %c0_21 = arith.constant 0 : index
    %35 = vector.load %arg5[%c8, %c0_20, %c0_21] : memref<9x8x8xbf16, #tpu.memory_space<vmem>>, vector<1x8x8xbf16>
    %36 = vector.shape_cast %35 : vector<1x8x8xbf16> to vector<8x8xbf16>
    %cst_22 = arith.constant dense<0.000000e+00> : vector<64x8xf32>
    %37 = tpu.matmul %34, %36, %cst_22 {dimension_numbers = #tpu.dot_dimension_numbers<[1], [0], [0], [1], [0, 0, 1, 1], [], []>} : vector<64x8xbf16>, vector<8x8xbf16>, vector<64x8xf32> -> vector<64x8xf32>
    %38 = arith.addf %33, %37 : vector<64x8xf32>
    %39 = vector.extract_strided_slice %38 {offsets = [0, 0], sizes = [16, 8], strides = [1, 1]} : vector<64x8xf32> to vector<16x8xf32>
    %c0_23 = arith.constant 0 : index
    %c0_24 = arith.constant 0 : index
    %40 = vector.load %arg4[%c0_23, %c0_24] : memref<1x8xf32, #tpu.memory_space<vmem>>, vector<1x8xf32>
    %41 = vector.broadcast %40 : vector<1x8xf32> to vector<16x8xf32>
    %42 = arith.addf %39, %41 : vector<16x8xf32>
    %c0_25 = arith.constant 0 : index
    %c0_26 = arith.constant 0 : index
    %43 = vector.load %arg3[%c0_25, %c0_26] : memref<16x8xf32, #tpu.memory_space<vmem>>, vector<1x8xf32>
    %44 = vector.broadcast %1 : vector<16x1xf32> to vector<16x8xf32>
    %45 = vector.broadcast %43 : vector<1x8xf32> to vector<16x8xf32>
    %46 = arith.mulf %44, %45 : vector<16x8xf32>
    %47 = arith.addf %42, %46 : vector<16x8xf32>
    %cst_27 = arith.constant 0.000000e+00 : f32
    %48 = vector.broadcast %cst_27 : f32 to vector<16x8xf32>
    %49 = arith.cmpf oge, %47, %48 : vector<16x8xf32>
    %cst_28 = arith.constant 2.000000e-01 : f32
    %50 = vector.broadcast %cst_28 : f32 to vector<16x8xf32>
    %51 = arith.mulf %50, %47 : vector<16x8xf32>
    %52 = arith.select %49, %47, %51 : vector<16x8xi1>, vector<16x8xf32>
    %53 = arith.truncf %52 : vector<16x8xf32> to vector<16x8xbf16>
    %c0_29 = arith.constant 0 : index
    %c0_30 = arith.constant 0 : index
    %c0_31 = arith.constant 0 : index
    %54 = vector.load %arg6[%c0_29, %c0_30, %c0_31] : memref<16x8x32xbf16, #tpu.memory_space<vmem>>, vector<1x8x32xbf16>
    %55 = vector.shape_cast %54 : vector<1x8x32xbf16> to vector<8x32xbf16>
    %cst_32 = arith.constant dense<0.000000e+00> : vector<16x32xf32>
    %56 = tpu.matmul %53, %55, %cst_32 {dimension_numbers = #tpu.dot_dimension_numbers<[1], [0], [0], [1], [0, 0, 1, 1], [], []>} : vector<16x8xbf16>, vector<8x32xbf16>, vector<16x32xf32> -> vector<16x32xf32>
    %57 = arith.addf %9, %56 : vector<16x32xf32>
    %58 = vector.extract_strided_slice %38 {offsets = [16, 0], sizes = [16, 8], strides = [1, 1]} : vector<64x8xf32> to vector<16x8xf32>
    %c0_33 = arith.constant 0 : index
    %c0_34 = arith.constant 0 : index
    %59 = vector.load %arg4[%c0_33, %c0_34] : memref<1x8xf32, #tpu.memory_space<vmem>>, vector<1x8xf32>
    %60 = vector.broadcast %59 : vector<1x8xf32> to vector<16x8xf32>
    %61 = arith.addf %58, %60 : vector<16x8xf32>
    %c1 = arith.constant 1 : index
    %c0_35 = arith.constant 0 : index
    %62 = vector.load %arg3[%c1, %c0_35] : memref<16x8xf32, #tpu.memory_space<vmem>>, vector<1x8xf32>
    %63 = vector.broadcast %1 : vector<16x1xf32> to vector<16x8xf32>
    %64 = vector.broadcast %62 : vector<1x8xf32> to vector<16x8xf32>
    %65 = arith.mulf %63, %64 : vector<16x8xf32>
    %66 = arith.addf %61, %65 : vector<16x8xf32>
    %cst_36 = arith.constant 0.000000e+00 : f32
    %67 = vector.broadcast %cst_36 : f32 to vector<16x8xf32>
    %68 = arith.cmpf oge, %66, %67 : vector<16x8xf32>
    %cst_37 = arith.constant 2.000000e-01 : f32
    %69 = vector.broadcast %cst_37 : f32 to vector<16x8xf32>
    %70 = arith.mulf %69, %66 : vector<16x8xf32>
    %71 = arith.select %68, %66, %70 : vector<16x8xi1>, vector<16x8xf32>
    %72 = arith.truncf %71 : vector<16x8xf32> to vector<16x8xbf16>
    %c1_38 = arith.constant 1 : index
    %c0_39 = arith.constant 0 : index
    %c0_40 = arith.constant 0 : index
    %73 = vector.load %arg6[%c1_38, %c0_39, %c0_40] : memref<16x8x32xbf16, #tpu.memory_space<vmem>>, vector<1x8x32xbf16>
    %74 = vector.shape_cast %73 : vector<1x8x32xbf16> to vector<8x32xbf16>
    %cst_41 = arith.constant dense<0.000000e+00> : vector<16x32xf32>
    %75 = tpu.matmul %72, %74, %cst_41 {dimension_numbers = #tpu.dot_dimension_numbers<[1], [0], [0], [1], [0, 0, 1, 1], [], []>} : vector<16x8xbf16>, vector<8x32xbf16>, vector<16x32xf32> -> vector<16x32xf32>
    %76 = arith.addf %57, %75 : vector<16x32xf32>
    %77 = vector.extract_strided_slice %38 {offsets = [32, 0], sizes = [16, 8], strides = [1, 1]} : vector<64x8xf32> to vector<16x8xf32>
    %c0_42 = arith.constant 0 : index
    %c0_43 = arith.constant 0 : index
    %78 = vector.load %arg4[%c0_42, %c0_43] : memref<1x8xf32, #tpu.memory_space<vmem>>, vector<1x8xf32>
    %79 = vector.broadcast %78 : vector<1x8xf32> to vector<16x8xf32>
    %80 = arith.addf %77, %79 : vector<16x8xf32>
    %c2 = arith.constant 2 : index
    %c0_44 = arith.constant 0 : index
    %81 = vector.load %arg3[%c2, %c0_44] : memref<16x8xf32, #tpu.memory_space<vmem>>, vector<1x8xf32>
    %82 = vector.broadcast %1 : vector<16x1xf32> to vector<16x8xf32>
    %83 = vector.broadcast %81 : vector<1x8xf32> to vector<16x8xf32>
    %84 = arith.mulf %82, %83 : vector<16x8xf32>
    %85 = arith.addf %80, %84 : vector<16x8xf32>
    %cst_45 = arith.constant 0.000000e+00 : f32
    %86 = vector.broadcast %cst_45 : f32 to vector<16x8xf32>
    %87 = arith.cmpf oge, %85, %86 : vector<16x8xf32>
    %cst_46 = arith.constant 2.000000e-01 : f32
    %88 = vector.broadcast %cst_46 : f32 to vector<16x8xf32>
    %89 = arith.mulf %88, %85 : vector<16x8xf32>
    %90 = arith.select %87, %85, %89 : vector<16x8xi1>, vector<16x8xf32>
    %91 = arith.truncf %90 : vector<16x8xf32> to vector<16x8xbf16>
    %c2_47 = arith.constant 2 : index
    %c0_48 = arith.constant 0 : index
    %c0_49 = arith.constant 0 : index
    %92 = vector.load %arg6[%c2_47, %c0_48, %c0_49] : memref<16x8x32xbf16, #tpu.memory_space<vmem>>, vector<1x8x32xbf16>
    %93 = vector.shape_cast %92 : vector<1x8x32xbf16> to vector<8x32xbf16>
    %cst_50 = arith.constant dense<0.000000e+00> : vector<16x32xf32>
    %94 = tpu.matmul %91, %93, %cst_50 {dimension_numbers = #tpu.dot_dimension_numbers<[1], [0], [0], [1], [0, 0, 1, 1], [], []>} : vector<16x8xbf16>, vector<8x32xbf16>, vector<16x32xf32> -> vector<16x32xf32>
    %95 = arith.addf %76, %94 : vector<16x32xf32>
    %96 = vector.extract_strided_slice %38 {offsets = [48, 0], sizes = [16, 8], strides = [1, 1]} : vector<64x8xf32> to vector<16x8xf32>
    %c0_51 = arith.constant 0 : index
    %c0_52 = arith.constant 0 : index
    %97 = vector.load %arg4[%c0_51, %c0_52] : memref<1x8xf32, #tpu.memory_space<vmem>>, vector<1x8xf32>
    %98 = vector.broadcast %97 : vector<1x8xf32> to vector<16x8xf32>
    %99 = arith.addf %96, %98 : vector<16x8xf32>
    %c3_53 = arith.constant 3 : index
    %c0_54 = arith.constant 0 : index
    %100 = vector.load %arg3[%c3_53, %c0_54] : memref<16x8xf32, #tpu.memory_space<vmem>>, vector<1x8xf32>
    %101 = vector.broadcast %1 : vector<16x1xf32> to vector<16x8xf32>
    %102 = vector.broadcast %100 : vector<1x8xf32> to vector<16x8xf32>
    %103 = arith.mulf %101, %102 : vector<16x8xf32>
    %104 = arith.addf %99, %103 : vector<16x8xf32>
    %cst_55 = arith.constant 0.000000e+00 : f32
    %105 = vector.broadcast %cst_55 : f32 to vector<16x8xf32>
    %106 = arith.cmpf oge, %104, %105 : vector<16x8xf32>
    %cst_56 = arith.constant 2.000000e-01 : f32
    %107 = vector.broadcast %cst_56 : f32 to vector<16x8xf32>
    %108 = arith.mulf %107, %104 : vector<16x8xf32>
    %109 = arith.select %106, %104, %108 : vector<16x8xi1>, vector<16x8xf32>
    %110 = arith.truncf %109 : vector<16x8xf32> to vector<16x8xbf16>
    %c3_57 = arith.constant 3 : index
    %c0_58 = arith.constant 0 : index
    %c0_59 = arith.constant 0 : index
    %111 = vector.load %arg6[%c3_57, %c0_58, %c0_59] : memref<16x8x32xbf16, #tpu.memory_space<vmem>>, vector<1x8x32xbf16>
    %112 = vector.shape_cast %111 : vector<1x8x32xbf16> to vector<8x32xbf16>
    %cst_60 = arith.constant dense<0.000000e+00> : vector<16x32xf32>
    %113 = tpu.matmul %110, %112, %cst_60 {dimension_numbers = #tpu.dot_dimension_numbers<[1], [0], [0], [1], [0, 0, 1, 1], [], []>} : vector<16x8xbf16>, vector<8x32xbf16>, vector<16x32xf32> -> vector<16x32xf32>
    %114 = arith.addf %95, %113 : vector<16x32xf32>
    %115 = vector.extract_strided_slice %8 {offsets = [0, 0], sizes = [64, 8], strides = [1, 1]} : vector<384x8xbf16> to vector<64x8xbf16>
    %c0_61 = arith.constant 0 : index
    %c0_62 = arith.constant 0 : index
    %c0_63 = arith.constant 0 : index
    %116 = vector.load %arg5[%c0_61, %c0_62, %c0_63] : memref<9x8x8xbf16, #tpu.memory_space<vmem>>, vector<1x8x8xbf16>
    %117 = vector.shape_cast %116 : vector<1x8x8xbf16> to vector<8x8xbf16>
    %cst_64 = arith.constant dense<0.000000e+00> : vector<64x8xf32>
    %118 = tpu.matmul %115, %117, %cst_64 {dimension_numbers = #tpu.dot_dimension_numbers<[1], [0], [0], [1], [0, 0, 1, 1], [], []>} : vector<64x8xbf16>, vector<8x8xbf16>, vector<64x8xf32> -> vector<64x8xf32>
    %119 = vector.extract_strided_slice %8 {offsets = [16, 0], sizes = [64, 8], strides = [1, 1]} : vector<384x8xbf16> to vector<64x8xbf16>
    %c1_65 = arith.constant 1 : index
    %c0_66 = arith.constant 0 : index
    %c0_67 = arith.constant 0 : index
    %120 = vector.load %arg5[%c1_65, %c0_66, %c0_67] : memref<9x8x8xbf16, #tpu.memory_space<vmem>>, vector<1x8x8xbf16>
    %121 = vector.shape_cast %120 : vector<1x8x8xbf16> to vector<8x8xbf16>
    %cst_68 = arith.constant dense<0.000000e+00> : vector<64x8xf32>
    %122 = tpu.matmul %119, %121, %cst_68 {dimension_numbers = #tpu.dot_dimension_numbers<[1], [0], [0], [1], [0, 0, 1, 1], [], []>} : vector<64x8xbf16>, vector<8x8xbf16>, vector<64x8xf32> -> vector<64x8xf32>
    %123 = arith.addf %118, %122 : vector<64x8xf32>
    %124 = vector.extract_strided_slice %8 {offsets = [32, 0], sizes = [64, 8], strides = [1, 1]} : vector<384x8xbf16> to vector<64x8xbf16>
    %c2_69 = arith.constant 2 : index
    %c0_70 = arith.constant 0 : index
    %c0_71 = arith.constant 0 : index
    %125 = vector.load %arg5[%c2_69, %c0_70, %c0_71] : memref<9x8x8xbf16, #tpu.memory_space<vmem>>, vector<1x8x8xbf16>
    %126 = vector.shape_cast %125 : vector<1x8x8xbf16> to vector<8x8xbf16>
    %cst_72 = arith.constant dense<0.000000e+00> : vector<64x8xf32>
    %127 = tpu.matmul %124, %126, %cst_72 {dimension_numbers = #tpu.dot_dimension_numbers<[1], [0], [0], [1], [0, 0, 1, 1], [], []>} : vector<64x8xbf16>, vector<8x8xbf16>, vector<64x8xf32> -> vector<64x8xf32>
    %128 = arith.addf %123, %127 : vector<64x8xf32>
    %129 = vector.extract_strided_slice %8 {offsets = [96, 0], sizes = [64, 8], strides = [1, 1]} : vector<384x8xbf16> to vector<64x8xbf16>
    %c3_73 = arith.constant 3 : index
    %c0_74 = arith.constant 0 : index
    %c0_75 = arith.constant 0 : index
    %130 = vector.load %arg5[%c3_73, %c0_74, %c0_75] : memref<9x8x8xbf16, #tpu.memory_space<vmem>>, vector<1x8x8xbf16>
    %131 = vector.shape_cast %130 : vector<1x8x8xbf16> to vector<8x8xbf16>
    %cst_76 = arith.constant dense<0.000000e+00> : vector<64x8xf32>
    %132 = tpu.matmul %129, %131, %cst_76 {dimension_numbers = #tpu.dot_dimension_numbers<[1], [0], [0], [1], [0, 0, 1, 1], [], []>} : vector<64x8xbf16>, vector<8x8xbf16>, vector<64x8xf32> -> vector<64x8xf32>
    %133 = arith.addf %128, %132 : vector<64x8xf32>
    %134 = vector.extract_strided_slice %8 {offsets = [112, 0], sizes = [64, 8], strides = [1, 1]} : vector<384x8xbf16> to vector<64x8xbf16>
    %c4_77 = arith.constant 4 : index
    %c0_78 = arith.constant 0 : index
    %c0_79 = arith.constant 0 : index
    %135 = vector.load %arg5[%c4_77, %c0_78, %c0_79] : memref<9x8x8xbf16, #tpu.memory_space<vmem>>, vector<1x8x8xbf16>
    %136 = vector.shape_cast %135 : vector<1x8x8xbf16> to vector<8x8xbf16>
    %cst_80 = arith.constant dense<0.000000e+00> : vector<64x8xf32>
    %137 = tpu.matmul %134, %136, %cst_80 {dimension_numbers = #tpu.dot_dimension_numbers<[1], [0], [0], [1], [0, 0, 1, 1], [], []>} : vector<64x8xbf16>, vector<8x8xbf16>, vector<64x8xf32> -> vector<64x8xf32>
    %138 = arith.addf %133, %137 : vector<64x8xf32>
    %139 = vector.extract_strided_slice %8 {offsets = [128, 0], sizes = [64, 8], strides = [1, 1]} : vector<384x8xbf16> to vector<64x8xbf16>
    %c5_81 = arith.constant 5 : index
    %c0_82 = arith.constant 0 : index
    %c0_83 = arith.constant 0 : index
    %140 = vector.load %arg5[%c5_81, %c0_82, %c0_83] : memref<9x8x8xbf16, #tpu.memory_space<vmem>>, vector<1x8x8xbf16>
    %141 = vector.shape_cast %140 : vector<1x8x8xbf16> to vector<8x8xbf16>
    %cst_84 = arith.constant dense<0.000000e+00> : vector<64x8xf32>
    %142 = tpu.matmul %139, %141, %cst_84 {dimension_numbers = #tpu.dot_dimension_numbers<[1], [0], [0], [1], [0, 0, 1, 1], [], []>} : vector<64x8xbf16>, vector<8x8xbf16>, vector<64x8xf32> -> vector<64x8xf32>
    %143 = arith.addf %138, %142 : vector<64x8xf32>
    %144 = vector.extract_strided_slice %8 {offsets = [192, 0], sizes = [64, 8], strides = [1, 1]} : vector<384x8xbf16> to vector<64x8xbf16>
    %c6_85 = arith.constant 6 : index
    %c0_86 = arith.constant 0 : index
    %c0_87 = arith.constant 0 : index
    %145 = vector.load %arg5[%c6_85, %c0_86, %c0_87] : memref<9x8x8xbf16, #tpu.memory_space<vmem>>, vector<1x8x8xbf16>
    %146 = vector.shape_cast %145 : vector<1x8x8xbf16> to vector<8x8xbf16>
    %cst_88 = arith.constant dense<0.000000e+00> : vector<64x8xf32>
    %147 = tpu.matmul %144, %146, %cst_88 {dimension_numbers = #tpu.dot_dimension_numbers<[1], [0], [0], [1], [0, 0, 1, 1], [], []>} : vector<64x8xbf16>, vector<8x8xbf16>, vector<64x8xf32> -> vector<64x8xf32>
    %148 = arith.addf %143, %147 : vector<64x8xf32>
    %149 = vector.extract_strided_slice %8 {offsets = [208, 0], sizes = [64, 8], strides = [1, 1]} : vector<384x8xbf16> to vector<64x8xbf16>
    %c7_89 = arith.constant 7 : index
    %c0_90 = arith.constant 0 : index
    %c0_91 = arith.constant 0 : index
    %150 = vector.load %arg5[%c7_89, %c0_90, %c0_91] : memref<9x8x8xbf16, #tpu.memory_space<vmem>>, vector<1x8x8xbf16>
    %151 = vector.shape_cast %150 : vector<1x8x8xbf16> to vector<8x8xbf16>
    %cst_92 = arith.constant dense<0.000000e+00> : vector<64x8xf32>
    %152 = tpu.matmul %149, %151, %cst_92 {dimension_numbers = #tpu.dot_dimension_numbers<[1], [0], [0], [1], [0, 0, 1, 1], [], []>} : vector<64x8xbf16>, vector<8x8xbf16>, vector<64x8xf32> -> vector<64x8xf32>
    %153 = arith.addf %148, %152 : vector<64x8xf32>
    %154 = vector.extract_strided_slice %8 {offsets = [224, 0], sizes = [64, 8], strides = [1, 1]} : vector<384x8xbf16> to vector<64x8xbf16>
    %c8_93 = arith.constant 8 : index
    %c0_94 = arith.constant 0 : index
    %c0_95 = arith.constant 0 : index
    %155 = vector.load %arg5[%c8_93, %c0_94, %c0_95] : memref<9x8x8xbf16, #tpu.memory_space<vmem>>, vector<1x8x8xbf16>
    %156 = vector.shape_cast %155 : vector<1x8x8xbf16> to vector<8x8xbf16>
    %cst_96 = arith.constant dense<0.000000e+00> : vector<64x8xf32>
    %157 = tpu.matmul %154, %156, %cst_96 {dimension_numbers = #tpu.dot_dimension_numbers<[1], [0], [0], [1], [0, 0, 1, 1], [], []>} : vector<64x8xbf16>, vector<8x8xbf16>, vector<64x8xf32> -> vector<64x8xf32>
    %158 = arith.addf %153, %157 : vector<64x8xf32>
    %159 = vector.extract_strided_slice %158 {offsets = [0, 0], sizes = [16, 8], strides = [1, 1]} : vector<64x8xf32> to vector<16x8xf32>
    %c0_97 = arith.constant 0 : index
    %c0_98 = arith.constant 0 : index
    %160 = vector.load %arg4[%c0_97, %c0_98] : memref<1x8xf32, #tpu.memory_space<vmem>>, vector<1x8xf32>
    %161 = vector.broadcast %160 : vector<1x8xf32> to vector<16x8xf32>
    %162 = arith.addf %159, %161 : vector<16x8xf32>
    %c4_99 = arith.constant 4 : index
    %c0_100 = arith.constant 0 : index
    %163 = vector.load %arg3[%c4_99, %c0_100] : memref<16x8xf32, #tpu.memory_space<vmem>>, vector<1x8xf32>
    %164 = vector.broadcast %1 : vector<16x1xf32> to vector<16x8xf32>
    %165 = vector.broadcast %163 : vector<1x8xf32> to vector<16x8xf32>
    %166 = arith.mulf %164, %165 : vector<16x8xf32>
    %167 = arith.addf %162, %166 : vector<16x8xf32>
    %cst_101 = arith.constant 0.000000e+00 : f32
    %168 = vector.broadcast %cst_101 : f32 to vector<16x8xf32>
    %169 = arith.cmpf oge, %167, %168 : vector<16x8xf32>
    %cst_102 = arith.constant 2.000000e-01 : f32
    %170 = vector.broadcast %cst_102 : f32 to vector<16x8xf32>
    %171 = arith.mulf %170, %167 : vector<16x8xf32>
    %172 = arith.select %169, %167, %171 : vector<16x8xi1>, vector<16x8xf32>
    %173 = arith.truncf %172 : vector<16x8xf32> to vector<16x8xbf16>
    %c4_103 = arith.constant 4 : index
    %c0_104 = arith.constant 0 : index
    %c0_105 = arith.constant 0 : index
    %174 = vector.load %arg6[%c4_103, %c0_104, %c0_105] : memref<16x8x32xbf16, #tpu.memory_space<vmem>>, vector<1x8x32xbf16>
    %175 = vector.shape_cast %174 : vector<1x8x32xbf16> to vector<8x32xbf16>
    %cst_106 = arith.constant dense<0.000000e+00> : vector<16x32xf32>
    %176 = tpu.matmul %173, %175, %cst_106 {dimension_numbers = #tpu.dot_dimension_numbers<[1], [0], [0], [1], [0, 0, 1, 1], [], []>} : vector<16x8xbf16>, vector<8x32xbf16>, vector<16x32xf32> -> vector<16x32xf32>
    %177 = arith.addf %114, %176 : vector<16x32xf32>
    %178 = vector.extract_strided_slice %158 {offsets = [16, 0], sizes = [16, 8], strides = [1, 1]} : vector<64x8xf32> to vector<16x8xf32>
    %c0_107 = arith.constant 0 : index
    %c0_108 = arith.constant 0 : index
    %179 = vector.load %arg4[%c0_107, %c0_108] : memref<1x8xf32, #tpu.memory_space<vmem>>, vector<1x8xf32>
    %180 = vector.broadcast %179 : vector<1x8xf32> to vector<16x8xf32>
    %181 = arith.addf %178, %180 : vector<16x8xf32>
    %c5_109 = arith.constant 5 : index
    %c0_110 = arith.constant 0 : index
    %182 = vector.load %arg3[%c5_109, %c0_110] : memref<16x8xf32, #tpu.memory_space<vmem>>, vector<1x8xf32>
    %183 = vector.broadcast %1 : vector<16x1xf32> to vector<16x8xf32>
    %184 = vector.broadcast %182 : vector<1x8xf32> to vector<16x8xf32>
    %185 = arith.mulf %183, %184 : vector<16x8xf32>
    %186 = arith.addf %181, %185 : vector<16x8xf32>
    %cst_111 = arith.constant 0.000000e+00 : f32
    %187 = vector.broadcast %cst_111 : f32 to vector<16x8xf32>
    %188 = arith.cmpf oge, %186, %187 : vector<16x8xf32>
    %cst_112 = arith.constant 2.000000e-01 : f32
    %189 = vector.broadcast %cst_112 : f32 to vector<16x8xf32>
    %190 = arith.mulf %189, %186 : vector<16x8xf32>
    %191 = arith.select %188, %186, %190 : vector<16x8xi1>, vector<16x8xf32>
    %192 = arith.truncf %191 : vector<16x8xf32> to vector<16x8xbf16>
    %c5_113 = arith.constant 5 : index
    %c0_114 = arith.constant 0 : index
    %c0_115 = arith.constant 0 : index
    %193 = vector.load %arg6[%c5_113, %c0_114, %c0_115] : memref<16x8x32xbf16, #tpu.memory_space<vmem>>, vector<1x8x32xbf16>
    %194 = vector.shape_cast %193 : vector<1x8x32xbf16> to vector<8x32xbf16>
    %cst_116 = arith.constant dense<0.000000e+00> : vector<16x32xf32>
    %195 = tpu.matmul %192, %194, %cst_116 {dimension_numbers = #tpu.dot_dimension_numbers<[1], [0], [0], [1], [0, 0, 1, 1], [], []>} : vector<16x8xbf16>, vector<8x32xbf16>, vector<16x32xf32> -> vector<16x32xf32>
    %196 = arith.addf %177, %195 : vector<16x32xf32>
    %197 = vector.extract_strided_slice %158 {offsets = [32, 0], sizes = [16, 8], strides = [1, 1]} : vector<64x8xf32> to vector<16x8xf32>
    %c0_117 = arith.constant 0 : index
    %c0_118 = arith.constant 0 : index
    %198 = vector.load %arg4[%c0_117, %c0_118] : memref<1x8xf32, #tpu.memory_space<vmem>>, vector<1x8xf32>
    %199 = vector.broadcast %198 : vector<1x8xf32> to vector<16x8xf32>
    %200 = arith.addf %197, %199 : vector<16x8xf32>
    %c6_119 = arith.constant 6 : index
    %c0_120 = arith.constant 0 : index
    %201 = vector.load %arg3[%c6_119, %c0_120] : memref<16x8xf32, #tpu.memory_space<vmem>>, vector<1x8xf32>
    %202 = vector.broadcast %1 : vector<16x1xf32> to vector<16x8xf32>
    %203 = vector.broadcast %201 : vector<1x8xf32> to vector<16x8xf32>
    %204 = arith.mulf %202, %203 : vector<16x8xf32>
    %205 = arith.addf %200, %204 : vector<16x8xf32>
    %cst_121 = arith.constant 0.000000e+00 : f32
    %206 = vector.broadcast %cst_121 : f32 to vector<16x8xf32>
    %207 = arith.cmpf oge, %205, %206 : vector<16x8xf32>
    %cst_122 = arith.constant 2.000000e-01 : f32
    %208 = vector.broadcast %cst_122 : f32 to vector<16x8xf32>
    %209 = arith.mulf %208, %205 : vector<16x8xf32>
    %210 = arith.select %207, %205, %209 : vector<16x8xi1>, vector<16x8xf32>
    %211 = arith.truncf %210 : vector<16x8xf32> to vector<16x8xbf16>
    %c6_123 = arith.constant 6 : index
    %c0_124 = arith.constant 0 : index
    %c0_125 = arith.constant 0 : index
    %212 = vector.load %arg6[%c6_123, %c0_124, %c0_125] : memref<16x8x32xbf16, #tpu.memory_space<vmem>>, vector<1x8x32xbf16>
    %213 = vector.shape_cast %212 : vector<1x8x32xbf16> to vector<8x32xbf16>
    %cst_126 = arith.constant dense<0.000000e+00> : vector<16x32xf32>
    %214 = tpu.matmul %211, %213, %cst_126 {dimension_numbers = #tpu.dot_dimension_numbers<[1], [0], [0], [1], [0, 0, 1, 1], [], []>} : vector<16x8xbf16>, vector<8x32xbf16>, vector<16x32xf32> -> vector<16x32xf32>
    %215 = arith.addf %196, %214 : vector<16x32xf32>
    %216 = vector.extract_strided_slice %158 {offsets = [48, 0], sizes = [16, 8], strides = [1, 1]} : vector<64x8xf32> to vector<16x8xf32>
    %c0_127 = arith.constant 0 : index
    %c0_128 = arith.constant 0 : index
    %217 = vector.load %arg4[%c0_127, %c0_128] : memref<1x8xf32, #tpu.memory_space<vmem>>, vector<1x8xf32>
    %218 = vector.broadcast %217 : vector<1x8xf32> to vector<16x8xf32>
    %219 = arith.addf %216, %218 : vector<16x8xf32>
    %c7_129 = arith.constant 7 : index
    %c0_130 = arith.constant 0 : index
    %220 = vector.load %arg3[%c7_129, %c0_130] : memref<16x8xf32, #tpu.memory_space<vmem>>, vector<1x8xf32>
    %221 = vector.broadcast %1 : vector<16x1xf32> to vector<16x8xf32>
    %222 = vector.broadcast %220 : vector<1x8xf32> to vector<16x8xf32>
    %223 = arith.mulf %221, %222 : vector<16x8xf32>
    %224 = arith.addf %219, %223 : vector<16x8xf32>
    %cst_131 = arith.constant 0.000000e+00 : f32
    %225 = vector.broadcast %cst_131 : f32 to vector<16x8xf32>
    %226 = arith.cmpf oge, %224, %225 : vector<16x8xf32>
    %cst_132 = arith.constant 2.000000e-01 : f32
    %227 = vector.broadcast %cst_132 : f32 to vector<16x8xf32>
    %228 = arith.mulf %227, %224 : vector<16x8xf32>
    %229 = arith.select %226, %224, %228 : vector<16x8xi1>, vector<16x8xf32>
    %230 = arith.truncf %229 : vector<16x8xf32> to vector<16x8xbf16>
    %c7_133 = arith.constant 7 : index
    %c0_134 = arith.constant 0 : index
    %c0_135 = arith.constant 0 : index
    %231 = vector.load %arg6[%c7_133, %c0_134, %c0_135] : memref<16x8x32xbf16, #tpu.memory_space<vmem>>, vector<1x8x32xbf16>
    %232 = vector.shape_cast %231 : vector<1x8x32xbf16> to vector<8x32xbf16>
    %cst_136 = arith.constant dense<0.000000e+00> : vector<16x32xf32>
    %233 = tpu.matmul %230, %232, %cst_136 {dimension_numbers = #tpu.dot_dimension_numbers<[1], [0], [0], [1], [0, 0, 1, 1], [], []>} : vector<16x8xbf16>, vector<8x32xbf16>, vector<16x32xf32> -> vector<16x32xf32>
    %234 = arith.addf %215, %233 : vector<16x32xf32>
    %235 = vector.extract_strided_slice %8 {offsets = [96, 0], sizes = [64, 8], strides = [1, 1]} : vector<384x8xbf16> to vector<64x8xbf16>
    %c0_137 = arith.constant 0 : index
    %c0_138 = arith.constant 0 : index
    %c0_139 = arith.constant 0 : index
    %236 = vector.load %arg5[%c0_137, %c0_138, %c0_139] : memref<9x8x8xbf16, #tpu.memory_space<vmem>>, vector<1x8x8xbf16>
    %237 = vector.shape_cast %236 : vector<1x8x8xbf16> to vector<8x8xbf16>
    %cst_140 = arith.constant dense<0.000000e+00> : vector<64x8xf32>
    %238 = tpu.matmul %235, %237, %cst_140 {dimension_numbers = #tpu.dot_dimension_numbers<[1], [0], [0], [1], [0, 0, 1, 1], [], []>} : vector<64x8xbf16>, vector<8x8xbf16>, vector<64x8xf32> -> vector<64x8xf32>
    %239 = vector.extract_strided_slice %8 {offsets = [112, 0], sizes = [64, 8], strides = [1, 1]} : vector<384x8xbf16> to vector<64x8xbf16>
    %c1_141 = arith.constant 1 : index
    %c0_142 = arith.constant 0 : index
    %c0_143 = arith.constant 0 : index
    %240 = vector.load %arg5[%c1_141, %c0_142, %c0_143] : memref<9x8x8xbf16, #tpu.memory_space<vmem>>, vector<1x8x8xbf16>
    %241 = vector.shape_cast %240 : vector<1x8x8xbf16> to vector<8x8xbf16>
    %cst_144 = arith.constant dense<0.000000e+00> : vector<64x8xf32>
    %242 = tpu.matmul %239, %241, %cst_144 {dimension_numbers = #tpu.dot_dimension_numbers<[1], [0], [0], [1], [0, 0, 1, 1], [], []>} : vector<64x8xbf16>, vector<8x8xbf16>, vector<64x8xf32> -> vector<64x8xf32>
    %243 = arith.addf %238, %242 : vector<64x8xf32>
    %244 = vector.extract_strided_slice %8 {offsets = [128, 0], sizes = [64, 8], strides = [1, 1]} : vector<384x8xbf16> to vector<64x8xbf16>
    %c2_145 = arith.constant 2 : index
    %c0_146 = arith.constant 0 : index
    %c0_147 = arith.constant 0 : index
    %245 = vector.load %arg5[%c2_145, %c0_146, %c0_147] : memref<9x8x8xbf16, #tpu.memory_space<vmem>>, vector<1x8x8xbf16>
    %246 = vector.shape_cast %245 : vector<1x8x8xbf16> to vector<8x8xbf16>
    %cst_148 = arith.constant dense<0.000000e+00> : vector<64x8xf32>
    %247 = tpu.matmul %244, %246, %cst_148 {dimension_numbers = #tpu.dot_dimension_numbers<[1], [0], [0], [1], [0, 0, 1, 1], [], []>} : vector<64x8xbf16>, vector<8x8xbf16>, vector<64x8xf32> -> vector<64x8xf32>
    %248 = arith.addf %243, %247 : vector<64x8xf32>
    %249 = vector.extract_strided_slice %8 {offsets = [192, 0], sizes = [64, 8], strides = [1, 1]} : vector<384x8xbf16> to vector<64x8xbf16>
    %c3_149 = arith.constant 3 : index
    %c0_150 = arith.constant 0 : index
    %c0_151 = arith.constant 0 : index
    %250 = vector.load %arg5[%c3_149, %c0_150, %c0_151] : memref<9x8x8xbf16, #tpu.memory_space<vmem>>, vector<1x8x8xbf16>
    %251 = vector.shape_cast %250 : vector<1x8x8xbf16> to vector<8x8xbf16>
    %cst_152 = arith.constant dense<0.000000e+00> : vector<64x8xf32>
    %252 = tpu.matmul %249, %251, %cst_152 {dimension_numbers = #tpu.dot_dimension_numbers<[1], [0], [0], [1], [0, 0, 1, 1], [], []>} : vector<64x8xbf16>, vector<8x8xbf16>, vector<64x8xf32> -> vector<64x8xf32>
    %253 = arith.addf %248, %252 : vector<64x8xf32>
    %254 = vector.extract_strided_slice %8 {offsets = [208, 0], sizes = [64, 8], strides = [1, 1]} : vector<384x8xbf16> to vector<64x8xbf16>
    %c4_153 = arith.constant 4 : index
    %c0_154 = arith.constant 0 : index
    %c0_155 = arith.constant 0 : index
    %255 = vector.load %arg5[%c4_153, %c0_154, %c0_155] : memref<9x8x8xbf16, #tpu.memory_space<vmem>>, vector<1x8x8xbf16>
    %256 = vector.shape_cast %255 : vector<1x8x8xbf16> to vector<8x8xbf16>
    %cst_156 = arith.constant dense<0.000000e+00> : vector<64x8xf32>
    %257 = tpu.matmul %254, %256, %cst_156 {dimension_numbers = #tpu.dot_dimension_numbers<[1], [0], [0], [1], [0, 0, 1, 1], [], []>} : vector<64x8xbf16>, vector<8x8xbf16>, vector<64x8xf32> -> vector<64x8xf32>
    %258 = arith.addf %253, %257 : vector<64x8xf32>
    %259 = vector.extract_strided_slice %8 {offsets = [224, 0], sizes = [64, 8], strides = [1, 1]} : vector<384x8xbf16> to vector<64x8xbf16>
    %c5_157 = arith.constant 5 : index
    %c0_158 = arith.constant 0 : index
    %c0_159 = arith.constant 0 : index
    %260 = vector.load %arg5[%c5_157, %c0_158, %c0_159] : memref<9x8x8xbf16, #tpu.memory_space<vmem>>, vector<1x8x8xbf16>
    %261 = vector.shape_cast %260 : vector<1x8x8xbf16> to vector<8x8xbf16>
    %cst_160 = arith.constant dense<0.000000e+00> : vector<64x8xf32>
    %262 = tpu.matmul %259, %261, %cst_160 {dimension_numbers = #tpu.dot_dimension_numbers<[1], [0], [0], [1], [0, 0, 1, 1], [], []>} : vector<64x8xbf16>, vector<8x8xbf16>, vector<64x8xf32> -> vector<64x8xf32>
    %263 = arith.addf %258, %262 : vector<64x8xf32>
    %264 = vector.extract_strided_slice %8 {offsets = [288, 0], sizes = [64, 8], strides = [1, 1]} : vector<384x8xbf16> to vector<64x8xbf16>
    %c6_161 = arith.constant 6 : index
    %c0_162 = arith.constant 0 : index
    %c0_163 = arith.constant 0 : index
    %265 = vector.load %arg5[%c6_161, %c0_162, %c0_163] : memref<9x8x8xbf16, #tpu.memory_space<vmem>>, vector<1x8x8xbf16>
    %266 = vector.shape_cast %265 : vector<1x8x8xbf16> to vector<8x8xbf16>
    %cst_164 = arith.constant dense<0.000000e+00> : vector<64x8xf32>
    %267 = tpu.matmul %264, %266, %cst_164 {dimension_numbers = #tpu.dot_dimension_numbers<[1], [0], [0], [1], [0, 0, 1, 1], [], []>} : vector<64x8xbf16>, vector<8x8xbf16>, vector<64x8xf32> -> vector<64x8xf32>
    %268 = arith.addf %263, %267 : vector<64x8xf32>
    %269 = vector.extract_strided_slice %8 {offsets = [304, 0], sizes = [64, 8], strides = [1, 1]} : vector<384x8xbf16> to vector<64x8xbf16>
    %c7_165 = arith.constant 7 : index
    %c0_166 = arith.constant 0 : index
    %c0_167 = arith.constant 0 : index
    %270 = vector.load %arg5[%c7_165, %c0_166, %c0_167] : memref<9x8x8xbf16, #tpu.memory_space<vmem>>, vector<1x8x8xbf16>
    %271 = vector.shape_cast %270 : vector<1x8x8xbf16> to vector<8x8xbf16>
    %cst_168 = arith.constant dense<0.000000e+00> : vector<64x8xf32>
    %272 = tpu.matmul %269, %271, %cst_168 {dimension_numbers = #tpu.dot_dimension_numbers<[1], [0], [0], [1], [0, 0, 1, 1], [], []>} : vector<64x8xbf16>, vector<8x8xbf16>, vector<64x8xf32> -> vector<64x8xf32>
    %273 = arith.addf %268, %272 : vector<64x8xf32>
    %274 = vector.extract_strided_slice %8 {offsets = [320, 0], sizes = [64, 8], strides = [1, 1]} : vector<384x8xbf16> to vector<64x8xbf16>
    %c8_169 = arith.constant 8 : index
    %c0_170 = arith.constant 0 : index
    %c0_171 = arith.constant 0 : index
    %275 = vector.load %arg5[%c8_169, %c0_170, %c0_171] : memref<9x8x8xbf16, #tpu.memory_space<vmem>>, vector<1x8x8xbf16>
    %276 = vector.shape_cast %275 : vector<1x8x8xbf16> to vector<8x8xbf16>
    %cst_172 = arith.constant dense<0.000000e+00> : vector<64x8xf32>
    %277 = tpu.matmul %274, %276, %cst_172 {dimension_numbers = #tpu.dot_dimension_numbers<[1], [0], [0], [1], [0, 0, 1, 1], [], []>} : vector<64x8xbf16>, vector<8x8xbf16>, vector<64x8xf32> -> vector<64x8xf32>
    %278 = arith.addf %273, %277 : vector<64x8xf32>
    %279 = vector.extract_strided_slice %278 {offsets = [0, 0], sizes = [16, 8], strides = [1, 1]} : vector<64x8xf32> to vector<16x8xf32>
    %c0_173 = arith.constant 0 : index
    %c0_174 = arith.constant 0 : index
    %280 = vector.load %arg4[%c0_173, %c0_174] : memref<1x8xf32, #tpu.memory_space<vmem>>, vector<1x8xf32>
    %281 = vector.broadcast %280 : vector<1x8xf32> to vector<16x8xf32>
    %282 = arith.addf %279, %281 : vector<16x8xf32>
    %c8_175 = arith.constant 8 : index
    %c0_176 = arith.constant 0 : index
    %283 = vector.load %arg3[%c8_175, %c0_176] : memref<16x8xf32, #tpu.memory_space<vmem>>, vector<1x8xf32>
    %284 = vector.broadcast %1 : vector<16x1xf32> to vector<16x8xf32>
    %285 = vector.broadcast %283 : vector<1x8xf32> to vector<16x8xf32>
    %286 = arith.mulf %284, %285 : vector<16x8xf32>
    %287 = arith.addf %282, %286 : vector<16x8xf32>
    %cst_177 = arith.constant 0.000000e+00 : f32
    %288 = vector.broadcast %cst_177 : f32 to vector<16x8xf32>
    %289 = arith.cmpf oge, %287, %288 : vector<16x8xf32>
    %cst_178 = arith.constant 2.000000e-01 : f32
    %290 = vector.broadcast %cst_178 : f32 to vector<16x8xf32>
    %291 = arith.mulf %290, %287 : vector<16x8xf32>
    %292 = arith.select %289, %287, %291 : vector<16x8xi1>, vector<16x8xf32>
    %293 = arith.truncf %292 : vector<16x8xf32> to vector<16x8xbf16>
    %c8_179 = arith.constant 8 : index
    %c0_180 = arith.constant 0 : index
    %c0_181 = arith.constant 0 : index
    %294 = vector.load %arg6[%c8_179, %c0_180, %c0_181] : memref<16x8x32xbf16, #tpu.memory_space<vmem>>, vector<1x8x32xbf16>
    %295 = vector.shape_cast %294 : vector<1x8x32xbf16> to vector<8x32xbf16>
    %cst_182 = arith.constant dense<0.000000e+00> : vector<16x32xf32>
    %296 = tpu.matmul %293, %295, %cst_182 {dimension_numbers = #tpu.dot_dimension_numbers<[1], [0], [0], [1], [0, 0, 1, 1], [], []>} : vector<16x8xbf16>, vector<8x32xbf16>, vector<16x32xf32> -> vector<16x32xf32>
    %297 = arith.addf %234, %296 : vector<16x32xf32>
    %298 = vector.extract_strided_slice %278 {offsets = [16, 0], sizes = [16, 8], strides = [1, 1]} : vector<64x8xf32> to vector<16x8xf32>
    %c0_183 = arith.constant 0 : index
    %c0_184 = arith.constant 0 : index
    %299 = vector.load %arg4[%c0_183, %c0_184] : memref<1x8xf32, #tpu.memory_space<vmem>>, vector<1x8xf32>
    %300 = vector.broadcast %299 : vector<1x8xf32> to vector<16x8xf32>
    %301 = arith.addf %298, %300 : vector<16x8xf32>
    %c9 = arith.constant 9 : index
    %c0_185 = arith.constant 0 : index
    %302 = vector.load %arg3[%c9, %c0_185] : memref<16x8xf32, #tpu.memory_space<vmem>>, vector<1x8xf32>
    %303 = vector.broadcast %1 : vector<16x1xf32> to vector<16x8xf32>
    %304 = vector.broadcast %302 : vector<1x8xf32> to vector<16x8xf32>
    %305 = arith.mulf %303, %304 : vector<16x8xf32>
    %306 = arith.addf %301, %305 : vector<16x8xf32>
    %cst_186 = arith.constant 0.000000e+00 : f32
    %307 = vector.broadcast %cst_186 : f32 to vector<16x8xf32>
    %308 = arith.cmpf oge, %306, %307 : vector<16x8xf32>
    %cst_187 = arith.constant 2.000000e-01 : f32
    %309 = vector.broadcast %cst_187 : f32 to vector<16x8xf32>
    %310 = arith.mulf %309, %306 : vector<16x8xf32>
    %311 = arith.select %308, %306, %310 : vector<16x8xi1>, vector<16x8xf32>
    %312 = arith.truncf %311 : vector<16x8xf32> to vector<16x8xbf16>
    %c9_188 = arith.constant 9 : index
    %c0_189 = arith.constant 0 : index
    %c0_190 = arith.constant 0 : index
    %313 = vector.load %arg6[%c9_188, %c0_189, %c0_190] : memref<16x8x32xbf16, #tpu.memory_space<vmem>>, vector<1x8x32xbf16>
    %314 = vector.shape_cast %313 : vector<1x8x32xbf16> to vector<8x32xbf16>
    %cst_191 = arith.constant dense<0.000000e+00> : vector<16x32xf32>
    %315 = tpu.matmul %312, %314, %cst_191 {dimension_numbers = #tpu.dot_dimension_numbers<[1], [0], [0], [1], [0, 0, 1, 1], [], []>} : vector<16x8xbf16>, vector<8x32xbf16>, vector<16x32xf32> -> vector<16x32xf32>
    %316 = arith.addf %297, %315 : vector<16x32xf32>
    %317 = vector.extract_strided_slice %278 {offsets = [32, 0], sizes = [16, 8], strides = [1, 1]} : vector<64x8xf32> to vector<16x8xf32>
    %c0_192 = arith.constant 0 : index
    %c0_193 = arith.constant 0 : index
    %318 = vector.load %arg4[%c0_192, %c0_193] : memref<1x8xf32, #tpu.memory_space<vmem>>, vector<1x8xf32>
    %319 = vector.broadcast %318 : vector<1x8xf32> to vector<16x8xf32>
    %320 = arith.addf %317, %319 : vector<16x8xf32>
    %c10 = arith.constant 10 : index
    %c0_194 = arith.constant 0 : index
    %321 = vector.load %arg3[%c10, %c0_194] : memref<16x8xf32, #tpu.memory_space<vmem>>, vector<1x8xf32>
    %322 = vector.broadcast %1 : vector<16x1xf32> to vector<16x8xf32>
    %323 = vector.broadcast %321 : vector<1x8xf32> to vector<16x8xf32>
    %324 = arith.mulf %322, %323 : vector<16x8xf32>
    %325 = arith.addf %320, %324 : vector<16x8xf32>
    %cst_195 = arith.constant 0.000000e+00 : f32
    %326 = vector.broadcast %cst_195 : f32 to vector<16x8xf32>
    %327 = arith.cmpf oge, %325, %326 : vector<16x8xf32>
    %cst_196 = arith.constant 2.000000e-01 : f32
    %328 = vector.broadcast %cst_196 : f32 to vector<16x8xf32>
    %329 = arith.mulf %328, %325 : vector<16x8xf32>
    %330 = arith.select %327, %325, %329 : vector<16x8xi1>, vector<16x8xf32>
    %331 = arith.truncf %330 : vector<16x8xf32> to vector<16x8xbf16>
    %c10_197 = arith.constant 10 : index
    %c0_198 = arith.constant 0 : index
    %c0_199 = arith.constant 0 : index
    %332 = vector.load %arg6[%c10_197, %c0_198, %c0_199] : memref<16x8x32xbf16, #tpu.memory_space<vmem>>, vector<1x8x32xbf16>
    %333 = vector.shape_cast %332 : vector<1x8x32xbf16> to vector<8x32xbf16>
    %cst_200 = arith.constant dense<0.000000e+00> : vector<16x32xf32>
    %334 = tpu.matmul %331, %333, %cst_200 {dimension_numbers = #tpu.dot_dimension_numbers<[1], [0], [0], [1], [0, 0, 1, 1], [], []>} : vector<16x8xbf16>, vector<8x32xbf16>, vector<16x32xf32> -> vector<16x32xf32>
    %335 = arith.addf %316, %334 : vector<16x32xf32>
    %336 = vector.extract_strided_slice %278 {offsets = [48, 0], sizes = [16, 8], strides = [1, 1]} : vector<64x8xf32> to vector<16x8xf32>
    %c0_201 = arith.constant 0 : index
    %c0_202 = arith.constant 0 : index
    %337 = vector.load %arg4[%c0_201, %c0_202] : memref<1x8xf32, #tpu.memory_space<vmem>>, vector<1x8xf32>
    %338 = vector.broadcast %337 : vector<1x8xf32> to vector<16x8xf32>
    %339 = arith.addf %336, %338 : vector<16x8xf32>
    %c11 = arith.constant 11 : index
    %c0_203 = arith.constant 0 : index
    %340 = vector.load %arg3[%c11, %c0_203] : memref<16x8xf32, #tpu.memory_space<vmem>>, vector<1x8xf32>
    %341 = vector.broadcast %1 : vector<16x1xf32> to vector<16x8xf32>
    %342 = vector.broadcast %340 : vector<1x8xf32> to vector<16x8xf32>
    %343 = arith.mulf %341, %342 : vector<16x8xf32>
    %344 = arith.addf %339, %343 : vector<16x8xf32>
    %cst_204 = arith.constant 0.000000e+00 : f32
    %345 = vector.broadcast %cst_204 : f32 to vector<16x8xf32>
    %346 = arith.cmpf oge, %344, %345 : vector<16x8xf32>
    %cst_205 = arith.constant 2.000000e-01 : f32
    %347 = vector.broadcast %cst_205 : f32 to vector<16x8xf32>
    %348 = arith.mulf %347, %344 : vector<16x8xf32>
    %349 = arith.select %346, %344, %348 : vector<16x8xi1>, vector<16x8xf32>
    %350 = arith.truncf %349 : vector<16x8xf32> to vector<16x8xbf16>
    %c11_206 = arith.constant 11 : index
    %c0_207 = arith.constant 0 : index
    %c0_208 = arith.constant 0 : index
    %351 = vector.load %arg6[%c11_206, %c0_207, %c0_208] : memref<16x8x32xbf16, #tpu.memory_space<vmem>>, vector<1x8x32xbf16>
    %352 = vector.shape_cast %351 : vector<1x8x32xbf16> to vector<8x32xbf16>
    %cst_209 = arith.constant dense<0.000000e+00> : vector<16x32xf32>
    %353 = tpu.matmul %350, %352, %cst_209 {dimension_numbers = #tpu.dot_dimension_numbers<[1], [0], [0], [1], [0, 0, 1, 1], [], []>} : vector<16x8xbf16>, vector<8x32xbf16>, vector<16x32xf32> -> vector<16x32xf32>
    %354 = arith.addf %335, %353 : vector<16x32xf32>
    %355 = vector.extract_strided_slice %8 {offsets = [192, 0], sizes = [64, 8], strides = [1, 1]} : vector<384x8xbf16> to vector<64x8xbf16>
    %c0_210 = arith.constant 0 : index
    %c0_211 = arith.constant 0 : index
    %c0_212 = arith.constant 0 : index
    %356 = vector.load %arg5[%c0_210, %c0_211, %c0_212] : memref<9x8x8xbf16, #tpu.memory_space<vmem>>, vector<1x8x8xbf16>
    %357 = vector.shape_cast %356 : vector<1x8x8xbf16> to vector<8x8xbf16>
    %cst_213 = arith.constant dense<0.000000e+00> : vector<64x8xf32>
    %358 = tpu.matmul %355, %357, %cst_213 {dimension_numbers = #tpu.dot_dimension_numbers<[1], [0], [0], [1], [0, 0, 1, 1], [], []>} : vector<64x8xbf16>, vector<8x8xbf16>, vector<64x8xf32> -> vector<64x8xf32>
    %359 = vector.extract_strided_slice %8 {offsets = [208, 0], sizes = [64, 8], strides = [1, 1]} : vector<384x8xbf16> to vector<64x8xbf16>
    %c1_214 = arith.constant 1 : index
    %c0_215 = arith.constant 0 : index
    %c0_216 = arith.constant 0 : index
    %360 = vector.load %arg5[%c1_214, %c0_215, %c0_216] : memref<9x8x8xbf16, #tpu.memory_space<vmem>>, vector<1x8x8xbf16>
    %361 = vector.shape_cast %360 : vector<1x8x8xbf16> to vector<8x8xbf16>
    %cst_217 = arith.constant dense<0.000000e+00> : vector<64x8xf32>
    %362 = tpu.matmul %359, %361, %cst_217 {dimension_numbers = #tpu.dot_dimension_numbers<[1], [0], [0], [1], [0, 0, 1, 1], [], []>} : vector<64x8xbf16>, vector<8x8xbf16>, vector<64x8xf32> -> vector<64x8xf32>
    %363 = arith.addf %358, %362 : vector<64x8xf32>
    %364 = vector.extract_strided_slice %8 {offsets = [224, 0], sizes = [64, 8], strides = [1, 1]} : vector<384x8xbf16> to vector<64x8xbf16>
    %c2_218 = arith.constant 2 : index
    %c0_219 = arith.constant 0 : index
    %c0_220 = arith.constant 0 : index
    %365 = vector.load %arg5[%c2_218, %c0_219, %c0_220] : memref<9x8x8xbf16, #tpu.memory_space<vmem>>, vector<1x8x8xbf16>
    %366 = vector.shape_cast %365 : vector<1x8x8xbf16> to vector<8x8xbf16>
    %cst_221 = arith.constant dense<0.000000e+00> : vector<64x8xf32>
    %367 = tpu.matmul %364, %366, %cst_221 {dimension_numbers = #tpu.dot_dimension_numbers<[1], [0], [0], [1], [0, 0, 1, 1], [], []>} : vector<64x8xbf16>, vector<8x8xbf16>, vector<64x8xf32> -> vector<64x8xf32>
    %368 = arith.addf %363, %367 : vector<64x8xf32>
    %369 = vector.extract_strided_slice %8 {offsets = [288, 0], sizes = [64, 8], strides = [1, 1]} : vector<384x8xbf16> to vector<64x8xbf16>
    %c3_222 = arith.constant 3 : index
    %c0_223 = arith.constant 0 : index
    %c0_224 = arith.constant 0 : index
    %370 = vector.load %arg5[%c3_222, %c0_223, %c0_224] : memref<9x8x8xbf16, #tpu.memory_space<vmem>>, vector<1x8x8xbf16>
    %371 = vector.shape_cast %370 : vector<1x8x8xbf16> to vector<8x8xbf16>
    %cst_225 = arith.constant dense<0.000000e+00> : vector<64x8xf32>
    %372 = tpu.matmul %369, %371, %cst_225 {dimension_numbers = #tpu.dot_dimension_numbers<[1], [0], [0], [1], [0, 0, 1, 1], [], []>} : vector<64x8xbf16>, vector<8x8xbf16>, vector<64x8xf32> -> vector<64x8xf32>
    %373 = arith.addf %368, %372 : vector<64x8xf32>
    %374 = vector.extract_strided_slice %8 {offsets = [304, 0], sizes = [64, 8], strides = [1, 1]} : vector<384x8xbf16> to vector<64x8xbf16>
    %c4_226 = arith.constant 4 : index
    %c0_227 = arith.constant 0 : index
    %c0_228 = arith.constant 0 : index
    %375 = vector.load %arg5[%c4_226, %c0_227, %c0_228] : memref<9x8x8xbf16, #tpu.memory_space<vmem>>, vector<1x8x8xbf16>
    %376 = vector.shape_cast %375 : vector<1x8x8xbf16> to vector<8x8xbf16>
    %cst_229 = arith.constant dense<0.000000e+00> : vector<64x8xf32>
    %377 = tpu.matmul %374, %376, %cst_229 {dimension_numbers = #tpu.dot_dimension_numbers<[1], [0], [0], [1], [0, 0, 1, 1], [], []>} : vector<64x8xbf16>, vector<8x8xbf16>, vector<64x8xf32> -> vector<64x8xf32>
    %378 = arith.addf %373, %377 : vector<64x8xf32>
    %379 = vector.extract_strided_slice %8 {offsets = [320, 0], sizes = [64, 8], strides = [1, 1]} : vector<384x8xbf16> to vector<64x8xbf16>
    %c5_230 = arith.constant 5 : index
    %c0_231 = arith.constant 0 : index
    %c0_232 = arith.constant 0 : index
    %380 = vector.load %arg5[%c5_230, %c0_231, %c0_232] : memref<9x8x8xbf16, #tpu.memory_space<vmem>>, vector<1x8x8xbf16>
    %381 = vector.shape_cast %380 : vector<1x8x8xbf16> to vector<8x8xbf16>
    %cst_233 = arith.constant dense<0.000000e+00> : vector<64x8xf32>
    %382 = tpu.matmul %379, %381, %cst_233 {dimension_numbers = #tpu.dot_dimension_numbers<[1], [0], [0], [1], [0, 0, 1, 1], [], []>} : vector<64x8xbf16>, vector<8x8xbf16>, vector<64x8xf32> -> vector<64x8xf32>
    %383 = arith.addf %378, %382 : vector<64x8xf32>
    %384 = vector.extract_strided_slice %383 {offsets = [0, 0], sizes = [16, 8], strides = [1, 1]} : vector<64x8xf32> to vector<16x8xf32>
    %c0_234 = arith.constant 0 : index
    %c0_235 = arith.constant 0 : index
    %385 = vector.load %arg4[%c0_234, %c0_235] : memref<1x8xf32, #tpu.memory_space<vmem>>, vector<1x8xf32>
    %386 = vector.broadcast %385 : vector<1x8xf32> to vector<16x8xf32>
    %387 = arith.addf %384, %386 : vector<16x8xf32>
    %c12 = arith.constant 12 : index
    %c0_236 = arith.constant 0 : index
    %388 = vector.load %arg3[%c12, %c0_236] : memref<16x8xf32, #tpu.memory_space<vmem>>, vector<1x8xf32>
    %389 = vector.broadcast %1 : vector<16x1xf32> to vector<16x8xf32>
    %390 = vector.broadcast %388 : vector<1x8xf32> to vector<16x8xf32>
    %391 = arith.mulf %389, %390 : vector<16x8xf32>
    %392 = arith.addf %387, %391 : vector<16x8xf32>
    %cst_237 = arith.constant 0.000000e+00 : f32
    %393 = vector.broadcast %cst_237 : f32 to vector<16x8xf32>
    %394 = arith.cmpf oge, %392, %393 : vector<16x8xf32>
    %cst_238 = arith.constant 2.000000e-01 : f32
    %395 = vector.broadcast %cst_238 : f32 to vector<16x8xf32>
    %396 = arith.mulf %395, %392 : vector<16x8xf32>
    %397 = arith.select %394, %392, %396 : vector<16x8xi1>, vector<16x8xf32>
    %398 = arith.truncf %397 : vector<16x8xf32> to vector<16x8xbf16>
    %c12_239 = arith.constant 12 : index
    %c0_240 = arith.constant 0 : index
    %c0_241 = arith.constant 0 : index
    %399 = vector.load %arg6[%c12_239, %c0_240, %c0_241] : memref<16x8x32xbf16, #tpu.memory_space<vmem>>, vector<1x8x32xbf16>
    %400 = vector.shape_cast %399 : vector<1x8x32xbf16> to vector<8x32xbf16>
    %cst_242 = arith.constant dense<0.000000e+00> : vector<16x32xf32>
    %401 = tpu.matmul %398, %400, %cst_242 {dimension_numbers = #tpu.dot_dimension_numbers<[1], [0], [0], [1], [0, 0, 1, 1], [], []>} : vector<16x8xbf16>, vector<8x32xbf16>, vector<16x32xf32> -> vector<16x32xf32>
    %402 = arith.addf %354, %401 : vector<16x32xf32>
    %403 = vector.extract_strided_slice %383 {offsets = [16, 0], sizes = [16, 8], strides = [1, 1]} : vector<64x8xf32> to vector<16x8xf32>
    %c0_243 = arith.constant 0 : index
    %c0_244 = arith.constant 0 : index
    %404 = vector.load %arg4[%c0_243, %c0_244] : memref<1x8xf32, #tpu.memory_space<vmem>>, vector<1x8xf32>
    %405 = vector.broadcast %404 : vector<1x8xf32> to vector<16x8xf32>
    %406 = arith.addf %403, %405 : vector<16x8xf32>
    %c13 = arith.constant 13 : index
    %c0_245 = arith.constant 0 : index
    %407 = vector.load %arg3[%c13, %c0_245] : memref<16x8xf32, #tpu.memory_space<vmem>>, vector<1x8xf32>
    %408 = vector.broadcast %1 : vector<16x1xf32> to vector<16x8xf32>
    %409 = vector.broadcast %407 : vector<1x8xf32> to vector<16x8xf32>
    %410 = arith.mulf %408, %409 : vector<16x8xf32>
    %411 = arith.addf %406, %410 : vector<16x8xf32>
    %cst_246 = arith.constant 0.000000e+00 : f32
    %412 = vector.broadcast %cst_246 : f32 to vector<16x8xf32>
    %413 = arith.cmpf oge, %411, %412 : vector<16x8xf32>
    %cst_247 = arith.constant 2.000000e-01 : f32
    %414 = vector.broadcast %cst_247 : f32 to vector<16x8xf32>
    %415 = arith.mulf %414, %411 : vector<16x8xf32>
    %416 = arith.select %413, %411, %415 : vector<16x8xi1>, vector<16x8xf32>
    %417 = arith.truncf %416 : vector<16x8xf32> to vector<16x8xbf16>
    %c13_248 = arith.constant 13 : index
    %c0_249 = arith.constant 0 : index
    %c0_250 = arith.constant 0 : index
    %418 = vector.load %arg6[%c13_248, %c0_249, %c0_250] : memref<16x8x32xbf16, #tpu.memory_space<vmem>>, vector<1x8x32xbf16>
    %419 = vector.shape_cast %418 : vector<1x8x32xbf16> to vector<8x32xbf16>
    %cst_251 = arith.constant dense<0.000000e+00> : vector<16x32xf32>
    %420 = tpu.matmul %417, %419, %cst_251 {dimension_numbers = #tpu.dot_dimension_numbers<[1], [0], [0], [1], [0, 0, 1, 1], [], []>} : vector<16x8xbf16>, vector<8x32xbf16>, vector<16x32xf32> -> vector<16x32xf32>
    %421 = arith.addf %402, %420 : vector<16x32xf32>
    %422 = vector.extract_strided_slice %383 {offsets = [32, 0], sizes = [16, 8], strides = [1, 1]} : vector<64x8xf32> to vector<16x8xf32>
    %c0_252 = arith.constant 0 : index
    %c0_253 = arith.constant 0 : index
    %423 = vector.load %arg4[%c0_252, %c0_253] : memref<1x8xf32, #tpu.memory_space<vmem>>, vector<1x8xf32>
    %424 = vector.broadcast %423 : vector<1x8xf32> to vector<16x8xf32>
    %425 = arith.addf %422, %424 : vector<16x8xf32>
    %c14 = arith.constant 14 : index
    %c0_254 = arith.constant 0 : index
    %426 = vector.load %arg3[%c14, %c0_254] : memref<16x8xf32, #tpu.memory_space<vmem>>, vector<1x8xf32>
    %427 = vector.broadcast %1 : vector<16x1xf32> to vector<16x8xf32>
    %428 = vector.broadcast %426 : vector<1x8xf32> to vector<16x8xf32>
    %429 = arith.mulf %427, %428 : vector<16x8xf32>
    %430 = arith.addf %425, %429 : vector<16x8xf32>
    %cst_255 = arith.constant 0.000000e+00 : f32
    %431 = vector.broadcast %cst_255 : f32 to vector<16x8xf32>
    %432 = arith.cmpf oge, %430, %431 : vector<16x8xf32>
    %cst_256 = arith.constant 2.000000e-01 : f32
    %433 = vector.broadcast %cst_256 : f32 to vector<16x8xf32>
    %434 = arith.mulf %433, %430 : vector<16x8xf32>
    %435 = arith.select %432, %430, %434 : vector<16x8xi1>, vector<16x8xf32>
    %436 = arith.truncf %435 : vector<16x8xf32> to vector<16x8xbf16>
    %c14_257 = arith.constant 14 : index
    %c0_258 = arith.constant 0 : index
    %c0_259 = arith.constant 0 : index
    %437 = vector.load %arg6[%c14_257, %c0_258, %c0_259] : memref<16x8x32xbf16, #tpu.memory_space<vmem>>, vector<1x8x32xbf16>
    %438 = vector.shape_cast %437 : vector<1x8x32xbf16> to vector<8x32xbf16>
    %cst_260 = arith.constant dense<0.000000e+00> : vector<16x32xf32>
    %439 = tpu.matmul %436, %438, %cst_260 {dimension_numbers = #tpu.dot_dimension_numbers<[1], [0], [0], [1], [0, 0, 1, 1], [], []>} : vector<16x8xbf16>, vector<8x32xbf16>, vector<16x32xf32> -> vector<16x32xf32>
    %440 = arith.addf %421, %439 : vector<16x32xf32>
    %441 = vector.extract_strided_slice %383 {offsets = [48, 0], sizes = [16, 8], strides = [1, 1]} : vector<64x8xf32> to vector<16x8xf32>
    %c0_261 = arith.constant 0 : index
    %c0_262 = arith.constant 0 : index
    %442 = vector.load %arg4[%c0_261, %c0_262] : memref<1x8xf32, #tpu.memory_space<vmem>>, vector<1x8xf32>
    %443 = vector.broadcast %442 : vector<1x8xf32> to vector<16x8xf32>
    %444 = arith.addf %441, %443 : vector<16x8xf32>
    %c15 = arith.constant 15 : index
    %c0_263 = arith.constant 0 : index
    %445 = vector.load %arg3[%c15, %c0_263] : memref<16x8xf32, #tpu.memory_space<vmem>>, vector<1x8xf32>
    %446 = vector.broadcast %1 : vector<16x1xf32> to vector<16x8xf32>
    %447 = vector.broadcast %445 : vector<1x8xf32> to vector<16x8xf32>
    %448 = arith.mulf %446, %447 : vector<16x8xf32>
    %449 = arith.addf %444, %448 : vector<16x8xf32>
    %cst_264 = arith.constant 0.000000e+00 : f32
    %450 = vector.broadcast %cst_264 : f32 to vector<16x8xf32>
    %451 = arith.cmpf oge, %449, %450 : vector<16x8xf32>
    %cst_265 = arith.constant 2.000000e-01 : f32
    %452 = vector.broadcast %cst_265 : f32 to vector<16x8xf32>
    %453 = arith.mulf %452, %449 : vector<16x8xf32>
    %454 = arith.select %451, %449, %453 : vector<16x8xi1>, vector<16x8xf32>
    %455 = arith.truncf %454 : vector<16x8xf32> to vector<16x8xbf16>
    %c15_266 = arith.constant 15 : index
    %c0_267 = arith.constant 0 : index
    %c0_268 = arith.constant 0 : index
    %456 = vector.load %arg6[%c15_266, %c0_267, %c0_268] : memref<16x8x32xbf16, #tpu.memory_space<vmem>>, vector<1x8x32xbf16>
    %457 = vector.shape_cast %456 : vector<1x8x32xbf16> to vector<8x32xbf16>
    %cst_269 = arith.constant dense<0.000000e+00> : vector<16x32xf32>
    %458 = tpu.matmul %455, %457, %cst_269 {dimension_numbers = #tpu.dot_dimension_numbers<[1], [0], [0], [1], [0, 0, 1, 1], [], []>} : vector<16x8xbf16>, vector<8x32xbf16>, vector<16x32xf32> -> vector<16x32xf32>
    %459 = arith.addf %440, %458 : vector<16x32xf32>
    %c0_270 = arith.constant 0 : index
    %c0_271 = arith.constant 0 : index
    %460 = vector.load %arg7[%c0_270, %c0_271] : memref<1x32xf32, #tpu.memory_space<vmem>>, vector<1x32xf32>
    %461 = vector.broadcast %460 : vector<1x32xf32> to vector<16x32xf32>
    %462 = arith.addf %459, %461 : vector<16x32xf32>
    %cst_272 = arith.constant 0.000000e+00 : f32
    %463 = vector.broadcast %cst_272 : f32 to vector<16x32xf32>
    %464 = arith.cmpf oge, %462, %463 : vector<16x32xf32>
    %cst_273 = arith.constant 2.000000e-01 : f32
    %465 = vector.broadcast %cst_273 : f32 to vector<16x32xf32>
    %466 = arith.mulf %465, %462 : vector<16x32xf32>
    %467 = arith.select %464, %462, %466 : vector<16x32xi1>, vector<16x32xf32>
    %c0_274 = arith.constant 0 : index
    %c0_275 = arith.constant 0 : index
    %468 = vector.load %arg8[%c0_274, %c0_275] : memref<1x32xf32, #tpu.memory_space<vmem>>, vector<1x32xf32>
    %469 = vector.broadcast %468 : vector<1x32xf32> to vector<16x32xf32>
    %470 = arith.mulf %467, %469 : vector<16x32xf32>
    %cst_276 = arith.constant dense<0.000000e+00> : vector<16xf32>
    %471 = vector.multi_reduction <add>, %470, %cst_276 [1] : vector<16x32xf32> to vector<16xf32>
    %472 = vector.shape_cast %471 : vector<16xf32> to vector<16x1xf32>
    %c0_277 = arith.constant 0 : index
    %c0_278 = arith.constant 0 : index
    %473 = vector.load %arg9[%c0_277, %c0_278] : memref<1x1xf32, #tpu.memory_space<vmem>>, vector<1x1xf32>
    %474 = vector.broadcast %473 : vector<1x1xf32> to vector<16x1xf32>
    %475 = arith.addf %472, %474 : vector<16x1xf32>
    %c0_279 = arith.constant 0 : index
    %c0_280 = arith.constant 0 : index
    %476 = vector.load %arg10[%c0_279, %c0_280] : memref<16x1xf32, #tpu.memory_space<vmem>>, vector<16x1xf32>
    tpu.vector_store %arg10[%c0_279, %c0_280], %475 {strides = array<i32>} : memref<16x1xf32, #tpu.memory_space<vmem>>, vector<16x1xf32>,
    return
  }
  func.func @transform_0(%arg0: i32) -> (i32, i32) {
    %c0_i32 = arith.constant 0 : i32
    %c0_i32_0 = arith.constant 0 : i32
    return %arg0, %c0_i32 : i32, i32
  }
  func.func @transform_1(%arg0: i32) -> (i32, i32) {
    %c0_i32 = arith.constant 0 : i32
    %c0_i32_0 = arith.constant 0 : i32
    return %arg0, %c0_i32 : i32, i32
  }
  func.func @transform_2(%arg0: i32) -> (i32, i32) {
    %c0_i32 = arith.constant 0 : i32
    %c0_i32_0 = arith.constant 0 : i32
    %c0_i32_1 = arith.constant 0 : i32
    return %c0_i32, %c0_i32_0 : i32, i32
  }
  func.func @transform_3(%arg0: i32) -> (i32, i32) {
    %c0_i32 = arith.constant 0 : i32
    %c0_i32_0 = arith.constant 0 : i32
    %c0_i32_1 = arith.constant 0 : i32
    return %c0_i32, %c0_i32_0 : i32, i32
  }
  func.func @transform_4(%arg0: i32) -> (i32, i32, i32) {
    %c0_i32 = arith.constant 0 : i32
    %c0_i32_0 = arith.constant 0 : i32
    %c0_i32_1 = arith.constant 0 : i32
    %c0_i32_2 = arith.constant 0 : i32
    return %c0_i32, %c0_i32_0, %c0_i32_1 : i32, i32, i32
  }
  func.func @transform_5(%arg0: i32) -> (i32, i32, i32) {
    %c0_i32 = arith.constant 0 : i32
    %c0_i32_0 = arith.constant 0 : i32
    %c0_i32_1 = arith.constant 0 : i32
    %c0_i32_2 = arith.constant 0 : i32
    return %c0_i32, %c0_i32_0, %c0_i32_1 : i32, i32, i32
  }
  func.func @transform_6(%arg0: i32) -> (i32, i32) {
    %c0_i32 = arith.constant 0 : i32
    %c0_i32_0 = arith.constant 0 : i32
    %c0_i32_1 = arith.constant 0 : i32
    return %c0_i32, %c0_i32_0 : i32, i32
  }
  func.func @transform_7(%arg0: i32) -> (i32, i32) {
    %c0_i32 = arith.constant 0 : i32
    %c0_i32_0 = arith.constant 0 : i32
    %c0_i32_1 = arith.constant 0 : i32
    return %c0_i32, %c0_i32_0 : i32, i32
  }
  func.func @transform_8(%arg0: i32) -> (i32, i32) {
    %c0_i32 = arith.constant 0 : i32
    %c0_i32_0 = arith.constant 0 : i32
    %c0_i32_1 = arith.constant 0 : i32
    return %c0_i32, %c0_i32_0 : i32, i32
  }
  func.func @transform_9(%arg0: i32) -> (i32, i32) {
    %c0_i32 = arith.constant 0 : i32
    %c0_i32_0 = arith.constant 0 : i32
    return %arg0, %c0_i32 : i32, i32
  }
}

module attributes {stable_mosaic.version = 11 : i64} {
  func.func @_discrim_last_block_kernel(%arg0: i32, %arg1: memref<256x8xbf16, #tpu.memory_space<vmem>>, %arg2: memref<16x1xf32, #tpu.memory_space<vmem>>, %arg3: memref<16x8xf32, #tpu.memory_space<vmem>>, %arg4: memref<1x8xf32, #tpu.memory_space<vmem>>, %arg5: memref<9x8x8xbf16, #tpu.memory_space<vmem>>, %arg6: memref<16x8x32xbf16, #tpu.memory_space<vmem>>, %arg7: memref<1x32xf32, #tpu.memory_space<vmem>>, %arg8: memref<1x32xf32, #tpu.memory_space<vmem>>, %arg9: memref<1x1xf32, #tpu.memory_space<vmem>>, %arg10: memref<16x1xf32, #tpu.memory_space<vmem>>) attributes {dimension_semantics = [#tpu.dimension_semantics<parallel>], iteration_bounds = array<i64: 2>, scalar_prefetch = 0 : i64, scratch_operands = 0 : i64, tpu.core_type = #tpu.core_type<tc>, window_params = [{transform_indices = @transform_0, window_bounds = array<i64: 256, 8>}, {transform_indices = @transform_1, window_bounds = array<i64: 16, 1>}, {pipeline_mode = #tpu.pipeline_mode<synchronous>, transform_indices = @transform_2, window_bounds = array<i64: 16, 8>}, {pipeline_mode = #tpu.pipeline_mode<synchronous>, transform_indices = @transform_3, window_bounds = array<i64: 1, 8>}, {pipeline_mode = #tpu.pipeline_mode<synchronous>, transform_indices = @transform_4, window_bounds = array<i64: 9, 8, 8>}, {pipeline_mode = #tpu.pipeline_mode<synchronous>, transform_indices = @transform_5, window_bounds = array<i64: 16, 8, 32>}, {pipeline_mode = #tpu.pipeline_mode<synchronous>, transform_indices = @transform_6, window_bounds = array<i64: 1, 32>}, {pipeline_mode = #tpu.pipeline_mode<synchronous>, transform_indices = @transform_7, window_bounds = array<i64: 1, 32>}, {pipeline_mode = #tpu.pipeline_mode<synchronous>, transform_indices = @transform_8, window_bounds = array<i64: 1, 1>}, {transform_indices = @transform_9, window_bounds = array<i64: 16, 1>}]} {
    %c0 = arith.constant 0 : index
    %c0_0 = arith.constant 0 : index
    %0 = vector.load %arg1[%c0, %c0_0] : memref<256x8xbf16, #tpu.memory_space<vmem>>, vector<256x8xbf16>
    %c0_1 = arith.constant 0 : index
    %c0_2 = arith.constant 0 : index
    %1 = vector.load %arg2[%c0_1, %c0_2] : memref<16x1xf32, #tpu.memory_space<vmem>>, vector<16x1xf32>
    %cst = arith.constant 0.000000e+00 : bf16
    %2 = vector.broadcast %cst : bf16 to vector<16x8xbf16>
    %cst_3 = arith.constant 0.000000e+00 : bf16
    %3 = vector.broadcast %cst_3 : bf16 to vector<32x8xbf16>
    %4 = vector.extract_strided_slice %0 {offsets = [0, 0], sizes = [64, 8], strides = [1, 1]} : vector<256x8xbf16> to vector<64x8xbf16>
    %5 = vector.extract_strided_slice %0 {offsets = [64, 0], sizes = [64, 8], strides = [1, 1]} : vector<256x8xbf16> to vector<64x8xbf16>
    %6 = vector.extract_strided_slice %0 {offsets = [128, 0], sizes = [64, 8], strides = [1, 1]} : vector<256x8xbf16> to vector<64x8xbf16>
    %7 = vector.extract_strided_slice %0 {offsets = [192, 0], sizes = [64, 8], strides = [1, 1]} : vector<256x8xbf16> to vector<64x8xbf16>
    %8 = tpu.concatenate %2, %4, %3, %5, %3, %6, %3, %7, %2 in 0 : vector<16x8xbf16>, vector<64x8xbf16>, vector<32x8xbf16>, vector<64x8xbf16>, vector<32x8xbf16>, vector<64x8xbf16>, vector<32x8xbf16>, vector<64x8xbf16>, vector<16x8xbf16> -> vector<384x8xbf16>
    %cst_4 = arith.constant 0.000000e+00 : f32
    %9 = vector.broadcast %cst_4 : f32 to vector<16x32xf32>
    %10 = vector.extract_strided_slice %8 {offsets = [0, 0], sizes = [64, 8], strides = [1, 1]} : vector<384x8xbf16> to vector<64x8xbf16>
    %c3 = arith.constant 3 : index
    %c0_5 = arith.constant 0 : index
    %c0_6 = arith.constant 0 : index
    %11 = vector.load %arg5[%c3, %c0_5, %c0_6] : memref<9x8x8xbf16, #tpu.memory_space<vmem>>, vector<1x8x8xbf16>
    %12 = vector.shape_cast %11 : vector<1x8x8xbf16> to vector<8x8xbf16>
    %cst_7 = arith.constant dense<0.000000e+00> : vector<64x8xf32>
    %13 = tpu.matmul %10, %12, %cst_7 {dimension_numbers = #tpu.dot_dimension_numbers<[1], [0], [0], [1], [0, 0, 1, 1], [], []>} : vector<64x8xbf16>, vector<8x8xbf16>, vector<64x8xf32> -> vector<64x8xf32>
    %14 = vector.extract_strided_slice %8 {offsets = [16, 0], sizes = [64, 8], strides = [1, 1]} : vector<384x8xbf16> to vector<64x8xbf16>
    %c4 = arith.constant 4 : index
    %c0_8 = arith.constant 0 : index
    %c0_9 = arith.constant 0 : index
    %15 = vector.load %arg5[%c4, %c0_8, %c0_9] : memref<9x8x8xbf16, #tpu.memory_space<vmem>>, vector<1x8x8xbf16>
    %16 = vector.shape_cast %15 : vector<1x8x8xbf16> to vector<8x8xbf16>
    %cst_10 = arith.constant dense<0.000000e+00> : vector<64x8xf32>
    %17 = tpu.matmul %14, %16, %cst_10 {dimension_numbers = #tpu.dot_dimension_numbers<[1], [0], [0], [1], [0, 0, 1, 1], [], []>} : vector<64x8xbf16>, vector<8x8xbf16>, vector<64x8xf32> -> vector<64x8xf32>
    %18 = arith.addf %13, %17 : vector<64x8xf32>
    %19 = vector.extract_strided_slice %8 {offsets = [32, 0], sizes = [64, 8], strides = [1, 1]} : vector<384x8xbf16> to vector<64x8xbf16>
    %c5 = arith.constant 5 : index
    %c0_11 = arith.constant 0 : index
    %c0_12 = arith.constant 0 : index
    %20 = vector.load %arg5[%c5, %c0_11, %c0_12] : memref<9x8x8xbf16, #tpu.memory_space<vmem>>, vector<1x8x8xbf16>
    %21 = vector.shape_cast %20 : vector<1x8x8xbf16> to vector<8x8xbf16>
    %cst_13 = arith.constant dense<0.000000e+00> : vector<64x8xf32>
    %22 = tpu.matmul %19, %21, %cst_13 {dimension_numbers = #tpu.dot_dimension_numbers<[1], [0], [0], [1], [0, 0, 1, 1], [], []>} : vector<64x8xbf16>, vector<8x8xbf16>, vector<64x8xf32> -> vector<64x8xf32>
    %23 = arith.addf %18, %22 : vector<64x8xf32>
    %24 = vector.extract_strided_slice %8 {offsets = [96, 0], sizes = [64, 8], strides = [1, 1]} : vector<384x8xbf16> to vector<64x8xbf16>
    %c6 = arith.constant 6 : index
    %c0_14 = arith.constant 0 : index
    %c0_15 = arith.constant 0 : index
    %25 = vector.load %arg5[%c6, %c0_14, %c0_15] : memref<9x8x8xbf16, #tpu.memory_space<vmem>>, vector<1x8x8xbf16>
    %26 = vector.shape_cast %25 : vector<1x8x8xbf16> to vector<8x8xbf16>
    %cst_16 = arith.constant dense<0.000000e+00> : vector<64x8xf32>
    %27 = tpu.matmul %24, %26, %cst_16 {dimension_numbers = #tpu.dot_dimension_numbers<[1], [0], [0], [1], [0, 0, 1, 1], [], []>} : vector<64x8xbf16>, vector<8x8xbf16>, vector<64x8xf32> -> vector<64x8xf32>
    %28 = arith.addf %23, %27 : vector<64x8xf32>
    %29 = vector.extract_strided_slice %8 {offsets = [112, 0], sizes = [64, 8], strides = [1, 1]} : vector<384x8xbf16> to vector<64x8xbf16>
    %c7 = arith.constant 7 : index
    %c0_17 = arith.constant 0 : index
    %c0_18 = arith.constant 0 : index
    %30 = vector.load %arg5[%c7, %c0_17, %c0_18] : memref<9x8x8xbf16, #tpu.memory_space<vmem>>, vector<1x8x8xbf16>
    %31 = vector.shape_cast %30 : vector<1x8x8xbf16> to vector<8x8xbf16>
    %cst_19 = arith.constant dense<0.000000e+00> : vector<64x8xf32>
    %32 = tpu.matmul %29, %31, %cst_19 {dimension_numbers = #tpu.dot_dimension_numbers<[1], [0], [0], [1], [0, 0, 1, 1], [], []>} : vector<64x8xbf16>, vector<8x8xbf16>, vector<64x8xf32> -> vector<64x8xf32>
    %33 = arith.addf %28, %32 : vector<64x8xf32>
    %34 = vector.extract_strided_slice %8 {offsets = [128, 0], sizes = [64, 8], strides = [1, 1]} : vector<384x8xbf16> to vector<64x8xbf16>
    %c8 = arith.constant 8 : index
    %c0_20 = arith.constant 0 : index
    %c0_21 = arith.constant 0 : index
    %35 = vector.load %arg5[%c8, %c0_20, %c0_21] : memref<9x8x8xbf16, #tpu.memory_space<vmem>>, vector<1x8x8xbf16>
    %36 = vector.shape_cast %35 : vector<1x8x8xbf16> to vector<8x8xbf16>
    %cst_22 = arith.constant dense<0.000000e+00> : vector<64x8xf32>
    %37 = tpu.matmul %34, %36, %cst_22 {dimension_numbers = #tpu.dot_dimension_numbers<[1], [0], [0], [1], [0, 0, 1, 1], [], []>} : vector<64x8xbf16>, vector<8x8xbf16>, vector<64x8xf32> -> vector<64x8xf32>
    %38 = arith.addf %33, %37 : vector<64x8xf32>
    %39 = vector.extract_strided_slice %38 {offsets = [0, 0], sizes = [16, 8], strides = [1, 1]} : vector<64x8xf32> to vector<16x8xf32>
    %c0_23 = arith.constant 0 : index
    %c0_24 = arith.constant 0 : index
    %40 = vector.load %arg4[%c0_23, %c0_24] : memref<1x8xf32, #tpu.memory_space<vmem>>, vector<1x8xf32>
    %41 = vector.broadcast %40 : vector<1x8xf32> to vector<16x8xf32>
    %42 = arith.addf %39, %41 : vector<16x8xf32>
    %c0_25 = arith.constant 0 : index
    %c0_26 = arith.constant 0 : index
    %43 = vector.load %arg3[%c0_25, %c0_26] : memref<16x8xf32, #tpu.memory_space<vmem>>, vector<1x8xf32>
    %44 = vector.broadcast %1 : vector<16x1xf32> to vector<16x8xf32>
    %45 = vector.broadcast %43 : vector<1x8xf32> to vector<16x8xf32>
    %46 = arith.mulf %44, %45 : vector<16x8xf32>
    %47 = arith.addf %42, %46 : vector<16x8xf32>
    %cst_27 = arith.constant 0.000000e+00 : f32
    %48 = vector.broadcast %cst_27 : f32 to vector<16x8xf32>
    %49 = arith.cmpf oge, %47, %48 : vector<16x8xf32>
    %cst_28 = arith.constant 2.000000e-01 : f32
    %50 = vector.broadcast %cst_28 : f32 to vector<16x8xf32>
    %51 = arith.mulf %50, %47 : vector<16x8xf32>
    %52 = arith.select %49, %47, %51 : vector<16x8xi1>, vector<16x8xf32>
    %53 = arith.truncf %52 : vector<16x8xf32> to vector<16x8xbf16>
    %c0_29 = arith.constant 0 : index
    %c0_30 = arith.constant 0 : index
    %c0_31 = arith.constant 0 : index
    %54 = vector.load %arg6[%c0_29, %c0_30, %c0_31] : memref<16x8x32xbf16, #tpu.memory_space<vmem>>, vector<1x8x32xbf16>
    %55 = vector.shape_cast %54 : vector<1x8x32xbf16> to vector<8x32xbf16>
    %cst_32 = arith.constant dense<0.000000e+00> : vector<16x32xf32>
    %56 = tpu.matmul %53, %55, %cst_32 {dimension_numbers = #tpu.dot_dimension_numbers<[1], [0], [0], [1], [0, 0, 1, 1], [], []>} : vector<16x8xbf16>, vector<8x32xbf16>, vector<16x32xf32> -> vector<16x32xf32>
    %57 = arith.addf %9, %56 : vector<16x32xf32>
    %58 = vector.extract_strided_slice %38 {offsets = [16, 0], sizes = [16, 8], strides = [1, 1]} : vector<64x8xf32> to vector<16x8xf32>
    %c0_33 = arith.constant 0 : index
    %c0_34 = arith.constant 0 : index
    %59 = vector.load %arg4[%c0_33, %c0_34] : memref<1x8xf32, #tpu.memory_space<vmem>>, vector<1x8xf32>
    %60 = vector.broadcast %59 : vector<1x8xf32> to vector<16x8xf32>
    %61 = arith.addf %58, %60 : vector<16x8xf32>
    %c1 = arith.constant 1 : index
    %c0_35 = arith.constant 0 : index
    %62 = vector.load %arg3[%c1, %c0_35] : memref<16x8xf32, #tpu.memory_space<vmem>>, vector<1x8xf32>
    %63 = vector.broadcast %1 : vector<16x1xf32> to vector<16x8xf32>
    %64 = vector.broadcast %62 : vector<1x8xf32> to vector<16x8xf32>
    %65 = arith.mulf %63, %64 : vector<16x8xf32>
    %66 = arith.addf %61, %65 : vector<16x8xf32>
    %cst_36 = arith.constant 0.000000e+00 : f32
    %67 = vector.broadcast %cst_36 : f32 to vector<16x8xf32>
    %68 = arith.cmpf oge, %66, %67 : vector<16x8xf32>
    %cst_37 = arith.constant 2.000000e-01 : f32
    %69 = vector.broadcast %cst_37 : f32 to vector<16x8xf32>
    %70 = arith.mulf %69, %66 : vector<16x8xf32>
    %71 = arith.select %68, %66, %70 : vector<16x8xi1>, vector<16x8xf32>
    %72 = arith.truncf %71 : vector<16x8xf32> to vector<16x8xbf16>
    %c1_38 = arith.constant 1 : index
    %c0_39 = arith.constant 0 : index
    %c0_40 = arith.constant 0 : index
    %73 = vector.load %arg6[%c1_38, %c0_39, %c0_40] : memref<16x8x32xbf16, #tpu.memory_space<vmem>>, vector<1x8x32xbf16>
    %74 = vector.shape_cast %73 : vector<1x8x32xbf16> to vector<8x32xbf16>
    %cst_41 = arith.constant dense<0.000000e+00> : vector<16x32xf32>
    %75 = tpu.matmul %72, %74, %cst_41 {dimension_numbers = #tpu.dot_dimension_numbers<[1], [0], [0], [1], [0, 0, 1, 1], [], []>} : vector<16x8xbf16>, vector<8x32xbf16>, vector<16x32xf32> -> vector<16x32xf32>
    %76 = arith.addf %57, %75 : vector<16x32xf32>
    %77 = vector.extract_strided_slice %38 {offsets = [32, 0], sizes = [16, 8], strides = [1, 1]} : vector<64x8xf32> to vector<16x8xf32>
    %c0_42 = arith.constant 0 : index
    %c0_43 = arith.constant 0 : index
    %78 = vector.load %arg4[%c0_42, %c0_43] : memref<1x8xf32, #tpu.memory_space<vmem>>, vector<1x8xf32>
    %79 = vector.broadcast %78 : vector<1x8xf32> to vector<16x8xf32>
    %80 = arith.addf %77, %79 : vector<16x8xf32>
    %c2 = arith.constant 2 : index
    %c0_44 = arith.constant 0 : index
    %81 = vector.load %arg3[%c2, %c0_44] : memref<16x8xf32, #tpu.memory_space<vmem>>, vector<1x8xf32>
    %82 = vector.broadcast %1 : vector<16x1xf32> to vector<16x8xf32>
    %83 = vector.broadcast %81 : vector<1x8xf32> to vector<16x8xf32>
    %84 = arith.mulf %82, %83 : vector<16x8xf32>
    %85 = arith.addf %80, %84 : vector<16x8xf32>
    %cst_45 = arith.constant 0.000000e+00 : f32
    %86 = vector.broadcast %cst_45 : f32 to vector<16x8xf32>
    %87 = arith.cmpf oge, %85, %86 : vector<16x8xf32>
    %cst_46 = arith.constant 2.000000e-01 : f32
    %88 = vector.broadcast %cst_46 : f32 to vector<16x8xf32>
    %89 = arith.mulf %88, %85 : vector<16x8xf32>
    %90 = arith.select %87, %85, %89 : vector<16x8xi1>, vector<16x8xf32>
    %91 = arith.truncf %90 : vector<16x8xf32> to vector<16x8xbf16>
    %c2_47 = arith.constant 2 : index
    %c0_48 = arith.constant 0 : index
    %c0_49 = arith.constant 0 : index
    %92 = vector.load %arg6[%c2_47, %c0_48, %c0_49] : memref<16x8x32xbf16, #tpu.memory_space<vmem>>, vector<1x8x32xbf16>
    %93 = vector.shape_cast %92 : vector<1x8x32xbf16> to vector<8x32xbf16>
    %cst_50 = arith.constant dense<0.000000e+00> : vector<16x32xf32>
    %94 = tpu.matmul %91, %93, %cst_50 {dimension_numbers = #tpu.dot_dimension_numbers<[1], [0], [0], [1], [0, 0, 1, 1], [], []>} : vector<16x8xbf16>, vector<8x32xbf16>, vector<16x32xf32> -> vector<16x32xf32>
    %95 = arith.addf %76, %94 : vector<16x32xf32>
    %96 = vector.extract_strided_slice %38 {offsets = [48, 0], sizes = [16, 8], strides = [1, 1]} : vector<64x8xf32> to vector<16x8xf32>
    %c0_51 = arith.constant 0 : index
    %c0_52 = arith.constant 0 : index
    %97 = vector.load %arg4[%c0_51, %c0_52] : memref<1x8xf32, #tpu.memory_space<vmem>>, vector<1x8xf32>
    %98 = vector.broadcast %97 : vector<1x8xf32> to vector<16x8xf32>
    %99 = arith.addf %96, %98 : vector<16x8xf32>
    %c3_53 = arith.constant 3 : index
    %c0_54 = arith.constant 0 : index
    %100 = vector.load %arg3[%c3_53, %c0_54] : memref<16x8xf32, #tpu.memory_space<vmem>>, vector<1x8xf32>
    %101 = vector.broadcast %1 : vector<16x1xf32> to vector<16x8xf32>
    %102 = vector.broadcast %100 : vector<1x8xf32> to vector<16x8xf32>
    %103 = arith.mulf %101, %102 : vector<16x8xf32>
    %104 = arith.addf %99, %103 : vector<16x8xf32>
    %cst_55 = arith.constant 0.000000e+00 : f32
    %105 = vector.broadcast %cst_55 : f32 to vector<16x8xf32>
    %106 = arith.cmpf oge, %104, %105 : vector<16x8xf32>
    %cst_56 = arith.constant 2.000000e-01 : f32
    %107 = vector.broadcast %cst_56 : f32 to vector<16x8xf32>
    %108 = arith.mulf %107, %104 : vector<16x8xf32>
    %109 = arith.select %106, %104, %108 : vector<16x8xi1>, vector<16x8xf32>
    %110 = arith.truncf %109 : vector<16x8xf32> to vector<16x8xbf16>
    %c3_57 = arith.constant 3 : index
    %c0_58 = arith.constant 0 : index
    %c0_59 = arith.constant 0 : index
    %111 = vector.load %arg6[%c3_57, %c0_58, %c0_59] : memref<16x8x32xbf16, #tpu.memory_space<vmem>>, vector<1x8x32xbf16>
    %112 = vector.shape_cast %111 : vector<1x8x32xbf16> to vector<8x32xbf16>
    %cst_60 = arith.constant dense<0.000000e+00> : vector<16x32xf32>
    %113 = tpu.matmul %110, %112, %cst_60 {dimension_numbers = #tpu.dot_dimension_numbers<[1], [0], [0], [1], [0, 0, 1, 1], [], []>} : vector<16x8xbf16>, vector<8x32xbf16>, vector<16x32xf32> -> vector<16x32xf32>
    %114 = arith.addf %95, %113 : vector<16x32xf32>
    %115 = vector.extract_strided_slice %8 {offsets = [0, 0], sizes = [64, 8], strides = [1, 1]} : vector<384x8xbf16> to vector<64x8xbf16>
    %c0_61 = arith.constant 0 : index
    %c0_62 = arith.constant 0 : index
    %c0_63 = arith.constant 0 : index
    %116 = vector.load %arg5[%c0_61, %c0_62, %c0_63] : memref<9x8x8xbf16, #tpu.memory_space<vmem>>, vector<1x8x8xbf16>
    %117 = vector.shape_cast %116 : vector<1x8x8xbf16> to vector<8x8xbf16>
    %cst_64 = arith.constant dense<0.000000e+00> : vector<64x8xf32>
    %118 = tpu.matmul %115, %117, %cst_64 {dimension_numbers = #tpu.dot_dimension_numbers<[1], [0], [0], [1], [0, 0, 1, 1], [], []>} : vector<64x8xbf16>, vector<8x8xbf16>, vector<64x8xf32> -> vector<64x8xf32>
    %119 = vector.extract_strided_slice %8 {offsets = [16, 0], sizes = [64, 8], strides = [1, 1]} : vector<384x8xbf16> to vector<64x8xbf16>
    %c1_65 = arith.constant 1 : index
    %c0_66 = arith.constant 0 : index
    %c0_67 = arith.constant 0 : index
    %120 = vector.load %arg5[%c1_65, %c0_66, %c0_67] : memref<9x8x8xbf16, #tpu.memory_space<vmem>>, vector<1x8x8xbf16>
    %121 = vector.shape_cast %120 : vector<1x8x8xbf16> to vector<8x8xbf16>
    %cst_68 = arith.constant dense<0.000000e+00> : vector<64x8xf32>
    %122 = tpu.matmul %119, %121, %cst_68 {dimension_numbers = #tpu.dot_dimension_numbers<[1], [0], [0], [1], [0, 0, 1, 1], [], []>} : vector<64x8xbf16>, vector<8x8xbf16>, vector<64x8xf32> -> vector<64x8xf32>
    %123 = arith.addf %118, %122 : vector<64x8xf32>
    %124 = vector.extract_strided_slice %8 {offsets = [32, 0], sizes = [64, 8], strides = [1, 1]} : vector<384x8xbf16> to vector<64x8xbf16>
    %c2_69 = arith.constant 2 : index
    %c0_70 = arith.constant 0 : index
    %c0_71 = arith.constant 0 : index
    %125 = vector.load %arg5[%c2_69, %c0_70, %c0_71] : memref<9x8x8xbf16, #tpu.memory_space<vmem>>, vector<1x8x8xbf16>
    %126 = vector.shape_cast %125 : vector<1x8x8xbf16> to vector<8x8xbf16>
    %cst_72 = arith.constant dense<0.000000e+00> : vector<64x8xf32>
    %127 = tpu.matmul %124, %126, %cst_72 {dimension_numbers = #tpu.dot_dimension_numbers<[1], [0], [0], [1], [0, 0, 1, 1], [], []>} : vector<64x8xbf16>, vector<8x8xbf16>, vector<64x8xf32> -> vector<64x8xf32>
    %128 = arith.addf %123, %127 : vector<64x8xf32>
    %129 = vector.extract_strided_slice %8 {offsets = [96, 0], sizes = [64, 8], strides = [1, 1]} : vector<384x8xbf16> to vector<64x8xbf16>
    %c3_73 = arith.constant 3 : index
    %c0_74 = arith.constant 0 : index
    %c0_75 = arith.constant 0 : index
    %130 = vector.load %arg5[%c3_73, %c0_74, %c0_75] : memref<9x8x8xbf16, #tpu.memory_space<vmem>>, vector<1x8x8xbf16>
    %131 = vector.shape_cast %130 : vector<1x8x8xbf16> to vector<8x8xbf16>
    %cst_76 = arith.constant dense<0.000000e+00> : vector<64x8xf32>
    %132 = tpu.matmul %129, %131, %cst_76 {dimension_numbers = #tpu.dot_dimension_numbers<[1], [0], [0], [1], [0, 0, 1, 1], [], []>} : vector<64x8xbf16>, vector<8x8xbf16>, vector<64x8xf32> -> vector<64x8xf32>
    %133 = arith.addf %128, %132 : vector<64x8xf32>
    %134 = vector.extract_strided_slice %8 {offsets = [112, 0], sizes = [64, 8], strides = [1, 1]} : vector<384x8xbf16> to vector<64x8xbf16>
    %c4_77 = arith.constant 4 : index
    %c0_78 = arith.constant 0 : index
    %c0_79 = arith.constant 0 : index
    %135 = vector.load %arg5[%c4_77, %c0_78, %c0_79] : memref<9x8x8xbf16, #tpu.memory_space<vmem>>, vector<1x8x8xbf16>
    %136 = vector.shape_cast %135 : vector<1x8x8xbf16> to vector<8x8xbf16>
    %cst_80 = arith.constant dense<0.000000e+00> : vector<64x8xf32>
    %137 = tpu.matmul %134, %136, %cst_80 {dimension_numbers = #tpu.dot_dimension_numbers<[1], [0], [0], [1], [0, 0, 1, 1], [], []>} : vector<64x8xbf16>, vector<8x8xbf16>, vector<64x8xf32> -> vector<64x8xf32>
    %138 = arith.addf %133, %137 : vector<64x8xf32>
    %139 = vector.extract_strided_slice %8 {offsets = [128, 0], sizes = [64, 8], strides = [1, 1]} : vector<384x8xbf16> to vector<64x8xbf16>
    %c5_81 = arith.constant 5 : index
    %c0_82 = arith.constant 0 : index
    %c0_83 = arith.constant 0 : index
    %140 = vector.load %arg5[%c5_81, %c0_82, %c0_83] : memref<9x8x8xbf16, #tpu.memory_space<vmem>>, vector<1x8x8xbf16>
    %141 = vector.shape_cast %140 : vector<1x8x8xbf16> to vector<8x8xbf16>
    %cst_84 = arith.constant dense<0.000000e+00> : vector<64x8xf32>
    %142 = tpu.matmul %139, %141, %cst_84 {dimension_numbers = #tpu.dot_dimension_numbers<[1], [0], [0], [1], [0, 0, 1, 1], [], []>} : vector<64x8xbf16>, vector<8x8xbf16>, vector<64x8xf32> -> vector<64x8xf32>
    %143 = arith.addf %138, %142 : vector<64x8xf32>
    %144 = vector.extract_strided_slice %8 {offsets = [192, 0], sizes = [64, 8], strides = [1, 1]} : vector<384x8xbf16> to vector<64x8xbf16>
    %c6_85 = arith.constant 6 : index
    %c0_86 = arith.constant 0 : index
    %c0_87 = arith.constant 0 : index
    %145 = vector.load %arg5[%c6_85, %c0_86, %c0_87] : memref<9x8x8xbf16, #tpu.memory_space<vmem>>, vector<1x8x8xbf16>
    %146 = vector.shape_cast %145 : vector<1x8x8xbf16> to vector<8x8xbf16>
    %cst_88 = arith.constant dense<0.000000e+00> : vector<64x8xf32>
    %147 = tpu.matmul %144, %146, %cst_88 {dimension_numbers = #tpu.dot_dimension_numbers<[1], [0], [0], [1], [0, 0, 1, 1], [], []>} : vector<64x8xbf16>, vector<8x8xbf16>, vector<64x8xf32> -> vector<64x8xf32>
    %148 = arith.addf %143, %147 : vector<64x8xf32>
    %149 = vector.extract_strided_slice %8 {offsets = [208, 0], sizes = [64, 8], strides = [1, 1]} : vector<384x8xbf16> to vector<64x8xbf16>
    %c7_89 = arith.constant 7 : index
    %c0_90 = arith.constant 0 : index
    %c0_91 = arith.constant 0 : index
    %150 = vector.load %arg5[%c7_89, %c0_90, %c0_91] : memref<9x8x8xbf16, #tpu.memory_space<vmem>>, vector<1x8x8xbf16>
    %151 = vector.shape_cast %150 : vector<1x8x8xbf16> to vector<8x8xbf16>
    %cst_92 = arith.constant dense<0.000000e+00> : vector<64x8xf32>
    %152 = tpu.matmul %149, %151, %cst_92 {dimension_numbers = #tpu.dot_dimension_numbers<[1], [0], [0], [1], [0, 0, 1, 1], [], []>} : vector<64x8xbf16>, vector<8x8xbf16>, vector<64x8xf32> -> vector<64x8xf32>
    %153 = arith.addf %148, %152 : vector<64x8xf32>
    %154 = vector.extract_strided_slice %8 {offsets = [224, 0], sizes = [64, 8], strides = [1, 1]} : vector<384x8xbf16> to vector<64x8xbf16>
    %c8_93 = arith.constant 8 : index
    %c0_94 = arith.constant 0 : index
    %c0_95 = arith.constant 0 : index
    %155 = vector.load %arg5[%c8_93, %c0_94, %c0_95] : memref<9x8x8xbf16, #tpu.memory_space<vmem>>, vector<1x8x8xbf16>
    %156 = vector.shape_cast %155 : vector<1x8x8xbf16> to vector<8x8xbf16>
    %cst_96 = arith.constant dense<0.000000e+00> : vector<64x8xf32>
    %157 = tpu.matmul %154, %156, %cst_96 {dimension_numbers = #tpu.dot_dimension_numbers<[1], [0], [0], [1], [0, 0, 1, 1], [], []>} : vector<64x8xbf16>, vector<8x8xbf16>, vector<64x8xf32> -> vector<64x8xf32>
    %158 = arith.addf %153, %157 : vector<64x8xf32>
    %159 = vector.extract_strided_slice %158 {offsets = [0, 0], sizes = [16, 8], strides = [1, 1]} : vector<64x8xf32> to vector<16x8xf32>
    %c0_97 = arith.constant 0 : index
    %c0_98 = arith.constant 0 : index
    %160 = vector.load %arg4[%c0_97, %c0_98] : memref<1x8xf32, #tpu.memory_space<vmem>>, vector<1x8xf32>
    %161 = vector.broadcast %160 : vector<1x8xf32> to vector<16x8xf32>
    %162 = arith.addf %159, %161 : vector<16x8xf32>
    %c4_99 = arith.constant 4 : index
    %c0_100 = arith.constant 0 : index
    %163 = vector.load %arg3[%c4_99, %c0_100] : memref<16x8xf32, #tpu.memory_space<vmem>>, vector<1x8xf32>
    %164 = vector.broadcast %1 : vector<16x1xf32> to vector<16x8xf32>
    %165 = vector.broadcast %163 : vector<1x8xf32> to vector<16x8xf32>
    %166 = arith.mulf %164, %165 : vector<16x8xf32>
    %167 = arith.addf %162, %166 : vector<16x8xf32>
    %cst_101 = arith.constant 0.000000e+00 : f32
    %168 = vector.broadcast %cst_101 : f32 to vector<16x8xf32>
    %169 = arith.cmpf oge, %167, %168 : vector<16x8xf32>
    %cst_102 = arith.constant 2.000000e-01 : f32
    %170 = vector.broadcast %cst_102 : f32 to vector<16x8xf32>
    %171 = arith.mulf %170, %167 : vector<16x8xf32>
    %172 = arith.select %169, %167, %171 : vector<16x8xi1>, vector<16x8xf32>
    %173 = arith.truncf %172 : vector<16x8xf32> to vector<16x8xbf16>
    %c4_103 = arith.constant 4 : index
    %c0_104 = arith.constant 0 : index
    %c0_105 = arith.constant 0 : index
    %174 = vector.load %arg6[%c4_103, %c0_104, %c0_105] : memref<16x8x32xbf16, #tpu.memory_space<vmem>>, vector<1x8x32xbf16>
    %175 = vector.shape_cast %174 : vector<1x8x32xbf16> to vector<8x32xbf16>
    %cst_106 = arith.constant dense<0.000000e+00> : vector<16x32xf32>
    %176 = tpu.matmul %173, %175, %cst_106 {dimension_numbers = #tpu.dot_dimension_numbers<[1], [0], [0], [1], [0, 0, 1, 1], [], []>} : vector<16x8xbf16>, vector<8x32xbf16>, vector<16x32xf32> -> vector<16x32xf32>
    %177 = arith.addf %114, %176 : vector<16x32xf32>
    %178 = vector.extract_strided_slice %158 {offsets = [16, 0], sizes = [16, 8], strides = [1, 1]} : vector<64x8xf32> to vector<16x8xf32>
    %c0_107 = arith.constant 0 : index
    %c0_108 = arith.constant 0 : index
    %179 = vector.load %arg4[%c0_107, %c0_108] : memref<1x8xf32, #tpu.memory_space<vmem>>, vector<1x8xf32>
    %180 = vector.broadcast %179 : vector<1x8xf32> to vector<16x8xf32>
    %181 = arith.addf %178, %180 : vector<16x8xf32>
    %c5_109 = arith.constant 5 : index
    %c0_110 = arith.constant 0 : index
    %182 = vector.load %arg3[%c5_109, %c0_110] : memref<16x8xf32, #tpu.memory_space<vmem>>, vector<1x8xf32>
    %183 = vector.broadcast %1 : vector<16x1xf32> to vector<16x8xf32>
    %184 = vector.broadcast %182 : vector<1x8xf32> to vector<16x8xf32>
    %185 = arith.mulf %183, %184 : vector<16x8xf32>
    %186 = arith.addf %181, %185 : vector<16x8xf32>
    %cst_111 = arith.constant 0.000000e+00 : f32
    %187 = vector.broadcast %cst_111 : f32 to vector<16x8xf32>
    %188 = arith.cmpf oge, %186, %187 : vector<16x8xf32>
    %cst_112 = arith.constant 2.000000e-01 : f32
    %189 = vector.broadcast %cst_112 : f32 to vector<16x8xf32>
    %190 = arith.mulf %189, %186 : vector<16x8xf32>
    %191 = arith.select %188, %186, %190 : vector<16x8xi1>, vector<16x8xf32>
    %192 = arith.truncf %191 : vector<16x8xf32> to vector<16x8xbf16>
    %c5_113 = arith.constant 5 : index
    %c0_114 = arith.constant 0 : index
    %c0_115 = arith.constant 0 : index
    %193 = vector.load %arg6[%c5_113, %c0_114, %c0_115] : memref<16x8x32xbf16, #tpu.memory_space<vmem>>, vector<1x8x32xbf16>
    %194 = vector.shape_cast %193 : vector<1x8x32xbf16> to vector<8x32xbf16>
    %cst_116 = arith.constant dense<0.000000e+00> : vector<16x32xf32>
    %195 = tpu.matmul %192, %194, %cst_116 {dimension_numbers = #tpu.dot_dimension_numbers<[1], [0], [0], [1], [0, 0, 1, 1], [], []>} : vector<16x8xbf16>, vector<8x32xbf16>, vector<16x32xf32> -> vector<16x32xf32>
    %196 = arith.addf %177, %195 : vector<16x32xf32>
    %197 = vector.extract_strided_slice %158 {offsets = [32, 0], sizes = [16, 8], strides = [1, 1]} : vector<64x8xf32> to vector<16x8xf32>
    %c0_117 = arith.constant 0 : index
    %c0_118 = arith.constant 0 : index
    %198 = vector.load %arg4[%c0_117, %c0_118] : memref<1x8xf32, #tpu.memory_space<vmem>>, vector<1x8xf32>
    %199 = vector.broadcast %198 : vector<1x8xf32> to vector<16x8xf32>
    %200 = arith.addf %197, %199 : vector<16x8xf32>
    %c6_119 = arith.constant 6 : index
    %c0_120 = arith.constant 0 : index
    %201 = vector.load %arg3[%c6_119, %c0_120] : memref<16x8xf32, #tpu.memory_space<vmem>>, vector<1x8xf32>
    %202 = vector.broadcast %1 : vector<16x1xf32> to vector<16x8xf32>
    %203 = vector.broadcast %201 : vector<1x8xf32> to vector<16x8xf32>
    %204 = arith.mulf %202, %203 : vector<16x8xf32>
    %205 = arith.addf %200, %204 : vector<16x8xf32>
    %cst_121 = arith.constant 0.000000e+00 : f32
    %206 = vector.broadcast %cst_121 : f32 to vector<16x8xf32>
    %207 = arith.cmpf oge, %205, %206 : vector<16x8xf32>
    %cst_122 = arith.constant 2.000000e-01 : f32
    %208 = vector.broadcast %cst_122 : f32 to vector<16x8xf32>
    %209 = arith.mulf %208, %205 : vector<16x8xf32>
    %210 = arith.select %207, %205, %209 : vector<16x8xi1>, vector<16x8xf32>
    %211 = arith.truncf %210 : vector<16x8xf32> to vector<16x8xbf16>
    %c6_123 = arith.constant 6 : index
    %c0_124 = arith.constant 0 : index
    %c0_125 = arith.constant 0 : index
    %212 = vector.load %arg6[%c6_123, %c0_124, %c0_125] : memref<16x8x32xbf16, #tpu.memory_space<vmem>>, vector<1x8x32xbf16>
    %213 = vector.shape_cast %212 : vector<1x8x32xbf16> to vector<8x32xbf16>
    %cst_126 = arith.constant dense<0.000000e+00> : vector<16x32xf32>
    %214 = tpu.matmul %211, %213, %cst_126 {dimension_numbers = #tpu.dot_dimension_numbers<[1], [0], [0], [1], [0, 0, 1, 1], [], []>} : vector<16x8xbf16>, vector<8x32xbf16>, vector<16x32xf32> -> vector<16x32xf32>
    %215 = arith.addf %196, %214 : vector<16x32xf32>
    %216 = vector.extract_strided_slice %158 {offsets = [48, 0], sizes = [16, 8], strides = [1, 1]} : vector<64x8xf32> to vector<16x8xf32>
    %c0_127 = arith.constant 0 : index
    %c0_128 = arith.constant 0 : index
    %217 = vector.load %arg4[%c0_127, %c0_128] : memref<1x8xf32, #tpu.memory_space<vmem>>, vector<1x8xf32>
    %218 = vector.broadcast %217 : vector<1x8xf32> to vector<16x8xf32>
    %219 = arith.addf %216, %218 : vector<16x8xf32>
    %c7_129 = arith.constant 7 : index
    %c0_130 = arith.constant 0 : index
    %220 = vector.load %arg3[%c7_129, %c0_130] : memref<16x8xf32, #tpu.memory_space<vmem>>, vector<1x8xf32>
    %221 = vector.broadcast %1 : vector<16x1xf32> to vector<16x8xf32>
    %222 = vector.broadcast %220 : vector<1x8xf32> to vector<16x8xf32>
    %223 = arith.mulf %221, %222 : vector<16x8xf32>
    %224 = arith.addf %219, %223 : vector<16x8xf32>
    %cst_131 = arith.constant 0.000000e+00 : f32
    %225 = vector.broadcast %cst_131 : f32 to vector<16x8xf32>
    %226 = arith.cmpf oge, %224, %225 : vector<16x8xf32>
    %cst_132 = arith.constant 2.000000e-01 : f32
    %227 = vector.broadcast %cst_132 : f32 to vector<16x8xf32>
    %228 = arith.mulf %227, %224 : vector<16x8xf32>
    %229 = arith.select %226, %224, %228 : vector<16x8xi1>, vector<16x8xf32>
    %230 = arith.truncf %229 : vector<16x8xf32> to vector<16x8xbf16>
    %c7_133 = arith.constant 7 : index
    %c0_134 = arith.constant 0 : index
    %c0_135 = arith.constant 0 : index
    %231 = vector.load %arg6[%c7_133, %c0_134, %c0_135] : memref<16x8x32xbf16, #tpu.memory_space<vmem>>, vector<1x8x32xbf16>
    %232 = vector.shape_cast %231 : vector<1x8x32xbf16> to vector<8x32xbf16>
    %cst_136 = arith.constant dense<0.000000e+00> : vector<16x32xf32>
    %233 = tpu.matmul %230, %232, %cst_136 {dimension_numbers = #tpu.dot_dimension_numbers<[1], [0], [0], [1], [0, 0, 1, 1], [], []>} : vector<16x8xbf16>, vector<8x32xbf16>, vector<16x32xf32> -> vector<16x32xf32>
    %234 = arith.addf %215, %233 : vector<16x32xf32>
    %235 = vector.extract_strided_slice %8 {offsets = [96, 0], sizes = [64, 8], strides = [1, 1]} : vector<384x8xbf16> to vector<64x8xbf16>
    %c0_137 = arith.constant 0 : index
    %c0_138 = arith.constant 0 : index
    %c0_139 = arith.constant 0 : index
    %236 = vector.load %arg5[%c0_137, %c0_138, %c0_139] : memref<9x8x8xbf16, #tpu.memory_space<vmem>>, vector<1x8x8xbf16>
    %237 = vector.shape_cast %236 : vector<1x8x8xbf16> to vector<8x8xbf16>
    %cst_140 = arith.constant dense<0.000000e+00> : vector<64x8xf32>
    %238 = tpu.matmul %235, %237, %cst_140 {dimension_numbers = #tpu.dot_dimension_numbers<[1], [0], [0], [1], [0, 0, 1, 1], [], []>} : vector<64x8xbf16>, vector<8x8xbf16>, vector<64x8xf32> -> vector<64x8xf32>
    %239 = vector.extract_strided_slice %8 {offsets = [112, 0], sizes = [64, 8], strides = [1, 1]} : vector<384x8xbf16> to vector<64x8xbf16>
    %c1_141 = arith.constant 1 : index
    %c0_142 = arith.constant 0 : index
    %c0_143 = arith.constant 0 : index
    %240 = vector.load %arg5[%c1_141, %c0_142, %c0_143] : memref<9x8x8xbf16, #tpu.memory_space<vmem>>, vector<1x8x8xbf16>
    %241 = vector.shape_cast %240 : vector<1x8x8xbf16> to vector<8x8xbf16>
    %cst_144 = arith.constant dense<0.000000e+00> : vector<64x8xf32>
    %242 = tpu.matmul %239, %241, %cst_144 {dimension_numbers = #tpu.dot_dimension_numbers<[1], [0], [0], [1], [0, 0, 1, 1], [], []>} : vector<64x8xbf16>, vector<8x8xbf16>, vector<64x8xf32> -> vector<64x8xf32>
    %243 = arith.addf %238, %242 : vector<64x8xf32>
    %244 = vector.extract_strided_slice %8 {offsets = [128, 0], sizes = [64, 8], strides = [1, 1]} : vector<384x8xbf16> to vector<64x8xbf16>
    %c2_145 = arith.constant 2 : index
    %c0_146 = arith.constant 0 : index
    %c0_147 = arith.constant 0 : index
    %245 = vector.load %arg5[%c2_145, %c0_146, %c0_147] : memref<9x8x8xbf16, #tpu.memory_space<vmem>>, vector<1x8x8xbf16>
    %246 = vector.shape_cast %245 : vector<1x8x8xbf16> to vector<8x8xbf16>
    %cst_148 = arith.constant dense<0.000000e+00> : vector<64x8xf32>
    %247 = tpu.matmul %244, %246, %cst_148 {dimension_numbers = #tpu.dot_dimension_numbers<[1], [0], [0], [1], [0, 0, 1, 1], [], []>} : vector<64x8xbf16>, vector<8x8xbf16>, vector<64x8xf32> -> vector<64x8xf32>
    %248 = arith.addf %243, %247 : vector<64x8xf32>
    %249 = vector.extract_strided_slice %8 {offsets = [192, 0], sizes = [64, 8], strides = [1, 1]} : vector<384x8xbf16> to vector<64x8xbf16>
    %c3_149 = arith.constant 3 : index
    %c0_150 = arith.constant 0 : index
    %c0_151 = arith.constant 0 : index
    %250 = vector.load %arg5[%c3_149, %c0_150, %c0_151] : memref<9x8x8xbf16, #tpu.memory_space<vmem>>, vector<1x8x8xbf16>
    %251 = vector.shape_cast %250 : vector<1x8x8xbf16> to vector<8x8xbf16>
    %cst_152 = arith.constant dense<0.000000e+00> : vector<64x8xf32>
    %252 = tpu.matmul %249, %251, %cst_152 {dimension_numbers = #tpu.dot_dimension_numbers<[1], [0], [0], [1], [0, 0, 1, 1], [], []>} : vector<64x8xbf16>, vector<8x8xbf16>, vector<64x8xf32> -> vector<64x8xf32>
    %253 = arith.addf %248, %252 : vector<64x8xf32>
    %254 = vector.extract_strided_slice %8 {offsets = [208, 0], sizes = [64, 8], strides = [1, 1]} : vector<384x8xbf16> to vector<64x8xbf16>
    %c4_153 = arith.constant 4 : index
    %c0_154 = arith.constant 0 : index
    %c0_155 = arith.constant 0 : index
    %255 = vector.load %arg5[%c4_153, %c0_154, %c0_155] : memref<9x8x8xbf16, #tpu.memory_space<vmem>>, vector<1x8x8xbf16>
    %256 = vector.shape_cast %255 : vector<1x8x8xbf16> to vector<8x8xbf16>
    %cst_156 = arith.constant dense<0.000000e+00> : vector<64x8xf32>
    %257 = tpu.matmul %254, %256, %cst_156 {dimension_numbers = #tpu.dot_dimension_numbers<[1], [0], [0], [1], [0, 0, 1, 1], [], []>} : vector<64x8xbf16>, vector<8x8xbf16>, vector<64x8xf32> -> vector<64x8xf32>
    %258 = arith.addf %253, %257 : vector<64x8xf32>
    %259 = vector.extract_strided_slice %8 {offsets = [224, 0], sizes = [64, 8], strides = [1, 1]} : vector<384x8xbf16> to vector<64x8xbf16>
    %c5_157 = arith.constant 5 : index
    %c0_158 = arith.constant 0 : index
    %c0_159 = arith.constant 0 : index
    %260 = vector.load %arg5[%c5_157, %c0_158, %c0_159] : memref<9x8x8xbf16, #tpu.memory_space<vmem>>, vector<1x8x8xbf16>
    %261 = vector.shape_cast %260 : vector<1x8x8xbf16> to vector<8x8xbf16>
    %cst_160 = arith.constant dense<0.000000e+00> : vector<64x8xf32>
    %262 = tpu.matmul %259, %261, %cst_160 {dimension_numbers = #tpu.dot_dimension_numbers<[1], [0], [0], [1], [0, 0, 1, 1], [], []>} : vector<64x8xbf16>, vector<8x8xbf16>, vector<64x8xf32> -> vector<64x8xf32>
    %263 = arith.addf %258, %262 : vector<64x8xf32>
    %264 = vector.extract_strided_slice %8 {offsets = [288, 0], sizes = [64, 8], strides = [1, 1]} : vector<384x8xbf16> to vector<64x8xbf16>
    %c6_161 = arith.constant 6 : index
    %c0_162 = arith.constant 0 : index
    %c0_163 = arith.constant 0 : index
    %265 = vector.load %arg5[%c6_161, %c0_162, %c0_163] : memref<9x8x8xbf16, #tpu.memory_space<vmem>>, vector<1x8x8xbf16>
    %266 = vector.shape_cast %265 : vector<1x8x8xbf16> to vector<8x8xbf16>
    %cst_164 = arith.constant dense<0.000000e+00> : vector<64x8xf32>
    %267 = tpu.matmul %264, %266, %cst_164 {dimension_numbers = #tpu.dot_dimension_numbers<[1], [0], [0], [1], [0, 0, 1, 1], [], []>} : vector<64x8xbf16>, vector<8x8xbf16>, vector<64x8xf32> -> vector<64x8xf32>
    %268 = arith.addf %263, %267 : vector<64x8xf32>
    %269 = vector.extract_strided_slice %8 {offsets = [304, 0], sizes = [64, 8], strides = [1, 1]} : vector<384x8xbf16> to vector<64x8xbf16>
    %c7_165 = arith.constant 7 : index
    %c0_166 = arith.constant 0 : index
    %c0_167 = arith.constant 0 : index
    %270 = vector.load %arg5[%c7_165, %c0_166, %c0_167] : memref<9x8x8xbf16, #tpu.memory_space<vmem>>, vector<1x8x8xbf16>
    %271 = vector.shape_cast %270 : vector<1x8x8xbf16> to vector<8x8xbf16>
    %cst_168 = arith.constant dense<0.000000e+00> : vector<64x8xf32>
    %272 = tpu.matmul %269, %271, %cst_168 {dimension_numbers = #tpu.dot_dimension_numbers<[1], [0], [0], [1], [0, 0, 1, 1], [], []>} : vector<64x8xbf16>, vector<8x8xbf16>, vector<64x8xf32> -> vector<64x8xf32>
    %273 = arith.addf %268, %272 : vector<64x8xf32>
    %274 = vector.extract_strided_slice %8 {offsets = [320, 0], sizes = [64, 8], strides = [1, 1]} : vector<384x8xbf16> to vector<64x8xbf16>
    %c8_169 = arith.constant 8 : index
    %c0_170 = arith.constant 0 : index
    %c0_171 = arith.constant 0 : index
    %275 = vector.load %arg5[%c8_169, %c0_170, %c0_171] : memref<9x8x8xbf16, #tpu.memory_space<vmem>>, vector<1x8x8xbf16>
    %276 = vector.shape_cast %275 : vector<1x8x8xbf16> to vector<8x8xbf16>
    %cst_172 = arith.constant dense<0.000000e+00> : vector<64x8xf32>
    %277 = tpu.matmul %274, %276, %cst_172 {dimension_numbers = #tpu.dot_dimension_numbers<[1], [0], [0], [1], [0, 0, 1, 1], [], []>} : vector<64x8xbf16>, vector<8x8xbf16>, vector<64x8xf32> -> vector<64x8xf32>
    %278 = arith.addf %273, %277 : vector<64x8xf32>
    %279 = vector.extract_strided_slice %278 {offsets = [0, 0], sizes = [16, 8], strides = [1, 1]} : vector<64x8xf32> to vector<16x8xf32>
    %c0_173 = arith.constant 0 : index
    %c0_174 = arith.constant 0 : index
    %280 = vector.load %arg4[%c0_173, %c0_174] : memref<1x8xf32, #tpu.memory_space<vmem>>, vector<1x8xf32>
    %281 = vector.broadcast %280 : vector<1x8xf32> to vector<16x8xf32>
    %282 = arith.addf %279, %281 : vector<16x8xf32>
    %c8_175 = arith.constant 8 : index
    %c0_176 = arith.constant 0 : index
    %283 = vector.load %arg3[%c8_175, %c0_176] : memref<16x8xf32, #tpu.memory_space<vmem>>, vector<1x8xf32>
    %284 = vector.broadcast %1 : vector<16x1xf32> to vector<16x8xf32>
    %285 = vector.broadcast %283 : vector<1x8xf32> to vector<16x8xf32>
    %286 = arith.mulf %284, %285 : vector<16x8xf32>
    %287 = arith.addf %282, %286 : vector<16x8xf32>
    %cst_177 = arith.constant 0.000000e+00 : f32
    %288 = vector.broadcast %cst_177 : f32 to vector<16x8xf32>
    %289 = arith.cmpf oge, %287, %288 : vector<16x8xf32>
    %cst_178 = arith.constant 2.000000e-01 : f32
    %290 = vector.broadcast %cst_178 : f32 to vector<16x8xf32>
    %291 = arith.mulf %290, %287 : vector<16x8xf32>
    %292 = arith.select %289, %287, %291 : vector<16x8xi1>, vector<16x8xf32>
    %293 = arith.truncf %292 : vector<16x8xf32> to vector<16x8xbf16>
    %c8_179 = arith.constant 8 : index
    %c0_180 = arith.constant 0 : index
    %c0_181 = arith.constant 0 : index
    %294 = vector.load %arg6[%c8_179, %c0_180, %c0_181] : memref<16x8x32xbf16, #tpu.memory_space<vmem>>, vector<1x8x32xbf16>
    %295 = vector.shape_cast %294 : vector<1x8x32xbf16> to vector<8x32xbf16>
    %cst_182 = arith.constant dense<0.000000e+00> : vector<16x32xf32>
    %296 = tpu.matmul %293, %295, %cst_182 {dimension_numbers = #tpu.dot_dimension_numbers<[1], [0], [0], [1], [0, 0, 1, 1], [], []>} : vector<16x8xbf16>, vector<8x32xbf16>, vector<16x32xf32> -> vector<16x32xf32>
    %297 = arith.addf %234, %296 : vector<16x32xf32>
    %298 = vector.extract_strided_slice %278 {offsets = [16, 0], sizes = [16, 8], strides = [1, 1]} : vector<64x8xf32> to vector<16x8xf32>
    %c0_183 = arith.constant 0 : index
    %c0_184 = arith.constant 0 : index
    %299 = vector.load %arg4[%c0_183, %c0_184] : memref<1x8xf32, #tpu.memory_space<vmem>>, vector<1x8xf32>
    %300 = vector.broadcast %299 : vector<1x8xf32> to vector<16x8xf32>
    %301 = arith.addf %298, %300 : vector<16x8xf32>
    %c9 = arith.constant 9 : index
    %c0_185 = arith.constant 0 : index
    %302 = vector.load %arg3[%c9, %c0_185] : memref<16x8xf32, #tpu.memory_space<vmem>>, vector<1x8xf32>
    %303 = vector.broadcast %1 : vector<16x1xf32> to vector<16x8xf32>
    %304 = vector.broadcast %302 : vector<1x8xf32> to vector<16x8xf32>
    %305 = arith.mulf %303, %304 : vector<16x8xf32>
    %306 = arith.addf %301, %305 : vector<16x8xf32>
    %cst_186 = arith.constant 0.000000e+00 : f32
    %307 = vector.broadcast %cst_186 : f32 to vector<16x8xf32>
    %308 = arith.cmpf oge, %306, %307 : vector<16x8xf32>
    %cst_187 = arith.constant 2.000000e-01 : f32
    %309 = vector.broadcast %cst_187 : f32 to vector<16x8xf32>
    %310 = arith.mulf %309, %306 : vector<16x8xf32>
    %311 = arith.select %308, %306, %310 : vector<16x8xi1>, vector<16x8xf32>
    %312 = arith.truncf %311 : vector<16x8xf32> to vector<16x8xbf16>
    %c9_188 = arith.constant 9 : index
    %c0_189 = arith.constant 0 : index
    %c0_190 = arith.constant 0 : index
    %313 = vector.load %arg6[%c9_188, %c0_189, %c0_190] : memref<16x8x32xbf16, #tpu.memory_space<vmem>>, vector<1x8x32xbf16>
    %314 = vector.shape_cast %313 : vector<1x8x32xbf16> to vector<8x32xbf16>
    %cst_191 = arith.constant dense<0.000000e+00> : vector<16x32xf32>
    %315 = tpu.matmul %312, %314, %cst_191 {dimension_numbers = #tpu.dot_dimension_numbers<[1], [0], [0], [1], [0, 0, 1, 1], [], []>} : vector<16x8xbf16>, vector<8x32xbf16>, vector<16x32xf32> -> vector<16x32xf32>
    %316 = arith.addf %297, %315 : vector<16x32xf32>
    %317 = vector.extract_strided_slice %278 {offsets = [32, 0], sizes = [16, 8], strides = [1, 1]} : vector<64x8xf32> to vector<16x8xf32>
    %c0_192 = arith.constant 0 : index
    %c0_193 = arith.constant 0 : index
    %318 = vector.load %arg4[%c0_192, %c0_193] : memref<1x8xf32, #tpu.memory_space<vmem>>, vector<1x8xf32>
    %319 = vector.broadcast %318 : vector<1x8xf32> to vector<16x8xf32>
    %320 = arith.addf %317, %319 : vector<16x8xf32>
    %c10 = arith.constant 10 : index
    %c0_194 = arith.constant 0 : index
    %321 = vector.load %arg3[%c10, %c0_194] : memref<16x8xf32, #tpu.memory_space<vmem>>, vector<1x8xf32>
    %322 = vector.broadcast %1 : vector<16x1xf32> to vector<16x8xf32>
    %323 = vector.broadcast %321 : vector<1x8xf32> to vector<16x8xf32>
    %324 = arith.mulf %322, %323 : vector<16x8xf32>
    %325 = arith.addf %320, %324 : vector<16x8xf32>
    %cst_195 = arith.constant 0.000000e+00 : f32
    %326 = vector.broadcast %cst_195 : f32 to vector<16x8xf32>
    %327 = arith.cmpf oge, %325, %326 : vector<16x8xf32>
    %cst_196 = arith.constant 2.000000e-01 : f32
    %328 = vector.broadcast %cst_196 : f32 to vector<16x8xf32>
    %329 = arith.mulf %328, %325 : vector<16x8xf32>
    %330 = arith.select %327, %325, %329 : vector<16x8xi1>, vector<16x8xf32>
    %331 = arith.truncf %330 : vector<16x8xf32> to vector<16x8xbf16>
    %c10_197 = arith.constant 10 : index
    %c0_198 = arith.constant 0 : index
    %c0_199 = arith.constant 0 : index
    %332 = vector.load %arg6[%c10_197, %c0_198, %c0_199] : memref<16x8x32xbf16, #tpu.memory_space<vmem>>, vector<1x8x32xbf16>
    %333 = vector.shape_cast %332 : vector<1x8x32xbf16> to vector<8x32xbf16>
    %cst_200 = arith.constant dense<0.000000e+00> : vector<16x32xf32>
    %334 = tpu.matmul %331, %333, %cst_200 {dimension_numbers = #tpu.dot_dimension_numbers<[1], [0], [0], [1], [0, 0, 1, 1], [], []>} : vector<16x8xbf16>, vector<8x32xbf16>, vector<16x32xf32> -> vector<16x32xf32>
    %335 = arith.addf %316, %334 : vector<16x32xf32>
    %336 = vector.extract_strided_slice %278 {offsets = [48, 0], sizes = [16, 8], strides = [1, 1]} : vector<64x8xf32> to vector<16x8xf32>
    %c0_201 = arith.constant 0 : index
    %c0_202 = arith.constant 0 : index
    %337 = vector.load %arg4[%c0_201, %c0_202] : memref<1x8xf32, #tpu.memory_space<vmem>>, vector<1x8xf32>
    %338 = vector.broadcast %337 : vector<1x8xf32> to vector<16x8xf32>
    %339 = arith.addf %336, %338 : vector<16x8xf32>
    %c11 = arith.constant 11 : index
    %c0_203 = arith.constant 0 : index
    %340 = vector.load %arg3[%c11, %c0_203] : memref<16x8xf32, #tpu.memory_space<vmem>>, vector<1x8xf32>
    %341 = vector.broadcast %1 : vector<16x1xf32> to vector<16x8xf32>
    %342 = vector.broadcast %340 : vector<1x8xf32> to vector<16x8xf32>
    %343 = arith.mulf %341, %342 : vector<16x8xf32>
    %344 = arith.addf %339, %343 : vector<16x8xf32>
    %cst_204 = arith.constant 0.000000e+00 : f32
    %345 = vector.broadcast %cst_204 : f32 to vector<16x8xf32>
    %346 = arith.cmpf oge, %344, %345 : vector<16x8xf32>
    %cst_205 = arith.constant 2.000000e-01 : f32
    %347 = vector.broadcast %cst_205 : f32 to vector<16x8xf32>
    %348 = arith.mulf %347, %344 : vector<16x8xf32>
    %349 = arith.select %346, %344, %348 : vector<16x8xi1>, vector<16x8xf32>
    %350 = arith.truncf %349 : vector<16x8xf32> to vector<16x8xbf16>
    %c11_206 = arith.constant 11 : index
    %c0_207 = arith.constant 0 : index
    %c0_208 = arith.constant 0 : index
    %351 = vector.load %arg6[%c11_206, %c0_207, %c0_208] : memref<16x8x32xbf16, #tpu.memory_space<vmem>>, vector<1x8x32xbf16>
    %352 = vector.shape_cast %351 : vector<1x8x32xbf16> to vector<8x32xbf16>
    %cst_209 = arith.constant dense<0.000000e+00> : vector<16x32xf32>
    %353 = tpu.matmul %350, %352, %cst_209 {dimension_numbers = #tpu.dot_dimension_numbers<[1], [0], [0], [1], [0, 0, 1, 1], [], []>} : vector<16x8xbf16>, vector<8x32xbf16>, vector<16x32xf32> -> vector<16x32xf32>
    %354 = arith.addf %335, %353 : vector<16x32xf32>
    %355 = vector.extract_strided_slice %8 {offsets = [192, 0], sizes = [64, 8], strides = [1, 1]} : vector<384x8xbf16> to vector<64x8xbf16>
    %c0_210 = arith.constant 0 : index
    %c0_211 = arith.constant 0 : index
    %c0_212 = arith.constant 0 : index
    %356 = vector.load %arg5[%c0_210, %c0_211, %c0_212] : memref<9x8x8xbf16, #tpu.memory_space<vmem>>, vector<1x8x8xbf16>
    %357 = vector.shape_cast %356 : vector<1x8x8xbf16> to vector<8x8xbf16>
    %cst_213 = arith.constant dense<0.000000e+00> : vector<64x8xf32>
    %358 = tpu.matmul %355, %357, %cst_213 {dimension_numbers = #tpu.dot_dimension_numbers<[1], [0], [0], [1], [0, 0, 1, 1], [], []>} : vector<64x8xbf16>, vector<8x8xbf16>, vector<64x8xf32> -> vector<64x8xf32>
    %359 = vector.extract_strided_slice %8 {offsets = [208, 0], sizes = [64, 8], strides = [1, 1]} : vector<384x8xbf16> to vector<64x8xbf16>
    %c1_214 = arith.constant 1 : index
    %c0_215 = arith.constant 0 : index
    %c0_216 = arith.constant 0 : index
    %360 = vector.load %arg5[%c1_214, %c0_215, %c0_216] : memref<9x8x8xbf16, #tpu.memory_space<vmem>>, vector<1x8x8xbf16>
    %361 = vector.shape_cast %360 : vector<1x8x8xbf16> to vector<8x8xbf16>
    %cst_217 = arith.constant dense<0.000000e+00> : vector<64x8xf32>
    %362 = tpu.matmul %359, %361, %cst_217 {dimension_numbers = #tpu.dot_dimension_numbers<[1], [0], [0], [1], [0, 0, 1, 1], [], []>} : vector<64x8xbf16>, vector<8x8xbf16>, vector<64x8xf32> -> vector<64x8xf32>
    %363 = arith.addf %358, %362 : vector<64x8xf32>
    %364 = vector.extract_strided_slice %8 {offsets = [224, 0], sizes = [64, 8], strides = [1, 1]} : vector<384x8xbf16> to vector<64x8xbf16>
    %c2_218 = arith.constant 2 : index
    %c0_219 = arith.constant 0 : index
    %c0_220 = arith.constant 0 : index
    %365 = vector.load %arg5[%c2_218, %c0_219, %c0_220] : memref<9x8x8xbf16, #tpu.memory_space<vmem>>, vector<1x8x8xbf16>
    %366 = vector.shape_cast %365 : vector<1x8x8xbf16> to vector<8x8xbf16>
    %cst_221 = arith.constant dense<0.000000e+00> : vector<64x8xf32>
    %367 = tpu.matmul %364, %366, %cst_221 {dimension_numbers = #tpu.dot_dimension_numbers<[1], [0], [0], [1], [0, 0, 1, 1], [], []>} : vector<64x8xbf16>, vector<8x8xbf16>, vector<64x8xf32> -> vector<64x8xf32>
    %368 = arith.addf %363, %367 : vector<64x8xf32>
    %369 = vector.extract_strided_slice %8 {offsets = [288, 0], sizes = [64, 8], strides = [1, 1]} : vector<384x8xbf16> to vector<64x8xbf16>
    %c3_222 = arith.constant 3 : index
    %c0_223 = arith.constant 0 : index
    %c0_224 = arith.constant 0 : index
    %370 = vector.load %arg5[%c3_222, %c0_223, %c0_224] : memref<9x8x8xbf16, #tpu.memory_space<vmem>>, vector<1x8x8xbf16>
    %371 = vector.shape_cast %370 : vector<1x8x8xbf16> to vector<8x8xbf16>
    %cst_225 = arith.constant dense<0.000000e+00> : vector<64x8xf32>
    %372 = tpu.matmul %369, %371, %cst_225 {dimension_numbers = #tpu.dot_dimension_numbers<[1], [0], [0], [1], [0, 0, 1, 1], [], []>} : vector<64x8xbf16>, vector<8x8xbf16>, vector<64x8xf32> -> vector<64x8xf32>
    %373 = arith.addf %368, %372 : vector<64x8xf32>
    %374 = vector.extract_strided_slice %8 {offsets = [304, 0], sizes = [64, 8], strides = [1, 1]} : vector<384x8xbf16> to vector<64x8xbf16>
    %c4_226 = arith.constant 4 : index
    %c0_227 = arith.constant 0 : index
    %c0_228 = arith.constant 0 : index
    %375 = vector.load %arg5[%c4_226, %c0_227, %c0_228] : memref<9x8x8xbf16, #tpu.memory_space<vmem>>, vector<1x8x8xbf16>
    %376 = vector.shape_cast %375 : vector<1x8x8xbf16> to vector<8x8xbf16>
    %cst_229 = arith.constant dense<0.000000e+00> : vector<64x8xf32>
    %377 = tpu.matmul %374, %376, %cst_229 {dimension_numbers = #tpu.dot_dimension_numbers<[1], [0], [0], [1], [0, 0, 1, 1], [], []>} : vector<64x8xbf16>, vector<8x8xbf16>, vector<64x8xf32> -> vector<64x8xf32>
    %378 = arith.addf %373, %377 : vector<64x8xf32>
    %379 = vector.extract_strided_slice %8 {offsets = [320, 0], sizes = [64, 8], strides = [1, 1]} : vector<384x8xbf16> to vector<64x8xbf16>
    %c5_230 = arith.constant 5 : index
    %c0_231 = arith.constant 0 : index
    %c0_232 = arith.constant 0 : index
    %380 = vector.load %arg5[%c5_230, %c0_231, %c0_232] : memref<9x8x8xbf16, #tpu.memory_space<vmem>>, vector<1x8x8xbf16>
    %381 = vector.shape_cast %380 : vector<1x8x8xbf16> to vector<8x8xbf16>
    %cst_233 = arith.constant dense<0.000000e+00> : vector<64x8xf32>
    %382 = tpu.matmul %379, %381, %cst_233 {dimension_numbers = #tpu.dot_dimension_numbers<[1], [0], [0], [1], [0, 0, 1, 1], [], []>} : vector<64x8xbf16>, vector<8x8xbf16>, vector<64x8xf32> -> vector<64x8xf32>
    %383 = arith.addf %378, %382 : vector<64x8xf32>
    %384 = vector.extract_strided_slice %383 {offsets = [0, 0], sizes = [16, 8], strides = [1, 1]} : vector<64x8xf32> to vector<16x8xf32>
    %c0_234 = arith.constant 0 : index
    %c0_235 = arith.constant 0 : index
    %385 = vector.load %arg4[%c0_234, %c0_235] : memref<1x8xf32, #tpu.memory_space<vmem>>, vector<1x8xf32>
    %386 = vector.broadcast %385 : vector<1x8xf32> to vector<16x8xf32>
    %387 = arith.addf %384, %386 : vector<16x8xf32>
    %c12 = arith.constant 12 : index
    %c0_236 = arith.constant 0 : index
    %388 = vector.load %arg3[%c12, %c0_236] : memref<16x8xf32, #tpu.memory_space<vmem>>, vector<1x8xf32>
    %389 = vector.broadcast %1 : vector<16x1xf32> to vector<16x8xf32>
    %390 = vector.broadcast %388 : vector<1x8xf32> to vector<16x8xf32>
    %391 = arith.mulf %389, %390 : vector<16x8xf32>
    %392 = arith.addf %387, %391 : vector<16x8xf32>
    %cst_237 = arith.constant 0.000000e+00 : f32
    %393 = vector.broadcast %cst_237 : f32 to vector<16x8xf32>
    %394 = arith.cmpf oge, %392, %393 : vector<16x8xf32>
    %cst_238 = arith.constant 2.000000e-01 : f32
    %395 = vector.broadcast %cst_238 : f32 to vector<16x8xf32>
    %396 = arith.mulf %395, %392 : vector<16x8xf32>
    %397 = arith.select %394, %392, %396 : vector<16x8xi1>, vector<16x8xf32>
    %398 = arith.truncf %397 : vector<16x8xf32> to vector<16x8xbf16>
    %c12_239 = arith.constant 12 : index
    %c0_240 = arith.constant 0 : index
    %c0_241 = arith.constant 0 : index
    %399 = vector.load %arg6[%c12_239, %c0_240, %c0_241] : memref<16x8x32xbf16, #tpu.memory_space<vmem>>, vector<1x8x32xbf16>
    %400 = vector.shape_cast %399 : vector<1x8x32xbf16> to vector<8x32xbf16>
    %cst_242 = arith.constant dense<0.000000e+00> : vector<16x32xf32>
    %401 = tpu.matmul %398, %400, %cst_242 {dimension_numbers = #tpu.dot_dimension_numbers<[1], [0], [0], [1], [0, 0, 1, 1], [], []>} : vector<16x8xbf16>, vector<8x32xbf16>, vector<16x32xf32> -> vector<16x32xf32>
    %402 = arith.addf %354, %401 : vector<16x32xf32>
    %403 = vector.extract_strided_slice %383 {offsets = [16, 0], sizes = [16, 8], strides = [1, 1]} : vector<64x8xf32> to vector<16x8xf32>
    %c0_243 = arith.constant 0 : index
    %c0_244 = arith.constant 0 : index
    %404 = vector.load %arg4[%c0_243, %c0_244] : memref<1x8xf32, #tpu.memory_space<vmem>>, vector<1x8xf32>
    %405 = vector.broadcast %404 : vector<1x8xf32> to vector<16x8xf32>
    %406 = arith.addf %403, %405 : vector<16x8xf32>
    %c13 = arith.constant 13 : index
    %c0_245 = arith.constant 0 : index
    %407 = vector.load %arg3[%c13, %c0_245] : memref<16x8xf32, #tpu.memory_space<vmem>>, vector<1x8xf32>
    %408 = vector.broadcast %1 : vector<16x1xf32> to vector<16x8xf32>
    %409 = vector.broadcast %407 : vector<1x8xf32> to vector<16x8xf32>
    %410 = arith.mulf %408, %409 : vector<16x8xf32>
    %411 = arith.addf %406, %410 : vector<16x8xf32>
    %cst_246 = arith.constant 0.000000e+00 : f32
    %412 = vector.broadcast %cst_246 : f32 to vector<16x8xf32>
    %413 = arith.cmpf oge, %411, %412 : vector<16x8xf32>
    %cst_247 = arith.constant 2.000000e-01 : f32
    %414 = vector.broadcast %cst_247 : f32 to vector<16x8xf32>
    %415 = arith.mulf %414, %411 : vector<16x8xf32>
    %416 = arith.select %413, %411, %415 : vector<16x8xi1>, vector<16x8xf32>
    %417 = arith.truncf %416 : vector<16x8xf32> to vector<16x8xbf16>
    %c13_248 = arith.constant 13 : index
    %c0_249 = arith.constant 0 : index
    %c0_250 = arith.constant 0 : index
    %418 = vector.load %arg6[%c13_248, %c0_249, %c0_250] : memref<16x8x32xbf16, #tpu.memory_space<vmem>>, vector<1x8x32xbf16>
    %419 = vector.shape_cast %418 : vector<1x8x32xbf16> to vector<8x32xbf16>
    %cst_251 = arith.constant dense<0.000000e+00> : vector<16x32xf32>
    %420 = tpu.matmul %417, %419, %cst_251 {dimension_numbers = #tpu.dot_dimension_numbers<[1], [0], [0], [1], [0, 0, 1, 1], [], []>} : vector<16x8xbf16>, vector<8x32xbf16>, vector<16x32xf32> -> vector<16x32xf32>
    %421 = arith.addf %402, %420 : vector<16x32xf32>
    %422 = vector.extract_strided_slice %383 {offsets = [32, 0], sizes = [16, 8], strides = [1, 1]} : vector<64x8xf32> to vector<16x8xf32>
    %c0_252 = arith.constant 0 : index
    %c0_253 = arith.constant 0 : index
    %423 = vector.load %arg4[%c0_252, %c0_253] : memref<1x8xf32, #tpu.memory_space<vmem>>, vector<1x8xf32>
    %424 = vector.broadcast %423 : vector<1x8xf32> to vector<16x8xf32>
    %425 = arith.addf %422, %424 : vector<16x8xf32>
    %c14 = arith.constant 14 : index
    %c0_254 = arith.constant 0 : index
    %426 = vector.load %arg3[%c14, %c0_254] : memref<16x8xf32, #tpu.memory_space<vmem>>, vector<1x8xf32>
    %427 = vector.broadcast %1 : vector<16x1xf32> to vector<16x8xf32>
    %428 = vector.broadcast %426 : vector<1x8xf32> to vector<16x8xf32>
    %429 = arith.mulf %427, %428 : vector<16x8xf32>
    %430 = arith.addf %425, %429 : vector<16x8xf32>
    %cst_255 = arith.constant 0.000000e+00 : f32
    %431 = vector.broadcast %cst_255 : f32 to vector<16x8xf32>
    %432 = arith.cmpf oge, %430, %431 : vector<16x8xf32>
    %cst_256 = arith.constant 2.000000e-01 : f32
    %433 = vector.broadcast %cst_256 : f32 to vector<16x8xf32>
    %434 = arith.mulf %433, %430 : vector<16x8xf32>
    %435 = arith.select %432, %430, %434 : vector<16x8xi1>, vector<16x8xf32>
    %436 = arith.truncf %435 : vector<16x8xf32> to vector<16x8xbf16>
    %c14_257 = arith.constant 14 : index
    %c0_258 = arith.constant 0 : index
    %c0_259 = arith.constant 0 : index
    %437 = vector.load %arg6[%c14_257, %c0_258, %c0_259] : memref<16x8x32xbf16, #tpu.memory_space<vmem>>, vector<1x8x32xbf16>
    %438 = vector.shape_cast %437 : vector<1x8x32xbf16> to vector<8x32xbf16>
    %cst_260 = arith.constant dense<0.000000e+00> : vector<16x32xf32>
    %439 = tpu.matmul %436, %438, %cst_260 {dimension_numbers = #tpu.dot_dimension_numbers<[1], [0], [0], [1], [0, 0, 1, 1], [], []>} : vector<16x8xbf16>, vector<8x32xbf16>, vector<16x32xf32> -> vector<16x32xf32>
    %440 = arith.addf %421, %439 : vector<16x32xf32>
    %441 = vector.extract_strided_slice %383 {offsets = [48, 0], sizes = [16, 8], strides = [1, 1]} : vector<64x8xf32> to vector<16x8xf32>
    %c0_261 = arith.constant 0 : index
    %c0_262 = arith.constant 0 : index
    %442 = vector.load %arg4[%c0_261, %c0_262] : memref<1x8xf32, #tpu.memory_space<vmem>>, vector<1x8xf32>
    %443 = vector.broadcast %442 : vector<1x8xf32> to vector<16x8xf32>
    %444 = arith.addf %441, %443 : vector<16x8xf32>
    %c15 = arith.constant 15 : index
    %c0_263 = arith.constant 0 : index
    %445 = vector.load %arg3[%c15, %c0_263] : memref<16x8xf32, #tpu.memory_space<vmem>>, vector<1x8xf32>
    %446 = vector.broadcast %1 : vector<16x1xf32> to vector<16x8xf32>
    %447 = vector.broadcast %445 : vector<1x8xf32> to vector<16x8xf32>
    %448 = arith.mulf %446, %447 : vector<16x8xf32>
    %449 = arith.addf %444, %448 : vector<16x8xf32>
    %cst_264 = arith.constant 0.000000e+00 : f32
    %450 = vector.broadcast %cst_264 : f32 to vector<16x8xf32>
    %451 = arith.cmpf oge, %449, %450 : vector<16x8xf32>
    %cst_265 = arith.constant 2.000000e-01 : f32
    %452 = vector.broadcast %cst_265 : f32 to vector<16x8xf32>
    %453 = arith.mulf %452, %449 : vector<16x8xf32>
    %454 = arith.select %451, %449, %453 : vector<16x8xi1>, vector<16x8xf32>
    %455 = arith.truncf %454 : vector<16x8xf32> to vector<16x8xbf16>
    %c15_266 = arith.constant 15 : index
    %c0_267 = arith.constant 0 : index
    %c0_268 = arith.constant 0 : index
    %456 = vector.load %arg6[%c15_266, %c0_267, %c0_268] : memref<16x8x32xbf16, #tpu.memory_space<vmem>>, vector<1x8x32xbf16>
    %457 = vector.shape_cast %456 : vector<1x8x32xbf16> to vector<8x32xbf16>
    %cst_269 = arith.constant dense<0.000000e+00> : vector<16x32xf32>
    %458 = tpu.matmul %455, %457, %cst_269 {dimension_numbers = #tpu.dot_dimension_numbers<[1], [0], [0], [1], [0, 0, 1, 1], [], []>} : vector<16x8xbf16>, vector<8x32xbf16>, vector<16x32xf32> -> vector<16x32xf32>
    %459 = arith.addf %440, %458 : vector<16x32xf32>
    %c0_270 = arith.constant 0 : index
    %c0_271 = arith.constant 0 : index
    %460 = vector.load %arg7[%c0_270, %c0_271] : memref<1x32xf32, #tpu.memory_space<vmem>>, vector<1x32xf32>
    %461 = vector.broadcast %460 : vector<1x32xf32> to vector<16x32xf32>
    %462 = arith.addf %459, %461 : vector<16x32xf32>
    %cst_272 = arith.constant 0.000000e+00 : f32
    %463 = vector.broadcast %cst_272 : f32 to vector<16x32xf32>
    %464 = arith.cmpf oge, %462, %463 : vector<16x32xf32>
    %cst_273 = arith.constant 2.000000e-01 : f32
    %465 = vector.broadcast %cst_273 : f32 to vector<16x32xf32>
    %466 = arith.mulf %465, %462 : vector<16x32xf32>
    %467 = arith.select %464, %462, %466 : vector<16x32xi1>, vector<16x32xf32>
    %c0_274 = arith.constant 0 : index
    %c0_275 = arith.constant 0 : index
    %468 = vector.load %arg8[%c0_274, %c0_275] : memref<1x32xf32, #tpu.memory_space<vmem>>, vector<1x32xf32>
    %469 = vector.broadcast %468 : vector<1x32xf32> to vector<16x32xf32>
    %470 = arith.mulf %467, %469 : vector<16x32xf32>
    %cst_276 = arith.constant dense<0.000000e+00> : vector<16xf32>
    %471 = vector.multi_reduction <add>, %470, %cst_276 [1] : vector<16x32xf32> to vector<16xf32>
    %472 = vector.shape_cast %471 : vector<16xf32> to vector<16x1xf32>
    %c0_277 = arith.constant 0 : index
    %c0_278 = arith.constant 0 : index
    %473 = vector.load %arg9[%c0_277, %c0_278] : memref<1x1xf32, #tpu.memory_space<vmem>>, vector<1x1xf32>
    %474 = vector.broadcast %473 : vector<1x1xf32> to vector<16x1xf32>
    %475 = arith.addf %472, %474 : vector<16x1xf32>
    %c0_279 = arith.constant 0 : index
    %c0_280 = arith.constant 0 : index
    %476 = vector.load %arg10[%c0_279, %c0_280] : memref<16x1xf32, #tpu.memory_space<vmem>>, vector<16x1xf32>
    tpu.vector_store %arg10[%c0_279, %c0_280], %475 {strides = array<i32>} : memref<16x1xf32, #tpu.memory_space<vmem>>, vector<16x1xf32>,
    return
  }
  func.func @transform_0(%arg0: i32) -> (i32, i32) {
    %c0_i32 = arith.constant 0 : i32
    %c0_i32_0 = arith.constant 0 : i32
    return %arg0, %c0_i32 : i32, i32
  }
  func.func @transform_1(%arg0: i32) -> (i32, i32) {
    %c0_i32 = arith.constant 0 : i32
    %c0_i32_0 = arith.constant 0 : i32
    return %arg0, %c0_i32 : i32, i32
  }
  func.func @transform_2(%arg0: i32) -> (i32, i32) {
    %c0_i32 = arith.constant 0 : i32
    %c0_i32_0 = arith.constant 0 : i32
    %c0_i32_1 = arith.constant 0 : i32
    return %c0_i32, %c0_i32_0 : i32, i32
  }
  func.func @transform_3(%arg0: i32) -> (i32, i32) {
    %c0_i32 = arith.constant 0 : i32
    %c0_i32_0 = arith.constant 0 : i32
    %c0_i32_1 = arith.constant 0 : i32
    return %c0_i32, %c0_i32_0 : i32, i32
  }
  func.func @transform_4(%arg0: i32) -> (i32, i32, i32) {
    %c0_i32 = arith.constant 0 : i32
    %c0_i32_0 = arith.constant 0 : i32
    %c0_i32_1 = arith.constant 0 : i32
    %c0_i32_2 = arith.constant 0 : i32
    return %c0_i32, %c0_i32_0, %c0_i32_1 : i32, i32, i32
  }
  func.func @transform_5(%arg0: i32) -> (i32, i32, i32) {
    %c0_i32 = arith.constant 0 : i32
    %c0_i32_0 = arith.constant 0 : i32
    %c0_i32_1 = arith.constant 0 : i32
    %c0_i32_2 = arith.constant 0 : i32
    return %c0_i32, %c0_i32_0, %c0_i32_1 : i32, i32, i32
  }
  func.func @transform_6(%arg0: i32) -> (i32, i32) {
    %c0_i32 = arith.constant 0 : i32
    %c0_i32_0 = arith.constant 0 : i32
    %c0_i32_1 = arith.constant 0 : i32
    return %c0_i32, %c0_i32_0 : i32, i32
  }
  func.func @transform_7(%arg0: i32) -> (i32, i32) {
    %c0_i32 = arith.constant 0 : i32
    %c0_i32_0 = arith.constant 0 : i32
    %c0_i32_1 = arith.constant 0 : i32
    return %c0_i32, %c0_i32_0 : i32, i32
  }
  func.func @transform_8(%arg0: i32) -> (i32, i32) {
    %c0_i32 = arith.constant 0 : i32
    %c0_i32_0 = arith.constant 0 : i32
    %c0_i32_1 = arith.constant 0 : i32
    return %c0_i32, %c0_i32_0 : i32, i32
  }
  func.func @transform_9(%arg0: i32) -> (i32, i32) {
    %c0_i32 = arith.constant 0 : i32
    %c0_i32_0 = arith.constant 0 : i32
    return %arg0, %c0_i32 : i32, i32
  }
}

</mosaic_0001>

<bundles_post_ra>
// kernel: tpu_custom_call.1
= control target key start
LH: loop header
LB: loop body
LE: loop exit
PB: predicated region body
PF: predicated region fallthrough
CT: control target
= control target key end

     0   :  { %s4826_s11 = smov 0   ;;  %s5731_s0 = inlined_call_operand.vmem [shape: bf16[512,8], index: 0, kind: input, shape index: {}]   ;;  %s5732_s1 = inlined_call_operand.vmem [shape: f32[32,1], index: 1, kind: input, shape index: {}]   ;;  %s5733_s2 = inlined_call_operand.vmem [shape: f32[16,8], index: 2, kind: input, shape index: {}]   ;;  %s5734_s3 = inlined_call_operand.vmem [shape: f32[1,8], index: 3, kind: input, shape index: {}]   ;;  %s5735_s4 = inlined_call_operand.vmem [shape: bf16[9,8,8], index: 4, kind: input, shape index: {}]   ;;  %s5736_s5 = inlined_call_operand.vmem [shape: bf16[16,8,32], index: 5, kind: input, shape index: {}]   ;;  %s5737_s6 = inlined_call_operand.vmem [shape: f32[1,32], index: 6, kind: input, shape index: {}]   ;;  %s5738_s7 = inlined_call_operand.vmem [shape: f32[1,32], index: 7, kind: input, shape index: {}]   ;;  %s5739_s8 = inlined_call_operand.<no memory space> [shape: f32[1,1], index: 8, kind: input, shape index: {}]   ;;  %s5740_s9 = inlined_call_operand.vmem [shape: f32[32,1], index: 9, kind: output, shape index: {}]  }
   0x1   :  { %v14_v0 = vstv %s5739_s8 }
   0x2   :  { %15 = vst [vmem:[#allocation2] sm:$0x1] %v14_v0 }
   0x3 LB: > { %s3925_s12 = sadd.s32 4294967295, %s4768_s11   ;;  %p3929_p0 = scmp.ge.s32.totalorder %s4768_s11, 1  ;;  %s4768_s11 = sphi %s4826_s11, %s21_s11  }
   0x4   : > { %p301_p1 = scmp.lt.s32.totalorder %s4768_s11, 3 }
   0x6   : > { %p302_p2 = pnand %p3929_p0, %p301_p1 }
   0x8   : > { %305 = sbr.rel (%p302_p2) target bundleno = 1472 (0x5c0), region = 56 }
   0xd   : > { %v4837_v1 = vld [vmem:[%s5735_s4 + $0x10] sm:$0xf]  ;;  %vm492_vm0 = vcmask 1043456   ;;  %v4842_v2 = vld [vmem:[%s5735_s4 + $0xc] sm:$0xf]  ;;  %s3930_s16 = sshll.u32 %s3925_s12, 5 }
   0xe   : > { %4691 = vmatprep.subr.msk.bf16.mxu0 %vm492_vm0, %v4837_v1  ;;  %4692 = vmatprep.subr.msk.bf16.mxu1 %vm492_vm0, %v4842_v2  ;;  %v4850_v3 = vsel %vm492_vm0, %v4837_v1, 0  ;;  %v4854_v4 = vsel %vm492_vm0, %v4842_v2, 0  ;;  %v4859_v5 = vld [vmem:[%s5735_s4 + $0x14] sm:$0xf]  ;;  %p343_p3 = scmp.lt.s32.totalorder %s3930_s16, 63  ;;  %v5741_v7 = vmov 0  }
   0xf   : > { %5799 = vst [vmem:[#allocation3_spill] sm:$0xff] %v4850_v3  ;;  %5800 = vst [vmem:[#allocation4_spill] sm:$0xff] %v4854_v4  ;;  %4296 = vmatpush3.bf16.msra.mxu0 %v4850_v3  ;;  %4306 = vmatpush3.bf16.msra.mxu1 %v4854_v4  ;;  %v4866_v6 = vld [vmem:[%s5735_s4 + $0x18] sm:$0xf]  ;;  %s3932_s21 = sshll.u32 %s3925_s12, 1  ;;  %vm479_vm1 = vcmask 64512  }
  0x10   : > { %4307 = vmatprep.mubr.bf16.mxu1 %v5741_v7  ;;  %4693 = vmatprep.subr.msk.bf16.mxu0 %vm492_vm0, %v4859_v5  ;;  %s5885_s16 = smov (!%p343_p3, %s3930_s16), 63  ;;  %p349_p4 = scmp.lt.s32.totalorder %s3932_s21, 3  ;;  %v4881_v8 = vsel %vm492_vm0, %v4866_v6, 0  ;;  %v4889_v10 = vld [vmem:[%s5735_s4 + $0x1c] sm:$0xf]  ;;  %v4898_v12 = vsel %vm492_vm0, %v4859_v5, 0 }
  0x11   : > { %4694 = vmatprep.subr.msk.bf16.mxu1 %vm492_vm0, %v4866_v6  ;;  %4732 = vset.pattern.permute.xlu0 %v5741_v7  ;;  %s3931_s22 = sshll.u32 %s5885_s16, 2  ;;  %5801 = vst [vmem:[#allocation5_spill] sm:$0xff] %v4881_v8  ;;  %5802 = vst [vmem:[#allocation6_spill] sm:$0xff] %v4898_v12  ;;  %v4914_v14 = vld [vmem:[%s5735_s4 + $0x20] sm:$0xf]  ;;  %v4952_v21 = vsel %vm492_vm0, %v4889_v10, 0 }
  0x12   : > { %s4877_s25 = scalar_lea.vmem %s5731_s0, %s3931_s22  ;;  %s5887_s21 = smov (!%p349_p4, %s3932_s21), 3  ;;  %v4945_v19 = vsel %vm492_vm0, %v4914_v14, 0  ;;  %5806 = vst [vmem:[#allocation10_spill] sm:$0xff] %v4952_v21  ;;  %v3981_v24 = vld [vmem:[%s5736_s5 + $0x4] sm:$0xf]  ;;  %v5743_v25 = vmov 0.0  }
  0x13   : > { %v4884_v9 = vld [vmem:[%s4877_s25] sm:$0xff]   ;;  %v4894_v11 = vld [vmem:[%s4877_s25 + $0x8] sm:$0xff]   ;;  %v4905_v13 = vld [vmem:[%s4877_s25 + $0x10] sm:$0xff]   ;;  %s3933_s28 = sshll.u32 %s5887_s21, 3  ;;  %5804 = vst [vmem:[#allocation8_spill] sm:$0xff] %v4945_v19  ;;  %v1016_v26 = vsel %vm492_vm0, %v3981_v24, 0 }
  0x14   : > { %4297 = vmatprep.mubr.msk.bf16.mxu0 %vm479_vm1, %v4884_v9  ;;  %4308 = vmatmul.mubr.msk.bf16.vlgmr.msra.gmra.mxu1 %vm479_vm1, %v4884_v9  ;;  %s352_s13 = scalar_lea.vmem %s5732_s1, %s3933_s28  ;;  %v4931_v15 = vld [vmem:[%s4877_s25 + $0x18] sm:$0xff]   ;;  %v4941_v18 = vld [vmem:[%s4877_s25 + $0x20] sm:$0xff]   ;;  %v4948_v20 = vld [vmem:[%s4877_s25 + $0x28] sm:$0xff]   ;;  %vm4772_vm2 = vmmov 0   ;;  %s358_s17 = scalar_lea.vmem %s5740_s9, %s3933_s28 }
  0x15   : > { %4298 = vmatmul.mubr.msk.bf16.vlgmr.msra.gmra.mxu0 %vm479_vm1, %v4894_v11  ;;  %4326 = vmatpush3.bf16.msra.mxu1 %v4881_v8  ;;  %v393_v16 = vld [vmem:[%s352_s13] sm:$0xff]  ;;  %v394_v17 = vld [vmem:[%s352_s13 + $0x8] sm:$0xff]  ;;  %5803 = vst [vmem:[#allocation7_spill] sm:$0xff] %v4941_v18  ;;  %5805 = vst [vmem:[#allocation9_spill] sm:$0xff] %v4948_v20 }
  0x16   : > { %4316 = vmatpush3.bf16.msra.mxu0 %v4898_v12  ;;  %4311 = vmatprep.mubr.msk.bf16.mxu1 %vm479_vm1, %v4894_v11  ;;  %v4965_v22 = vld [vmem:[%s4877_s25 + $0x30] sm:$0xff]   ;;  %v4975_v23 = vld [vmem:[%s4877_s25 + $0x38] sm:$0xff]   ;;  %v991_v27 = vld [vmem:[%s5736_s5] sm:$0xf] }
  0x17   : > { %4301 = vmatprep.mubr.msk.bf16.mxu0 %vm479_vm1, %v4905_v13  ;;  %4695 = vmatprep.subr.msk.bf16.mxu0 %vm492_vm0, %v4889_v10  ;;  %5807 = vst [vmem:[#allocation11_spill] sm:$0xff] %v4965_v22  ;;  %5808 = vst [vmem:[#allocation12_spill] sm:$0xff] %v4975_v23  ;;  %v1063_v28 = vsel %vm492_vm0, %v991_v27, 0 }
  0x18   : > { %4696 = vmatprep.subr.msk.bf16.mxu1 %vm492_vm0, %v4914_v14  ;;  %968 = vperm.xlu0 %4732, %v393_v16  }
  0x1c   : > { %4312 = vmatmul.mubr.msk.bf16.gmra.mxu1 %vm479_vm1, %v4905_v13  ;;  %973 = vperm.xlu0 %4732, %v394_v17  }
  0x1d   : > { %4302 = vmatmul.mubr.msk.bf16.gmra.mxu0 %vm479_vm1, %v4931_v15  ;;  %4327 = vmatprep.mubr.bf16.mxu1 %v5741_v7 }
  0x1e   : > { %4317 = vmatprep.mubr.msk.bf16.mxu0 %vm479_vm1, %v4894_v11 }
  0x24   : > { %4328 = vmatmul.mubr.msk.bf16.vlgmr.msra.gmra.mxu1 %vm479_vm1, %v4941_v18 }
  0x25   : > { %4318 = vmatmul.mubr.msk.bf16.vlgmr.msra.gmra.mxu0 %vm479_vm1, %v4905_v13  ;;  %4346 = vmatpush3.bf16.msra.mxu1 %v4945_v19 }
  0x26   : > { %4336 = vmatpush3.bf16.msra.mxu0 %v4952_v21  ;;  %4331 = vmatprep.mubr.msk.bf16.mxu1 %vm479_vm1, %v4948_v20 }
  0x27   : > { %4321 = vmatprep.mubr.msk.bf16.mxu0 %vm479_vm1, %v4931_v15  ;;  %4355 = vmatprep.subr.bf16.mxu0 %v5743_v25 }
  0x28   : > { %4361 = vmatprep.subr.bf16.mxu1 %v5743_v25 }
  0x2c   : > { %4332 = vmatmul.mubr.msk.bf16.gmra.mxu1 %vm479_vm1, %v4965_v22 }
  0x2d   : > { %4322 = vmatmul.mubr.bf16.gmra.mxu0 %v5741_v7  ;;  %4347 = vmatprep.mubr.msk.bf16.mxu1 %vm479_vm1, %v4948_v20 }
  0x2e   : > { %4337 = vmatprep.mubr.msk.bf16.mxu0 %vm479_vm1, %v4941_v18 }
  0x34   : > { %4348 = vmatmul.mubr.msk.bf16.vlgmr.msra.gmra.mxu1 %vm479_vm1, %v4965_v22 }
  0x35   : > { %4338 = vmatmul.mubr.msk.bf16.vlgmr.msra.gmra.mxu0 %vm479_vm1, %v4948_v20  ;;  %4351 = vmatprep.mubr.msk.bf16.mxu1 %vm479_vm1, %v4975_v23 }
  0x36   : > { %4341 = vmatprep.mubr.msk.bf16.mxu0 %vm479_vm1, %v4965_v22  ;;  %4356 = vmatpush3.bf16.msra.mxu0 %v1016_v26 }
  0x37   : > { %4367 = vmatprep.subr.bf16.mxu0 %v5743_v25  ;;  %4362 = vmatpush3.bf16.msra.mxu1 %v1063_v28 }
  0x38   : > { %4373 = vmatprep.subr.bf16.mxu1 %v5743_v25 }
  0x3c   : > { %4352 = vmatmul.mubr.bf16.gmra.mxu1 %v5741_v7 }
  0x3d   : > { %4342 = vmatmul.mubr.msk.bf16.gmra.mxu0 %vm479_vm1, %v4975_v23  ;;  %4363 = vmatprep.mubr.msk.bf16.mxu1 %vm4772_vm2, %v5743_v25 }
  0x3e   : > { %4357 = vmatprep.mubr.msk.bf16.mxu0 %vm4772_vm2, %v5743_v25 }
  0xd4   : > { %v4309_v29 = vpop.f32.mrf.mxu1 }
  0xd5   : > { %v4299_v30 = vpop.f32.mrf.mxu0 }
  0xd6   : > { %v601_v31 = vpop.f32.mrf.mxu1  ;;  %v610_v55 = vadd.f32 %v4309_v29, %v4299_v30  ;;  %v3979_v29 = vld [vmem:[%s5733_s2] ss:$0 sm:$0xff] }
  0xd7   : > { %v530_v32 = vpop.f32.mrf.mxu0 }
  0xd8   : > { %v4310_v33 = vpop.f32.mrf.mxu1  ;;  %v602_v58 = vadd.f32 %v601_v31, %v530_v32 }
  0xd9   : > { %v4300_v34 = vpop.f32.mrf.mxu0 }
  0xda   : > { %v604_v35 = vpop.f32.mrf.mxu1  ;;  %v613_v62 = vadd.f32 %v4310_v33, %v4300_v34  ;;  %v3980_v34 = vld [vmem:[%s5733_s2 + $0x1] ss:$0 sm:$0xff] }
  0xdb   : > { %v533_v36 = vpop.f32.mrf.mxu0 }
  0xdc   : > { %v4313_v37 = vpop.f32.mrf.mxu1  ;;  %v605_v17 = vadd.f32 %v604_v35, %v533_v36  ;;  %v5021_v36 = vld [vmem:[%s5734_s3] ss:$0 sm:$0xff] }
  0xdd   : > { %v4303_v38 = vpop.f32.mrf.mxu0  ;;  %5810 = vst [vmem:[#allocation14_spill] sm:$0xff] %v5021_v36 }
  0xde   : > { %v617_v39 = vpop.f32.mrf.mxu1  ;;  %v626_v28 = vadd.f32 %v4313_v37, %v4303_v38 }
  0xdf   : > { %v546_v40 = vpop.f32.mrf.mxu0 }
  0xe0   : > { %v4314_v41 = vpop.f32.mrf.mxu1 }
  0xe1   : > { %v4304_v42 = vpop.f32.mrf.mxu0 }
  0xe2   : > { %v620_v43 = vpop.f32.mrf.mxu1 }
  0xe3   : > { %v549_v44 = vpop.f32.mrf.mxu0 }
  0xe4   : > { %v4329_v45 = vpop.f32.mrf.mxu1 }
  0xe5   : > { %v4319_v46 = vpop.f32.mrf.mxu0 }
  0xe6   : > { %v758_v47 = vpop.f32.mrf.mxu1  ;;  %v704_v59 = vadd.f32 %v4319_v46, %v610_v55  ;;  %v5013_v46 = vpop.permute.xlu0 %968  ;;  %v629_v55 = vadd.f32 %v4314_v41, %v4304_v42 }
  0xe7   : > { %v671_v48 = vpop.f32.mrf.mxu0  ;;  %5809 = vst [vmem:[#allocation13_spill] sm:$0xff] %v5013_v46 }
  0xe8   : > { %v4330_v49 = vpop.f32.mrf.mxu1  ;;  %v702_v63 = vadd.f32 %v671_v48, %v602_v58  ;;  %v791_v27 = vadd.f32 %v4329_v45, %v704_v59  ;;  %v980_v48 = vmul.f32 %v3979_v29, %v5013_v46  ;;  %v999_v59 = vmul.f32 %v3980_v34, %v5013_v46 }
  0xe9   : > { %v4320_v50 = vpop.f32.mrf.mxu0 }
  0xea   : > { %v761_v51 = vpop.f32.mrf.mxu1  ;;  %v705_v24 = vadd.f32 %v4320_v50, %v613_v62  ;;  %v789_v33 = vadd.f32 %v758_v47, %v702_v63  ;;  %v621_v47 = vadd.f32 %v620_v43, %v549_v44 }
  0xeb   : > { %v674_v52 = vpop.f32.mrf.mxu0 }
  0xec   : > { %v4333_v53 = vpop.f32.mrf.mxu1  ;;  %v703_v30 = vadd.f32 %v674_v52, %v605_v17  ;;  %v792_v50 = vadd.f32 %v4330_v49, %v705_v24  ;;  %v618_v52 = vadd.f32 %v617_v39, %v546_v40  ;;  %v3985_v49 = vld [vmem:[%s5736_s5 + $0x8] sm:$0xf]  ;;  %v3988_v39 = vld [vmem:[%s5736_s5 + $0xc] sm:$0xf] }
  0xed   : > { %v4323_v54 = vpop.f32.mrf.mxu0 }
  0xee   : > { %v5004_v56 = vpop.f32.mrf.mxu1  ;;  %v708_v35 = vadd.f32 %v4323_v54, %v626_v28  ;;  %v5036_v28 = vpop.permute.xlu0 %973 }
  0xef   : > { %v687_v57 = vpop.f32.mrf.mxu0  ;;  %5811 = vst [vmem:[#allocation15_spill] sm:$0xff] %v5036_v28 }
  0xf0   : > { %v5006_v60 = vpop.f32.mrf.mxu1  ;;  %v706_v40 = vadd.f32 %v687_v57, %v618_v52  ;;  %v795_v43 = vadd.f32 %v4333_v53, %v708_v35  ;;  %v1130_v57 = vsel %vm492_vm0, %v3985_v49, 0  ;;  %v1199_v53 = vsel %vm492_vm0, %v3988_v39, 0 }
  0xf1   : > { %v4324_v61 = vpop.f32.mrf.mxu0 }
  0xf2   : > { %v5008_v0 = vpop.f32.mrf.mxu1  ;;  %v709_v41 = vadd.f32 %v4324_v61, %v629_v55  ;;  %v793_v52 = vadd.f32 %v5004_v56, %v706_v40 }
  0xf3   : > { %v690_v16 = vpop.f32.mrf.mxu0 }
  0xf4   : > { %v4349_v26 = vpop.f32.mrf.mxu1  ;;  %v707_v44 = vadd.f32 %v690_v16, %v621_v47 }
  0xf5   : > { %v4339_v7 = vpop.f32.mrf.mxu0 }
  0xf6   : > { %v872_v31 = vadd.f32 %v4339_v7, %v791_v27  ;;  %v917_v32 = vpop.f32.mrf.mxu1  ;;  %v790_v27 = vadd.f32 %v761_v51, %v703_v30 }
  0xf7   : > { %v839_v37 = vpop.f32.mrf.mxu0 }
  0xf8   : > { %v950_v38 = vadd.f32 %v4349_v26, %v872_v31  ;;  %v870_v45 = vadd.f32 %v839_v37, %v789_v33  ;;  %v4350_v7 = vpop.f32.mrf.mxu1  ;;  %v3987_v26 = vld [vmem:[%s5733_s2 + $0x3] ss:$0 sm:$0xff] }
  0xf9   : > { %v4340_v58 = vpop.f32.mrf.mxu0  ;;  %v1182_v37 = vmul.f32 %v3987_v26, %v5013_v46 }
  0xfa   : > { %v992_v54 = vadd.f32 %v5021_v36, %v950_v38  ;;  %v948_v62 = vadd.f32 %v917_v32, %v870_v45  ;;  %v873_v63 = vadd.f32 %v4340_v58, %v792_v50  ;;  %v920_v17 = vpop.f32.mrf.mxu1  ;;  %v3984_v32 = vld [vmem:[%s5733_s2 + $0x2] ss:$0 sm:$0xff]  ;;  %v981_v50 = vmul.f32 %v3979_v29, %v5036_v28 }
  0xfb   : > { %v842_v42 = vpop.f32.mrf.mxu0  ;;  %v1113_v47 = vmul.f32 %v3984_v32, %v5013_v46  ;;  %v1000_v58 = vmul.f32 %v3980_v34, %v5036_v28 }
  0xfc   : > { %v963_v24 = vadd.f32 %v5021_v36, %v948_v62  ;;  %v951_v51 = vadd.f32 %v4350_v7, %v873_v63  ;;  %v871_v30 = vadd.f32 %v842_v42, %v790_v27  ;;  %v4353_v31 = vpop.f32.mrf.mxu1  ;;  %v1001_v38 = vadd.f32 %v999_v59, %v992_v54 }
  0xfd   : > { %v4343_v33 = vpop.f32.mrf.mxu0  ;;  %v796_v62 = vadd.f32 %v5006_v60, %v709_v41 }
  0xfe   : > { %v982_v61 = vadd.f32 %v980_v48, %v963_v24  ;;  %v993_v16 = vadd.f32 %v5021_v36, %v951_v51  ;;  %v949_v35 = vadd.f32 %v920_v17, %v871_v30  ;;  %v876_v45 = vadd.f32 %v4343_v33, %v795_v43  ;;  %v933_v7 = vpop.f32.mrf.mxu1 }
  0xff   : > { %v855_v55 = vpop.f32.mrf.mxu0  ;;  %v794_v48 = vadd.f32 %v5008_v0, %v707_v44  ;;  %vm1003_vm3 = vcmp.ge.f32.partialorder %v1001_v38, 0.0  ;;  %v1005_v49 = vmul.f32 0.2, %v1001_v38  ;;  %v1183_v0 = vmul.f32 %v3987_v26, %v5036_v28 }
 0x100   : > { %v964_v59 = vadd.f32 %v5021_v36, %v949_v35  ;;  %v954_v54 = vadd.f32 %v4353_v31, %v876_v45  ;;  %v874_v63 = vadd.f32 %v855_v55, %v793_v52  ;;  %v1002_v27 = vadd.f32 %v1000_v58, %v993_v16  ;;  %v4354_v40 = vpop.f32.mrf.mxu1 }
 0x101   : > { %v4344_v17 = vpop.f32.mrf.mxu0  ;;  %v986_v29 = vmul.f32 0.2, %v982_v61  ;;  %vm984_vm4 = vcmp.ge.f32.partialorder %v982_v61, 0.0  ;;  %v1007_v30 = vsel %vm1003_vm3, %v1001_v38, %v1005_v49  ;;  %v1114_v26 = vmul.f32 %v3984_v32, %v5036_v28  ;;  %v5069_v38 = vld [vmem:[%s5735_s4] sm:$0xf] }
 0x102   : > { %v983_v39 = vadd.f32 %v981_v50, %v964_v59  ;;  %v1175_v56 = vadd.f32 %v5021_v36, %v954_v54  ;;  %v877_v42 = vadd.f32 %v4344_v17, %v796_v62  ;;  %v952_v34 = vadd.f32 %v933_v7, %v874_v63  ;;  %v936_v7 = vpop.f32.mrf.mxu1  ;;  %5813 = vst [vmem:[#allocation17_spill] sm:$0xff] %v5069_v38 }
 0x103   : > { %v858_v43 = vpop.f32.mrf.mxu0  ;;  %vm1004_vm5 = vcmp.ge.f32.partialorder %v1002_v27, 0.0  ;;  %v1006_v24 = vmul.f32 0.2, %v1002_v27  ;;  %v988_v33 = vsel %vm984_vm4, %v982_v61, %v986_v29  ;;  %v5081_v49 = vsel %vm492_vm0, %v5069_v38, 0 }
 0x104   : > { %vm985_vm6 = vcmp.ge.f32.partialorder %v983_v39, 0.0  ;;  %v987_v60 = vmul.f32 0.2, %v983_v39  ;;  %v955_v41 = vadd.f32 %v4354_v40, %v877_v42  ;;  %v1106_v44 = vadd.f32 %v5021_v36, %v952_v34  ;;  %5814 = vst [vmem:[#allocation18_spill] sm:$0xff] %v5081_v49 }
 0x105   : > { %v875_v51 = vadd.f32 %v858_v43, %v794_v48  ;;  %v1008_v31 = vsel %vm1004_vm5, %v1002_v27, %v1006_v24  ;;  %v1184_v35 = vadd.f32 %v1182_v37, %v1175_v56  ;;  %v5064_v37 = vld [vmem:[%s5735_s4 + $0x4] sm:$0xf]  ;;  %v5091_v56 = vld [vmem:[%s5735_s4 + $0x8] sm:$0xf]  ;;  %v5817_v40 = vmov 0  }
 0x106   : > { %v989_v16 = vsel %vm985_vm6, %v983_v39, %v987_v60  ;;  %v1176_v45 = vadd.f32 %v5021_v36, %v955_v41  ;;  %v1115_v52 = vadd.f32 %v1113_v47, %v1106_v44  ;;  %v1009_v58 = vpack.c.bf16 %v1008_v31, %v1007_v30  ;;  %5812 = vst [vmem:[#allocation16_spill] sm:$0xff] %v5064_v37 }
 0x107   : > { %v990_v50 = vpack.c.bf16 %v989_v16, %v988_v33  ;;  %v953_v55 = vadd.f32 %v936_v7, %v875_v51  ;;  %v1188_v61 = vmul.f32 0.2, %v1184_v35  ;;  %vm1186_vm8 = vcmp.ge.f32.partialorder %v1184_v35, 0.0  ;;  %5816 = vst [vmem:[#allocation20_spill] sm:$0xff] %v5091_v56 }
 0x108   : > { %v1185_v59 = vadd.f32 %v1183_v0, %v1176_v45  ;;  %4358 = vmatmul.mubr.msk.bf16.vlgmr.msra.gmra.mxu0 %vm479_vm1, %v1009_v58  ;;  %v1119_v32 = vmul.f32 0.2, %v1115_v52  ;;  %vm1117_vm9 = vcmp.ge.f32.partialorder %v1115_v52, 0.0  ;;  %v5085_v39 = vsel %vm492_vm0, %v5064_v37, 0 }
 0x109   : > { %v1107_v54 = vadd.f32 %v5021_v36, %v953_v55  ;;  %4364 = vmatmul.mubr.msk.bf16.vlgmr.msra.gmra.mxu1 %vm479_vm1, %v990_v50  ;;  %4368 = vmatpush3.bf16.msra.mxu0 %v1130_v57  ;;  %5815 = vst [vmem:[#allocation19_spill] sm:$0xff] %v5085_v39  ;;  %v5105_v42 = vsel %vm492_vm0, %v5091_v56, 0 }
 0x10a   : > { %vm1187_vm7 = vcmp.ge.f32.partialorder %v1185_v59, 0.0  ;;  %v1189_v47 = vmul.f32 0.2, %v1185_v59  ;;  %4374 = vmatpush3.bf16.msra.mxu1 %v1199_v53  ;;  %4369 = vmatprep.mubr.msk.bf16.mxu0 %vm4772_vm2, %v5743_v25  ;;  %v1190_v53 = vsel %vm1186_vm8, %v1184_v35, %v1188_v61  ;;  %v1121_v63 = vsel %vm1117_vm9, %v1115_v52, %v1119_v32  ;;  %5818 = vst [vmem:[#allocation21_spill] sm:$0xff] %v5105_v42 }
 0x10b   : > { %v1116_v62 = vadd.f32 %v1114_v26, %v1107_v54  ;;  %4375 = vmatprep.mubr.msk.bf16.mxu1 %vm4772_vm2, %v5743_v25  ;;  %4697 = vmatprep.subr.msk.bf16.mxu0 %vm492_vm0, %v5064_v37 }
 0x10c   : > { %v1191_v48 = vsel %vm1187_vm7, %v1185_v59, %v1189_v47  ;;  %4698 = vmatprep.subr.msk.bf16.mxu1 %vm492_vm0, %v5069_v38 }
 0x10d   : > { %vm1118_vm10 = vcmp.ge.f32.partialorder %v1116_v62, 0.0  ;;  %v1120_v57 = vmul.f32 0.2, %v1116_v62  ;;  %v1192_v27 = vpack.c.bf16 %v1191_v48, %v1190_v53 }
 0x10f   : > { %v1122_v17 = vsel %vm1118_vm10, %v1116_v62, %v1120_v57 }
 0x110   : > { %v1123_v29 = vpack.c.bf16 %v1122_v17, %v1121_v63 }
 0x111   : > { %4376 = vmatmul.mubr.msk.bf16.vlgmr.msra.gmra.mxu1 %vm479_vm1, %v1192_v27 }
 0x112   : > { %4370 = vmatmul.mubr.msk.bf16.vlgmr.msra.gmra.mxu0 %vm479_vm1, %v1123_v29  ;;  %4390 = vmatpush3.bf16.msra.mxu1 %v5081_v49 }
 0x113   : > { %4380 = vmatpush3.bf16.msra.mxu0 %v5085_v39  ;;  %4381 = vmatprep.mubr.msk.bf16.mxu0 %vm479_vm1, %v4884_v9 }
 0x114   : > { %4391 = vmatprep.mubr.bf16.mxu1 %v5817_v40  ;;  %4699 = vmatprep.subr.msk.bf16.mxu0 %vm492_vm0, %v5091_v56 }
 0x115   : > { %4700 = vmatprep.subr.msk.bf16.mxu1 %vm492_vm0, %v4842_v2  ;;  %v5172_v2 = vld [vmem:[%s4877_s25 + $0x48] sm:$0xff]  }
 0x116   : > { %5820 = vst [vmem:[#allocation23_spill] sm:$0xff] %v5172_v2 }
 0x119   : > { %4392 = vmatmul.mubr.msk.bf16.vlgmr.msra.gmra.mxu1 %vm479_vm1, %v4884_v9  ;;  %v4023_v9 = vld [vmem:[%s5736_s5 + $0x10] sm:$0xf] }
 0x11a   : > { %4382 = vmatmul.mubr.msk.bf16.vlgmr.msra.gmra.mxu0 %vm479_vm1, %v4894_v11  ;;  %4395 = vmatprep.mubr.msk.bf16.mxu1 %vm479_vm1, %v4894_v11 }
 0x11b   : > { %4400 = vmatpush3.bf16.msra.mxu0 %v5105_v42  ;;  %4385 = vmatprep.mubr.msk.bf16.mxu0 %vm479_vm1, %v4905_v13 }
 0x11c   : > { %4410 = vmatpush3.bf16.msra.mxu1 %v4854_v4  ;;  %4701 = vmatprep.subr.msk.bf16.mxu0 %vm492_vm0, %v4837_v1  ;;  %v5163_v1 = vld [vmem:[%s4877_s25 + $0x40] sm:$0xff]  }
 0x11d   : > { %4702 = vmatprep.subr.msk.bf16.mxu1 %vm492_vm0, %v4859_v5  ;;  %5819 = vst [vmem:[#allocation22_spill] sm:$0xff] %v5163_v1  ;;  %v5175_v5 = vld [vmem:[%s4877_s25 + $0x50] sm:$0xff]  }
 0x11e   : > { %5821 = vst [vmem:[#allocation24_spill] sm:$0xff] %v5175_v5 }
 0x121   : > { %4396 = vmatmul.mubr.msk.bf16.gmra.mxu1 %vm479_vm1, %v4905_v13 }
 0x122   : > { %4386 = vmatmul.mubr.msk.bf16.gmra.mxu0 %vm479_vm1, %v4931_v15  ;;  %4411 = vmatprep.mubr.bf16.mxu1 %v5817_v40 }
 0x123   : > { %4401 = vmatprep.mubr.msk.bf16.mxu0 %vm479_vm1, %v4894_v11  ;;  %v4029_v11 = vld [vmem:[%s5736_s5 + $0x18] sm:$0xf] }
 0x129   : > { %4412 = vmatmul.mubr.msk.bf16.vlgmr.msra.gmra.mxu1 %vm479_vm1, %v4941_v18 }
 0x12a   : > { %4402 = vmatmul.mubr.msk.bf16.vlgmr.msra.gmra.mxu0 %vm479_vm1, %v4905_v13  ;;  %4415 = vmatprep.mubr.msk.bf16.mxu1 %vm479_vm1, %v4948_v20  ;;  %v2073_v13 = vsel %vm492_vm0, %v4029_v11, 0 }
 0x12b   : > { %4420 = vmatpush3.bf16.msra.mxu0 %v4850_v3  ;;  %4405 = vmatprep.mubr.msk.bf16.mxu0 %vm479_vm1, %v4931_v15 }
 0x12c   : > { %4430 = vmatpush3.bf16.msra.mxu1 %v4898_v12  ;;  %4703 = vmatprep.subr.msk.bf16.mxu0 %vm492_vm0, %v4866_v6  ;;  %v5188_v6 = vld [vmem:[%s4877_s25 + $0x58] sm:$0xff]  }
 0x12d   : > { %4704 = vmatprep.subr.msk.bf16.mxu1 %vm492_vm0, %v4889_v10  ;;  %5822 = vst [vmem:[#allocation25_spill] sm:$0xff] %v5188_v6  ;;  %v1935_v10 = vsel %vm492_vm0, %v4023_v9, 0 }
 0x131   : > { %4416 = vmatmul.mubr.msk.bf16.gmra.mxu1 %vm479_vm1, %v4965_v22 }
 0x132   : > { %4406 = vmatmul.mubr.bf16.gmra.mxu0 %v5817_v40  ;;  %4431 = vmatprep.mubr.msk.bf16.mxu1 %vm479_vm1, %v4948_v20 }
 0x133   : > { %4421 = vmatprep.mubr.msk.bf16.mxu0 %vm479_vm1, %v4941_v18 }
 0x139   : > { %4432 = vmatmul.mubr.msk.bf16.vlgmr.msra.gmra.mxu1 %vm479_vm1, %v4965_v22 }
 0x13a   : > { %4422 = vmatmul.mubr.msk.bf16.vlgmr.msra.gmra.mxu0 %vm479_vm1, %v4948_v20  ;;  %4435 = vmatprep.mubr.msk.bf16.mxu1 %vm479_vm1, %v4975_v23 }
 0x13b   : > { %4440 = vmatpush3.bf16.msra.mxu0 %v4881_v8  ;;  %4425 = vmatprep.mubr.msk.bf16.mxu0 %vm479_vm1, %v4965_v22 }
 0x13c   : > { %4450 = vmatpush3.bf16.msra.mxu1 %v4952_v21  ;;  %4705 = vmatprep.subr.msk.bf16.mxu0 %vm492_vm0, %v4914_v14 }
 0x13d   : > { %4469 = vmatprep.subr.bf16.mxu1 %v5743_v25 }
 0x141   : > { %4436 = vmatmul.mubr.bf16.gmra.mxu1 %v5817_v40 }
 0x142   : > { %4426 = vmatmul.mubr.msk.bf16.gmra.mxu0 %vm479_vm1, %v4975_v23  ;;  %4451 = vmatprep.mubr.msk.bf16.mxu1 %vm479_vm1, %v5163_v1 }
 0x143   : > { %4441 = vmatprep.mubr.bf16.mxu0 %v5817_v40 }
 0x149   : > { %4452 = vmatmul.mubr.msk.bf16.vlgmr.msra.gmra.mxu1 %vm479_vm1, %v5172_v2 }
 0x14a   : > { %4442 = vmatmul.mubr.msk.bf16.vlgmr.msra.gmra.mxu0 %vm479_vm1, %v5163_v1  ;;  %4455 = vmatprep.mubr.msk.bf16.mxu1 %vm479_vm1, %v5175_v5 }
 0x14b   : > { %4460 = vmatpush3.bf16.msra.mxu0 %v4945_v19  ;;  %4445 = vmatprep.mubr.msk.bf16.mxu0 %vm479_vm1, %v5172_v2 }
 0x14c   : > { %4481 = vmatprep.subr.bf16.mxu0 %v5743_v25  ;;  %4470 = vmatpush3.bf16.msra.mxu1 %v1935_v10 }
 0x14d   : > { %4475 = vmatprep.subr.bf16.mxu1 %v5743_v25 }
 0x151   : > { %4456 = vmatmul.mubr.msk.bf16.gmra.mxu1 %vm479_vm1, %v5188_v6 }
 0x152   : > { %4446 = vmatmul.mubr.msk.bf16.gmra.mxu0 %vm479_vm1, %v5175_v5  ;;  %4471 = vmatprep.mubr.msk.bf16.mxu1 %vm4772_vm2, %v5743_v25 }
 0x153   : > { %4461 = vmatprep.mubr.msk.bf16.mxu0 %vm479_vm1, %v5172_v2 }
 0x15a   : > { %4462 = vmatmul.mubr.msk.bf16.vlgmr.msra.gmra.mxu0 %vm479_vm1, %v5175_v5 }
 0x15b   : > { %4465 = vmatprep.mubr.msk.bf16.mxu0 %vm479_vm1, %v5188_v6  ;;  %4482 = vmatpush3.bf16.msra.mxu0 %v2073_v13 }
 0x15c   : > { %4706 = vmatprep.subr.msk.bf16.mxu0 %vm492_vm0, %v5064_v37 }
 0x162   : > { %4466 = vmatmul.mubr.bf16.gmra.mxu0 %v5817_v40 }
 0x163   : > { %4483 = vmatprep.mubr.msk.bf16.mxu0 %vm4772_vm2, %v5743_v25 }
 0x1c8   : > { %v1052_v14 = vpop.f32.mrf.mxu0 }
 0x1c9   : > { %v1099_v15 = vpop.f32.mrf.mxu1 }
 0x1ca   : > { %v1100_v34 = vadd.f32 %v1099_v15, %v1052_v14  ;;  %v4359_v43 = vpop.f32.mrf.mxu0 }
 0x1cb   : > { %v4365_v24 = vpop.f32.mrf.mxu1 }
 0x1cc   : > { %v1055_v60 = vpop.f32.mrf.mxu0 }
 0x1cd   : > { %v1102_v41 = vpop.f32.mrf.mxu1 }
 0x1ce   : > { %v1103_v0 = vadd.f32 %v1102_v41, %v1055_v60  ;;  %v4360_v44 = vpop.f32.mrf.mxu0 }
 0x1cf   : > { %v4366_v51 = vpop.f32.mrf.mxu1 }
 0x1d1   : > { %v1235_v30 = vpop.f32.mrf.mxu1 }
 0x1d2   : > { %v1166_v31 = vpop.f32.mrf.mxu0 }
 0x1d3   : > { %v1173_v33 = vadd.f32 %v1166_v31, %v1100_v34  ;;  %v4377_v16 = vpop.f32.mrf.mxu1 }
 0x1d4   : > { %v4371_v35 = vpop.f32.mrf.mxu0 }
 0x1d5   : > { %v5216_v45 = vadd.f32 %v1235_v30, %v1173_v33  ;;  %v1238_v7 = vpop.f32.mrf.mxu1 }
 0x1d6   : > { %v1169_v50 = vpop.f32.mrf.mxu0 }
 0x1d7   : > { %5823 = vst [vmem:[#allocation26_spill] sm:$0xff] %v5216_v45  ;;  %v1174_v52 = vadd.f32 %v1169_v50, %v1103_v0  ;;  %v4378_v55 = vpop.f32.mrf.mxu1 }
 0x1d8   : > { %v4372_v58 = vpop.f32.mrf.mxu0 }
 0x1d9   : > { %v5218_v59 = vadd.f32 %v1238_v7, %v1174_v52  ;;  %v4393_v54 = vpop.f32.mrf.mxu1 }
 0x1da   : > { %v4383_v26 = vpop.f32.mrf.mxu0 }
 0x1db   : > { %5824 = vst [vmem:[#allocation27_spill] sm:$0xff] %v5218_v59  ;;  %v1352_v61 = vpop.f32.mrf.mxu1  ;;  %v1361_v2 = vadd.f32 %v4393_v54, %v4383_v26 }
 0x1dc   : > { %v1284_v47 = vpop.f32.mrf.mxu0 }
 0x1dd   : > { %v4394_v32 = vpop.f32.mrf.mxu1  ;;  %v1353_v3 = vadd.f32 %v1352_v61, %v1284_v47 }
 0x1de   : > { %v4384_v62 = vpop.f32.mrf.mxu0 }
 0x1df   : > { %v1355_v48 = vpop.f32.mrf.mxu1  ;;  %v1364_v22 = vadd.f32 %v4394_v32, %v4384_v62 }
 0x1e0   : > { %v1287_v57 = vpop.f32.mrf.mxu0 }
 0x1e1   : > { %v4397_v53 = vpop.f32.mrf.mxu1  ;;  %v1356_v18 = vadd.f32 %v1355_v48, %v1287_v57 }
 0x1e2   : > { %v4387_v63 = vpop.f32.mrf.mxu0 }
 0x1e3   : > { %v1368_v17 = vpop.f32.mrf.mxu1 }
 0x1e4   : > { %v1300_v27 = vpop.f32.mrf.mxu0 }
 0x1e5   : > { %v4398_v29 = vpop.f32.mrf.mxu1 }
 0x1e6   : > { %v4388_v9 = vpop.f32.mrf.mxu0 }
 0x1e7   : > { %v1371_v10 = vpop.f32.mrf.mxu1 }
 0x1e8   : > { %v1303_v11 = vpop.f32.mrf.mxu0 }
 0x1e9   : > { %v4413_v13 = vpop.f32.mrf.mxu1  ;;  %v1372_v47 = vadd.f32 %v1371_v10, %v1303_v11  ;;  %v4025_v10 = vld [vmem:[%s5733_s2 + $0x5] ss:$0 sm:$0xff] }
 0x1ea   : > { %v4403_v14 = vpop.f32.mrf.mxu0 }
 0x1eb   : > { %v1495_v15 = vpop.f32.mrf.mxu1  ;;  %v1455_v4 = vadd.f32 %v4403_v14, %v1361_v2  ;;  %v1380_v2 = vadd.f32 %v4398_v29, %v4388_v9 }
 0x1ec   : > { %v1422_v34 = vpop.f32.mrf.mxu0 }
 0x1ed   : > { %v4414_v43 = vpop.f32.mrf.mxu1  ;;  %v1453_v49 = vadd.f32 %v1422_v34, %v1353_v3  ;;  %v1528_v38 = vadd.f32 %v4413_v13, %v1455_v4 }
 0x1ee   : > { %v4404_v24 = vpop.f32.mrf.mxu0 }
 0x1ef   : > { %v1498_v60 = vpop.f32.mrf.mxu1  ;;  %v1456_v56 = vadd.f32 %v4404_v24, %v1364_v22  ;;  %v1526_v36 = vadd.f32 %v1495_v15, %v1453_v49 }
 0x1f0   : > { %v1425_v41 = vpop.f32.mrf.mxu0 }
 0x1f1   : > { %v4417_v0 = vpop.f32.mrf.mxu1  ;;  %v1454_v54 = vadd.f32 %v1425_v41, %v1356_v18  ;;  %v1529_v46 = vadd.f32 %v4414_v43, %v1456_v56 }
 0x1f2   : > { %v4407_v44 = vpop.f32.mrf.mxu0 }
 0x1f3   : > { %v1511_v51 = vpop.f32.mrf.mxu1  ;;  %v1527_v22 = vadd.f32 %v1498_v60, %v1454_v54 }
 0x1f4   : > { %v1438_v30 = vpop.f32.mrf.mxu0 }
 0x1f5   : > { %v5220_v31 = vpop.f32.mrf.mxu1 }
 0x1f6   : > { %v4408_v33 = vpop.f32.mrf.mxu0 }
 0x1f7   : > { %v1514_v16 = vpop.f32.mrf.mxu1  ;;  %v1460_v48 = vadd.f32 %v4408_v33, %v1380_v2  ;;  %v4028_v2 = vld [vmem:[%s5733_s2 + $0x6] ss:$0 sm:$0xff] }
 0x1f8   : > { %v1441_v35 = vpop.f32.mrf.mxu0 }
 0x1f9   : > { %v4433_v7 = vpop.f32.mrf.mxu1  ;;  %v1458_v57 = vadd.f32 %v1441_v35, %v1372_v47 }
 0x1fa   : > { %v4423_v50 = vpop.f32.mrf.mxu0 }
 0x1fb   : > { %v1641_v52 = vpop.f32.mrf.mxu1  ;;  %v1531_v29 = vadd.f32 %v1514_v16, %v1458_v57 }
 0x1fc   : > { %v1568_v55 = vpop.f32.mrf.mxu0 }
 0x1fd   : > { %v4434_v58 = vpop.f32.mrf.mxu1  ;;  %v1599_v61 = vadd.f32 %v1568_v55, %v1526_v36 }
 0x1fe   : > { %v4424_v25 = vpop.f32.mrf.mxu0 }
 0x1ff   : > { %v1644_v59 = vpop.f32.mrf.mxu1  ;;  %v1602_v4 = vadd.f32 %v4424_v25, %v1529_v46  ;;  %v1672_v49 = vadd.f32 %v1641_v52, %v1599_v61 }
 0x200   : > { %v1571_v45 = vpop.f32.mrf.mxu0 }
 0x201   : > { %v5222_v37 = vpop.f32.mrf.mxu1  ;;  %v1600_v18 = vadd.f32 %v1571_v45, %v1527_v22  ;;  %v1675_v36 = vadd.f32 %v4434_v58, %v1602_v4 }
 0x202   : > { %v4427_v19 = vpop.f32.mrf.mxu0 }
 0x203   : > { %v5224_v21 = vpop.f32.mrf.mxu1 }
 0x204   : > { %5825 = vst [vmem:[#allocation28_spill] sm:$0xff] %v5224_v21  ;;  %v1584_v6 = vpop.f32.mrf.mxu0  ;;  %v1377_v21 = vadd.f32 %v4397_v53, %v4387_v63 }
 0x205   : > { %v5226_v8 = vpop.f32.mrf.mxu1 }
 0x206   : > { %5826 = vst [vmem:[#allocation29_spill] sm:$0xff] %v5226_v8  ;;  %v4428_v5 = vpop.f32.mrf.mxu0  ;;  %v1601_v8 = vadd.f32 %v4423_v50, %v1528_v38  ;;  %v1459_v14 = vadd.f32 %v4407_v44, %v1377_v21  ;;  %v1533_v21 = vadd.f32 %v5220_v31, %v1460_v48 }
 0x207   : > { %v5228_v12 = vpop.f32.mrf.mxu1 }
 0x208   : > { %5827 = vst [vmem:[#allocation30_spill] sm:$0xff] %v5228_v12  ;;  %v1587_v1 = vpop.f32.mrf.mxu0  ;;  %v1369_v12 = vadd.f32 %v1368_v17, %v1300_v27  ;;  %v1674_v34 = vadd.f32 %v4433_v7, %v1601_v8  ;;  %v1532_v53 = vadd.f32 %v4417_v0, %v1459_v14  ;;  %v1606_v11 = vadd.f32 %v4428_v5, %v1533_v21  ;;  %v5828_v0 = vld [vmem:[#allocation13_spill] sm:$0xff]  ;;  %v4031_v7 = vld [vmem:[%s5733_s2 + $0x7] ss:$0 sm:$0xff] }
 0x209   : > { %v4453_v23 = vpop.f32.mrf.mxu1  ;;  %v1604_v45 = vadd.f32 %v1587_v1, %v1531_v29  ;;  %v4022_v1 = vld [vmem:[%s5733_s2 + $0x4] ss:$0 sm:$0xff] }
 0x20a   : > { %v4443_v40 = vpop.f32.mrf.mxu0  ;;  %v1457_v62 = vadd.f32 %v1438_v30, %v1369_v12  ;;  %v1605_v9 = vadd.f32 %v4427_v19, %v1532_v53  ;;  %v1987_v19 = vmul.f32 %v4025_v10, %v5828_v0  ;;  %v2056_v53 = vmul.f32 %v4028_v2, %v5828_v0 }
 0x20b   : > { %v1799_v42 = vpop.f32.mrf.mxu1  ;;  %v1756_v38 = vadd.f32 %v4443_v40, %v1674_v34  ;;  %v1673_v40 = vadd.f32 %v1644_v59, %v1600_v18  ;;  %v2125_v34 = vmul.f32 %v4031_v7, %v5828_v0 }
 0x20c   : > { %v1723_v20 = vpop.f32.mrf.mxu0  ;;  %v1530_v56 = vadd.f32 %v1511_v51, %v1457_v62  ;;  %v5830_v51 = vld [vmem:[#allocation14_spill] sm:$0xff] }
 0x20d   : > { %v4454_v28 = vpop.f32.mrf.mxu1  ;;  %v1754_v27 = vadd.f32 %v1723_v20, %v1672_v49  ;;  %v1832_v25 = vadd.f32 %v4453_v23, %v1756_v38  ;;  %v1678_v20 = vadd.f32 %v5222_v37, %v1605_v9  ;;  %v5831_v5 = vld [vmem:[#allocation29_spill] sm:$0xff] }
 0x20e   : > { %v4444_v39 = vpop.f32.mrf.mxu0  ;;  %v1603_v8 = vadd.f32 %v1584_v6, %v1530_v56  ;;  %v5829_v6 = vld [vmem:[#allocation28_spill] sm:$0xff]  ;;  %v1679_v59 = vadd.f32 %v5831_v5, %v1606_v11 }
 0x20f   : > { %v1802_v3 = vpop.f32.mrf.mxu1  ;;  %v1757_v46 = vadd.f32 %v4444_v39, %v1675_v36  ;;  %v1830_v24 = vadd.f32 %v1799_v42, %v1754_v27  ;;  %v5832_v42 = vld [vmem:[#allocation30_spill] sm:$0xff] }
 0x210   : > { %v1726_v26 = vpop.f32.mrf.mxu0  ;;  %v1676_v23 = vadd.f32 %v5829_v6, %v1603_v8  ;;  %v1677_v33 = vadd.f32 %v5832_v42, %v1604_v45 }
 0x211   : > { %v4457_v63 = vpop.f32.mrf.mxu1  ;;  %v1755_v41 = vadd.f32 %v1726_v26, %v1673_v40  ;;  %v1833_v39 = vadd.f32 %v4454_v28, %v1757_v46  ;;  %v1918_v26 = vmul.f32 %v4022_v1, %v5828_v0 }
 0x212   : > { %v4447_v32 = vpop.f32.mrf.mxu0 }
 0x213   : > { %v1815_v15 = vpop.f32.mrf.mxu1  ;;  %v1760_v16 = vadd.f32 %v4447_v32, %v1678_v20  ;;  %v1831_v58 = vadd.f32 %v1802_v3, %v1755_v41  ;;  %v5833_v32 = vld [vmem:[#allocation15_spill] sm:$0xff] }
 0x214   : > { %v1739_v13 = vpop.f32.mrf.mxu0  ;;  %v1988_v62 = vmul.f32 %v4025_v10, %v5833_v32  ;;  %v1919_v56 = vmul.f32 %v4022_v1, %v5833_v32  ;;  %v2126_v41 = vmul.f32 %v4031_v7, %v5833_v32 }
 0x215   : > { %v4458_v37 = vpop.f32.mrf.mxu1  ;;  %v1758_v50 = vadd.f32 %v1739_v13, %v1676_v23  ;;  %v1836_v4 = vadd.f32 %v4457_v63, %v1760_v16 }
 0x216   : > { %v4448_v17 = vpop.f32.mrf.mxu0 }
 0x217   : > { %v1761_v54 = vadd.f32 %v4448_v17, %v1679_v59  ;;  %v1818_v22 = vpop.f32.mrf.mxu1  ;;  %v1834_v49 = vadd.f32 %v1815_v15, %v1758_v50  ;;  %v2057_v59 = vmul.f32 %v4028_v2, %v5833_v32  ;;  %v5837_v2 = vld [vmem:[#allocation20_spill] sm:$0xff] }
 0x218   : > { %v1742_v12 = vpop.f32.mrf.mxu0 }
 0x219   : > { %v1759_v47 = vadd.f32 %v1742_v12, %v1677_v33  ;;  %v1837_v18 = vadd.f32 %v4458_v37, %v1761_v54  ;;  %v5834_v37 = vmov 0.0  }
 0x21a   : > { %v4463_v43 = vpop.f32.mrf.mxu0 }
 0x21b   : > { %v1905_v60 = vadd.f32 %v4463_v43, %v1832_v25  ;;  %v1835_v21 = vadd.f32 %v1818_v22, %v1759_v47  ;;  %v5838_v47 = vld [vmem:[#allocation17_spill] sm:$0xff]  ;;  %v5843_v22 = vmov 0  }
 0x21c   : > { %v1872_v44 = vpop.f32.mrf.mxu0 }
 0x21d   : > { %v1980_v30 = vadd.f32 %v5830_v51, %v1905_v60  ;;  %v1903_v31 = vadd.f32 %v1872_v44, %v1830_v24  ;;  %v4026_v60 = vld [vmem:[%s5736_s5 + $0x14] sm:$0xf] }
 0x21e   : > { %v4464_v35 = vpop.f32.mrf.mxu0  ;;  %v2004_v1 = vsel %vm492_vm0, %v4026_v60, 0  ;;  %v5863_v60 = vld [vmem:[#allocation26_spill] sm:$0xff] }
 0x21f   : > { %v1989_v28 = vadd.f32 %v1987_v19, %v1980_v30  ;;  %v1911_v52 = vadd.f32 %v5830_v51, %v1903_v31  ;;  %v1906_v55 = vadd.f32 %v4464_v35, %v1833_v39 }
 0x220   : > { %v1875_v61 = vpop.f32.mrf.mxu0 }
 0x221   : > { %v1981_v14 = vadd.f32 %v5830_v51, %v1906_v55  ;;  %v1993_v48 = vmul.f32 0.2, %v1989_v28  ;;  %v1920_v57 = vadd.f32 %v1918_v26, %v1911_v52  ;;  %v1904_v3 = vadd.f32 %v1875_v61, %v1831_v58  ;;  %v5835_v26 = vld [vmem:[#allocation19_spill] sm:$0xff] }
 0x222   : > { %v4467_v13 = vpop.f32.mrf.mxu0  ;;  %vm1991_vm11 = vcmp.ge.f32.partialorder %v1989_v28, 0.0  ;;  %v5836_v61 = vld [vmem:[#allocation7_spill] sm:$0xff] }
 0x223   : > { %v1990_v38 = vadd.f32 %v1988_v62, %v1981_v14  ;;  %v1912_v17 = vadd.f32 %v5830_v51, %v1904_v3  ;;  %v1909_v36 = vadd.f32 %v4467_v13, %v1836_v4  ;;  %v1995_v9 = vsel %vm1991_vm11, %v1989_v28, %v1993_v48  ;;  %v4032_v28 = vld [vmem:[%s5736_s5 + $0x1c] sm:$0xf]  ;;  %v5839_v14 = vld [vmem:[#allocation9_spill] sm:$0xff]  ;;  %v5842_v4 = vld [vmem:[#allocation11_spill] sm:$0xff] }
 0x224   : > { %v1888_v27 = vpop.f32.mrf.mxu0  ;;  %v1924_v12 = vmul.f32 0.2, %v1920_v57  ;;  %vm1922_vm13 = vcmp.ge.f32.partialorder %v1920_v57, 0.0  ;;  %v2142_v54 = vsel %vm492_vm0, %v4032_v28, 0  ;;  %v5840_v62 = vld [vmem:[#allocation21_spill] sm:$0xff]  ;;  %v5846_v3 = vld [vmem:[#allocation12_spill] sm:$0xff] }
 0x225   : > { %vm1992_vm12 = vcmp.ge.f32.partialorder %v1990_v38, 0.0  ;;  %v1994_v63 = vmul.f32 0.2, %v1990_v38  ;;  %v1907_v29 = vadd.f32 %v1888_v27, %v1834_v49  ;;  %v1921_v8 = vadd.f32 %v1919_v56, %v1912_v17  ;;  %v5297_v48 = vld [vmem:[%s5735_s4 + $0xc] sm:$0xf]  ;;  %v5851_v17 = vld [vmem:[#allocation6_spill] sm:$0xff] }
 0x226   : > { %v2118_v25 = vadd.f32 %v5830_v51, %v1909_v36  ;;  %v4468_v46 = vpop.f32.mrf.mxu0  ;;  %v1926_v44 = vsel %vm1922_vm13, %v1920_v57, %v1924_v12  ;;  %5844 = vst [vmem:[#allocation13_spill] sm:$0xff] %v5297_v48  ;;  %v5304_v57 = vld [vmem:[%s5735_s4 + $0x10] sm:$0xf]  ;;  %v5320_v49 = vld [vmem:[%s5735_s4 + $0x14] sm:$0xf]  ;;  %v5852_v56 = vld [vmem:[#allocation23_spill] sm:$0xff] }
 0x227   : > { %v1996_v10 = vsel %vm1992_vm12, %v1990_v38, %v1994_v63  ;;  %v2049_v40 = vadd.f32 %v5830_v51, %v1907_v29  ;;  %v1910_v11 = vadd.f32 %v4468_v46, %v1837_v18  ;;  %vm1923_vm14 = vcmp.ge.f32.partialorder %v1921_v8, 0.0  ;;  %5845 = vst [vmem:[#allocation28_spill] sm:$0xff] %v5304_v57  ;;  %v5847_v13 = vld [vmem:[#allocation4_spill] sm:$0xff]  ;;  %5848 = vst [vmem:[#allocation14_spill] sm:$0xff] %v5320_v49  ;;  %v5849_v38 = vld [vmem:[#allocation3_spill] sm:$0xff] }
 0x228   : > { %v1997_v45 = vpack.c.bf16 %v1996_v10, %v1995_v9  ;;  %v1925_v15 = vmul.f32 0.2, %v1921_v8  ;;  %v2127_v43 = vadd.f32 %v2125_v34, %v2118_v25  ;;  %v1891_v24 = vpop.f32.mrf.mxu0  ;;  %v5841_v34 = vld [vmem:[#allocation18_spill] sm:$0xff]  ;;  %v5853_v27 = vld [vmem:[#allocation24_spill] sm:$0xff]  ;;  %v5855_v29 = vld [vmem:[#allocation25_spill] sm:$0xff] }
 0x229   : > { %v2119_v20 = vadd.f32 %v5830_v51, %v1910_v11  ;;  %v1908_v19 = vadd.f32 %v1891_v24, %v1835_v21  ;;  %v2058_v23 = vadd.f32 %v2056_v53, %v2049_v40  ;;  %v4752_v53 = vld [vmem:[%s5735_s4 + $0x18] sm:$0xf]  ;;  %v4753_v36 = vld [vmem:[%s5735_s4 + $0x1c] sm:$0xf]  ;;  %v4754_v63 = vld [vmem:[%s5735_s4 + $0x20] sm:$0xf] }
 0x22a   : > { %v1927_v6 = vsel %vm1923_vm14, %v1921_v8, %v1925_v15  ;;  %v2131_v30 = vmul.f32 0.2, %v2127_v43  ;;  %vm2129_vm15 = vcmp.ge.f32.partialorder %v2127_v43, 0.0  ;;  %v5850_v18 = vld [vmem:[#allocation22_spill] sm:$0xff]  ;;  %v5854_v21 = vld [vmem:[#allocation5_spill] sm:$0xff]  ;;  %v5374_v8 = vld [vmem:[%s4877_s25 + $0x68] sm:$0xff]  }
 0x22b   : > { %v1928_v39 = vpack.c.bf16 %v1927_v6, %v1926_v44  ;;  %v2128_v31 = vadd.f32 %v2126_v41, %v2119_v20  ;;  %v2050_v5 = vadd.f32 %v5830_v51, %v1908_v19  ;;  %v2062_v33 = vmul.f32 0.2, %v2058_v23  ;;  %v5856_v9 = vld [vmem:[#allocation10_spill] sm:$0xff]  ;;  %5858 = vst [vmem:[#allocation30_spill] sm:$0xff] %v5374_v8  ;;  %v5859_v25 = vld [vmem:[#allocation8_spill] sm:$0xff]  ;;  %v5864_v44 = vld [vmem:[#allocation27_spill] sm:$0xff] }
 0x22c   : > { %v2133_v35 = vsel %vm2129_vm15, %v2127_v43, %v2131_v30  ;;  %vm2060_vm4 = vcmp.ge.f32.partialorder %v2058_v23, 0.0  ;;  %v5371_v12 = vld [vmem:[%s4877_s25 + $0x60] sm:$0xff]   ;;  %v5386_v46 = vld [vmem:[%s4877_s25 + $0x70] sm:$0xff]   ;;  %v5397_v10 = vld [vmem:[%s4877_s25 + $0x78] sm:$0xff]  }
 0x22d   : > { %vm2130_vm3 = vcmp.ge.f32.partialorder %v2128_v31, 0.0  ;;  %v2132_v42 = vmul.f32 0.2, %v2128_v31  ;;  %4472 = vmatmul.mubr.msk.bf16.vlgmr.msra.gmra.mxu1 %vm479_vm1, %v1928_v39  ;;  %v2059_v16 = vadd.f32 %v2057_v59, %v2050_v5  ;;  %v2064_v52 = vsel %vm2060_vm4, %v2058_v23, %v2062_v33  ;;  %5857 = vst [vmem:[#allocation29_spill] sm:$0xff] %v5371_v12  ;;  %5860 = vst [vmem:[#allocation15_spill] sm:$0xff] %v5386_v46  ;;  %v5862_v43 = vld [vmem:[#allocation16_spill] sm:$0xff] }
 0x22e   : > { %4476 = vmatpush3.bf16.msra.mxu1 %v2004_v1  ;;  %4477 = vmatprep.mubr.msk.bf16.mxu1 %vm4772_vm2, %v5834_v37  ;;  %5861 = vst [vmem:[#allocation7_spill] sm:$0xff] %v5397_v10  ;;  %v4065_v40 = vld [vmem:[%s5736_s5 + $0x20] sm:$0xf] }
 0x22f   : > { %v2134_v7 = vsel %vm2130_vm3, %v2128_v31, %v2132_v42  ;;  %4487 = vmatprep.subr.bf16.mxu1 %v5834_v37  ;;  %vm2061_vm5 = vcmp.ge.f32.partialorder %v2059_v16, 0.0  ;;  %v2063_v51 = vmul.f32 0.2, %v2059_v16  ;;  %v2864_v11 = vsel %vm492_vm0, %v4065_v40, 0 }
 0x230   : > { %v2135_v50 = vpack.c.bf16 %v2134_v7, %v2133_v35 }
 0x231   : > { %v2065_v55 = vsel %vm2061_vm5, %v2059_v16, %v2063_v51 }
 0x232   : > { %v2066_v58 = vpack.c.bf16 %v2065_v55, %v2064_v52 }
 0x234   : > { %4484 = vmatmul.mubr.msk.bf16.vlgmr.msra.gmra.mxu0 %vm479_vm1, %v2066_v58 }
 0x235   : > { %4478 = vmatmul.mubr.msk.bf16.vlgmr.msra.gmra.mxu1 %vm479_vm1, %v1997_v45  ;;  %4494 = vmatpush3.bf16.msra.mxu0 %v5835_v26  ;;  %v4071_v45 = vld [vmem:[%s5736_s5 + $0x28] sm:$0xf] }
 0x236   : > { %4488 = vmatpush3.bf16.msra.mxu1 %v2142_v54  ;;  %4489 = vmatprep.mubr.msk.bf16.mxu1 %vm4772_vm2, %v5834_v37  ;;  %v3002_v15 = vsel %vm492_vm0, %v4071_v45, 0 }
 0x237   : > { %4495 = vmatprep.mubr.msk.bf16.mxu0 %vm479_vm1, %v5836_v61  ;;  %4708 = vmatprep.subr.msk.bf16.mxu0 %vm492_vm0, %v5837_v2 }
 0x238   : > { %4707 = vmatprep.subr.msk.bf16.mxu1 %vm492_vm0, %v5838_v47 }
 0x23c   : > { %4496 = vmatmul.mubr.msk.bf16.vlgmr.msra.gmra.mxu0 %vm479_vm1, %v5839_v14 }
 0x23d   : > { %4490 = vmatmul.mubr.msk.bf16.vlgmr.msra.gmra.mxu1 %vm479_vm1, %v2135_v50  ;;  %4514 = vmatpush3.bf16.msra.mxu0 %v5840_v62  ;;  %v5480_v62 = vld [vmem:[%s5733_s2 + $0x9] ss:$0 sm:$0xff] }
 0x23e   : > { %4504 = vmatpush3.bf16.msra.mxu1 %v5841_v34  ;;  %4499 = vmatprep.mubr.msk.bf16.mxu0 %vm479_vm1, %v5842_v4 }
 0x23f   : > { %4505 = vmatprep.mubr.bf16.mxu1 %v5843_v22  ;;  %4709 = vmatprep.subr.msk.bf16.mxu1 %vm492_vm0, %v5297_v48 }
 0x240   : > { %4710 = vmatprep.subr.msk.bf16.mxu0 %vm492_vm0, %v5304_v57 }
 0x244   : > { %4500 = vmatmul.mubr.msk.bf16.gmra.mxu0 %vm479_vm1, %v5846_v3 }
 0x245   : > { %4506 = vmatmul.mubr.msk.bf16.vlgmr.msra.gmra.mxu1 %vm479_vm1, %v5836_v61  ;;  %4515 = vmatprep.mubr.msk.bf16.mxu0 %vm479_vm1, %v5839_v14 }
 0x246   : > { %4524 = vmatpush3.bf16.msra.mxu1 %v5847_v13  ;;  %4509 = vmatprep.mubr.msk.bf16.mxu1 %vm479_vm1, %v5839_v14 }
 0x247   : > { %4711 = vmatprep.subr.msk.bf16.mxu1 %vm492_vm0, %v5320_v49 }
 0x24c   : > { %4516 = vmatmul.mubr.msk.bf16.vlgmr.msra.gmra.mxu0 %vm479_vm1, %v5842_v4 }
 0x24d   : > { %4510 = vmatmul.mubr.msk.bf16.gmra.mxu1 %vm479_vm1, %v5842_v4  ;;  %4534 = vmatpush3.bf16.msra.mxu0 %v5849_v38 }
 0x24e   : > { %4519 = vmatprep.mubr.msk.bf16.mxu0 %vm479_vm1, %v5846_v3  ;;  %4525 = vmatprep.mubr.bf16.mxu1 %v5843_v22 }
 0x24f   : > { %4712 = vmatprep.subr.msk.bf16.mxu0 %vm492_vm0, %v4752_v53 }
 0x254   : > { %4520 = vmatmul.mubr.bf16.gmra.mxu0 %v5843_v22 }
 0x255   : > { %4526 = vmatmul.mubr.msk.bf16.vlgmr.msra.gmra.mxu1 %vm479_vm1, %v5850_v18  ;;  %4535 = vmatprep.mubr.msk.bf16.mxu0 %vm479_vm1, %v5850_v18 }
 0x256   : > { %4544 = vmatpush3.bf16.msra.mxu1 %v5851_v17  ;;  %4529 = vmatprep.mubr.msk.bf16.mxu1 %vm479_vm1, %v5852_v56 }
 0x257   : > { %4713 = vmatprep.subr.msk.bf16.mxu1 %vm492_vm0, %v4753_v36 }
 0x25c   : > { %4536 = vmatmul.mubr.msk.bf16.vlgmr.msra.gmra.mxu0 %vm479_vm1, %v5852_v56 }
 0x25d   : > { %4530 = vmatmul.mubr.msk.bf16.gmra.mxu1 %vm479_vm1, %v5853_v27  ;;  %4554 = vmatpush3.bf16.msra.mxu0 %v5854_v21 }
 0x25e   : > { %4539 = vmatprep.mubr.msk.bf16.mxu0 %vm479_vm1, %v5853_v27  ;;  %4545 = vmatprep.mubr.msk.bf16.mxu1 %vm479_vm1, %v5852_v56 }
 0x25f   : > { %4714 = vmatprep.subr.msk.bf16.mxu0 %vm492_vm0, %v4754_v63 }
 0x264   : > { %4540 = vmatmul.mubr.msk.bf16.gmra.mxu0 %vm479_vm1, %v5855_v29 }
 0x265   : > { %4546 = vmatmul.mubr.msk.bf16.vlgmr.msra.gmra.mxu1 %vm479_vm1, %v5853_v27  ;;  %4555 = vmatprep.mubr.bf16.mxu0 %v5843_v22 }
 0x266   : > { %4564 = vmatpush3.bf16.msra.mxu1 %v5856_v9  ;;  %4549 = vmatprep.mubr.msk.bf16.mxu1 %vm479_vm1, %v5855_v29 }
 0x267   : > { %4583 = vmatprep.subr.bf16.mxu1 %v5834_v37 }
 0x26c   : > { %4556 = vmatmul.mubr.msk.bf16.vlgmr.msra.gmra.mxu0 %vm479_vm1, %v5371_v12 }
 0x26d   : > { %4550 = vmatmul.mubr.bf16.gmra.mxu1 %v5843_v22  ;;  %4574 = vmatpush3.bf16.msra.mxu0 %v5859_v25 }
 0x26e   : > { %4559 = vmatprep.mubr.msk.bf16.mxu0 %vm479_vm1, %v5374_v8  ;;  %4565 = vmatprep.mubr.msk.bf16.mxu1 %vm479_vm1, %v5371_v12 }
 0x26f   : > { %4595 = vmatprep.subr.bf16.mxu0 %v5834_v37 }
 0x274   : > { %4560 = vmatmul.mubr.msk.bf16.gmra.mxu0 %vm479_vm1, %v5386_v46 }
 0x275   : > { %4566 = vmatmul.mubr.msk.bf16.vlgmr.msra.gmra.mxu1 %vm479_vm1, %v5374_v8  ;;  %4575 = vmatprep.mubr.msk.bf16.mxu0 %vm479_vm1, %v5374_v8 }
 0x276   : > { %4569 = vmatprep.mubr.msk.bf16.mxu1 %vm479_vm1, %v5386_v46  ;;  %4584 = vmatpush3.bf16.msra.mxu1 %v2864_v11 }
 0x277   : > { %4589 = vmatprep.subr.bf16.mxu1 %v5834_v37 }
 0x27c   : > { %4576 = vmatmul.mubr.msk.bf16.vlgmr.msra.gmra.mxu0 %vm479_vm1, %v5386_v46 }
 0x27d   : > { %4570 = vmatmul.mubr.msk.bf16.gmra.mxu1 %vm479_vm1, %v5397_v10  ;;  %4579 = vmatprep.mubr.msk.bf16.mxu0 %vm479_vm1, %v5397_v10 }
 0x27e   : > { %4585 = vmatprep.mubr.msk.bf16.mxu1 %vm4772_vm2, %v5834_v37  ;;  %4596 = vmatpush3.bf16.msra.mxu0 %v3002_v15 }
 0x27f   : > { %4715 = vmatprep.subr.msk.bf16.mxu0 %vm492_vm0, %v5862_v43 }
 0x284   : > { %4580 = vmatmul.mubr.bf16.gmra.mxu0 %v5843_v22 }
 0x285   : > { %4597 = vmatprep.mubr.msk.bf16.mxu0 %vm4772_vm2, %v5834_v37 }
 0x2ed   : > { %v1971_v24 = vpop.f32.mrf.mxu1 }
 0x2ee   : > { %v1978_v20 = vadd.f32 %v1971_v24, %v5863_v60 }
 0x2ef   : > { %v4473_v41 = vpop.f32.mrf.mxu1 }
 0x2f1   : > { %v1974_v19 = vpop.f32.mrf.mxu1 }
 0x2f2   : > { %v1979_v6 = vadd.f32 %v1974_v19, %v5864_v44 }
 0x2f3   : > { %v4474_v23 = vpop.f32.mrf.mxu1 }
 0x2f4   : > { %v2109_v30 = vpop.f32.mrf.mxu0 }
 0x2f5   : > { %v2040_v39 = vpop.f32.mrf.mxu1 }
 0x2f6   : > { %v2047_v31 = vadd.f32 %v2040_v39, %v1978_v20  ;;  %v4485_v5 = vpop.f32.mrf.mxu0 }
 0x2f7   : > { %v4479_v1 = vpop.f32.mrf.mxu1 }
 0x2f8   : > { %v2116_v59 = vadd.f32 %v2109_v30, %v2047_v31  ;;  %v2112_v33 = vpop.f32.mrf.mxu0 }
 0x2f9   : > { %v2043_v42 = vpop.f32.mrf.mxu1 }
 0x2fa   : > { %v2048_v16 = vadd.f32 %v2043_v42, %v1979_v6  ;;  %v4486_v7 = vpop.f32.mrf.mxu0 }
 0x2fb   : > { %v4480_v35 = vpop.f32.mrf.mxu1 }
 0x2fc   : > { %v2117_v50 = vadd.f32 %v2112_v33, %v2048_v16  ;;  %v4497_v28 = vpop.f32.mrf.mxu0 }
 0x2fd   : > { %v2178_v51 = vpop.f32.mrf.mxu1 }
 0x2fe   : > { %v5423_v52 = vadd.f32 %v2178_v51, %v2116_v59  ;;  %v2221_v58 = vpop.f32.mrf.mxu0 }
 0x2ff   : > { %v4491_v55 = vpop.f32.mrf.mxu1 }
 0x300   : > { %5865 = vst [vmem:[#allocation20_spill] sm:$0xff] %v5423_v52  ;;  %v4498_v61 = vpop.f32.mrf.mxu0 }
 0x301   : > { %v2181_v54 = vpop.f32.mrf.mxu1 }
 0x302   : > { %v5425_v2 = vadd.f32 %v2181_v54, %v2117_v50  ;;  %v5427_v14 = vpop.f32.mrf.mxu0 }
 0x303   : > { %v4492_v47 = vpop.f32.mrf.mxu1 }
 0x304   : > { %5866 = vst [vmem:[#allocation17_spill] sm:$0xff] %v5425_v2  ;;  %v5429_v4 = vpop.f32.mrf.mxu0 }
 0x305   : > { %v4507_v3 = vpop.f32.mrf.mxu1 }
 0x306   : > { %v5431_v53 = vpop.f32.mrf.mxu0  ;;  %v2295_v46 = vadd.f32 %v4507_v3, %v4497_v28 }
 0x307   : > { %v2286_v18 = vpop.f32.mrf.mxu1 }
 0x308   : > { %v5433_v56 = vpop.f32.mrf.mxu0  ;;  %v2287_v12 = vadd.f32 %v2286_v18, %v2221_v58  ;;  %v5487_v58 = vld [vmem:[%s5733_s2 + $0x8] ss:$0 sm:$0xff] }
 0x309   : > { %v4508_v36 = vpop.f32.mrf.mxu1 }
 0x30a   : > { %v5435_v27 = vpop.f32.mrf.mxu0  ;;  %v2298_v57 = vadd.f32 %v4508_v36, %v4498_v61 }
 0x30b   : > { %v2289_v21 = vpop.f32.mrf.mxu1 }
 0x30c   : > { %v4517_v29 = vpop.f32.mrf.mxu0 }
 0x30d   : > { %v4511_v63 = vpop.f32.mrf.mxu1  ;;  %v2384_v38 = vadd.f32 %v4517_v29, %v2295_v46  ;;  %v2916_v29 = vmul.f32 %v5480_v62, %v5828_v0 }
 0x30e   : > { %v2351_v25 = vpop.f32.mrf.mxu0 }
 0x30f   : > { %v2302_v9 = vpop.f32.mrf.mxu1  ;;  %v2382_v48 = vadd.f32 %v2351_v25, %v2287_v12  ;;  %v2290_v12 = vadd.f32 %v2289_v21, %v5427_v14 }
 0x310   : > { %v4518_v11 = vpop.f32.mrf.mxu0 }
 0x311   : > { %v5437_v40 = vpop.f32.mrf.mxu1  ;;  %v2385_v46 = vadd.f32 %v4518_v11, %v2298_v57  ;;  %v2303_v57 = vadd.f32 %v2302_v9, %v5431_v53 }
 0x312   : > { %v2354_v15 = vpop.f32.mrf.mxu0 }
 0x313   : > { %v5439_v45 = vpop.f32.mrf.mxu1  ;;  %v2383_v11 = vadd.f32 %v2354_v15, %v2290_v12 }
 0x314   : > { %v5441_v43 = vpop.f32.mrf.mxu0 }
 0x315   : > { %v4527_v24 = vpop.f32.mrf.mxu1 }
 0x316   : > { %v5443_v60 = vpop.f32.mrf.mxu0  ;;  %v2457_v22 = vadd.f32 %v4527_v24, %v2384_v38  ;;  %v5492_v38 = vld [vmem:[%s5733_s2 + $0xb] ss:$0 sm:$0xff] }
 0x317   : > { %v2424_v20 = vpop.f32.mrf.mxu1  ;;  %v5507_v21 = vmul.f32 %v5492_v38, %v5828_v0  ;;  %v2386_v53 = vadd.f32 %v5443_v60, %v2303_v57 }
 0x318   : > { %v5445_v41 = vpop.f32.mrf.mxu0  ;;  %v2455_v3 = vadd.f32 %v2424_v20, %v2382_v48  ;;  %v5501_v48 = vmul.f32 %v5487_v58, %v5828_v0 }
 0x319   : > { %v4528_v19 = vpop.f32.mrf.mxu1 }
 0x31a   : > { %v5447_v44 = vpop.f32.mrf.mxu0  ;;  %v2458_v25 = vadd.f32 %v4528_v19, %v2385_v46  ;;  %v2314_v19 = vadd.f32 %v5437_v40, %v5433_v56  ;;  %v2306_v46 = vadd.f32 %v5439_v45, %v5435_v27 }
 0x31b   : > { %v2427_v6 = vpop.f32.mrf.mxu1 }
 0x31c   : > { %v4537_v39 = vpop.f32.mrf.mxu0  ;;  %v2387_v56 = vadd.f32 %v5447_v44, %v2306_v46 }
 0x31d   : > { %v5449_v23 = vpop.f32.mrf.mxu1  ;;  %v2530_v18 = vadd.f32 %v4537_v39, %v2457_v22  ;;  %v2311_v22 = vadd.f32 %v4511_v63, %v5429_v4  ;;  %v2456_v63 = vadd.f32 %v2427_v6, %v2383_v11 }
 0x31e   : > { %v2497_v31 = vpop.f32.mrf.mxu0 }
 0x31f   : > { %v5451_v30 = vpop.f32.mrf.mxu1  ;;  %v2528_v24 = vadd.f32 %v2497_v31, %v2455_v3  ;;  %v2388_v4 = vadd.f32 %v5441_v43, %v2311_v22  ;;  %v2389_v3 = vadd.f32 %v5445_v41, %v2314_v19 }
 0x320   : > { %v4538_v5 = vpop.f32.mrf.mxu0 }
 0x321   : > { %v5453_v1 = vpop.f32.mrf.mxu1  ;;  %v2531_v39 = vadd.f32 %v4538_v5, %v2458_v25  ;;  %v2461_v40 = vadd.f32 %v5449_v23, %v2388_v4 }
 0x322   : > { %v2500_v42 = vpop.f32.mrf.mxu0  ;;  %v2462_v43 = vadd.f32 %v5453_v1, %v2389_v3  ;;  %v5528_v1 = vld [vmem:[%s5734_s3] ss:$0 sm:$0xff] }
 0x323   : > { %v5455_v59 = vpop.f32.mrf.mxu1 }
 0x324   : > { %v5457_v33 = vpop.f32.mrf.mxu0 }
 0x325   : > { %v4547_v16 = vpop.f32.mrf.mxu1  ;;  %v2534_v41 = vadd.f32 %v5457_v33, %v2461_v40 }
 0x326   : > { %v5459_v35 = vpop.f32.mrf.mxu0  ;;  %v2603_v26 = vadd.f32 %v4547_v16, %v2530_v18 }
 0x327   : > { %v2570_v7 = vpop.f32.mrf.mxu1 }
 0x328   : > { %v5461_v50 = vpop.f32.mrf.mxu0  ;;  %v2601_v31 = vadd.f32 %v2570_v7, %v2528_v24  ;;  %v2460_v7 = vadd.f32 %v5455_v59, %v2387_v56  ;;  %v5534_v59 = vld [vmem:[%s5733_s2 + $0xa] ss:$0 sm:$0xff] }
 0x329   : > { %v4548_v51 = vpop.f32.mrf.mxu1 }
 0x32a   : > { %v5463_v55 = vpop.f32.mrf.mxu0  ;;  %v2604_v18 = vadd.f32 %v4548_v51, %v2531_v39 }
 0x32b   : > { %v5465_v54 = vpop.f32.mrf.mxu1  ;;  %v2533_v33 = vadd.f32 %v5463_v55, %v2460_v7  ;;  %v2917_v55 = vmul.f32 %v5480_v62, %v5833_v32  ;;  %v4068_v7 = vld [vmem:[%s5736_s5 + $0x24] sm:$0xf] }
 0x32c   : > { %v4557_v2 = vpop.f32.mrf.mxu0 }
 0x32d   : > { %v5467_v47 = vpop.f32.mrf.mxu1  ;;  %v2685_v16 = vadd.f32 %v4557_v2, %v2603_v26  ;;  %v2459_v26 = vadd.f32 %v5451_v30, %v2386_v53  ;;  %v2529_v2 = vadd.f32 %v2500_v42, %v2456_v63  ;;  %v2535_v30 = vadd.f32 %v5461_v50, %v2462_v43 }
 0x32e   : > { %v2652_v10 = vpop.f32.mrf.mxu0 }
 0x32f   : > { %v5469_v52 = vpop.f32.mrf.mxu1  ;;  %v2683_v12 = vadd.f32 %v2652_v10, %v2601_v31  ;;  %v2532_v10 = vadd.f32 %v5459_v35, %v2459_v26  ;;  %v2602_v44 = vadd.f32 %v5465_v54, %v2529_v2  ;;  %v2607_v35 = vadd.f32 %v5467_v47, %v2534_v41 }
 0x330   : > { %v4558_v17 = vpop.f32.mrf.mxu0 }
 0x331   : > { %v5471_v8 = vpop.f32.mrf.mxu1  ;;  %v2686_v60 = vadd.f32 %v4558_v17, %v2604_v18  ;;  %v2605_v50 = vadd.f32 %v5469_v52, %v2532_v10  ;;  %v2985_v52 = vmul.f32 %v5534_v59, %v5828_v0  ;;  %v3055_v10 = vmul.f32 %v5492_v38, %v5833_v32 }
 0x332   : > { %v5475_v13 = vpop.f32.mrf.mxu0  ;;  %v2608_v25 = vadd.f32 %v5471_v8, %v2535_v30 }
 0x333   : > { %v5473_v49 = vpop.f32.mrf.mxu1  ;;  %v2684_v54 = vadd.f32 %v5475_v13, %v2602_v44 }
 0x334   : > { %v5482_v34 = vpop.f32.mrf.mxu0  ;;  %v2606_v13 = vadd.f32 %v5473_v49, %v2533_v33  ;;  %v2848_v49 = vmul.f32 %v5487_v58, %v5833_v32  ;;  %v2933_v33 = vsel %vm492_vm0, %v4068_v7, 0 }
 0x335   : > { %v4567_v28 = vpop.f32.mrf.mxu1  ;;  %v2689_v11 = vadd.f32 %v5482_v34, %v2607_v35  ;;  %v2986_v35 = vmul.f32 %v5534_v59, %v5833_v32  ;;  %v4074_v59 = vld [vmem:[%s5736_s5 + $0x2c] sm:$0xf] }
 0x336   : > { %v5495_v61 = vpop.f32.mrf.mxu0  ;;  %v2761_v37 = vadd.f32 %v4567_v28, %v2685_v16 }
 0x337   : > { %v2728_v36 = vpop.f32.mrf.mxu1  ;;  %v2687_v47 = vadd.f32 %v5495_v61, %v2605_v50 }
 0x338   : > { %v4562_v20 = vpop.f32.mrf.mxu0  ;;  %v2759_v6 = vadd.f32 %v2728_v36, %v2683_v12 }
 0x339   : > { %v4568_v14 = vpop.f32.mrf.mxu1  ;;  %v2690_v39 = vadd.f32 %v4562_v20, %v2608_v25 }
 0x33a   : > { %v2671_v9 = vpop.f32.mrf.mxu0  ;;  %v2762_v42 = vadd.f32 %v4568_v14, %v2686_v60 }
 0x33b   : > { %v2731_v15 = vpop.f32.mrf.mxu1  ;;  %v2688_v53 = vadd.f32 %v2671_v9, %v2606_v13  ;;  %v4757_v13 = vld [vmem:[%s5735_s4] sm:$0xf] }
 0x33c   : > { %v4577_v45 = vpop.f32.mrf.mxu0  ;;  %v2760_v14 = vadd.f32 %v2731_v15, %v2684_v54 }
 0x33d   : > { %v4571_v27 = vpop.f32.mrf.mxu1  ;;  %v2834_v5 = vadd.f32 %v4577_v45, %v2761_v37 }
 0x33e   : > { %v2801_v23 = vpop.f32.mrf.mxu0 }
 0x33f   : > { %v2744_v51 = vpop.f32.mrf.mxu1  ;;  %v2909_v37 = vadd.f32 %v5528_v1, %v2834_v5  ;;  %v2832_v17 = vadd.f32 %v2801_v23, %v2759_v6 }
 0x340   : > { %v4578_v36 = vpop.f32.mrf.mxu0  ;;  %v2763_v62 = vadd.f32 %v2744_v51, %v2687_v47  ;;  %v4758_v47 = vld [vmem:[%s5735_s4 + $0x8] sm:$0xf] }
 0x341   : > { %v4572_v28 = vpop.f32.mrf.mxu1  ;;  %v2918_v24 = vadd.f32 %v2916_v29, %v2909_v37  ;;  %v2840_v22 = vadd.f32 %v5528_v1, %v2832_v17  ;;  %v2835_v57 = vadd.f32 %v4578_v36, %v2762_v42  ;;  %v2765_v29 = vadd.f32 %v4571_v27, %v2689_v11 }
 0x342   : > { %v2804_v19 = vpop.f32.mrf.mxu0  ;;  %v2766_v15 = vadd.f32 %v4572_v28, %v2690_v39  ;;  %v5867_v28 = vmov 0.0   ;;  %v4759_v39 = vld [vmem:[%s4877_s25 + $0x48] sm:$0xff]  }
 0x343   : > { %v2910_v8 = vadd.f32 %v5528_v1, %v2835_v57  ;;  %v2922_v31 = vmul.f32 0.2, %v2918_v24  ;;  %v2849_v16 = vadd.f32 %v5501_v48, %v2840_v22  ;;  %v2747_v34 = vpop.f32.mrf.mxu1  ;;  %v2833_v46 = vadd.f32 %v2804_v19, %v2760_v14  ;;  %v5868_v19 = vld [vmem:[#allocation19_spill] sm:$0xff] }
 0x344   : > { %v4581_v4 = vpop.f32.mrf.mxu0  ;;  %vm2920_vm6 = vcmp.ge.f32.partialorder %v2918_v24, 0.0  ;;  %v2764_v12 = vadd.f32 %v2747_v34, %v2688_v53  ;;  %v5872_v34 = vld [vmem:[#allocation13_spill] sm:$0xff]  ;;  %v5874_v53 = vld [vmem:[#allocation4_spill] sm:$0xff] }
 0x345   : > { %v2919_v63 = vadd.f32 %v2917_v55, %v2910_v8  ;;  %v2841_v3 = vadd.f32 %v5528_v1, %v2833_v46  ;;  %v2838_v61 = vadd.f32 %v4581_v4, %v2765_v29  ;;  %v2924_v48 = vsel %vm2920_vm6, %v2918_v24, %v2922_v31  ;;  %v5869_v8 = vld [vmem:[#allocation18_spill] sm:$0xff]  ;;  %v5870_v29 = vld [vmem:[#allocation21_spill] sm:$0xff]  ;;  %v5873_v46 = vld [vmem:[#allocation28_spill] sm:$0xff] }
 0x346   : > { %v2817_v20 = vpop.f32.mrf.mxu0  ;;  %v2853_v40 = vmul.f32 0.2, %v2849_v16  ;;  %vm2851_vm8 = vcmp.ge.f32.partialorder %v2849_v16, 0.0  ;;  %v3071_v55 = vsel %vm492_vm0, %v4074_v59, 0  ;;  %v4760_v31 = vld [vmem:[%s4877_s25 + $0x50] sm:$0xff]   ;;  %v4761_v4 = vld [vmem:[%s4877_s25 + $0x58] sm:$0xff]  }
 0x347   : > { %vm2921_vm7 = vcmp.ge.f32.partialorder %v2919_v63, 0.0  ;;  %v2923_v18 = vmul.f32 0.2, %v2919_v63  ;;  %v2836_v56 = vadd.f32 %v2817_v20, %v2763_v62  ;;  %v2850_v26 = vadd.f32 %v2848_v49, %v2841_v3  ;;  %v5875_v62 = vld [vmem:[#allocation14_spill] sm:$0xff]  ;;  %v5881_v20 = vld [vmem:[#allocation7_spill] sm:$0xff] }
 0x348   : > { %v3047_v9 = vadd.f32 %v5528_v1, %v2838_v61  ;;  %v4582_v2 = vpop.f32.mrf.mxu0  ;;  %v2855_v51 = vsel %vm2851_vm8, %v2849_v16, %v2853_v40  ;;  %v5871_v16 = vmov 0   ;;  %v5878_v3 = vld [vmem:[#allocation6_spill] sm:$0xff]  ;;  %v5880_v61 = vld [vmem:[#allocation15_spill] sm:$0xff] }
 0x349   : > { %v2925_v27 = vsel %vm2921_vm7, %v2919_v63, %v2923_v18  ;;  %v2978_v45 = vadd.f32 %v5528_v1, %v2836_v56  ;;  %v2839_v43 = vadd.f32 %v4582_v2, %v2766_v15  ;;  %vm2852_vm9 = vcmp.ge.f32.partialorder %v2850_v26, 0.0  ;;  %v5876_v63 = vld [vmem:[#allocation3_spill] sm:$0xff]  ;;  %v5877_v15 = vld [vmem:[#allocation29_spill] sm:$0xff]  ;;  %v5879_v49 = vld [vmem:[#allocation30_spill] sm:$0xff] }
 0x34a   : > { %v2926_v60 = vpack.c.bf16 %v2925_v27, %v2924_v48  ;;  %v2854_v58 = vmul.f32 0.2, %v2850_v26  ;;  %v3056_v6 = vadd.f32 %v5507_v21, %v3047_v9  ;;  %v2820_v5 = vpop.f32.mrf.mxu0  ;;  %v4097_v18 = vld [vmem:[%s5736_s5 + $0x30] sm:$0xf] }
 0x34b   : > { %v3048_v41 = vadd.f32 %v5528_v1, %v2839_v43  ;;  %v2837_v44 = vadd.f32 %v2820_v5, %v2764_v12  ;;  %v2987_v30 = vadd.f32 %v2985_v52, %v2978_v45  ;;  %v4756_v52 = vld [vmem:[%s4877_s25 + $0x40] sm:$0xff]   ;;  %v4100_v12 = vld [vmem:[%s5736_s5 + $0x34] sm:$0xf]  ;;  %v3562_v56 = vsel %vm492_vm0, %v4097_v18, 0 }
 0x34c   : > { %v2856_v23 = vsel %vm2852_vm9, %v2850_v26, %v2854_v58  ;;  %v3060_v37 = vmul.f32 0.2, %v3056_v6  ;;  %vm3058_vm10 = vcmp.ge.f32.partialorder %v3056_v6, 0.0  ;;  %v3631_v48 = vsel %vm492_vm0, %v4100_v12, 0  ;;  %v5882_v26 = vld [vmem:[#allocation20_spill] sm:$0xff]  ;;  %v5883_v45 = vld [vmem:[#allocation17_spill] sm:$0xff] }
 0x34d   : > { %v2857_v42 = vpack.c.bf16 %v2856_v23, %v2855_v51  ;;  %v3057_v17 = vadd.f32 %v3055_v10, %v3048_v41  ;;  %v2979_v21 = vadd.f32 %v5528_v1, %v2837_v44  ;;  %v2991_v38 = vmul.f32 0.2, %v2987_v30 }
 0x34e   : > { %v3062_v36 = vsel %vm3058_vm10, %v3056_v6, %v3060_v37  ;;  %vm2989_vm12 = vcmp.ge.f32.partialorder %v2987_v30, 0.0  ;;  %vm3854_vm9 = vcmask 7168  }
 0x34f   : > { %vm3059_vm11 = vcmp.ge.f32.partialorder %v3057_v17, 0.0  ;;  %v3061_v50 = vmul.f32 0.2, %v3057_v17  ;;  %4586 = vmatmul.mubr.msk.bf16.vlgmr.msra.gmra.mxu1 %vm479_vm1, %v2857_v42  ;;  %v2988_v54 = vadd.f32 %v2986_v35, %v2979_v21  ;;  %v2993_v57 = vsel %vm2989_vm12, %v2987_v30, %v2991_v38 }
 0x350   : > { %4590 = vmatpush3.bf16.msra.mxu1 %v2933_v33  ;;  %4591 = vmatprep.mubr.msk.bf16.mxu1 %vm4772_vm2, %v5867_v28 }
 0x351   : > { %v3063_v25 = vsel %vm3059_vm11, %v3057_v17, %v3061_v50  ;;  %4601 = vmatprep.subr.bf16.mxu1 %v5867_v28  ;;  %vm2990_vm13 = vcmp.ge.f32.partialorder %v2988_v54, 0.0  ;;  %v2992_v22 = vmul.f32 0.2, %v2988_v54 }
 0x352   : > { %v3064_v24 = vpack.c.bf16 %v3063_v25, %v3062_v36 }
 0x353   : > { %v2994_v11 = vsel %vm2990_vm13, %v2988_v54, %v2992_v22 }
 0x354   : > { %v2995_v14 = vpack.c.bf16 %v2994_v11, %v2993_v57 }
 0x356   : > { %4598 = vmatmul.mubr.msk.bf16.vlgmr.msra.gmra.mxu0 %vm479_vm1, %v2995_v14 }
 0x357   : > { %4592 = vmatmul.mubr.msk.bf16.vlgmr.msra.gmra.mxu1 %vm479_vm1, %v2926_v60  ;;  %4608 = vmatpush3.bf16.msra.mxu0 %v5868_v19 }
 0x358   : > { %4602 = vmatpush3.bf16.msra.mxu1 %v3071_v55  ;;  %4603 = vmatprep.mubr.msk.bf16.mxu1 %vm4772_vm2, %v5867_v28 }
 0x359   : > { %4609 = vmatprep.mubr.msk.bf16.mxu0 %vm479_vm1, %v4756_v52  ;;  %4716 = vmatprep.subr.msk.bf16.mxu1 %vm492_vm0, %v4757_v13 }
 0x35a   : > { %4717 = vmatprep.subr.msk.bf16.mxu0 %vm492_vm0, %v4758_v47 }
 0x35e   : > { %4610 = vmatmul.mubr.msk.bf16.vlgmr.msra.gmra.mxu0 %vm479_vm1, %v4759_v39 }
 0x35f   : > { %4604 = vmatmul.mubr.msk.bf16.vlgmr.msra.gmra.mxu1 %vm479_vm1, %v3064_v24  ;;  %4628 = vmatpush3.bf16.msra.mxu0 %v5870_v29 }
 0x360   : > { %4618 = vmatpush3.bf16.msra.mxu1 %v5869_v8  ;;  %4613 = vmatprep.mubr.msk.bf16.mxu0 %vm479_vm1, %v4760_v31 }
 0x361   : > { %4619 = vmatprep.mubr.bf16.mxu1 %v5871_v16  ;;  %4718 = vmatprep.subr.msk.bf16.mxu1 %vm492_vm0, %v5872_v34 }
 0x362   : > { %4719 = vmatprep.subr.msk.bf16.mxu0 %vm492_vm0, %v5873_v46 }
 0x366   : > { %4614 = vmatmul.mubr.msk.bf16.gmra.mxu0 %vm479_vm1, %v4761_v4 }
 0x367   : > { %4620 = vmatmul.mubr.msk.bf16.vlgmr.msra.gmra.mxu1 %vm479_vm1, %v4756_v52  ;;  %4629 = vmatprep.mubr.msk.bf16.mxu0 %vm479_vm1, %v4759_v39 }
 0x368   : > { %4638 = vmatpush3.bf16.msra.mxu1 %v5874_v53  ;;  %4623 = vmatprep.mubr.msk.bf16.mxu1 %vm479_vm1, %v4759_v39 }
 0x369   : > { %4720 = vmatprep.subr.msk.bf16.mxu1 %vm492_vm0, %v5875_v62 }
 0x36e   : > { %4630 = vmatmul.mubr.msk.bf16.vlgmr.msra.gmra.mxu0 %vm479_vm1, %v4760_v31 }
 0x36f   : > { %4624 = vmatmul.mubr.msk.bf16.gmra.mxu1 %vm479_vm1, %v4760_v31  ;;  %4648 = vmatpush3.bf16.msra.mxu0 %v5876_v63 }
 0x370   : > { %4633 = vmatprep.mubr.msk.bf16.mxu0 %vm479_vm1, %v4761_v4  ;;  %4639 = vmatprep.mubr.bf16.mxu1 %v5871_v16 }
 0x371   : > { %4667 = vmatprep.subr.bf16.mxu0 %v5867_v28 }
 0x376   : > { %4634 = vmatmul.mubr.bf16.gmra.mxu0 %v5871_v16 }
 0x377   : > { %4640 = vmatmul.mubr.msk.bf16.vlgmr.msra.gmra.mxu1 %vm479_vm1, %v5877_v15  ;;  %4649 = vmatprep.mubr.msk.bf16.mxu0 %vm479_vm1, %v5877_v15 }
 0x378   : > { %4658 = vmatpush3.bf16.msra.mxu1 %v5878_v3  ;;  %4643 = vmatprep.mubr.msk.bf16.mxu1 %vm479_vm1, %v5879_v49 }
 0x379   : > { %4673 = vmatprep.subr.bf16.mxu1 %v5867_v28 }
 0x37e   : > { %4650 = vmatmul.mubr.msk.bf16.vlgmr.msra.gmra.mxu0 %vm479_vm1, %v5879_v49 }
 0x37f   : > { %4644 = vmatmul.mubr.msk.bf16.gmra.mxu1 %vm479_vm1, %v5880_v61  ;;  %4653 = vmatprep.mubr.msk.bf16.mxu0 %vm479_vm1, %v5880_v61 }
 0x380   : > { %4659 = vmatprep.mubr.msk.bf16.mxu1 %vm479_vm1, %v5879_v49  ;;  %4668 = vmatpush3.bf16.msra.mxu0 %v3562_v56 }
 0x381   : > { %4679 = vmatprep.subr.bf16.mxu0 %v5867_v28 }
 0x386   : > { %4654 = vmatmul.mubr.msk.bf16.gmra.mxu0 %vm479_vm1, %v5881_v20 }
 0x387   : > { %4660 = vmatmul.mubr.msk.bf16.vlgmr.msra.gmra.mxu1 %vm479_vm1, %v5880_v61  ;;  %4669 = vmatprep.mubr.msk.bf16.mxu0 %vm4772_vm2, %v5867_v28 }
 0x388   : > { %4663 = vmatprep.mubr.msk.bf16.mxu1 %vm479_vm1, %v5881_v20  ;;  %4674 = vmatpush3.bf16.msra.mxu1 %v3631_v48 }
 0x389   : > { %4685 = vmatprep.subr.bf16.mxu1 %v5867_v28 }
 0x38f   : > { %4664 = vmatmul.mubr.bf16.gmra.mxu1 %v5871_v16 }
 0x390   : > { %4675 = vmatprep.mubr.msk.bf16.mxu1 %vm4772_vm2, %v5867_v28 }
 0x40f   : > { %v2900_v40 = vpop.f32.mrf.mxu1 }
 0x410   : > { %v2907_v9 = vadd.f32 %v2900_v40, %v5882_v26 }
 0x411   : > { %v4587_v2 = vpop.f32.mrf.mxu1 }
 0x413   : > { %v2903_v27 = vpop.f32.mrf.mxu1 }
 0x414   : > { %v2908_v43 = vadd.f32 %v2903_v27, %v5883_v45 }
 0x415   : > { %v4588_v60 = vpop.f32.mrf.mxu1 }
 0x416   : > { %v3038_v6 = vpop.f32.mrf.mxu0  ;;  %v4096_v60 = vld [vmem:[%s5733_s2 + $0xc] ss:$0 sm:$0xff] }
 0x417   : > { %v2969_v58 = vpop.f32.mrf.mxu1 }
 0x418   : > { %v2976_v5 = vadd.f32 %v2969_v58, %v2907_v9  ;;  %v4599_v41 = vpop.f32.mrf.mxu0 }
 0x419   : > { %v4593_v7 = vpop.f32.mrf.mxu1 }
 0x41a   : > { %v3045_v10 = vadd.f32 %v3038_v6, %v2976_v5  ;;  %v3041_v51 = vpop.f32.mrf.mxu0  ;;  %v5669_v5 = vld [vmem:[%s5733_s2 + $0xf] ss:$0 sm:$0xff] }
 0x41b   : > { %v2972_v44 = vpop.f32.mrf.mxu1 }
 0x41c   : > { %v2977_v23 = vadd.f32 %v2972_v44, %v2908_v43  ;;  %v4600_v42 = vpop.f32.mrf.mxu0  ;;  %v4099_v43 = vld [vmem:[%s5733_s2 + $0xd] ss:$0 sm:$0xff] }
 0x41d   : > { %v4594_v30 = vpop.f32.mrf.mxu1  ;;  %v3545_v42 = vmul.f32 %v4096_v60, %v5828_v0 }
 0x41e   : > { %v3046_v37 = vadd.f32 %v3041_v51, %v2977_v23  ;;  %v4611_v33 = vpop.f32.mrf.mxu0  ;;  %v3614_v30 = vmul.f32 %v4099_v43, %v5828_v0 }
 0x41f   : > { %v3107_v17 = vpop.f32.mrf.mxu1 }
 0x420   : > { %v5656_v21 = vadd.f32 %v3107_v17, %v3045_v10  ;;  %v3150_v50 = vpop.f32.mrf.mxu0 }
 0x421   : > { %v4605_v35 = vpop.f32.mrf.mxu1 }
 0x422   : > { %v4612_v54 = vpop.f32.mrf.mxu0  ;;  %v5675_v35 = vmul.f32 %v5669_v5, %v5828_v0 }
 0x423   : > { %v3110_v38 = vpop.f32.mrf.mxu1 }
 0x424   : > { %v5658_v36 = vadd.f32 %v3110_v38, %v3046_v37  ;;  %v3153_v24 = vpop.f32.mrf.mxu0 }
 0x425   : > { %v4606_v25 = vpop.f32.mrf.mxu1 }
 0x426   : > { %v4615_v22 = vpop.f32.mrf.mxu0 }
 0x427   : > { %v4621_v59 = vpop.f32.mrf.mxu1 }
 0x428   : > { %v3166_v57 = vpop.f32.mrf.mxu0  ;;  %v3224_v18 = vadd.f32 %v4621_v59, %v4611_v33 }
 0x429   : > { %v3215_v11 = vpop.f32.mrf.mxu1 }
 0x42a   : > { %v4616_v14 = vpop.f32.mrf.mxu0  ;;  %v3216_v48 = vadd.f32 %v3215_v11, %v3150_v50 }
 0x42b   : > { %v4622_v55 = vpop.f32.mrf.mxu1 }
 0x42c   : > { %v3169_v19 = vpop.f32.mrf.mxu0  ;;  %v3227_v2 = vadd.f32 %v4622_v55, %v4612_v54 }
 0x42d   : > { %v3218_v52 = vpop.f32.mrf.mxu1 }
 0x42e   : > { %v4631_v47 = vpop.f32.mrf.mxu0  ;;  %v3219_v44 = vadd.f32 %v3218_v52, %v3153_v24  ;;  %v3615_v24 = vmul.f32 %v4099_v43, %v5833_v32 }
 0x42f   : > { %v4625_v13 = vpop.f32.mrf.mxu1  ;;  %v3313_v40 = vadd.f32 %v4631_v47, %v3224_v18 }
 0x430   : > { %v3280_v8 = vpop.f32.mrf.mxu0  ;;  %v3240_v50 = vadd.f32 %v4625_v13, %v4615_v22 }
 0x431   : > { %v3231_v39 = vpop.f32.mrf.mxu1  ;;  %v3311_v27 = vadd.f32 %v3280_v8, %v3216_v48  ;;  %v5682_v8 = vld [vmem:[%s5733_s2 + $0xe] ss:$0 sm:$0xff] }
 0x432   : > { %v4632_v31 = vpop.f32.mrf.mxu0  ;;  %v3232_v38 = vadd.f32 %v3231_v39, %v3166_v57  ;;  %v3683_v48 = vmul.f32 %v5682_v8, %v5828_v0 }
 0x433   : > { %v4626_v29 = vpop.f32.mrf.mxu1  ;;  %v3314_v7 = vadd.f32 %v4632_v31, %v3227_v2 }
 0x434   : > { %v3283_v34 = vpop.f32.mrf.mxu0  ;;  %v3243_v11 = vadd.f32 %v4626_v29, %v4616_v14 }
 0x435   : > { %v3234_v16 = vpop.f32.mrf.mxu1  ;;  %v3312_v54 = vadd.f32 %v3283_v34, %v3219_v44 }
 0x436   : > { %v4635_v46 = vpop.f32.mrf.mxu0  ;;  %v3235_v31 = vadd.f32 %v3234_v16, %v3169_v19 }
 0x437   : > { %v4641_v4 = vpop.f32.mrf.mxu1 }
 0x438   : > { %v3296_v53 = vpop.f32.mrf.mxu0  ;;  %v3386_v45 = vadd.f32 %v4641_v4, %v3313_v40  ;;  %v3317_v4 = vadd.f32 %v4635_v46, %v3240_v50 }
 0x439   : > { %v3353_v62 = vpop.f32.mrf.mxu1 }
 0x43a   : > { %v4636_v63 = vpop.f32.mrf.mxu0  ;;  %v3384_v41 = vadd.f32 %v3353_v62, %v3311_v27  ;;  %v3315_v62 = vadd.f32 %v3296_v53, %v3232_v38  ;;  %v4106_v53 = vld [vmem:[%s5736_s5 + $0x3c] sm:$0xf] }
 0x43b   : > { %v4642_v15 = vpop.f32.mrf.mxu1  ;;  %v3318_v39 = vadd.f32 %v4636_v63, %v3243_v11 }
 0x43c   : > { %v3299_v3 = vpop.f32.mrf.mxu0  ;;  %v3387_v37 = vadd.f32 %v4642_v15, %v3314_v7 }
 0x43d   : > { %v3356_v49 = vpop.f32.mrf.mxu1  ;;  %v3316_v40 = vadd.f32 %v3299_v3, %v3235_v31 }
 0x43e   : > { %v4651_v20 = vpop.f32.mrf.mxu0  ;;  %v3385_v22 = vadd.f32 %v3356_v49, %v3312_v54 }
 0x43f   : > { %v4645_v61 = vpop.f32.mrf.mxu1  ;;  %v3459_v10 = vadd.f32 %v4651_v20, %v3386_v45 }
 0x440   : > { %v3426_v56 = vpop.f32.mrf.mxu0  ;;  %v3390_v29 = vadd.f32 %v4645_v61, %v3317_v4 }
 0x441   : > { %v3369_v12 = vpop.f32.mrf.mxu1  ;;  %v3457_v17 = vadd.f32 %v3426_v56, %v3384_v41  ;;  %v3546_v56 = vmul.f32 %v4096_v60, %v5833_v32 }
 0x442   : > { %v4652_v9 = vpop.f32.mrf.mxu0  ;;  %v3388_v19 = vadd.f32 %v3369_v12, %v3315_v62 }
 0x443   : > { %v4646_v26 = vpop.f32.mrf.mxu1  ;;  %v3460_v55 = vadd.f32 %v4652_v9, %v3387_v37 }
 0x444   : > { %v3429_v6 = vpop.f32.mrf.mxu0  ;;  %v3391_v16 = vadd.f32 %v4646_v26, %v3318_v39 }
 0x445   : > { %v3372_v58 = vpop.f32.mrf.mxu1  ;;  %v3458_v20 = vadd.f32 %v3429_v6, %v3385_v22  ;;  %v3769_v6 = vsel %vm492_vm0, %v4106_v53, 0 }
 0x446   : > { %v4655_v51 = vpop.f32.mrf.mxu0  ;;  %v3389_v45 = vadd.f32 %v3372_v58, %v3316_v40 }
 0x447   : > { %v4661_v23 = vpop.f32.mrf.mxu1  ;;  %v3463_v63 = vadd.f32 %v4655_v51, %v3390_v29 }
 0x448   : > { %v3532_v33 = vadd.f32 %v4661_v23, %v3459_v10  ;;  %v3442_v25 = vpop.f32.mrf.mxu0 }
 0x449   : > { %v3499_v59 = vpop.f32.mrf.mxu1  ;;  %v3461_v43 = vadd.f32 %v3442_v25, %v3388_v19  ;;  %v4103_v25 = vld [vmem:[%s5736_s5 + $0x38] sm:$0xf] }
 0x44a   : > { %v3607_v52 = vadd.f32 %v5528_v1, %v3532_v33  ;;  %v3530_v47 = vadd.f32 %v3499_v59, %v3457_v17  ;;  %v4656_v57 = vpop.f32.mrf.mxu0 }
 0x44b   : > { %v4662_v13 = vpop.f32.mrf.mxu1  ;;  %v3464_v0 = vadd.f32 %v4656_v57, %v3391_v16 }
 0x44c   : > { %v3616_v34 = vadd.f32 %v3614_v30, %v3607_v52  ;;  %v3538_v15 = vadd.f32 %v5528_v1, %v3530_v47  ;;  %v3533_v14 = vadd.f32 %v4662_v13, %v3460_v55  ;;  %v3445_v61 = vpop.f32.mrf.mxu0 }
 0x44d   : > { %v3502_v18 = vpop.f32.mrf.mxu1  ;;  %v3462_v41 = vadd.f32 %v3445_v61, %v3389_v45  ;;  %v4108_v45 = vld [vmem:[%s5737_s6] ss:$0 sm:$0xff] }
 0x44e   : > { %v3608_v46 = vadd.f32 %v5528_v1, %v3533_v14  ;;  %v3620_v49 = vmul.f32 0.2, %v3616_v34  ;;  %v3547_v9 = vadd.f32 %v3545_v42, %v3538_v15  ;;  %v3531_v2 = vadd.f32 %v3502_v18, %v3458_v20 }
 0x44f   : > { %v4665_v27 = vpop.f32.mrf.mxu1  ;;  %vm3618_vm14 = vcmp.ge.f32.partialorder %v3616_v34, 0.0 }
 0x450   : > { %v3617_v60 = vadd.f32 %v3615_v24, %v3608_v46  ;;  %v3539_v3 = vadd.f32 %v5528_v1, %v3531_v2  ;;  %v3536_v12 = vadd.f32 %v4665_v27, %v3463_v63  ;;  %v3622_v44 = vsel %vm3618_vm14, %v3616_v34, %v3620_v49 }
 0x451   : > { %v3515_v26 = vpop.f32.mrf.mxu1  ;;  %v3551_v51 = vmul.f32 0.2, %v3547_v9  ;;  %vm3549_vm3 = vcmp.ge.f32.partialorder %v3547_v9, 0.0  ;;  %v3753_v24 = vmul.f32 %v5669_v5, %v5833_v32  ;;  %v3684_v5 = vmul.f32 %v5682_v8, %v5833_v32 }
 0x452   : > { %vm3619_vm15 = vcmp.ge.f32.partialorder %v3617_v60, 0.0  ;;  %v3621_v7 = vmul.f32 0.2, %v3617_v60  ;;  %v3534_v10 = vadd.f32 %v3515_v26, %v3461_v43  ;;  %v3548_v23 = vadd.f32 %v3546_v56, %v3539_v3 }
 0x453   : > { %v3745_v30 = vadd.f32 %v5528_v1, %v3536_v12  ;;  %v4666_v58 = vpop.f32.mrf.mxu1  ;;  %v3553_v55 = vsel %vm3549_vm3, %v3547_v9, %v3551_v51 }
 0x454   : > { %v3623_v42 = vsel %vm3619_vm15, %v3617_v60, %v3621_v7  ;;  %v3676_v37 = vadd.f32 %v5528_v1, %v3534_v10  ;;  %v3537_v17 = vadd.f32 %v4666_v58, %v3464_v0  ;;  %vm3550_vm4 = vcmp.ge.f32.partialorder %v3548_v23, 0.0 }
 0x455   : > { %v3624_v33 = vpack.c.bf16 %v3623_v42, %v3622_v44  ;;  %v3552_v50 = vmul.f32 0.2, %v3548_v23  ;;  %v3754_v38 = vadd.f32 %v5675_v35, %v3745_v30  ;;  %v3518_v54 = vpop.f32.mrf.mxu1  ;;  %v3700_v35 = vsel %vm492_vm0, %v4103_v25, 0 }
 0x456   : > { %v3746_v59 = vadd.f32 %v5528_v1, %v3537_v17  ;;  %v3535_v11 = vadd.f32 %v3518_v54, %v3462_v41  ;;  %v3685_v47 = vadd.f32 %v3683_v48, %v3676_v37  ;;  %v4109_v41 = vld [vmem:[%s5738_s7] ss:$0 sm:$0xff] }
 0x457   : > { %v3554_v52 = vsel %vm3550_vm4, %v3548_v23, %v3552_v50  ;;  %4676 = vmatmul.mubr.msk.bf16.vlgmr.msra.gmra.mxu1 %vm479_vm1, %v3624_v33  ;;  %v3758_v4 = vmul.f32 0.2, %v3754_v38  ;;  %vm3756_vm5 = vcmp.ge.f32.partialorder %v3754_v38, 0.0  ;;  %v4110_v17 = vld [vmem:[#allocation2] ss:$0 sm:$0xff] }
 0x458   : > { %v3555_v31 = vpack.c.bf16 %v3554_v52, %v3553_v55  ;;  %v3755_v62 = vadd.f32 %v3753_v24, %v3746_v59  ;;  %4686 = vmatpush3.bf16.msra.mxu1 %v3769_v6  ;;  %4687 = vmatprep.mubr.msk.bf16.mxu1 %vm4772_vm2, %v5867_v28  ;;  %v3677_v22 = vadd.f32 %v5528_v1, %v3535_v11  ;;  %v3689_v13 = vmul.f32 0.2, %v3685_v47 }
 0x459   : > { %v3760_v34 = vsel %vm3756_vm5, %v3754_v38, %v3758_v4  ;;  %vm3687_vm0 = vcmp.ge.f32.partialorder %v3685_v47, 0.0 }
 0x45a   : > { %vm3757_vm6 = vcmp.ge.f32.partialorder %v3755_v62, 0.0  ;;  %v3759_v57 = vmul.f32 0.2, %v3755_v62  ;;  %4670 = vmatmul.mubr.msk.bf16.vlgmr.msra.gmra.mxu0 %vm479_vm1, %v3555_v31  ;;  %v3686_v39 = vadd.f32 %v3684_v5, %v3677_v22  ;;  %v3691_v1 = vsel %vm3687_vm0, %v3685_v47, %v3689_v13 }
 0x45b   : > { %4680 = vmatpush3.bf16.msra.mxu0 %v3700_v35  ;;  %4681 = vmatprep.mubr.msk.bf16.mxu0 %vm4772_vm2, %v5867_v28  ;;  %vm3838_vm2 = vcmask 261120  }
 0x45c   : > { %v3761_v15 = vsel %vm3757_vm6, %v3755_v62, %v3759_v57  ;;  %vm3688_vm7 = vcmp.ge.f32.partialorder %v3686_v39, 0.0  ;;  %v3690_v29 = vmul.f32 0.2, %v3686_v39 }
 0x45d   : > { %v3762_v14 = vpack.c.bf16 %v3761_v15, %v3760_v34 }
 0x45e   : > { %v3692_v20 = vsel %vm3688_vm7, %v3686_v39, %v3690_v29 }
 0x45f   : > { %4688 = vmatmul.mubr.msk.bf16.vlgmr.msra.gmra.mxu1 %vm479_vm1, %v3762_v14  ;;  %v3693_v32 = vpack.c.bf16 %v3692_v20, %v3691_v1 }
 0x462   : > { %4682 = vmatmul.mubr.msk.bf16.vlgmr.msra.gmra.mxu0 %vm479_vm1, %v3693_v32 }
 0x517   : > { %v3667_v8 = vpop.f32.mrf.mxu1 }
 0x519   : > { %v4677_v18 = vpop.f32.mrf.mxu1 }
 0x51a   : > { %v3598_v56 = vpop.f32.mrf.mxu0 }
 0x51b   : > { %v3670_v48 = vpop.f32.mrf.mxu1  ;;  %v3605_v28 = vadd.f32 %v3598_v56, %v5656_v21 }
 0x51c   : > { %v4671_v40 = vpop.f32.mrf.mxu0 }
 0x51d   : > { %v4678_v19 = vpop.f32.mrf.mxu1  ;;  %v3674_v49 = vadd.f32 %v3667_v8, %v3605_v28 }
 0x51e   : > { %v3601_v16 = vpop.f32.mrf.mxu0 }
 0x51f   : > { %v3805_v46 = vpop.f32.mrf.mxu1  ;;  %v3606_v63 = vadd.f32 %v3601_v16, %v5658_v36 }
 0x520   : > { %v4672_v53 = vpop.f32.mrf.mxu0 }
 0x521   : > { %v4689_v9 = vpop.f32.mrf.mxu1  ;;  %v3675_v0 = vadd.f32 %v3670_v48, %v3606_v63 }
 0x522   : > { %v3736_v61 = vpop.f32.mrf.mxu0 }
 0x523   : > { %v3743_v2 = vadd.f32 %v3736_v61, %v3674_v49  ;;  %v3808_v27 = vpop.f32.mrf.mxu1 }
 0x524   : > { %v4683_v43 = vpop.f32.mrf.mxu0 }
 0x525   : > { %v3812_v60 = vadd.f32 %v3805_v46, %v3743_v2  ;;  %v4690_v3 = vpop.f32.mrf.mxu1 }
 0x526   : > { %v3739_v21 = vpop.f32.mrf.mxu0 }
 0x527   : > { %v3821_v12 = vadd.f32 %v4108_v45, %v3812_v60  ;;  %v3744_v26 = vadd.f32 %v3739_v21, %v3675_v0 }
 0x528   : > { %v4684_v6 = vpop.f32.mrf.mxu0 }
 0x529   : > { %v3813_v7 = vadd.f32 %v3808_v27, %v3744_v26  ;;  %vm3823_vm1 = vcmp.ge.f32.partialorder %v3821_v12, 0.0  ;;  %v3825_v36 = vmul.f32 0.2, %v3821_v12 }
 0x52b   : > { %v3822_v10 = vadd.f32 %v4108_v45, %v3813_v7  ;;  %v3827_v44 = vsel %vm3823_vm1, %v3821_v12, %v3825_v36 }
 0x52c   : > { %v3836_v51 = vmul.f32 %v4109_v41, %v3827_v44 }
 0x52d   : > { %vm3824_vm8 = vcmp.ge.f32.partialorder %v3822_v10, 0.0  ;;  %v3826_v23 = vmul.f32 0.2, %v3822_v10 }
 0x52e   : > { %v3839_v30 = vsel %vm3838_vm2, %v3836_v51, 0.0 }
 0x52f   : > { %3840 = vadd.xlane.f32.xlu1 %v3839_v30  ;;  %v3828_v58 = vsel %vm3824_vm8, %v3822_v10, %v3826_v23 }
 0x530   : > { %v3837_v42 = vmul.f32 %v4109_v41, %v3828_v58 }
 0x532   : > { %v3842_v37 = vsel %vm3838_vm2, %v3837_v42, 0.0 }
 0x533   : > { %3843 = vadd.xlane.f32.xlu1 %v3842_v37 }
 0x5b8   : > { %v3841_v33 = vpop.xlane.xlu1 %3840 }
 0x5b9   : > { %v3852_v50 = vadd.f32 %v4110_v17, %v3841_v33 }
 0x5bb   : > { %3855 = vst.msk [vmem:[%s358_s17] sm:$0xff] %vm3854_vm9, %v3852_v50 }
 0x5bc   : > { %v3844_v38 = vpop.xlane.xlu1 %3843 }
 0x5bd   : > { %v3853_v54 = vadd.f32 %v4110_v17, %v3844_v38 }
 0x5bf   : > { %3856 = vst.msk [vmem:[%s358_s17 + $0x8] sm:$0xff] %vm3854_vm9, %v3853_v54 }
 0x5c0 PF: > { %s21_s11 = sadd.s32 1, %s4768_s11  }
 0x5c1   : > { %p18_p5 = scmp.ge.s32.totalorder %s21_s11, 4  }
 0x5c3   :  { %20 = sbr.rel (!%p18_p5) target bundleno = 3 (0x3), region = 112 }

// kernel: tpu_custom_call.1
= control target key start
LH: loop header
LB: loop body
LE: loop exit
PB: predicated region body
PF: predicated region fallthrough
CT: control target
= control target key end

     0   :  { %s4826_s11 = smov 0   ;;  %s5731_s0 = inlined_call_operand.vmem [shape: bf16[512,8], index: 0, kind: input, shape index: {}]   ;;  %s5732_s1 = inlined_call_operand.vmem [shape: f32[32,1], index: 1, kind: input, shape index: {}]   ;;  %s5733_s2 = inlined_call_operand.vmem [shape: f32[16,8], index: 2, kind: input, shape index: {}]   ;;  %s5734_s3 = inlined_call_operand.vmem [shape: f32[1,8], index: 3, kind: input, shape index: {}]   ;;  %s5735_s4 = inlined_call_operand.vmem [shape: bf16[9,8,8], index: 4, kind: input, shape index: {}]   ;;  %s5736_s5 = inlined_call_operand.vmem [shape: bf16[16,8,32], index: 5, kind: input, shape index: {}]   ;;  %s5737_s6 = inlined_call_operand.vmem [shape: f32[1,32], index: 6, kind: input, shape index: {}]   ;;  %s5738_s7 = inlined_call_operand.vmem [shape: f32[1,32], index: 7, kind: input, shape index: {}]   ;;  %s5739_s8 = inlined_call_operand.<no memory space> [shape: f32[1,1], index: 8, kind: input, shape index: {}]   ;;  %s5740_s9 = inlined_call_operand.vmem [shape: f32[32,1], index: 9, kind: output, shape index: {}]  }
   0x1   :  { %v14_v0 = vstv %s5739_s8 }
   0x2   :  { %15 = vst [vmem:[#allocation2] sm:$0x1] %v14_v0 }
   0x3 LB: > { %s3925_s12 = sadd.s32 4294967295, %s4768_s11   ;;  %p3929_p0 = scmp.ge.s32.totalorder %s4768_s11, 1  ;;  %s4768_s11 = sphi %s4826_s11, %s21_s11  }
   0x4   : > { %p301_p1 = scmp.lt.s32.totalorder %s4768_s11, 3 }
   0x6   : > { %p302_p2 = pnand %p3929_p0, %p301_p1 }
   0x8   : > { %305 = sbr.rel (%p302_p2) target bundleno = 1472 (0x5c0), region = 56 }
   0xd   : > { %v4837_v1 = vld [vmem:[%s5735_s4 + $0x10] sm:$0xf]  ;;  %vm492_vm0 = vcmask 1043456   ;;  %v4842_v2 = vld [vmem:[%s5735_s4 + $0xc] sm:$0xf]  ;;  %s3930_s16 = sshll.u32 %s3925_s12, 5 }
   0xe   : > { %4691 = vmatprep.subr.msk.bf16.mxu0 %vm492_vm0, %v4837_v1  ;;  %4692 = vmatprep.subr.msk.bf16.mxu1 %vm492_vm0, %v4842_v2  ;;  %v4850_v3 = vsel %vm492_vm0, %v4837_v1, 0  ;;  %v4854_v4 = vsel %vm492_vm0, %v4842_v2, 0  ;;  %v4859_v5 = vld [vmem:[%s5735_s4 + $0x14] sm:$0xf]  ;;  %p343_p3 = scmp.lt.s32.totalorder %s3930_s16, 63  ;;  %v5741_v7 = vmov 0  }
   0xf   : > { %5799 = vst [vmem:[#allocation3_spill] sm:$0xff] %v4850_v3  ;;  %5800 = vst [vmem:[#allocation4_spill] sm:$0xff] %v4854_v4  ;;  %4296 = vmatpush3.bf16.msra.mxu0 %v4850_v3  ;;  %4306 = vmatpush3.bf16.msra.mxu1 %v4854_v4  ;;  %v4866_v6 = vld [vmem:[%s5735_s4 + $0x18] sm:$0xf]  ;;  %s3932_s21 = sshll.u32 %s3925_s12, 1  ;;  %vm479_vm1 = vcmask 64512  }
  0x10   : > { %4307 = vmatprep.mubr.bf16.mxu1 %v5741_v7  ;;  %4693 = vmatprep.subr.msk.bf16.mxu0 %vm492_vm0, %v4859_v5  ;;  %s5885_s16 = smov (!%p343_p3, %s3930_s16), 63  ;;  %p349_p4 = scmp.lt.s32.totalorder %s3932_s21, 3  ;;  %v4881_v8 = vsel %vm492_vm0, %v4866_v6, 0  ;;  %v4889_v10 = vld [vmem:[%s5735_s4 + $0x1c] sm:$0xf]  ;;  %v4898_v12 = vsel %vm492_vm0, %v4859_v5, 0 }
  0x11   : > { %4694 = vmatprep.subr.msk.bf16.mxu1 %vm492_vm0, %v4866_v6  ;;  %4732 = vset.pattern.permute.xlu0 %v5741_v7  ;;  %s3931_s22 = sshll.u32 %s5885_s16, 2  ;;  %5801 = vst [vmem:[#allocation5_spill] sm:$0xff] %v4881_v8  ;;  %5802 = vst [vmem:[#allocation6_spill] sm:$0xff] %v4898_v12  ;;  %v4914_v14 = vld [vmem:[%s5735_s4 + $0x20] sm:$0xf]  ;;  %v4952_v21 = vsel %vm492_vm0, %v4889_v10, 0 }
  0x12   : > { %s4877_s25 = scalar_lea.vmem %s5731_s0, %s3931_s22  ;;  %s5887_s21 = smov (!%p349_p4, %s3932_s21), 3  ;;  %v4945_v19 = vsel %vm492_vm0, %v4914_v14, 0  ;;  %5806 = vst [vmem:[#allocation10_spill] sm:$0xff] %v4952_v21  ;;  %v3981_v24 = vld [vmem:[%s5736_s5 + $0x4] sm:$0xf]  ;;  %v5743_v25 = vmov 0.0  }
  0x13   : > { %v4884_v9 = vld [vmem:[%s4877_s25] sm:$0xff]   ;;  %v4894_v11 = vld [vmem:[%s4877_s25 + $0x8] sm:$0xff]   ;;  %v4905_v13 = vld [vmem:[%s4877_s25 + $0x10] sm:$0xff]   ;;  %s3933_s28 = sshll.u32 %s5887_s21, 3  ;;  %5804 = vst [vmem:[#allocation8_spill] sm:$0xff] %v4945_v19  ;;  %v1016_v26 = vsel %vm492_vm0, %v3981_v24, 0 }
  0x14   : > { %4297 = vmatprep.mubr.msk.bf16.mxu0 %vm479_vm1, %v4884_v9  ;;  %4308 = vmatmul.mubr.msk.bf16.vlgmr.msra.gmra.mxu1 %vm479_vm1, %v4884_v9  ;;  %s352_s13 = scalar_lea.vmem %s5732_s1, %s3933_s28  ;;  %v4931_v15 = vld [vmem:[%s4877_s25 + $0x18] sm:$0xff]   ;;  %v4941_v18 = vld [vmem:[%s4877_s25 + $0x20] sm:$0xff]   ;;  %v4948_v20 = vld [vmem:[%s4877_s25 + $0x28] sm:$0xff]   ;;  %vm4772_vm2 = vmmov 0   ;;  %s358_s17 = scalar_lea.vmem %s5740_s9, %s3933_s28 }
  0x15   : > { %4298 = vmatmul.mubr.msk.bf16.vlgmr.msra.gmra.mxu0 %vm479_vm1, %v4894_v11  ;;  %4326 = vmatpush3.bf16.msra.mxu1 %v4881_v8  ;;  %v393_v16 = vld [vmem:[%s352_s13] sm:$0xff]  ;;  %v394_v17 = vld [vmem:[%s352_s13 + $0x8] sm:$0xff]  ;;  %5803 = vst [vmem:[#allocation7_spill] sm:$0xff] %v4941_v18  ;;  %5805 = vst [vmem:[#allocation9_spill] sm:$0xff] %v4948_v20 }
  0x16   : > { %4316 = vmatpush3.bf16.msra.mxu0 %v4898_v12  ;;  %4311 = vmatprep.mubr.msk.bf16.mxu1 %vm479_vm1, %v4894_v11  ;;  %v4965_v22 = vld [vmem:[%s4877_s25 + $0x30] sm:$0xff]   ;;  %v4975_v23 = vld [vmem:[%s4877_s25 + $0x38] sm:$0xff]   ;;  %v991_v27 = vld [vmem:[%s5736_s5] sm:$0xf] }
  0x17   : > { %4301 = vmatprep.mubr.msk.bf16.mxu0 %vm479_vm1, %v4905_v13  ;;  %4695 = vmatprep.subr.msk.bf16.mxu0 %vm492_vm0, %v4889_v10  ;;  %5807 = vst [vmem:[#allocation11_spill] sm:$0xff] %v4965_v22  ;;  %5808 = vst [vmem:[#allocation12_spill] sm:$0xff] %v4975_v23  ;;  %v1063_v28 = vsel %vm492_vm0, %v991_v27, 0 }
  0x18   : > { %4696 = vmatprep.subr.msk.bf16.mxu1 %vm492_vm0, %v4914_v14  ;;  %968 = vperm.xlu0 %4732, %v393_v16  }
  0x1c   : > { %4312 = vmatmul.mubr.msk.bf16.gmra.mxu1 %vm479_vm1, %v4905_v13  ;;  %973 = vperm.xlu0 %4732, %v394_v17  }
  0x1d   : > { %4302 = vmatmul.mubr.msk.bf16.gmra.mxu0 %vm479_vm1, %v4931_v15  ;;  %4327 = vmatprep.mubr.bf16.mxu1 %v5741_v7 }
  0x1e   : > { %4317 = vmatprep.mubr.msk.bf16.mxu0 %vm479_vm1, %v4894_v11 }
  0x24   : > { %4328 = vmatmul.mubr.msk.bf16.vlgmr.msra.gmra.mxu1 %vm479_vm1, %v4941_v18 }
  0x25   : > { %4318 = vmatmul.mubr.msk.bf16.vlgmr.msra.gmra.mxu0 %vm479_vm1, %v4905_v13  ;;  %4346 = vmatpush3.bf16.msra.mxu1 %v4945_v19 }
  0x26   : > { %4336 = vmatpush3.bf16.msra.mxu0 %v4952_v21  ;;  %4331 = vmatprep.mubr.msk.bf16.mxu1 %vm479_vm1, %v4948_v20 }
  0x27   : > { %4321 = vmatprep.mubr.msk.bf16.mxu0 %vm479_vm1, %v4931_v15  ;;  %4355 = vmatprep.subr.bf16.mxu0 %v5743_v25 }
  0x28   : > { %4361 = vmatprep.subr.bf16.mxu1 %v5743_v25 }
  0x2c   : > { %4332 = vmatmul.mubr.msk.bf16.gmra.mxu1 %vm479_vm1, %v4965_v22 }
  0x2d   : > { %4322 = vmatmul.mubr.bf16.gmra.mxu0 %v5741_v7  ;;  %4347 = vmatprep.mubr.msk.bf16.mxu1 %vm479_vm1, %v4948_v20 }
  0x2e   : > { %4337 = vmatprep.mubr.msk.bf16.mxu0 %vm479_vm1, %v4941_v18 }
  0x34   : > { %4348 = vmatmul.mubr.msk.bf16.vlgmr.msra.gmra.mxu1 %vm479_vm1, %v4965_v22 }
  0x35   : > { %4338 = vmatmul.mubr.msk.bf16.vlgmr.msra.gmra.mxu0 %vm479_vm1, %v4948_v20  ;;  %4351 = vmatprep.mubr.msk.bf16.mxu1 %vm479_vm1, %v4975_v23 }
  0x36   : > { %4341 = vmatprep.mubr.msk.bf16.mxu0 %vm479_vm1, %v4965_v22  ;;  %4356 = vmatpush3.bf16.msra.mxu0 %v1016_v26 }
  0x37   : > { %4367 = vmatprep.subr.bf16.mxu0 %v5743_v25  ;;  %4362 = vmatpush3.bf16.msra.mxu1 %v1063_v28 }
  0x38   : > { %4373 = vmatprep.subr.bf16.mxu1 %v5743_v25 }
  0x3c   : > { %4352 = vmatmul.mubr.bf16.gmra.mxu1 %v5741_v7 }
  0x3d   : > { %4342 = vmatmul.mubr.msk.bf16.gmra.mxu0 %vm479_vm1, %v4975_v23  ;;  %4363 = vmatprep.mubr.msk.bf16.mxu1 %vm4772_vm2, %v5743_v25 }
  0x3e   : > { %4357 = vmatprep.mubr.msk.bf16.mxu0 %vm4772_vm2, %v5743_v25 }
  0xd4   : > { %v4309_v29 = vpop.f32.mrf.mxu1 }
  0xd5   : > { %v4299_v30 = vpop.f32.mrf.mxu0 }
  0xd6   : > { %v601_v31 = vpop.f32.mrf.mxu1  ;;  %v610_v55 = vadd.f32 %v4309_v29, %v4299_v30  ;;  %v3979_v29 = vld [vmem:[%s5733_s2] ss:$0 sm:$0xff] }
  0xd7   : > { %v530_v32 = vpop.f32.mrf.mxu0 }
  0xd8   : > { %v4310_v33 = vpop.f32.mrf.mxu1  ;;  %v602_v58 = vadd.f32 %v601_v31, %v530_v32 }
  0xd9   : > { %v4300_v34 = vpop.f32.mrf.mxu0 }
  0xda   : > { %v604_v35 = vpop.f32.mrf.mxu1  ;;  %v613_v62 = vadd.f32 %v4310_v33, %v4300_v34  ;;  %v3980_v34 = vld [vmem:[%s5733_s2 + $0x1] ss:$0 sm:$0xff] }
  0xdb   : > { %v533_v36 = vpop.f32.mrf.mxu0 }
  0xdc   : > { %v4313_v37 = vpop.f32.mrf.mxu1  ;;  %v605_v17 = vadd.f32 %v604_v35, %v533_v36  ;;  %v5021_v36 = vld [vmem:[%s5734_s3] ss:$0 sm:$0xff] }
  0xdd   : > { %v4303_v38 = vpop.f32.mrf.mxu0  ;;  %5810 = vst [vmem:[#allocation14_spill] sm:$0xff] %v5021_v36 }
  0xde   : > { %v617_v39 = vpop.f32.mrf.mxu1  ;;  %v626_v28 = vadd.f32 %v4313_v37, %v4303_v38 }
  0xdf   : > { %v546_v40 = vpop.f32.mrf.mxu0 }
  0xe0   : > { %v4314_v41 = vpop.f32.mrf.mxu1 }
  0xe1   : > { %v4304_v42 = vpop.f32.mrf.mxu0 }
  0xe2   : > { %v620_v43 = vpop.f32.mrf.mxu1 }
  0xe3   : > { %v549_v44 = vpop.f32.mrf.mxu0 }
  0xe4   : > { %v4329_v45 = vpop.f32.mrf.mxu1 }
  0xe5   : > { %v4319_v46 = vpop.f32.mrf.mxu0 }
  0xe6   : > { %v758_v47 = vpop.f32.mrf.mxu1  ;;  %v704_v59 = vadd.f32 %v4319_v46, %v610_v55  ;;  %v5013_v46 = vpop.permute.xlu0 %968  ;;  %v629_v55 = vadd.f32 %v4314_v41, %v4304_v42 }
  0xe7   : > { %v671_v48 = vpop.f32.mrf.mxu0  ;;  %5809 = vst [vmem:[#allocation13_spill] sm:$0xff] %v5013_v46 }
  0xe8   : > { %v4330_v49 = vpop.f32.mrf.mxu1  ;;  %v702_v63 = vadd.f32 %v671_v48, %v602_v58  ;;  %v791_v27 = vadd.f32 %v4329_v45, %v704_v59  ;;  %v980_v48 = vmul.f32 %v3979_v29, %v5013_v46  ;;  %v999_v59 = vmul.f32 %v3980_v34, %v5013_v46 }
  0xe9   : > { %v4320_v50 = vpop.f32.mrf.mxu0 }
  0xea   : > { %v761_v51 = vpop.f32.mrf.mxu1  ;;  %v705_v24 = vadd.f32 %v4320_v50, %v613_v62  ;;  %v789_v33 = vadd.f32 %v758_v47, %v702_v63  ;;  %v621_v47 = vadd.f32 %v620_v43, %v549_v44 }
  0xeb   : > { %v674_v52 = vpop.f32.mrf.mxu0 }
  0xec   : > { %v4333_v53 = vpop.f32.mrf.mxu1  ;;  %v703_v30 = vadd.f32 %v674_v52, %v605_v17  ;;  %v792_v50 = vadd.f32 %v4330_v49, %v705_v24  ;;  %v618_v52 = vadd.f32 %v617_v39, %v546_v40  ;;  %v3985_v49 = vld [vmem:[%s5736_s5 + $0x8] sm:$0xf]  ;;  %v3988_v39 = vld [vmem:[%s5736_s5 + $0xc] sm:$0xf] }
  0xed   : > { %v4323_v54 = vpop.f32.mrf.mxu0 }
  0xee   : > { %v5004_v56 = vpop.f32.mrf.mxu1  ;;  %v708_v35 = vadd.f32 %v4323_v54, %v626_v28  ;;  %v5036_v28 = vpop.permute.xlu0 %973 }
  0xef   : > { %v687_v57 = vpop.f32.mrf.mxu0  ;;  %5811 = vst [vmem:[#allocation15_spill] sm:$0xff] %v5036_v28 }
  0xf0   : > { %v5006_v60 = vpop.f32.mrf.mxu1  ;;  %v706_v40 = vadd.f32 %v687_v57, %v618_v52  ;;  %v795_v43 = vadd.f32 %v4333_v53, %v708_v35  ;;  %v1130_v57 = vsel %vm492_vm0, %v3985_v49, 0  ;;  %v1199_v53 = vsel %vm492_vm0, %v3988_v39, 0 }
  0xf1   : > { %v4324_v61 = vpop.f32.mrf.mxu0 }
  0xf2   : > { %v5008_v0 = vpop.f32.mrf.mxu1  ;;  %v709_v41 = vadd.f32 %v4324_v61, %v629_v55  ;;  %v793_v52 = vadd.f32 %v5004_v56, %v706_v40 }
  0xf3   : > { %v690_v16 = vpop.f32.mrf.mxu0 }
  0xf4   : > { %v4349_v26 = vpop.f32.mrf.mxu1  ;;  %v707_v44 = vadd.f32 %v690_v16, %v621_v47 }
  0xf5   : > { %v4339_v7 = vpop.f32.mrf.mxu0 }
  0xf6   : > { %v872_v31 = vadd.f32 %v4339_v7, %v791_v27  ;;  %v917_v32 = vpop.f32.mrf.mxu1  ;;  %v790_v27 = vadd.f32 %v761_v51, %v703_v30 }
  0xf7   : > { %v839_v37 = vpop.f32.mrf.mxu0 }
  0xf8   : > { %v950_v38 = vadd.f32 %v4349_v26, %v872_v31  ;;  %v870_v45 = vadd.f32 %v839_v37, %v789_v33  ;;  %v4350_v7 = vpop.f32.mrf.mxu1  ;;  %v3987_v26 = vld [vmem:[%s5733_s2 + $0x3] ss:$0 sm:$0xff] }
  0xf9   : > { %v4340_v58 = vpop.f32.mrf.mxu0  ;;  %v1182_v37 = vmul.f32 %v3987_v26, %v5013_v46 }
  0xfa   : > { %v992_v54 = vadd.f32 %v5021_v36, %v950_v38  ;;  %v948_v62 = vadd.f32 %v917_v32, %v870_v45  ;;  %v873_v63 = vadd.f32 %v4340_v58, %v792_v50  ;;  %v920_v17 = vpop.f32.mrf.mxu1  ;;  %v3984_v32 = vld [vmem:[%s5733_s2 + $0x2] ss:$0 sm:$0xff]  ;;  %v981_v50 = vmul.f32 %v3979_v29, %v5036_v28 }
  0xfb   : > { %v842_v42 = vpop.f32.mrf.mxu0  ;;  %v1113_v47 = vmul.f32 %v3984_v32, %v5013_v46  ;;  %v1000_v58 = vmul.f32 %v3980_v34, %v5036_v28 }
  0xfc   : > { %v963_v24 = vadd.f32 %v5021_v36, %v948_v62  ;;  %v951_v51 = vadd.f32 %v4350_v7, %v873_v63  ;;  %v871_v30 = vadd.f32 %v842_v42, %v790_v27  ;;  %v4353_v31 = vpop.f32.mrf.mxu1  ;;  %v1001_v38 = vadd.f32 %v999_v59, %v992_v54 }
  0xfd   : > { %v4343_v33 = vpop.f32.mrf.mxu0  ;;  %v796_v62 = vadd.f32 %v5006_v60, %v709_v41 }
  0xfe   : > { %v982_v61 = vadd.f32 %v980_v48, %v963_v24  ;;  %v993_v16 = vadd.f32 %v5021_v36, %v951_v51  ;;  %v949_v35 = vadd.f32 %v920_v17, %v871_v30  ;;  %v876_v45 = vadd.f32 %v4343_v33, %v795_v43  ;;  %v933_v7 = vpop.f32.mrf.mxu1 }
  0xff   : > { %v855_v55 = vpop.f32.mrf.mxu0  ;;  %v794_v48 = vadd.f32 %v5008_v0, %v707_v44  ;;  %vm1003_vm3 = vcmp.ge.f32.partialorder %v1001_v38, 0.0  ;;  %v1005_v49 = vmul.f32 0.2, %v1001_v38  ;;  %v1183_v0 = vmul.f32 %v3987_v26, %v5036_v28 }
 0x100   : > { %v964_v59 = vadd.f32 %v5021_v36, %v949_v35  ;;  %v954_v54 = vadd.f32 %v4353_v31, %v876_v45  ;;  %v874_v63 = vadd.f32 %v855_v55, %v793_v52  ;;  %v1002_v27 = vadd.f32 %v1000_v58, %v993_v16  ;;  %v4354_v40 = vpop.f32.mrf.mxu1 }
 0x101   : > { %v4344_v17 = vpop.f32.mrf.mxu0  ;;  %v986_v29 = vmul.f32 0.2, %v982_v61  ;;  %vm984_vm4 = vcmp.ge.f32.partialorder %v982_v61, 0.0  ;;  %v1007_v30 = vsel %vm1003_vm3, %v1001_v38, %v1005_v49  ;;  %v1114_v26 = vmul.f32 %v3984_v32, %v5036_v28  ;;  %v5069_v38 = vld [vmem:[%s5735_s4] sm:$0xf] }
 0x102   : > { %v983_v39 = vadd.f32 %v981_v50, %v964_v59  ;;  %v1175_v56 = vadd.f32 %v5021_v36, %v954_v54  ;;  %v877_v42 = vadd.f32 %v4344_v17, %v796_v62  ;;  %v952_v34 = vadd.f32 %v933_v7, %v874_v63  ;;  %v936_v7 = vpop.f32.mrf.mxu1  ;;  %5813 = vst [vmem:[#allocation17_spill] sm:$0xff] %v5069_v38 }
 0x103   : > { %v858_v43 = vpop.f32.mrf.mxu0  ;;  %vm1004_vm5 = vcmp.ge.f32.partialorder %v1002_v27, 0.0  ;;  %v1006_v24 = vmul.f32 0.2, %v1002_v27  ;;  %v988_v33 = vsel %vm984_vm4, %v982_v61, %v986_v29  ;;  %v5081_v49 = vsel %vm492_vm0, %v5069_v38, 0 }
 0x104   : > { %vm985_vm6 = vcmp.ge.f32.partialorder %v983_v39, 0.0  ;;  %v987_v60 = vmul.f32 0.2, %v983_v39  ;;  %v955_v41 = vadd.f32 %v4354_v40, %v877_v42  ;;  %v1106_v44 = vadd.f32 %v5021_v36, %v952_v34  ;;  %5814 = vst [vmem:[#allocation18_spill] sm:$0xff] %v5081_v49 }
 0x105   : > { %v875_v51 = vadd.f32 %v858_v43, %v794_v48  ;;  %v1008_v31 = vsel %vm1004_vm5, %v1002_v27, %v1006_v24  ;;  %v1184_v35 = vadd.f32 %v1182_v37, %v1175_v56  ;;  %v5064_v37 = vld [vmem:[%s5735_s4 + $0x4] sm:$0xf]  ;;  %v5091_v56 = vld [vmem:[%s5735_s4 + $0x8] sm:$0xf]  ;;  %v5817_v40 = vmov 0  }
 0x106   : > { %v989_v16 = vsel %vm985_vm6, %v983_v39, %v987_v60  ;;  %v1176_v45 = vadd.f32 %v5021_v36, %v955_v41  ;;  %v1115_v52 = vadd.f32 %v1113_v47, %v1106_v44  ;;  %v1009_v58 = vpack.c.bf16 %v1008_v31, %v1007_v30  ;;  %5812 = vst [vmem:[#allocation16_spill] sm:$0xff] %v5064_v37 }
 0x107   : > { %v990_v50 = vpack.c.bf16 %v989_v16, %v988_v33  ;;  %v953_v55 = vadd.f32 %v936_v7, %v875_v51  ;;  %v1188_v61 = vmul.f32 0.2, %v1184_v35  ;;  %vm1186_vm8 = vcmp.ge.f32.partialorder %v1184_v35, 0.0  ;;  %5816 = vst [vmem:[#allocation20_spill] sm:$0xff] %v5091_v56 }
 0x108   : > { %v1185_v59 = vadd.f32 %v1183_v0, %v1176_v45  ;;  %4358 = vmatmul.mubr.msk.bf16.vlgmr.msra.gmra.mxu0 %vm479_vm1, %v1009_v58  ;;  %v1119_v32 = vmul.f32 0.2, %v1115_v52  ;;  %vm1117_vm9 = vcmp.ge.f32.partialorder %v1115_v52, 0.0  ;;  %v5085_v39 = vsel %vm492_vm0, %v5064_v37, 0 }
 0x109   : > { %v1107_v54 = vadd.f32 %v5021_v36, %v953_v55  ;;  %4364 = vmatmul.mubr.msk.bf16.vlgmr.msra.gmra.mxu1 %vm479_vm1, %v990_v50  ;;  %4368 = vmatpush3.bf16.msra.mxu0 %v1130_v57  ;;  %5815 = vst [vmem:[#allocation19_spill] sm:$0xff] %v5085_v39  ;;  %v5105_v42 = vsel %vm492_vm0, %v5091_v56, 0 }
 0x10a   : > { %vm1187_vm7 = vcmp.ge.f32.partialorder %v1185_v59, 0.0  ;;  %v1189_v47 = vmul.f32 0.2, %v1185_v59  ;;  %4374 = vmatpush3.bf16.msra.mxu1 %v1199_v53  ;;  %4369 = vmatprep.mubr.msk.bf16.mxu0 %vm4772_vm2, %v5743_v25  ;;  %v1190_v53 = vsel %vm1186_vm8, %v1184_v35, %v1188_v61  ;;  %v1121_v63 = vsel %vm1117_vm9, %v1115_v52, %v1119_v32  ;;  %5818 = vst [vmem:[#allocation21_spill] sm:$0xff] %v5105_v42 }
 0x10b   : > { %v1116_v62 = vadd.f32 %v1114_v26, %v1107_v54  ;;  %4375 = vmatprep.mubr.msk.bf16.mxu1 %vm4772_vm2, %v5743_v25  ;;  %4697 = vmatprep.subr.msk.bf16.mxu0 %vm492_vm0, %v5064_v37 }
 0x10c   : > { %v1191_v48 = vsel %vm1187_vm7, %v1185_v59, %v1189_v47  ;;  %4698 = vmatprep.subr.msk.bf16.mxu1 %vm492_vm0, %v5069_v38 }
 0x10d   : > { %vm1118_vm10 = vcmp.ge.f32.partialorder %v1116_v62, 0.0  ;;  %v1120_v57 = vmul.f32 0.2, %v1116_v62  ;;  %v1192_v27 = vpack.c.bf16 %v1191_v48, %v1190_v53 }
 0x10f   : > { %v1122_v17 = vsel %vm1118_vm10, %v1116_v62, %v1120_v57 }
 0x110   : > { %v1123_v29 = vpack.c.bf16 %v1122_v17, %v1121_v63 }
 0x111   : > { %4376 = vmatmul.mubr.msk.bf16.vlgmr.msra.gmra.mxu1 %vm479_vm1, %v1192_v27 }
 0x112   : > { %4370 = vmatmul.mubr.msk.bf16.vlgmr.msra.gmra.mxu0 %vm479_vm1, %v1123_v29  ;;  %4390 = vmatpush3.bf16.msra.mxu1 %v5081_v49 }
 0x113   : > { %4380 = vmatpush3.bf16.msra.mxu0 %v5085_v39  ;;  %4381 = vmatprep.mubr.msk.bf16.mxu0 %vm479_vm1, %v4884_v9 }
 0x114   : > { %4391 = vmatprep.mubr.bf16.mxu1 %v5817_v40  ;;  %4699 = vmatprep.subr.msk.bf16.mxu0 %vm492_vm0, %v5091_v56 }
 0x115   : > { %4700 = vmatprep.subr.msk.bf16.mxu1 %vm492_vm0, %v4842_v2  ;;  %v5172_v2 = vld [vmem:[%s4877_s25 + $0x48] sm:$0xff]  }
 0x116   : > { %5820 = vst [vmem:[#allocation23_spill] sm:$0xff] %v5172_v2 }
 0x119   : > { %4392 = vmatmul.mubr.msk.bf16.vlgmr.msra.gmra.mxu1 %vm479_vm1, %v4884_v9  ;;  %v4023_v9 = vld [vmem:[%s5736_s5 + $0x10] sm:$0xf] }
 0x11a   : > { %4382 = vmatmul.mubr.msk.bf16.vlgmr.msra.gmra.mxu0 %vm479_vm1, %v4894_v11  ;;  %4395 = vmatprep.mubr.msk.bf16.mxu1 %vm479_vm1, %v4894_v11 }
 0x11b   : > { %4400 = vmatpush3.bf16.msra.mxu0 %v5105_v42  ;;  %4385 = vmatprep.mubr.msk.bf16.mxu0 %vm479_vm1, %v4905_v13 }
 0x11c   : > { %4410 = vmatpush3.bf16.msra.mxu1 %v4854_v4  ;;  %4701 = vmatprep.subr.msk.bf16.mxu0 %vm492_vm0, %v4837_v1  ;;  %v5163_v1 = vld [vmem:[%s4877_s25 + $0x40] sm:$0xff]  }
 0x11d   : > { %4702 = vmatprep.subr.msk.bf16.mxu1 %vm492_vm0, %v4859_v5  ;;  %5819 = vst [vmem:[#allocation22_spill] sm:$0xff] %v5163_v1  ;;  %v5175_v5 = vld [vmem:[%s4877_s25 + $0x50] sm:$0xff]  }
 0x11e   : > { %5821 = vst [vmem:[#allocation24_spill] sm:$0xff] %v5175_v5 }
 0x121   : > { %4396 = vmatmul.mubr.msk.bf16.gmra.mxu1 %vm479_vm1, %v4905_v13 }
 0x122   : > { %4386 = vmatmul.mubr.msk.bf16.gmra.mxu0 %vm479_vm1, %v4931_v15  ;;  %4411 = vmatprep.mubr.bf16.mxu1 %v5817_v40 }
 0x123   : > { %4401 = vmatprep.mubr.msk.bf16.mxu0 %vm479_vm1, %v4894_v11  ;;  %v4029_v11 = vld [vmem:[%s5736_s5 + $0x18] sm:$0xf] }
 0x129   : > { %4412 = vmatmul.mubr.msk.bf16.vlgmr.msra.gmra.mxu1 %vm479_vm1, %v4941_v18 }
 0x12a   : > { %4402 = vmatmul.mubr.msk.bf16.vlgmr.msra.gmra.mxu0 %vm479_vm1, %v4905_v13  ;;  %4415 = vmatprep.mubr.msk.bf16.mxu1 %vm479_vm1, %v4948_v20  ;;  %v2073_v13 = vsel %vm492_vm0, %v4029_v11, 0 }
 0x12b   : > { %4420 = vmatpush3.bf16.msra.mxu0 %v4850_v3  ;;  %4405 = vmatprep.mubr.msk.bf16.mxu0 %vm479_vm1, %v4931_v15 }
 0x12c   : > { %4430 = vmatpush3.bf16.msra.mxu1 %v4898_v12  ;;  %4703 = vmatprep.subr.msk.bf16.mxu0 %vm492_vm0, %v4866_v6  ;;  %v5188_v6 = vld [vmem:[%s4877_s25 + $0x58] sm:$0xff]  }
 0x12d   : > { %4704 = vmatprep.subr.msk.bf16.mxu1 %vm492_vm0, %v4889_v10  ;;  %5822 = vst [vmem:[#allocation25_spill] sm:$0xff] %v5188_v6  ;;  %v1935_v10 = vsel %vm492_vm0, %v4023_v9, 0 }
 0x131   : > { %4416 = vmatmul.mubr.msk.bf16.gmra.mxu1 %vm479_vm1, %v4965_v22 }
 0x132   : > { %4406 = vmatmul.mubr.bf16.gmra.mxu0 %v5817_v40  ;;  %4431 = vmatprep.mubr.msk.bf16.mxu1 %vm479_vm1, %v4948_v20 }
 0x133   : > { %4421 = vmatprep.mubr.msk.bf16.mxu0 %vm479_vm1, %v4941_v18 }
 0x139   : > { %4432 = vmatmul.mubr.msk.bf16.vlgmr.msra.gmra.mxu1 %vm479_vm1, %v4965_v22 }
 0x13a   : > { %4422 = vmatmul.mubr.msk.bf16.vlgmr.msra.gmra.mxu0 %vm479_vm1, %v4948_v20  ;;  %4435 = vmatprep.mubr.msk.bf16.mxu1 %vm479_vm1, %v4975_v23 }
 0x13b   : > { %4440 = vmatpush3.bf16.msra.mxu0 %v4881_v8  ;;  %4425 = vmatprep.mubr.msk.bf16.mxu0 %vm479_vm1, %v4965_v22 }
 0x13c   : > { %4450 = vmatpush3.bf16.msra.mxu1 %v4952_v21  ;;  %4705 = vmatprep.subr.msk.bf16.mxu0 %vm492_vm0, %v4914_v14 }
 0x13d   : > { %4469 = vmatprep.subr.bf16.mxu1 %v5743_v25 }
 0x141   : > { %4436 = vmatmul.mubr.bf16.gmra.mxu1 %v5817_v40 }
 0x142   : > { %4426 = vmatmul.mubr.msk.bf16.gmra.mxu0 %vm479_vm1, %v4975_v23  ;;  %4451 = vmatprep.mubr.msk.bf16.mxu1 %vm479_vm1, %v5163_v1 }
 0x143   : > { %4441 = vmatprep.mubr.bf16.mxu0 %v5817_v40 }
 0x149   : > { %4452 = vmatmul.mubr.msk.bf16.vlgmr.msra.gmra.mxu1 %vm479_vm1, %v5172_v2 }
 0x14a   : > { %4442 = vmatmul.mubr.msk.bf16.vlgmr.msra.gmra.mxu0 %vm479_vm1, %v5163_v1  ;;  %4455 = vmatprep.mubr.msk.bf16.mxu1 %vm479_vm1, %v5175_v5 }
 0x14b   : > { %4460 = vmatpush3.bf16.msra.mxu0 %v4945_v19  ;;  %4445 = vmatprep.mubr.msk.bf16.mxu0 %vm479_vm1, %v5172_v2 }
 0x14c   : > { %4481 = vmatprep.subr.bf16.mxu0 %v5743_v25  ;;  %4470 = vmatpush3.bf16.msra.mxu1 %v1935_v10 }
 0x14d   : > { %4475 = vmatprep.subr.bf16.mxu1 %v5743_v25 }
 0x151   : > { %4456 = vmatmul.mubr.msk.bf16.gmra.mxu1 %vm479_vm1, %v5188_v6 }
 0x152   : > { %4446 = vmatmul.mubr.msk.bf16.gmra.mxu0 %vm479_vm1, %v5175_v5  ;;  %4471 = vmatprep.mubr.msk.bf16.mxu1 %vm4772_vm2, %v5743_v25 }
 0x153   : > { %4461 = vmatprep.mubr.msk.bf16.mxu0 %vm479_vm1, %v5172_v2 }
 0x15a   : > { %4462 = vmatmul.mubr.msk.bf16.vlgmr.msra.gmra.mxu0 %vm479_vm1, %v5175_v5 }
 0x15b   : > { %4465 = vmatprep.mubr.msk.bf16.mxu0 %vm479_vm1, %v5188_v6  ;;  %4482 = vmatpush3.bf16.msra.mxu0 %v2073_v13 }
 0x15c   : > { %4706 = vmatprep.subr.msk.bf16.mxu0 %vm492_vm0, %v5064_v37 }
 0x162   : > { %4466 = vmatmul.mubr.bf16.gmra.mxu0 %v5817_v40 }
 0x163   : > { %4483 = vmatprep.mubr.msk.bf16.mxu0 %vm4772_vm2, %v5743_v25 }
 0x1c8   : > { %v1052_v14 = vpop.f32.mrf.mxu0 }
 0x1c9   : > { %v1099_v15 = vpop.f32.mrf.mxu1 }
 0x1ca   : > { %v1100_v34 = vadd.f32 %v1099_v15, %v1052_v14  ;;  %v4359_v43 = vpop.f32.mrf.mxu0 }
 0x1cb   : > { %v4365_v24 = vpop.f32.mrf.mxu1 }
 0x1cc   : > { %v1055_v60 = vpop.f32.mrf.mxu0 }
 0x1cd   : > { %v1102_v41 = vpop.f32.mrf.mxu1 }
 0x1ce   : > { %v1103_v0 = vadd.f32 %v1102_v41, %v1055_v60  ;;  %v4360_v44 = vpop.f32.mrf.mxu0 }
 0x1cf   : > { %v4366_v51 = vpop.f32.mrf.mxu1 }
 0x1d1   : > { %v1235_v30 = vpop.f32.mrf.mxu1 }
 0x1d2   : > { %v1166_v31 = vpop.f32.mrf.mxu0 }
 0x1d3   : > { %v1173_v33 = vadd.f32 %v1166_v31, %v1100_v34  ;;  %v4377_v16 = vpop.f32.mrf.mxu1 }
 0x1d4   : > { %v4371_v35 = vpop.f32.mrf.mxu0 }
 0x1d5   : > { %v5216_v45 = vadd.f32 %v1235_v30, %v1173_v33  ;;  %v1238_v7 = vpop.f32.mrf.mxu1 }
 0x1d6   : > { %v1169_v50 = vpop.f32.mrf.mxu0 }
 0x1d7   : > { %5823 = vst [vmem:[#allocation26_spill] sm:$0xff] %v5216_v45  ;;  %v1174_v52 = vadd.f32 %v1169_v50, %v1103_v0  ;;  %v4378_v55 = vpop.f32.mrf.mxu1 }
 0x1d8   : > { %v4372_v58 = vpop.f32.mrf.mxu0 }
 0x1d9   : > { %v5218_v59 = vadd.f32 %v1238_v7, %v1174_v52  ;;  %v4393_v54 = vpop.f32.mrf.mxu1 }
 0x1da   : > { %v4383_v26 = vpop.f32.mrf.mxu0 }
 0x1db   : > { %5824 = vst [vmem:[#allocation27_spill] sm:$0xff] %v5218_v59  ;;  %v1352_v61 = vpop.f32.mrf.mxu1  ;;  %v1361_v2 = vadd.f32 %v4393_v54, %v4383_v26 }
 0x1dc   : > { %v1284_v47 = vpop.f32.mrf.mxu0 }
 0x1dd   : > { %v4394_v32 = vpop.f32.mrf.mxu1  ;;  %v1353_v3 = vadd.f32 %v1352_v61, %v1284_v47 }
 0x1de   : > { %v4384_v62 = vpop.f32.mrf.mxu0 }
 0x1df   : > { %v1355_v48 = vpop.f32.mrf.mxu1  ;;  %v1364_v22 = vadd.f32 %v4394_v32, %v4384_v62 }
 0x1e0   : > { %v1287_v57 = vpop.f32.mrf.mxu0 }
 0x1e1   : > { %v4397_v53 = vpop.f32.mrf.mxu1  ;;  %v1356_v18 = vadd.f32 %v1355_v48, %v1287_v57 }
 0x1e2   : > { %v4387_v63 = vpop.f32.mrf.mxu0 }
 0x1e3   : > { %v1368_v17 = vpop.f32.mrf.mxu1 }
 0x1e4   : > { %v1300_v27 = vpop.f32.mrf.mxu0 }
 0x1e5   : > { %v4398_v29 = vpop.f32.mrf.mxu1 }
 0x1e6   : > { %v4388_v9 = vpop.f32.mrf.mxu0 }
 0x1e7   : > { %v1371_v10 = vpop.f32.mrf.mxu1 }
 0x1e8   : > { %v1303_v11 = vpop.f32.mrf.mxu0 }
 0x1e9   : > { %v4413_v13 = vpop.f32.mrf.mxu1  ;;  %v1372_v47 = vadd.f32 %v1371_v10, %v1303_v11  ;;  %v4025_v10 = vld [vmem:[%s5733_s2 + $0x5] ss:$0 sm:$0xff] }
 0x1ea   : > { %v4403_v14 = vpop.f32.mrf.mxu0 }
 0x1eb   : > { %v1495_v15 = vpop.f32.mrf.mxu1  ;;  %v1455_v4 = vadd.f32 %v4403_v14, %v1361_v2  ;;  %v1380_v2 = vadd.f32 %v4398_v29, %v4388_v9 }
 0x1ec   : > { %v1422_v34 = vpop.f32.mrf.mxu0 }
 0x1ed   : > { %v4414_v43 = vpop.f32.mrf.mxu1  ;;  %v1453_v49 = vadd.f32 %v1422_v34, %v1353_v3  ;;  %v1528_v38 = vadd.f32 %v4413_v13, %v1455_v4 }
 0x1ee   : > { %v4404_v24 = vpop.f32.mrf.mxu0 }
 0x1ef   : > { %v1498_v60 = vpop.f32.mrf.mxu1  ;;  %v1456_v56 = vadd.f32 %v4404_v24, %v1364_v22  ;;  %v1526_v36 = vadd.f32 %v1495_v15, %v1453_v49 }
 0x1f0   : > { %v1425_v41 = vpop.f32.mrf.mxu0 }
 0x1f1   : > { %v4417_v0 = vpop.f32.mrf.mxu1  ;;  %v1454_v54 = vadd.f32 %v1425_v41, %v1356_v18  ;;  %v1529_v46 = vadd.f32 %v4414_v43, %v1456_v56 }
 0x1f2   : > { %v4407_v44 = vpop.f32.mrf.mxu0 }
 0x1f3   : > { %v1511_v51 = vpop.f32.mrf.mxu1  ;;  %v1527_v22 = vadd.f32 %v1498_v60, %v1454_v54 }
 0x1f4   : > { %v1438_v30 = vpop.f32.mrf.mxu0 }
 0x1f5   : > { %v5220_v31 = vpop.f32.mrf.mxu1 }
 0x1f6   : > { %v4408_v33 = vpop.f32.mrf.mxu0 }
 0x1f7   : > { %v1514_v16 = vpop.f32.mrf.mxu1  ;;  %v1460_v48 = vadd.f32 %v4408_v33, %v1380_v2  ;;  %v4028_v2 = vld [vmem:[%s5733_s2 + $0x6] ss:$0 sm:$0xff] }
 0x1f8   : > { %v1441_v35 = vpop.f32.mrf.mxu0 }
 0x1f9   : > { %v4433_v7 = vpop.f32.mrf.mxu1  ;;  %v1458_v57 = vadd.f32 %v1441_v35, %v1372_v47 }
 0x1fa   : > { %v4423_v50 = vpop.f32.mrf.mxu0 }
 0x1fb   : > { %v1641_v52 = vpop.f32.mrf.mxu1  ;;  %v1531_v29 = vadd.f32 %v1514_v16, %v1458_v57 }
 0x1fc   : > { %v1568_v55 = vpop.f32.mrf.mxu0 }
 0x1fd   : > { %v4434_v58 = vpop.f32.mrf.mxu1  ;;  %v1599_v61 = vadd.f32 %v1568_v55, %v1526_v36 }
 0x1fe   : > { %v4424_v25 = vpop.f32.mrf.mxu0 }
 0x1ff   : > { %v1644_v59 = vpop.f32.mrf.mxu1  ;;  %v1602_v4 = vadd.f32 %v4424_v25, %v1529_v46  ;;  %v1672_v49 = vadd.f32 %v1641_v52, %v1599_v61 }
 0x200   : > { %v1571_v45 = vpop.f32.mrf.mxu0 }
 0x201   : > { %v5222_v37 = vpop.f32.mrf.mxu1  ;;  %v1600_v18 = vadd.f32 %v1571_v45, %v1527_v22  ;;  %v1675_v36 = vadd.f32 %v4434_v58, %v1602_v4 }
 0x202   : > { %v4427_v19 = vpop.f32.mrf.mxu0 }
 0x203   : > { %v5224_v21 = vpop.f32.mrf.mxu1 }
 0x204   : > { %5825 = vst [vmem:[#allocation28_spill] sm:$0xff] %v5224_v21  ;;  %v1584_v6 = vpop.f32.mrf.mxu0  ;;  %v1377_v21 = vadd.f32 %v4397_v53, %v4387_v63 }
 0x205   : > { %v5226_v8 = vpop.f32.mrf.mxu1 }
 0x206   : > { %5826 = vst [vmem:[#allocation29_spill] sm:$0xff] %v5226_v8  ;;  %v4428_v5 = vpop.f32.mrf.mxu0  ;;  %v1601_v8 = vadd.f32 %v4423_v50, %v1528_v38  ;;  %v1459_v14 = vadd.f32 %v4407_v44, %v1377_v21  ;;  %v1533_v21 = vadd.f32 %v5220_v31, %v1460_v48 }
 0x207   : > { %v5228_v12 = vpop.f32.mrf.mxu1 }
 0x208   : > { %5827 = vst [vmem:[#allocation30_spill] sm:$0xff] %v5228_v12  ;;  %v1587_v1 = vpop.f32.mrf.mxu0  ;;  %v1369_v12 = vadd.f32 %v1368_v17, %v1300_v27  ;;  %v1674_v34 = vadd.f32 %v4433_v7, %v1601_v8  ;;  %v1532_v53 = vadd.f32 %v4417_v0, %v1459_v14  ;;  %v1606_v11 = vadd.f32 %v4428_v5, %v1533_v21  ;;  %v5828_v0 = vld [vmem:[#allocation13_spill] sm:$0xff]  ;;  %v4031_v7 = vld [vmem:[%s5733_s2 + $0x7] ss:$0 sm:$0xff] }
 0x209   : > { %v4453_v23 = vpop.f32.mrf.mxu1  ;;  %v1604_v45 = vadd.f32 %v1587_v1, %v1531_v29  ;;  %v4022_v1 = vld [vmem:[%s5733_s2 + $0x4] ss:$0 sm:$0xff] }
 0x20a   : > { %v4443_v40 = vpop.f32.mrf.mxu0  ;;  %v1457_v62 = vadd.f32 %v1438_v30, %v1369_v12  ;;  %v1605_v9 = vadd.f32 %v4427_v19, %v1532_v53  ;;  %v1987_v19 = vmul.f32 %v4025_v10, %v5828_v0  ;;  %v2056_v53 = vmul.f32 %v4028_v2, %v5828_v0 }
 0x20b   : > { %v1799_v42 = vpop.f32.mrf.mxu1  ;;  %v1756_v38 = vadd.f32 %v4443_v40, %v1674_v34  ;;  %v1673_v40 = vadd.f32 %v1644_v59, %v1600_v18  ;;  %v2125_v34 = vmul.f32 %v4031_v7, %v5828_v0 }
 0x20c   : > { %v1723_v20 = vpop.f32.mrf.mxu0  ;;  %v1530_v56 = vadd.f32 %v1511_v51, %v1457_v62  ;;  %v5830_v51 = vld [vmem:[#allocation14_spill] sm:$0xff] }
 0x20d   : > { %v4454_v28 = vpop.f32.mrf.mxu1  ;;  %v1754_v27 = vadd.f32 %v1723_v20, %v1672_v49  ;;  %v1832_v25 = vadd.f32 %v4453_v23, %v1756_v38  ;;  %v1678_v20 = vadd.f32 %v5222_v37, %v1605_v9  ;;  %v5831_v5 = vld [vmem:[#allocation29_spill] sm:$0xff] }
 0x20e   : > { %v4444_v39 = vpop.f32.mrf.mxu0  ;;  %v1603_v8 = vadd.f32 %v1584_v6, %v1530_v56  ;;  %v5829_v6 = vld [vmem:[#allocation28_spill] sm:$0xff]  ;;  %v1679_v59 = vadd.f32 %v5831_v5, %v1606_v11 }
 0x20f   : > { %v1802_v3 = vpop.f32.mrf.mxu1  ;;  %v1757_v46 = vadd.f32 %v4444_v39, %v1675_v36  ;;  %v1830_v24 = vadd.f32 %v1799_v42, %v1754_v27  ;;  %v5832_v42 = vld [vmem:[#allocation30_spill] sm:$0xff] }
 0x210   : > { %v1726_v26 = vpop.f32.mrf.mxu0  ;;  %v1676_v23 = vadd.f32 %v5829_v6, %v1603_v8  ;;  %v1677_v33 = vadd.f32 %v5832_v42, %v1604_v45 }
 0x211   : > { %v4457_v63 = vpop.f32.mrf.mxu1  ;;  %v1755_v41 = vadd.f32 %v1726_v26, %v1673_v40  ;;  %v1833_v39 = vadd.f32 %v4454_v28, %v1757_v46  ;;  %v1918_v26 = vmul.f32 %v4022_v1, %v5828_v0 }
 0x212   : > { %v4447_v32 = vpop.f32.mrf.mxu0 }
 0x213   : > { %v1815_v15 = vpop.f32.mrf.mxu1  ;;  %v1760_v16 = vadd.f32 %v4447_v32, %v1678_v20  ;;  %v1831_v58 = vadd.f32 %v1802_v3, %v1755_v41  ;;  %v5833_v32 = vld [vmem:[#allocation15_spill] sm:$0xff] }
 0x214   : > { %v1739_v13 = vpop.f32.mrf.mxu0  ;;  %v1988_v62 = vmul.f32 %v4025_v10, %v5833_v32  ;;  %v1919_v56 = vmul.f32 %v4022_v1, %v5833_v32  ;;  %v2126_v41 = vmul.f32 %v4031_v7, %v5833_v32 }
 0x215   : > { %v4458_v37 = vpop.f32.mrf.mxu1  ;;  %v1758_v50 = vadd.f32 %v1739_v13, %v1676_v23  ;;  %v1836_v4 = vadd.f32 %v4457_v63, %v1760_v16 }
 0x216   : > { %v4448_v17 = vpop.f32.mrf.mxu0 }
 0x217   : > { %v1761_v54 = vadd.f32 %v4448_v17, %v1679_v59  ;;  %v1818_v22 = vpop.f32.mrf.mxu1  ;;  %v1834_v49 = vadd.f32 %v1815_v15, %v1758_v50  ;;  %v2057_v59 = vmul.f32 %v4028_v2, %v5833_v32  ;;  %v5837_v2 = vld [vmem:[#allocation20_spill] sm:$0xff] }
 0x218   : > { %v1742_v12 = vpop.f32.mrf.mxu0 }
 0x219   : > { %v1759_v47 = vadd.f32 %v1742_v12, %v1677_v33  ;;  %v1837_v18 = vadd.f32 %v4458_v37, %v1761_v54  ;;  %v5834_v37 = vmov 0.0  }
 0x21a   : > { %v4463_v43 = vpop.f32.mrf.mxu0 }
 0x21b   : > { %v1905_v60 = vadd.f32 %v4463_v43, %v1832_v25  ;;  %v1835_v21 = vadd.f32 %v1818_v22, %v1759_v47  ;;  %v5838_v47 = vld [vmem:[#allocation17_spill] sm:$0xff]  ;;  %v5843_v22 = vmov 0  }
 0x21c   : > { %v1872_v44 = vpop.f32.mrf.mxu0 }
 0x21d   : > { %v1980_v30 = vadd.f32 %v5830_v51, %v1905_v60  ;;  %v1903_v31 = vadd.f32 %v1872_v44, %v1830_v24  ;;  %v4026_v60 = vld [vmem:[%s5736_s5 + $0x14] sm:$0xf] }
 0x21e   : > { %v4464_v35 = vpop.f32.mrf.mxu0  ;;  %v2004_v1 = vsel %vm492_vm0, %v4026_v60, 0  ;;  %v5863_v60 = vld [vmem:[#allocation26_spill] sm:$0xff] }
 0x21f   : > { %v1989_v28 = vadd.f32 %v1987_v19, %v1980_v30  ;;  %v1911_v52 = vadd.f32 %v5830_v51, %v1903_v31  ;;  %v1906_v55 = vadd.f32 %v4464_v35, %v1833_v39 }
 0x220   : > { %v1875_v61 = vpop.f32.mrf.mxu0 }
 0x221   : > { %v1981_v14 = vadd.f32 %v5830_v51, %v1906_v55  ;;  %v1993_v48 = vmul.f32 0.2, %v1989_v28  ;;  %v1920_v57 = vadd.f32 %v1918_v26, %v1911_v52  ;;  %v1904_v3 = vadd.f32 %v1875_v61, %v1831_v58  ;;  %v5835_v26 = vld [vmem:[#allocation19_spill] sm:$0xff] }
 0x222   : > { %v4467_v13 = vpop.f32.mrf.mxu0  ;;  %vm1991_vm11 = vcmp.ge.f32.partialorder %v1989_v28, 0.0  ;;  %v5836_v61 = vld [vmem:[#allocation7_spill] sm:$0xff] }
 0x223   : > { %v1990_v38 = vadd.f32 %v1988_v62, %v1981_v14  ;;  %v1912_v17 = vadd.f32 %v5830_v51, %v1904_v3  ;;  %v1909_v36 = vadd.f32 %v4467_v13, %v1836_v4  ;;  %v1995_v9 = vsel %vm1991_vm11, %v1989_v28, %v1993_v48  ;;  %v4032_v28 = vld [vmem:[%s5736_s5 + $0x1c] sm:$0xf]  ;;  %v5839_v14 = vld [vmem:[#allocation9_spill] sm:$0xff]  ;;  %v5842_v4 = vld [vmem:[#allocation11_spill] sm:$0xff] }
 0x224   : > { %v1888_v27 = vpop.f32.mrf.mxu0  ;;  %v1924_v12 = vmul.f32 0.2, %v1920_v57  ;;  %vm1922_vm13 = vcmp.ge.f32.partialorder %v1920_v57, 0.0  ;;  %v2142_v54 = vsel %vm492_vm0, %v4032_v28, 0  ;;  %v5840_v62 = vld [vmem:[#allocation21_spill] sm:$0xff]  ;;  %v5846_v3 = vld [vmem:[#allocation12_spill] sm:$0xff] }
 0x225   : > { %vm1992_vm12 = vcmp.ge.f32.partialorder %v1990_v38, 0.0  ;;  %v1994_v63 = vmul.f32 0.2, %v1990_v38  ;;  %v1907_v29 = vadd.f32 %v1888_v27, %v1834_v49  ;;  %v1921_v8 = vadd.f32 %v1919_v56, %v1912_v17  ;;  %v5297_v48 = vld [vmem:[%s5735_s4 + $0xc] sm:$0xf]  ;;  %v5851_v17 = vld [vmem:[#allocation6_spill] sm:$0xff] }
 0x226   : > { %v2118_v25 = vadd.f32 %v5830_v51, %v1909_v36  ;;  %v4468_v46 = vpop.f32.mrf.mxu0  ;;  %v1926_v44 = vsel %vm1922_vm13, %v1920_v57, %v1924_v12  ;;  %5844 = vst [vmem:[#allocation13_spill] sm:$0xff] %v5297_v48  ;;  %v5304_v57 = vld [vmem:[%s5735_s4 + $0x10] sm:$0xf]  ;;  %v5320_v49 = vld [vmem:[%s5735_s4 + $0x14] sm:$0xf]  ;;  %v5852_v56 = vld [vmem:[#allocation23_spill] sm:$0xff] }
 0x227   : > { %v1996_v10 = vsel %vm1992_vm12, %v1990_v38, %v1994_v63  ;;  %v2049_v40 = vadd.f32 %v5830_v51, %v1907_v29  ;;  %v1910_v11 = vadd.f32 %v4468_v46, %v1837_v18  ;;  %vm1923_vm14 = vcmp.ge.f32.partialorder %v1921_v8, 0.0  ;;  %5845 = vst [vmem:[#allocation28_spill] sm:$0xff] %v5304_v57  ;;  %v5847_v13 = vld [vmem:[#allocation4_spill] sm:$0xff]  ;;  %5848 = vst [vmem:[#allocation14_spill] sm:$0xff] %v5320_v49  ;;  %v5849_v38 = vld [vmem:[#allocation3_spill] sm:$0xff] }
 0x228   : > { %v1997_v45 = vpack.c.bf16 %v1996_v10, %v1995_v9  ;;  %v1925_v15 = vmul.f32 0.2, %v1921_v8  ;;  %v2127_v43 = vadd.f32 %v2125_v34, %v2118_v25  ;;  %v1891_v24 = vpop.f32.mrf.mxu0  ;;  %v5841_v34 = vld [vmem:[#allocation18_spill] sm:$0xff]  ;;  %v5853_v27 = vld [vmem:[#allocation24_spill] sm:$0xff]  ;;  %v5855_v29 = vld [vmem:[#allocation25_spill] sm:$0xff] }
 0x229   : > { %v2119_v20 = vadd.f32 %v5830_v51, %v1910_v11  ;;  %v1908_v19 = vadd.f32 %v1891_v24, %v1835_v21  ;;  %v2058_v23 = vadd.f32 %v2056_v53, %v2049_v40  ;;  %v4752_v53 = vld [vmem:[%s5735_s4 + $0x18] sm:$0xf]  ;;  %v4753_v36 = vld [vmem:[%s5735_s4 + $0x1c] sm:$0xf]  ;;  %v4754_v63 = vld [vmem:[%s5735_s4 + $0x20] sm:$0xf] }
 0x22a   : > { %v1927_v6 = vsel %vm1923_vm14, %v1921_v8, %v1925_v15  ;;  %v2131_v30 = vmul.f32 0.2, %v2127_v43  ;;  %vm2129_vm15 = vcmp.ge.f32.partialorder %v2127_v43, 0.0  ;;  %v5850_v18 = vld [vmem:[#allocation22_spill] sm:$0xff]  ;;  %v5854_v21 = vld [vmem:[#allocation5_spill] sm:$0xff]  ;;  %v5374_v8 = vld [vmem:[%s4877_s25 + $0x68] sm:$0xff]  }
 0x22b   : > { %v1928_v39 = vpack.c.bf16 %v1927_v6, %v1926_v44  ;;  %v2128_v31 = vadd.f32 %v2126_v41, %v2119_v20  ;;  %v2050_v5 = vadd.f32 %v5830_v51, %v1908_v19  ;;  %v2062_v33 = vmul.f32 0.2, %v2058_v23  ;;  %v5856_v9 = vld [vmem:[#allocation10_spill] sm:$0xff]  ;;  %5858 = vst [vmem:[#allocation30_spill] sm:$0xff] %v5374_v8  ;;  %v5859_v25 = vld [vmem:[#allocation8_spill] sm:$0xff]  ;;  %v5864_v44 = vld [vmem:[#allocation27_spill] sm:$0xff] }
 0x22c   : > { %v2133_v35 = vsel %vm2129_vm15, %v2127_v43, %v2131_v30  ;;  %vm2060_vm4 = vcmp.ge.f32.partialorder %v2058_v23, 0.0  ;;  %v5371_v12 = vld [vmem:[%s4877_s25 + $0x60] sm:$0xff]   ;;  %v5386_v46 = vld [vmem:[%s4877_s25 + $0x70] sm:$0xff]   ;;  %v5397_v10 = vld [vmem:[%s4877_s25 + $0x78] sm:$0xff]  }
 0x22d   : > { %vm2130_vm3 = vcmp.ge.f32.partialorder %v2128_v31, 0.0  ;;  %v2132_v42 = vmul.f32 0.2, %v2128_v31  ;;  %4472 = vmatmul.mubr.msk.bf16.vlgmr.msra.gmra.mxu1 %vm479_vm1, %v1928_v39  ;;  %v2059_v16 = vadd.f32 %v2057_v59, %v2050_v5  ;;  %v2064_v52 = vsel %vm2060_vm4, %v2058_v23, %v2062_v33  ;;  %5857 = vst [vmem:[#allocation29_spill] sm:$0xff] %v5371_v12  ;;  %5860 = vst [vmem:[#allocation15_spill] sm:$0xff] %v5386_v46  ;;  %v5862_v43 = vld [vmem:[#allocation16_spill] sm:$0xff] }
 0x22e   : > { %4476 = vmatpush3.bf16.msra.mxu1 %v2004_v1  ;;  %4477 = vmatprep.mubr.msk.bf16.mxu1 %vm4772_vm2, %v5834_v37  ;;  %5861 = vst [vmem:[#allocation7_spill] sm:$0xff] %v5397_v10  ;;  %v4065_v40 = vld [vmem:[%s5736_s5 + $0x20] sm:$0xf] }
 0x22f   : > { %v2134_v7 = vsel %vm2130_vm3, %v2128_v31, %v2132_v42  ;;  %4487 = vmatprep.subr.bf16.mxu1 %v5834_v37  ;;  %vm2061_vm5 = vcmp.ge.f32.partialorder %v2059_v16, 0.0  ;;  %v2063_v51 = vmul.f32 0.2, %v2059_v16  ;;  %v2864_v11 = vsel %vm492_vm0, %v4065_v40, 0 }
 0x230   : > { %v2135_v50 = vpack.c.bf16 %v2134_v7, %v2133_v35 }
 0x231   : > { %v2065_v55 = vsel %vm2061_vm5, %v2059_v16, %v2063_v51 }
 0x232   : > { %v2066_v58 = vpack.c.bf16 %v2065_v55, %v2064_v52 }
 0x234   : > { %4484 = vmatmul.mubr.msk.bf16.vlgmr.msra.gmra.mxu0 %vm479_vm1, %v2066_v58 }
 0x235   : > { %4478 = vmatmul.mubr.msk.bf16.vlgmr.msra.gmra.mxu1 %vm479_vm1, %v1997_v45  ;;  %4494 = vmatpush3.bf16.msra.mxu0 %v5835_v26  ;;  %v4071_v45 = vld [vmem:[%s5736_s5 + $0x28] sm:$0xf] }
 0x236   : > { %4488 = vmatpush3.bf16.msra.mxu1 %v2142_v54  ;;  %4489 = vmatprep.mubr.msk.bf16.mxu1 %vm4772_vm2, %v5834_v37  ;;  %v3002_v15 = vsel %vm492_vm0, %v4071_v45, 0 }
 0x237   : > { %4495 = vmatprep.mubr.msk.bf16.mxu0 %vm479_vm1, %v5836_v61  ;;  %4708 = vmatprep.subr.msk.bf16.mxu0 %vm492_vm0, %v5837_v2 }
 0x238   : > { %4707 = vmatprep.subr.msk.bf16.mxu1 %vm492_vm0, %v5838_v47 }
 0x23c   : > { %4496 = vmatmul.mubr.msk.bf16.vlgmr.msra.gmra.mxu0 %vm479_vm1, %v5839_v14 }
 0x23d   : > { %4490 = vmatmul.mubr.msk.bf16.vlgmr.msra.gmra.mxu1 %vm479_vm1, %v2135_v50  ;;  %4514 = vmatpush3.bf16.msra.mxu0 %v5840_v62  ;;  %v5480_v62 = vld [vmem:[%s5733_s2 + $0x9] ss:$0 sm:$0xff] }
 0x23e   : > { %4504 = vmatpush3.bf16.msra.mxu1 %v5841_v34  ;;  %4499 = vmatprep.mubr.msk.bf16.mxu0 %vm479_vm1, %v5842_v4 }
 0x23f   : > { %4505 = vmatprep.mubr.bf16.mxu1 %v5843_v22  ;;  %4709 = vmatprep.subr.msk.bf16.mxu1 %vm492_vm0, %v5297_v48 }
 0x240   : > { %4710 = vmatprep.subr.msk.bf16.mxu0 %vm492_vm0, %v5304_v57 }
 0x244   : > { %4500 = vmatmul.mubr.msk.bf16.gmra.mxu0 %vm479_vm1, %v5846_v3 }
 0x245   : > { %4506 = vmatmul.mubr.msk.bf16.vlgmr.msra.gmra.mxu1 %vm479_vm1, %v5836_v61  ;;  %4515 = vmatprep.mubr.msk.bf16.mxu0 %vm479_vm1, %v5839_v14 }
 0x246   : > { %4524 = vmatpush3.bf16.msra.mxu1 %v5847_v13  ;;  %4509 = vmatprep.mubr.msk.bf16.mxu1 %vm479_vm1, %v5839_v14 }
 0x247   : > { %4711 = vmatprep.subr.msk.bf16.mxu1 %vm492_vm0, %v5320_v49 }
 0x24c   : > { %4516 = vmatmul.mubr.msk.bf16.vlgmr.msra.gmra.mxu0 %vm479_vm1, %v5842_v4 }
 0x24d   : > { %4510 = vmatmul.mubr.msk.bf16.gmra.mxu1 %vm479_vm1, %v5842_v4  ;;  %4534 = vmatpush3.bf16.msra.mxu0 %v5849_v38 }
 0x24e   : > { %4519 = vmatprep.mubr.msk.bf16.mxu0 %vm479_vm1, %v5846_v3  ;;  %4525 = vmatprep.mubr.bf16.mxu1 %v5843_v22 }
 0x24f   : > { %4712 = vmatprep.subr.msk.bf16.mxu0 %vm492_vm0, %v4752_v53 }
 0x254   : > { %4520 = vmatmul.mubr.bf16.gmra.mxu0 %v5843_v22 }
 0x255   : > { %4526 = vmatmul.mubr.msk.bf16.vlgmr.msra.gmra.mxu1 %vm479_vm1, %v5850_v18  ;;  %4535 = vmatprep.mubr.msk.bf16.mxu0 %vm479_vm1, %v5850_v18 }
 0x256   : > { %4544 = vmatpush3.bf16.msra.mxu1 %v5851_v17  ;;  %4529 = vmatprep.mubr.msk.bf16.mxu1 %vm479_vm1, %v5852_v56 }
 0x257   : > { %4713 = vmatprep.subr.msk.bf16.mxu1 %vm492_vm0, %v4753_v36 }
 0x25c   : > { %4536 = vmatmul.mubr.msk.bf16.vlgmr.msra.gmra.mxu0 %vm479_vm1, %v5852_v56 }
 0x25d   : > { %4530 = vmatmul.mubr.msk.bf16.gmra.mxu1 %vm479_vm1, %v5853_v27  ;;  %4554 = vmatpush3.bf16.msra.mxu0 %v5854_v21 }
 0x25e   : > { %4539 = vmatprep.mubr.msk.bf16.mxu0 %vm479_vm1, %v5853_v27  ;;  %4545 = vmatprep.mubr.msk.bf16.mxu1 %vm479_vm1, %v5852_v56 }
 0x25f   : > { %4714 = vmatprep.subr.msk.bf16.mxu0 %vm492_vm0, %v4754_v63 }
 0x264   : > { %4540 = vmatmul.mubr.msk.bf16.gmra.mxu0 %vm479_vm1, %v5855_v29 }
 0x265   : > { %4546 = vmatmul.mubr.msk.bf16.vlgmr.msra.gmra.mxu1 %vm479_vm1, %v5853_v27  ;;  %4555 = vmatprep.mubr.bf16.mxu0 %v5843_v22 }
 0x266   : > { %4564 = vmatpush3.bf16.msra.mxu1 %v5856_v9  ;;  %4549 = vmatprep.mubr.msk.bf16.mxu1 %vm479_vm1, %v5855_v29 }
 0x267   : > { %4583 = vmatprep.subr.bf16.mxu1 %v5834_v37 }
 0x26c   : > { %4556 = vmatmul.mubr.msk.bf16.vlgmr.msra.gmra.mxu0 %vm479_vm1, %v5371_v12 }
 0x26d   : > { %4550 = vmatmul.mubr.bf16.gmra.mxu1 %v5843_v22  ;;  %4574 = vmatpush3.bf16.msra.mxu0 %v5859_v25 }
 0x26e   : > { %4559 = vmatprep.mubr.msk.bf16.mxu0 %vm479_vm1, %v5374_v8  ;;  %4565 = vmatprep.mubr.msk.bf16.mxu1 %vm479_vm1, %v5371_v12 }
 0x26f   : > { %4595 = vmatprep.subr.bf16.mxu0 %v5834_v37 }
 0x274   : > { %4560 = vmatmul.mubr.msk.bf16.gmra.mxu0 %vm479_vm1, %v5386_v46 }
 0x275   : > { %4566 = vmatmul.mubr.msk.bf16.vlgmr.msra.gmra.mxu1 %vm479_vm1, %v5374_v8  ;;  %4575 = vmatprep.mubr.msk.bf16.mxu0 %vm479_vm1, %v5374_v8 }
 0x276   : > { %4569 = vmatprep.mubr.msk.bf16.mxu1 %vm479_vm1, %v5386_v46  ;;  %4584 = vmatpush3.bf16.msra.mxu1 %v2864_v11 }
 0x277   : > { %4589 = vmatprep.subr.bf16.mxu1 %v5834_v37 }
 0x27c   : > { %4576 = vmatmul.mubr.msk.bf16.vlgmr.msra.gmra.mxu0 %vm479_vm1, %v5386_v46 }
 0x27d   : > { %4570 = vmatmul.mubr.msk.bf16.gmra.mxu1 %vm479_vm1, %v5397_v10  ;;  %4579 = vmatprep.mubr.msk.bf16.mxu0 %vm479_vm1, %v5397_v10 }
 0x27e   : > { %4585 = vmatprep.mubr.msk.bf16.mxu1 %vm4772_vm2, %v5834_v37  ;;  %4596 = vmatpush3.bf16.msra.mxu0 %v3002_v15 }
 0x27f   : > { %4715 = vmatprep.subr.msk.bf16.mxu0 %vm492_vm0, %v5862_v43 }
 0x284   : > { %4580 = vmatmul.mubr.bf16.gmra.mxu0 %v5843_v22 }
 0x285   : > { %4597 = vmatprep.mubr.msk.bf16.mxu0 %vm4772_vm2, %v5834_v37 }
 0x2ed   : > { %v1971_v24 = vpop.f32.mrf.mxu1 }
 0x2ee   : > { %v1978_v20 = vadd.f32 %v1971_v24, %v5863_v60 }
 0x2ef   : > { %v4473_v41 = vpop.f32.mrf.mxu1 }
 0x2f1   : > { %v1974_v19 = vpop.f32.mrf.mxu1 }
 0x2f2   : > { %v1979_v6 = vadd.f32 %v1974_v19, %v5864_v44 }
 0x2f3   : > { %v4474_v23 = vpop.f32.mrf.mxu1 }
 0x2f4   : > { %v2109_v30 = vpop.f32.mrf.mxu0 }
 0x2f5   : > { %v2040_v39 = vpop.f32.mrf.mxu1 }
 0x2f6   : > { %v2047_v31 = vadd.f32 %v2040_v39, %v1978_v20  ;;  %v4485_v5 = vpop.f32.mrf.mxu0 }
 0x2f7   : > { %v4479_v1 = vpop.f32.mrf.mxu1 }
 0x2f8   : > { %v2116_v59 = vadd.f32 %v2109_v30, %v2047_v31  ;;  %v2112_v33 = vpop.f32.mrf.mxu0 }
 0x2f9   : > { %v2043_v42 = vpop.f32.mrf.mxu1 }
 0x2fa   : > { %v2048_v16 = vadd.f32 %v2043_v42, %v1979_v6  ;;  %v4486_v7 = vpop.f32.mrf.mxu0 }
 0x2fb   : > { %v4480_v35 = vpop.f32.mrf.mxu1 }
 0x2fc   : > { %v2117_v50 = vadd.f32 %v2112_v33, %v2048_v16  ;;  %v4497_v28 = vpop.f32.mrf.mxu0 }
 0x2fd   : > { %v2178_v51 = vpop.f32.mrf.mxu1 }
 0x2fe   : > { %v5423_v52 = vadd.f32 %v2178_v51, %v2116_v59  ;;  %v2221_v58 = vpop.f32.mrf.mxu0 }
 0x2ff   : > { %v4491_v55 = vpop.f32.mrf.mxu1 }
 0x300   : > { %5865 = vst [vmem:[#allocation20_spill] sm:$0xff] %v5423_v52  ;;  %v4498_v61 = vpop.f32.mrf.mxu0 }
 0x301   : > { %v2181_v54 = vpop.f32.mrf.mxu1 }
 0x302   : > { %v5425_v2 = vadd.f32 %v2181_v54, %v2117_v50  ;;  %v5427_v14 = vpop.f32.mrf.mxu0 }
 0x303   : > { %v4492_v47 = vpop.f32.mrf.mxu1 }
 0x304   : > { %5866 = vst [vmem:[#allocation17_spill] sm:$0xff] %v5425_v2  ;;  %v5429_v4 = vpop.f32.mrf.mxu0 }
 0x305   : > { %v4507_v3 = vpop.f32.mrf.mxu1 }
 0x306   : > { %v5431_v53 = vpop.f32.mrf.mxu0  ;;  %v2295_v46 = vadd.f32 %v4507_v3, %v4497_v28 }
 0x307   : > { %v2286_v18 = vpop.f32.mrf.mxu1 }
 0x308   : > { %v5433_v56 = vpop.f32.mrf.mxu0  ;;  %v2287_v12 = vadd.f32 %v2286_v18, %v2221_v58  ;;  %v5487_v58 = vld [vmem:[%s5733_s2 + $0x8] ss:$0 sm:$0xff] }
 0x309   : > { %v4508_v36 = vpop.f32.mrf.mxu1 }
 0x30a   : > { %v5435_v27 = vpop.f32.mrf.mxu0  ;;  %v2298_v57 = vadd.f32 %v4508_v36, %v4498_v61 }
 0x30b   : > { %v2289_v21 = vpop.f32.mrf.mxu1 }
 0x30c   : > { %v4517_v29 = vpop.f32.mrf.mxu0 }
 0x30d   : > { %v4511_v63 = vpop.f32.mrf.mxu1  ;;  %v2384_v38 = vadd.f32 %v4517_v29, %v2295_v46  ;;  %v2916_v29 = vmul.f32 %v5480_v62, %v5828_v0 }
 0x30e   : > { %v2351_v25 = vpop.f32.mrf.mxu0 }
 0x30f   : > { %v2302_v9 = vpop.f32.mrf.mxu1  ;;  %v2382_v48 = vadd.f32 %v2351_v25, %v2287_v12  ;;  %v2290_v12 = vadd.f32 %v2289_v21, %v5427_v14 }
 0x310   : > { %v4518_v11 = vpop.f32.mrf.mxu0 }
 0x311   : > { %v5437_v40 = vpop.f32.mrf.mxu1  ;;  %v2385_v46 = vadd.f32 %v4518_v11, %v2298_v57  ;;  %v2303_v57 = vadd.f32 %v2302_v9, %v5431_v53 }
 0x312   : > { %v2354_v15 = vpop.f32.mrf.mxu0 }
 0x313   : > { %v5439_v45 = vpop.f32.mrf.mxu1  ;;  %v2383_v11 = vadd.f32 %v2354_v15, %v2290_v12 }
 0x314   : > { %v5441_v43 = vpop.f32.mrf.mxu0 }
 0x315   : > { %v4527_v24 = vpop.f32.mrf.mxu1 }
 0x316   : > { %v5443_v60 = vpop.f32.mrf.mxu0  ;;  %v2457_v22 = vadd.f32 %v4527_v24, %v2384_v38  ;;  %v5492_v38 = vld [vmem:[%s5733_s2 + $0xb] ss:$0 sm:$0xff] }
 0x317   : > { %v2424_v20 = vpop.f32.mrf.mxu1  ;;  %v5507_v21 = vmul.f32 %v5492_v38, %v5828_v0  ;;  %v2386_v53 = vadd.f32 %v5443_v60, %v2303_v57 }
 0x318   : > { %v5445_v41 = vpop.f32.mrf.mxu0  ;;  %v2455_v3 = vadd.f32 %v2424_v20, %v2382_v48  ;;  %v5501_v48 = vmul.f32 %v5487_v58, %v5828_v0 }
 0x319   : > { %v4528_v19 = vpop.f32.mrf.mxu1 }
 0x31a   : > { %v5447_v44 = vpop.f32.mrf.mxu0  ;;  %v2458_v25 = vadd.f32 %v4528_v19, %v2385_v46  ;;  %v2314_v19 = vadd.f32 %v5437_v40, %v5433_v56  ;;  %v2306_v46 = vadd.f32 %v5439_v45, %v5435_v27 }
 0x31b   : > { %v2427_v6 = vpop.f32.mrf.mxu1 }
 0x31c   : > { %v4537_v39 = vpop.f32.mrf.mxu0  ;;  %v2387_v56 = vadd.f32 %v5447_v44, %v2306_v46 }
 0x31d   : > { %v5449_v23 = vpop.f32.mrf.mxu1  ;;  %v2530_v18 = vadd.f32 %v4537_v39, %v2457_v22  ;;  %v2311_v22 = vadd.f32 %v4511_v63, %v5429_v4  ;;  %v2456_v63 = vadd.f32 %v2427_v6, %v2383_v11 }
 0x31e   : > { %v2497_v31 = vpop.f32.mrf.mxu0 }
 0x31f   : > { %v5451_v30 = vpop.f32.mrf.mxu1  ;;  %v2528_v24 = vadd.f32 %v2497_v31, %v2455_v3  ;;  %v2388_v4 = vadd.f32 %v5441_v43, %v2311_v22  ;;  %v2389_v3 = vadd.f32 %v5445_v41, %v2314_v19 }
 0x320   : > { %v4538_v5 = vpop.f32.mrf.mxu0 }
 0x321   : > { %v5453_v1 = vpop.f32.mrf.mxu1  ;;  %v2531_v39 = vadd.f32 %v4538_v5, %v2458_v25  ;;  %v2461_v40 = vadd.f32 %v5449_v23, %v2388_v4 }
 0x322   : > { %v2500_v42 = vpop.f32.mrf.mxu0  ;;  %v2462_v43 = vadd.f32 %v5453_v1, %v2389_v3  ;;  %v5528_v1 = vld [vmem:[%s5734_s3] ss:$0 sm:$0xff] }
 0x323   : > { %v5455_v59 = vpop.f32.mrf.mxu1 }
 0x324   : > { %v5457_v33 = vpop.f32.mrf.mxu0 }
 0x325   : > { %v4547_v16 = vpop.f32.mrf.mxu1  ;;  %v2534_v41 = vadd.f32 %v5457_v33, %v2461_v40 }
 0x326   : > { %v5459_v35 = vpop.f32.mrf.mxu0  ;;  %v2603_v26 = vadd.f32 %v4547_v16, %v2530_v18 }
 0x327   : > { %v2570_v7 = vpop.f32.mrf.mxu1 }
 0x328   : > { %v5461_v50 = vpop.f32.mrf.mxu0  ;;  %v2601_v31 = vadd.f32 %v2570_v7, %v2528_v24  ;;  %v2460_v7 = vadd.f32 %v5455_v59, %v2387_v56  ;;  %v5534_v59 = vld [vmem:[%s5733_s2 + $0xa] ss:$0 sm:$0xff] }
 0x329   : > { %v4548_v51 = vpop.f32.mrf.mxu1 }
 0x32a   : > { %v5463_v55 = vpop.f32.mrf.mxu0  ;;  %v2604_v18 = vadd.f32 %v4548_v51, %v2531_v39 }
 0x32b   : > { %v5465_v54 = vpop.f32.mrf.mxu1  ;;  %v2533_v33 = vadd.f32 %v5463_v55, %v2460_v7  ;;  %v2917_v55 = vmul.f32 %v5480_v62, %v5833_v32  ;;  %v4068_v7 = vld [vmem:[%s5736_s5 + $0x24] sm:$0xf] }
 0x32c   : > { %v4557_v2 = vpop.f32.mrf.mxu0 }
 0x32d   : > { %v5467_v47 = vpop.f32.mrf.mxu1  ;;  %v2685_v16 = vadd.f32 %v4557_v2, %v2603_v26  ;;  %v2459_v26 = vadd.f32 %v5451_v30, %v2386_v53  ;;  %v2529_v2 = vadd.f32 %v2500_v42, %v2456_v63  ;;  %v2535_v30 = vadd.f32 %v5461_v50, %v2462_v43 }
 0x32e   : > { %v2652_v10 = vpop.f32.mrf.mxu0 }
 0x32f   : > { %v5469_v52 = vpop.f32.mrf.mxu1  ;;  %v2683_v12 = vadd.f32 %v2652_v10, %v2601_v31  ;;  %v2532_v10 = vadd.f32 %v5459_v35, %v2459_v26  ;;  %v2602_v44 = vadd.f32 %v5465_v54, %v2529_v2  ;;  %v2607_v35 = vadd.f32 %v5467_v47, %v2534_v41 }
 0x330   : > { %v4558_v17 = vpop.f32.mrf.mxu0 }
 0x331   : > { %v5471_v8 = vpop.f32.mrf.mxu1  ;;  %v2686_v60 = vadd.f32 %v4558_v17, %v2604_v18  ;;  %v2605_v50 = vadd.f32 %v5469_v52, %v2532_v10  ;;  %v2985_v52 = vmul.f32 %v5534_v59, %v5828_v0  ;;  %v3055_v10 = vmul.f32 %v5492_v38, %v5833_v32 }
 0x332   : > { %v5475_v13 = vpop.f32.mrf.mxu0  ;;  %v2608_v25 = vadd.f32 %v5471_v8, %v2535_v30 }
 0x333   : > { %v5473_v49 = vpop.f32.mrf.mxu1  ;;  %v2684_v54 = vadd.f32 %v5475_v13, %v2602_v44 }
 0x334   : > { %v5482_v34 = vpop.f32.mrf.mxu0  ;;  %v2606_v13 = vadd.f32 %v5473_v49, %v2533_v33  ;;  %v2848_v49 = vmul.f32 %v5487_v58, %v5833_v32  ;;  %v2933_v33 = vsel %vm492_vm0, %v4068_v7, 0 }
 0x335   : > { %v4567_v28 = vpop.f32.mrf.mxu1  ;;  %v2689_v11 = vadd.f32 %v5482_v34, %v2607_v35  ;;  %v2986_v35 = vmul.f32 %v5534_v59, %v5833_v32  ;;  %v4074_v59 = vld [vmem:[%s5736_s5 + $0x2c] sm:$0xf] }
 0x336   : > { %v5495_v61 = vpop.f32.mrf.mxu0  ;;  %v2761_v37 = vadd.f32 %v4567_v28, %v2685_v16 }
 0x337   : > { %v2728_v36 = vpop.f32.mrf.mxu1  ;;  %v2687_v47 = vadd.f32 %v5495_v61, %v2605_v50 }
 0x338   : > { %v4562_v20 = vpop.f32.mrf.mxu0  ;;  %v2759_v6 = vadd.f32 %v2728_v36, %v2683_v12 }
 0x339   : > { %v4568_v14 = vpop.f32.mrf.mxu1  ;;  %v2690_v39 = vadd.f32 %v4562_v20, %v2608_v25 }
 0x33a   : > { %v2671_v9 = vpop.f32.mrf.mxu0  ;;  %v2762_v42 = vadd.f32 %v4568_v14, %v2686_v60 }
 0x33b   : > { %v2731_v15 = vpop.f32.mrf.mxu1  ;;  %v2688_v53 = vadd.f32 %v2671_v9, %v2606_v13  ;;  %v4757_v13 = vld [vmem:[%s5735_s4] sm:$0xf] }
 0x33c   : > { %v4577_v45 = vpop.f32.mrf.mxu0  ;;  %v2760_v14 = vadd.f32 %v2731_v15, %v2684_v54 }
 0x33d   : > { %v4571_v27 = vpop.f32.mrf.mxu1  ;;  %v2834_v5 = vadd.f32 %v4577_v45, %v2761_v37 }
 0x33e   : > { %v2801_v23 = vpop.f32.mrf.mxu0 }
 0x33f   : > { %v2744_v51 = vpop.f32.mrf.mxu1  ;;  %v2909_v37 = vadd.f32 %v5528_v1, %v2834_v5  ;;  %v2832_v17 = vadd.f32 %v2801_v23, %v2759_v6 }
 0x340   : > { %v4578_v36 = vpop.f32.mrf.mxu0  ;;  %v2763_v62 = vadd.f32 %v2744_v51, %v2687_v47  ;;  %v4758_v47 = vld [vmem:[%s5735_s4 + $0x8] sm:$0xf] }
 0x341   : > { %v4572_v28 = vpop.f32.mrf.mxu1  ;;  %v2918_v24 = vadd.f32 %v2916_v29, %v2909_v37  ;;  %v2840_v22 = vadd.f32 %v5528_v1, %v2832_v17  ;;  %v2835_v57 = vadd.f32 %v4578_v36, %v2762_v42  ;;  %v2765_v29 = vadd.f32 %v4571_v27, %v2689_v11 }
 0x342   : > { %v2804_v19 = vpop.f32.mrf.mxu0  ;;  %v2766_v15 = vadd.f32 %v4572_v28, %v2690_v39  ;;  %v5867_v28 = vmov 0.0   ;;  %v4759_v39 = vld [vmem:[%s4877_s25 + $0x48] sm:$0xff]  }
 0x343   : > { %v2910_v8 = vadd.f32 %v5528_v1, %v2835_v57  ;;  %v2922_v31 = vmul.f32 0.2, %v2918_v24  ;;  %v2849_v16 = vadd.f32 %v5501_v48, %v2840_v22  ;;  %v2747_v34 = vpop.f32.mrf.mxu1  ;;  %v2833_v46 = vadd.f32 %v2804_v19, %v2760_v14  ;;  %v5868_v19 = vld [vmem:[#allocation19_spill] sm:$0xff] }
 0x344   : > { %v4581_v4 = vpop.f32.mrf.mxu0  ;;  %vm2920_vm6 = vcmp.ge.f32.partialorder %v2918_v24, 0.0  ;;  %v2764_v12 = vadd.f32 %v2747_v34, %v2688_v53  ;;  %v5872_v34 = vld [vmem:[#allocation13_spill] sm:$0xff]  ;;  %v5874_v53 = vld [vmem:[#allocation4_spill] sm:$0xff] }
 0x345   : > { %v2919_v63 = vadd.f32 %v2917_v55, %v2910_v8  ;;  %v2841_v3 = vadd.f32 %v5528_v1, %v2833_v46  ;;  %v2838_v61 = vadd.f32 %v4581_v4, %v2765_v29  ;;  %v2924_v48 = vsel %vm2920_vm6, %v2918_v24, %v2922_v31  ;;  %v5869_v8 = vld [vmem:[#allocation18_spill] sm:$0xff]  ;;  %v5870_v29 = vld [vmem:[#allocation21_spill] sm:$0xff]  ;;  %v5873_v46 = vld [vmem:[#allocation28_spill] sm:$0xff] }
 0x346   : > { %v2817_v20 = vpop.f32.mrf.mxu0  ;;  %v2853_v40 = vmul.f32 0.2, %v2849_v16  ;;  %vm2851_vm8 = vcmp.ge.f32.partialorder %v2849_v16, 0.0  ;;  %v3071_v55 = vsel %vm492_vm0, %v4074_v59, 0  ;;  %v4760_v31 = vld [vmem:[%s4877_s25 + $0x50] sm:$0xff]   ;;  %v4761_v4 = vld [vmem:[%s4877_s25 + $0x58] sm:$0xff]  }
 0x347   : > { %vm2921_vm7 = vcmp.ge.f32.partialorder %v2919_v63, 0.0  ;;  %v2923_v18 = vmul.f32 0.2, %v2919_v63  ;;  %v2836_v56 = vadd.f32 %v2817_v20, %v2763_v62  ;;  %v2850_v26 = vadd.f32 %v2848_v49, %v2841_v3  ;;  %v5875_v62 = vld [vmem:[#allocation14_spill] sm:$0xff]  ;;  %v5881_v20 = vld [vmem:[#allocation7_spill] sm:$0xff] }
 0x348   : > { %v3047_v9 = vadd.f32 %v5528_v1, %v2838_v61  ;;  %v4582_v2 = vpop.f32.mrf.mxu0  ;;  %v2855_v51 = vsel %vm2851_vm8, %v2849_v16, %v2853_v40  ;;  %v5871_v16 = vmov 0   ;;  %v5878_v3 = vld [vmem:[#allocation6_spill] sm:$0xff]  ;;  %v5880_v61 = vld [vmem:[#allocation15_spill] sm:$0xff] }
 0x349   : > { %v2925_v27 = vsel %vm2921_vm7, %v2919_v63, %v2923_v18  ;;  %v2978_v45 = vadd.f32 %v5528_v1, %v2836_v56  ;;  %v2839_v43 = vadd.f32 %v4582_v2, %v2766_v15  ;;  %vm2852_vm9 = vcmp.ge.f32.partialorder %v2850_v26, 0.0  ;;  %v5876_v63 = vld [vmem:[#allocation3_spill] sm:$0xff]  ;;  %v5877_v15 = vld [vmem:[#allocation29_spill] sm:$0xff]  ;;  %v5879_v49 = vld [vmem:[#allocation30_spill] sm:$0xff] }
 0x34a   : > { %v2926_v60 = vpack.c.bf16 %v2925_v27, %v2924_v48  ;;  %v2854_v58 = vmul.f32 0.2, %v2850_v26  ;;  %v3056_v6 = vadd.f32 %v5507_v21, %v3047_v9  ;;  %v2820_v5 = vpop.f32.mrf.mxu0  ;;  %v4097_v18 = vld [vmem:[%s5736_s5 + $0x30] sm:$0xf] }
 0x34b   : > { %v3048_v41 = vadd.f32 %v5528_v1, %v2839_v43  ;;  %v2837_v44 = vadd.f32 %v2820_v5, %v2764_v12  ;;  %v2987_v30 = vadd.f32 %v2985_v52, %v2978_v45  ;;  %v4756_v52 = vld [vmem:[%s4877_s25 + $0x40] sm:$0xff]   ;;  %v4100_v12 = vld [vmem:[%s5736_s5 + $0x34] sm:$0xf]  ;;  %v3562_v56 = vsel %vm492_vm0, %v4097_v18, 0 }
 0x34c   : > { %v2856_v23 = vsel %vm2852_vm9, %v2850_v26, %v2854_v58  ;;  %v3060_v37 = vmul.f32 0.2, %v3056_v6  ;;  %vm3058_vm10 = vcmp.ge.f32.partialorder %v3056_v6, 0.0  ;;  %v3631_v48 = vsel %vm492_vm0, %v4100_v12, 0  ;;  %v5882_v26 = vld [vmem:[#allocation20_spill] sm:$0xff]  ;;  %v5883_v45 = vld [vmem:[#allocation17_spill] sm:$0xff] }
 0x34d   : > { %v2857_v42 = vpack.c.bf16 %v2856_v23, %v2855_v51  ;;  %v3057_v17 = vadd.f32 %v3055_v10, %v3048_v41  ;;  %v2979_v21 = vadd.f32 %v5528_v1, %v2837_v44  ;;  %v2991_v38 = vmul.f32 0.2, %v2987_v30 }
 0x34e   : > { %v3062_v36 = vsel %vm3058_vm10, %v3056_v6, %v3060_v37  ;;  %vm2989_vm12 = vcmp.ge.f32.partialorder %v2987_v30, 0.0  ;;  %vm3854_vm9 = vcmask 7168  }
 0x34f   : > { %vm3059_vm11 = vcmp.ge.f32.partialorder %v3057_v17, 0.0  ;;  %v3061_v50 = vmul.f32 0.2, %v3057_v17  ;;  %4586 = vmatmul.mubr.msk.bf16.vlgmr.msra.gmra.mxu1 %vm479_vm1, %v2857_v42  ;;  %v2988_v54 = vadd.f32 %v2986_v35, %v2979_v21  ;;  %v2993_v57 = vsel %vm2989_vm12, %v2987_v30, %v2991_v38 }
 0x350   : > { %4590 = vmatpush3.bf16.msra.mxu1 %v2933_v33  ;;  %4591 = vmatprep.mubr.msk.bf16.mxu1 %vm4772_vm2, %v5867_v28 }
 0x351   : > { %v3063_v25 = vsel %vm3059_vm11, %v3057_v17, %v3061_v50  ;;  %4601 = vmatprep.subr.bf16.mxu1 %v5867_v28  ;;  %vm2990_vm13 = vcmp.ge.f32.partialorder %v2988_v54, 0.0  ;;  %v2992_v22 = vmul.f32 0.2, %v2988_v54 }
 0x352   : > { %v3064_v24 = vpack.c.bf16 %v3063_v25, %v3062_v36 }
 0x353   : > { %v2994_v11 = vsel %vm2990_vm13, %v2988_v54, %v2992_v22 }
 0x354   : > { %v2995_v14 = vpack.c.bf16 %v2994_v11, %v2993_v57 }
 0x356   : > { %4598 = vmatmul.mubr.msk.bf16.vlgmr.msra.gmra.mxu0 %vm479_vm1, %v2995_v14 }
 0x357   : > { %4592 = vmatmul.mubr.msk.bf16.vlgmr.msra.gmra.mxu1 %vm479_vm1, %v2926_v60  ;;  %4608 = vmatpush3.bf16.msra.mxu0 %v5868_v19 }
 0x358   : > { %4602 = vmatpush3.bf16.msra.mxu1 %v3071_v55  ;;  %4603 = vmatprep.mubr.msk.bf16.mxu1 %vm4772_vm2, %v5867_v28 }
 0x359   : > { %4609 = vmatprep.mubr.msk.bf16.mxu0 %vm479_vm1, %v4756_v52  ;;  %4716 = vmatprep.subr.msk.bf16.mxu1 %vm492_vm0, %v4757_v13 }
 0x35a   : > { %4717 = vmatprep.subr.msk.bf16.mxu0 %vm492_vm0, %v4758_v47 }
 0x35e   : > { %4610 = vmatmul.mubr.msk.bf16.vlgmr.msra.gmra.mxu0 %vm479_vm1, %v4759_v39 }
 0x35f   : > { %4604 = vmatmul.mubr.msk.bf16.vlgmr.msra.gmra.mxu1 %vm479_vm1, %v3064_v24  ;;  %4628 = vmatpush3.bf16.msra.mxu0 %v5870_v29 }
 0x360   : > { %4618 = vmatpush3.bf16.msra.mxu1 %v5869_v8  ;;  %4613 = vmatprep.mubr.msk.bf16.mxu0 %vm479_vm1, %v4760_v31 }
 0x361   : > { %4619 = vmatprep.mubr.bf16.mxu1 %v5871_v16  ;;  %4718 = vmatprep.subr.msk.bf16.mxu1 %vm492_vm0, %v5872_v34 }
 0x362   : > { %4719 = vmatprep.subr.msk.bf16.mxu0 %vm492_vm0, %v5873_v46 }
 0x366   : > { %4614 = vmatmul.mubr.msk.bf16.gmra.mxu0 %vm479_vm1, %v4761_v4 }
 0x367   : > { %4620 = vmatmul.mubr.msk.bf16.vlgmr.msra.gmra.mxu1 %vm479_vm1, %v4756_v52  ;;  %4629 = vmatprep.mubr.msk.bf16.mxu0 %vm479_vm1, %v4759_v39 }
 0x368   : > { %4638 = vmatpush3.bf16.msra.mxu1 %v5874_v53  ;;  %4623 = vmatprep.mubr.msk.bf16.mxu1 %vm479_vm1, %v4759_v39 }
 0x369   : > { %4720 = vmatprep.subr.msk.bf16.mxu1 %vm492_vm0, %v5875_v62 }
 0x36e   : > { %4630 = vmatmul.mubr.msk.bf16.vlgmr.msra.gmra.mxu0 %vm479_vm1, %v4760_v31 }
 0x36f   : > { %4624 = vmatmul.mubr.msk.bf16.gmra.mxu1 %vm479_vm1, %v4760_v31  ;;  %4648 = vmatpush3.bf16.msra.mxu0 %v5876_v63 }
 0x370   : > { %4633 = vmatprep.mubr.msk.bf16.mxu0 %vm479_vm1, %v4761_v4  ;;  %4639 = vmatprep.mubr.bf16.mxu1 %v5871_v16 }
 0x371   : > { %4667 = vmatprep.subr.bf16.mxu0 %v5867_v28 }
 0x376   : > { %4634 = vmatmul.mubr.bf16.gmra.mxu0 %v5871_v16 }
 0x377   : > { %4640 = vmatmul.mubr.msk.bf16.vlgmr.msra.gmra.mxu1 %vm479_vm1, %v5877_v15  ;;  %4649 = vmatprep.mubr.msk.bf16.mxu0 %vm479_vm1, %v5877_v15 }
 0x378   : > { %4658 = vmatpush3.bf16.msra.mxu1 %v5878_v3  ;;  %4643 = vmatprep.mubr.msk.bf16.mxu1 %vm479_vm1, %v5879_v49 }
 0x379   : > { %4673 = vmatprep.subr.bf16.mxu1 %v5867_v28 }
 0x37e   : > { %4650 = vmatmul.mubr.msk.bf16.vlgmr.msra.gmra.mxu0 %vm479_vm1, %v5879_v49 }
 0x37f   : > { %4644 = vmatmul.mubr.msk.bf16.gmra.mxu1 %vm479_vm1, %v5880_v61  ;;  %4653 = vmatprep.mubr.msk.bf16.mxu0 %vm479_vm1, %v5880_v61 }
 0x380   : > { %4659 = vmatprep.mubr.msk.bf16.mxu1 %vm479_vm1, %v5879_v49  ;;  %4668 = vmatpush3.bf16.msra.mxu0 %v3562_v56 }
 0x381   : > { %4679 = vmatprep.subr.bf16.mxu0 %v5867_v28 }
 0x386   : > { %4654 = vmatmul.mubr.msk.bf16.gmra.mxu0 %vm479_vm1, %v5881_v20 }
 0x387   : > { %4660 = vmatmul.mubr.msk.bf16.vlgmr.msra.gmra.mxu1 %vm479_vm1, %v5880_v61  ;;  %4669 = vmatprep.mubr.msk.bf16.mxu0 %vm4772_vm2, %v5867_v28 }
 0x388   : > { %4663 = vmatprep.mubr.msk.bf16.mxu1 %vm479_vm1, %v5881_v20  ;;  %4674 = vmatpush3.bf16.msra.mxu1 %v3631_v48 }
 0x389   : > { %4685 = vmatprep.subr.bf16.mxu1 %v5867_v28 }
 0x38f   : > { %4664 = vmatmul.mubr.bf16.gmra.mxu1 %v5871_v16 }
 0x390   : > { %4675 = vmatprep.mubr.msk.bf16.mxu1 %vm4772_vm2, %v5867_v28 }
 0x40f   : > { %v2900_v40 = vpop.f32.mrf.mxu1 }
 0x410   : > { %v2907_v9 = vadd.f32 %v2900_v40, %v5882_v26 }
 0x411   : > { %v4587_v2 = vpop.f32.mrf.mxu1 }
 0x413   : > { %v2903_v27 = vpop.f32.mrf.mxu1 }
 0x414   : > { %v2908_v43 = vadd.f32 %v2903_v27, %v5883_v45 }
 0x415   : > { %v4588_v60 = vpop.f32.mrf.mxu1 }
 0x416   : > { %v3038_v6 = vpop.f32.mrf.mxu0  ;;  %v4096_v60 = vld [vmem:[%s5733_s2 + $0xc] ss:$0 sm:$0xff] }
 0x417   : > { %v2969_v58 = vpop.f32.mrf.mxu1 }
 0x418   : > { %v2976_v5 = vadd.f32 %v2969_v58, %v2907_v9  ;;  %v4599_v41 = vpop.f32.mrf.mxu0 }
 0x419   : > { %v4593_v7 = vpop.f32.mrf.mxu1 }
 0x41a   : > { %v3045_v10 = vadd.f32 %v3038_v6, %v2976_v5  ;;  %v3041_v51 = vpop.f32.mrf.mxu0  ;;  %v5669_v5 = vld [vmem:[%s5733_s2 + $0xf] ss:$0 sm:$0xff] }
 0x41b   : > { %v2972_v44 = vpop.f32.mrf.mxu1 }
 0x41c   : > { %v2977_v23 = vadd.f32 %v2972_v44, %v2908_v43  ;;  %v4600_v42 = vpop.f32.mrf.mxu0  ;;  %v4099_v43 = vld [vmem:[%s5733_s2 + $0xd] ss:$0 sm:$0xff] }
 0x41d   : > { %v4594_v30 = vpop.f32.mrf.mxu1  ;;  %v3545_v42 = vmul.f32 %v4096_v60, %v5828_v0 }
 0x41e   : > { %v3046_v37 = vadd.f32 %v3041_v51, %v2977_v23  ;;  %v4611_v33 = vpop.f32.mrf.mxu0  ;;  %v3614_v30 = vmul.f32 %v4099_v43, %v5828_v0 }
 0x41f   : > { %v3107_v17 = vpop.f32.mrf.mxu1 }
 0x420   : > { %v5656_v21 = vadd.f32 %v3107_v17, %v3045_v10  ;;  %v3150_v50 = vpop.f32.mrf.mxu0 }
 0x421   : > { %v4605_v35 = vpop.f32.mrf.mxu1 }
 0x422   : > { %v4612_v54 = vpop.f32.mrf.mxu0  ;;  %v5675_v35 = vmul.f32 %v5669_v5, %v5828_v0 }
 0x423   : > { %v3110_v38 = vpop.f32.mrf.mxu1 }
 0x424   : > { %v5658_v36 = vadd.f32 %v3110_v38, %v3046_v37  ;;  %v3153_v24 = vpop.f32.mrf.mxu0 }
 0x425   : > { %v4606_v25 = vpop.f32.mrf.mxu1 }
 0x426   : > { %v4615_v22 = vpop.f32.mrf.mxu0 }
 0x427   : > { %v4621_v59 = vpop.f32.mrf.mxu1 }
 0x428   : > { %v3166_v57 = vpop.f32.mrf.mxu0  ;;  %v3224_v18 = vadd.f32 %v4621_v59, %v4611_v33 }
 0x429   : > { %v3215_v11 = vpop.f32.mrf.mxu1 }
 0x42a   : > { %v4616_v14 = vpop.f32.mrf.mxu0  ;;  %v3216_v48 = vadd.f32 %v3215_v11, %v3150_v50 }
 0x42b   : > { %v4622_v55 = vpop.f32.mrf.mxu1 }
 0x42c   : > { %v3169_v19 = vpop.f32.mrf.mxu0  ;;  %v3227_v2 = vadd.f32 %v4622_v55, %v4612_v54 }
 0x42d   : > { %v3218_v52 = vpop.f32.mrf.mxu1 }
 0x42e   : > { %v4631_v47 = vpop.f32.mrf.mxu0  ;;  %v3219_v44 = vadd.f32 %v3218_v52, %v3153_v24  ;;  %v3615_v24 = vmul.f32 %v4099_v43, %v5833_v32 }
 0x42f   : > { %v4625_v13 = vpop.f32.mrf.mxu1  ;;  %v3313_v40 = vadd.f32 %v4631_v47, %v3224_v18 }
 0x430   : > { %v3280_v8 = vpop.f32.mrf.mxu0  ;;  %v3240_v50 = vadd.f32 %v4625_v13, %v4615_v22 }
 0x431   : > { %v3231_v39 = vpop.f32.mrf.mxu1  ;;  %v3311_v27 = vadd.f32 %v3280_v8, %v3216_v48  ;;  %v5682_v8 = vld [vmem:[%s5733_s2 + $0xe] ss:$0 sm:$0xff] }
 0x432   : > { %v4632_v31 = vpop.f32.mrf.mxu0  ;;  %v3232_v38 = vadd.f32 %v3231_v39, %v3166_v57  ;;  %v3683_v48 = vmul.f32 %v5682_v8, %v5828_v0 }
 0x433   : > { %v4626_v29 = vpop.f32.mrf.mxu1  ;;  %v3314_v7 = vadd.f32 %v4632_v31, %v3227_v2 }
 0x434   : > { %v3283_v34 = vpop.f32.mrf.mxu0  ;;  %v3243_v11 = vadd.f32 %v4626_v29, %v4616_v14 }
 0x435   : > { %v3234_v16 = vpop.f32.mrf.mxu1  ;;  %v3312_v54 = vadd.f32 %v3283_v34, %v3219_v44 }
 0x436   : > { %v4635_v46 = vpop.f32.mrf.mxu0  ;;  %v3235_v31 = vadd.f32 %v3234_v16, %v3169_v19 }
 0x437   : > { %v4641_v4 = vpop.f32.mrf.mxu1 }
 0x438   : > { %v3296_v53 = vpop.f32.mrf.mxu0  ;;  %v3386_v45 = vadd.f32 %v4641_v4, %v3313_v40  ;;  %v3317_v4 = vadd.f32 %v4635_v46, %v3240_v50 }
 0x439   : > { %v3353_v62 = vpop.f32.mrf.mxu1 }
 0x43a   : > { %v4636_v63 = vpop.f32.mrf.mxu0  ;;  %v3384_v41 = vadd.f32 %v3353_v62, %v3311_v27  ;;  %v3315_v62 = vadd.f32 %v3296_v53, %v3232_v38  ;;  %v4106_v53 = vld [vmem:[%s5736_s5 + $0x3c] sm:$0xf] }
 0x43b   : > { %v4642_v15 = vpop.f32.mrf.mxu1  ;;  %v3318_v39 = vadd.f32 %v4636_v63, %v3243_v11 }
 0x43c   : > { %v3299_v3 = vpop.f32.mrf.mxu0  ;;  %v3387_v37 = vadd.f32 %v4642_v15, %v3314_v7 }
 0x43d   : > { %v3356_v49 = vpop.f32.mrf.mxu1  ;;  %v3316_v40 = vadd.f32 %v3299_v3, %v3235_v31 }
 0x43e   : > { %v4651_v20 = vpop.f32.mrf.mxu0  ;;  %v3385_v22 = vadd.f32 %v3356_v49, %v3312_v54 }
 0x43f   : > { %v4645_v61 = vpop.f32.mrf.mxu1  ;;  %v3459_v10 = vadd.f32 %v4651_v20, %v3386_v45 }
 0x440   : > { %v3426_v56 = vpop.f32.mrf.mxu0  ;;  %v3390_v29 = vadd.f32 %v4645_v61, %v3317_v4 }
 0x441   : > { %v3369_v12 = vpop.f32.mrf.mxu1  ;;  %v3457_v17 = vadd.f32 %v3426_v56, %v3384_v41  ;;  %v3546_v56 = vmul.f32 %v4096_v60, %v5833_v32 }
 0x442   : > { %v4652_v9 = vpop.f32.mrf.mxu0  ;;  %v3388_v19 = vadd.f32 %v3369_v12, %v3315_v62 }
 0x443   : > { %v4646_v26 = vpop.f32.mrf.mxu1  ;;  %v3460_v55 = vadd.f32 %v4652_v9, %v3387_v37 }
 0x444   : > { %v3429_v6 = vpop.f32.mrf.mxu0  ;;  %v3391_v16 = vadd.f32 %v4646_v26, %v3318_v39 }
 0x445   : > { %v3372_v58 = vpop.f32.mrf.mxu1  ;;  %v3458_v20 = vadd.f32 %v3429_v6, %v3385_v22  ;;  %v3769_v6 = vsel %vm492_vm0, %v4106_v53, 0 }
 0x446   : > { %v4655_v51 = vpop.f32.mrf.mxu0  ;;  %v3389_v45 = vadd.f32 %v3372_v58, %v3316_v40 }
 0x447   : > { %v4661_v23 = vpop.f32.mrf.mxu1  ;;  %v3463_v63 = vadd.f32 %v4655_v51, %v3390_v29 }
 0x448   : > { %v3532_v33 = vadd.f32 %v4661_v23, %v3459_v10  ;;  %v3442_v25 = vpop.f32.mrf.mxu0 }
 0x449   : > { %v3499_v59 = vpop.f32.mrf.mxu1  ;;  %v3461_v43 = vadd.f32 %v3442_v25, %v3388_v19  ;;  %v4103_v25 = vld [vmem:[%s5736_s5 + $0x38] sm:$0xf] }
 0x44a   : > { %v3607_v52 = vadd.f32 %v5528_v1, %v3532_v33  ;;  %v3530_v47 = vadd.f32 %v3499_v59, %v3457_v17  ;;  %v4656_v57 = vpop.f32.mrf.mxu0 }
 0x44b   : > { %v4662_v13 = vpop.f32.mrf.mxu1  ;;  %v3464_v0 = vadd.f32 %v4656_v57, %v3391_v16 }
 0x44c   : > { %v3616_v34 = vadd.f32 %v3614_v30, %v3607_v52  ;;  %v3538_v15 = vadd.f32 %v5528_v1, %v3530_v47  ;;  %v3533_v14 = vadd.f32 %v4662_v13, %v3460_v55  ;;  %v3445_v61 = vpop.f32.mrf.mxu0 }
 0x44d   : > { %v3502_v18 = vpop.f32.mrf.mxu1  ;;  %v3462_v41 = vadd.f32 %v3445_v61, %v3389_v45  ;;  %v4108_v45 = vld [vmem:[%s5737_s6] ss:$0 sm:$0xff] }
 0x44e   : > { %v3608_v46 = vadd.f32 %v5528_v1, %v3533_v14  ;;  %v3620_v49 = vmul.f32 0.2, %v3616_v34  ;;  %v3547_v9 = vadd.f32 %v3545_v42, %v3538_v15  ;;  %v3531_v2 = vadd.f32 %v3502_v18, %v3458_v20 }
 0x44f   : > { %v4665_v27 = vpop.f32.mrf.mxu1  ;;  %vm3618_vm14 = vcmp.ge.f32.partialorder %v3616_v34, 0.0 }
 0x450   : > { %v3617_v60 = vadd.f32 %v3615_v24, %v3608_v46  ;;  %v3539_v3 = vadd.f32 %v5528_v1, %v3531_v2  ;;  %v3536_v12 = vadd.f32 %v4665_v27, %v3463_v63  ;;  %v3622_v44 = vsel %vm3618_vm14, %v3616_v34, %v3620_v49 }
 0x451   : > { %v3515_v26 = vpop.f32.mrf.mxu1  ;;  %v3551_v51 = vmul.f32 0.2, %v3547_v9  ;;  %vm3549_vm3 = vcmp.ge.f32.partialorder %v3547_v9, 0.0  ;;  %v3753_v24 = vmul.f32 %v5669_v5, %v5833_v32  ;;  %v3684_v5 = vmul.f32 %v5682_v8, %v5833_v32 }
 0x452   : > { %vm3619_vm15 = vcmp.ge.f32.partialorder %v3617_v60, 0.0  ;;  %v3621_v7 = vmul.f32 0.2, %v3617_v60  ;;  %v3534_v10 = vadd.f32 %v3515_v26, %v3461_v43  ;;  %v3548_v23 = vadd.f32 %v3546_v56, %v3539_v3 }
 0x453   : > { %v3745_v30 = vadd.f32 %v5528_v1, %v3536_v12  ;;  %v4666_v58 = vpop.f32.mrf.mxu1  ;;  %v3553_v55 = vsel %vm3549_vm3, %v3547_v9, %v3551_v51 }
 0x454   : > { %v3623_v42 = vsel %vm3619_vm15, %v3617_v60, %v3621_v7  ;;  %v3676_v37 = vadd.f32 %v5528_v1, %v3534_v10  ;;  %v3537_v17 = vadd.f32 %v4666_v58, %v3464_v0  ;;  %vm3550_vm4 = vcmp.ge.f32.partialorder %v3548_v23, 0.0 }
 0x455   : > { %v3624_v33 = vpack.c.bf16 %v3623_v42, %v3622_v44  ;;  %v3552_v50 = vmul.f32 0.2, %v3548_v23  ;;  %v3754_v38 = vadd.f32 %v5675_v35, %v3745_v30  ;;  %v3518_v54 = vpop.f32.mrf.mxu1  ;;  %v3700_v35 = vsel %vm492_vm0, %v4103_v25, 0 }
 0x456   : > { %v3746_v59 = vadd.f32 %v5528_v1, %v3537_v17  ;;  %v3535_v11 = vadd.f32 %v3518_v54, %v3462_v41  ;;  %v3685_v47 = vadd.f32 %v3683_v48, %v3676_v37  ;;  %v4109_v41 = vld [vmem:[%s5738_s7] ss:$0 sm:$0xff] }
 0x457   : > { %v3554_v52 = vsel %vm3550_vm4, %v3548_v23, %v3552_v50  ;;  %4676 = vmatmul.mubr.msk.bf16.vlgmr.msra.gmra.mxu1 %vm479_vm1, %v3624_v33  ;;  %v3758_v4 = vmul.f32 0.2, %v3754_v38  ;;  %vm3756_vm5 = vcmp.ge.f32.partialorder %v3754_v38, 0.0  ;;  %v4110_v17 = vld [vmem:[#allocation2] ss:$0 sm:$0xff] }
 0x458   : > { %v3555_v31 = vpack.c.bf16 %v3554_v52, %v3553_v55  ;;  %v3755_v62 = vadd.f32 %v3753_v24, %v3746_v59  ;;  %4686 = vmatpush3.bf16.msra.mxu1 %v3769_v6  ;;  %4687 = vmatprep.mubr.msk.bf16.mxu1 %vm4772_vm2, %v5867_v28  ;;  %v3677_v22 = vadd.f32 %v5528_v1, %v3535_v11  ;;  %v3689_v13 = vmul.f32 0.2, %v3685_v47 }
 0x459   : > { %v3760_v34 = vsel %vm3756_vm5, %v3754_v38, %v3758_v4  ;;  %vm3687_vm0 = vcmp.ge.f32.partialorder %v3685_v47, 0.0 }
 0x45a   : > { %vm3757_vm6 = vcmp.ge.f32.partialorder %v3755_v62, 0.0  ;;  %v3759_v57 = vmul.f32 0.2, %v3755_v62  ;;  %4670 = vmatmul.mubr.msk.bf16.vlgmr.msra.gmra.mxu0 %vm479_vm1, %v3555_v31  ;;  %v3686_v39 = vadd.f32 %v3684_v5, %v3677_v22  ;;  %v3691_v1 = vsel %vm3687_vm0, %v3685_v47, %v3689_v13 }
 0x45b   : > { %4680 = vmatpush3.bf16.msra.mxu0 %v3700_v35  ;;  %4681 = vmatprep.mubr.msk.bf16.mxu0 %vm4772_vm2, %v5867_v28  ;;  %vm3838_vm2 = vcmask 261120  }
 0x45c   : > { %v3761_v15 = vsel %vm3757_vm6, %v3755_v62, %v3759_v57  ;;  %vm3688_vm7 = vcmp.ge.f32.partialorder %v3686_v39, 0.0  ;;  %v3690_v29 = vmul.f32 0.2, %v3686_v39 }
 0x45d   : > { %v3762_v14 = vpack.c.bf16 %v3761_v15, %v3760_v34 }
 0x45e   : > { %v3692_v20 = vsel %vm3688_vm7, %v3686_v39, %v3690_v29 }
 0x45f   : > { %4688 = vmatmul.mubr.msk.bf16.vlgmr.msra.gmra.mxu1 %vm479_vm1, %v3762_v14  ;;  %v3693_v32 = vpack.c.bf16 %v3692_v20, %v3691_v1 }
 0x462   : > { %4682 = vmatmul.mubr.msk.bf16.vlgmr.msra.gmra.mxu0 %vm479_vm1, %v3693_v32 }
 0x517   : > { %v3667_v8 = vpop.f32.mrf.mxu1 }
 0x519   : > { %v4677_v18 = vpop.f32.mrf.mxu1 }
 0x51a   : > { %v3598_v56 = vpop.f32.mrf.mxu0 }
 0x51b   : > { %v3670_v48 = vpop.f32.mrf.mxu1  ;;  %v3605_v28 = vadd.f32 %v3598_v56, %v5656_v21 }
 0x51c   : > { %v4671_v40 = vpop.f32.mrf.mxu0 }
 0x51d   : > { %v4678_v19 = vpop.f32.mrf.mxu1  ;;  %v3674_v49 = vadd.f32 %v3667_v8, %v3605_v28 }
 0x51e   : > { %v3601_v16 = vpop.f32.mrf.mxu0 }
 0x51f   : > { %v3805_v46 = vpop.f32.mrf.mxu1  ;;  %v3606_v63 = vadd.f32 %v3601_v16, %v5658_v36 }
 0x520   : > { %v4672_v53 = vpop.f32.mrf.mxu0 }
 0x521   : > { %v4689_v9 = vpop.f32.mrf.mxu1  ;;  %v3675_v0 = vadd.f32 %v3670_v48, %v3606_v63 }
 0x522   : > { %v3736_v61 = vpop.f32.mrf.mxu0 }
 0x523   : > { %v3743_v2 = vadd.f32 %v3736_v61, %v3674_v49  ;;  %v3808_v27 = vpop.f32.mrf.mxu1 }
 0x524   : > { %v4683_v43 = vpop.f32.mrf.mxu0 }
 0x525   : > { %v3812_v60 = vadd.f32 %v3805_v46, %v3743_v2  ;;  %v4690_v3 = vpop.f32.mrf.mxu1 }
 0x526   : > { %v3739_v21 = vpop.f32.mrf.mxu0 }
 0x527   : > { %v3821_v12 = vadd.f32 %v4108_v45, %v3812_v60  ;;  %v3744_v26 = vadd.f32 %v3739_v21, %v3675_v0 }
 0x528   : > { %v4684_v6 = vpop.f32.mrf.mxu0 }
 0x529   : > { %v3813_v7 = vadd.f32 %v3808_v27, %v3744_v26  ;;  %vm3823_vm1 = vcmp.ge.f32.partialorder %v3821_v12, 0.0  ;;  %v3825_v36 = vmul.f32 0.2, %v3821_v12 }
 0x52b   : > { %v3822_v10 = vadd.f32 %v4108_v45, %v3813_v7  ;;  %v3827_v44 = vsel %vm3823_vm1, %v3821_v12, %v3825_v36 }
 0x52c   : > { %v3836_v51 = vmul.f32 %v4109_v41, %v3827_v44 }
 0x52d   : > { %vm3824_vm8 = vcmp.ge.f32.partialorder %v3822_v10, 0.0  ;;  %v3826_v23 = vmul.f32 0.2, %v3822_v10 }
 0x52e   : > { %v3839_v30 = vsel %vm3838_vm2, %v3836_v51, 0.0 }
 0x52f   : > { %3840 = vadd.xlane.f32.xlu1 %v3839_v30  ;;  %v3828_v58 = vsel %vm3824_vm8, %v3822_v10, %v3826_v23 }
 0x530   : > { %v3837_v42 = vmul.f32 %v4109_v41, %v3828_v58 }
 0x532   : > { %v3842_v37 = vsel %vm3838_vm2, %v3837_v42, 0.0 }
 0x533   : > { %3843 = vadd.xlane.f32.xlu1 %v3842_v37 }
 0x5b8   : > { %v3841_v33 = vpop.xlane.xlu1 %3840 }
 0x5b9   : > { %v3852_v50 = vadd.f32 %v4110_v17, %v3841_v33 }
 0x5bb   : > { %3855 = vst.msk [vmem:[%s358_s17] sm:$0xff] %vm3854_vm9, %v3852_v50 }
 0x5bc   : > { %v3844_v38 = vpop.xlane.xlu1 %3843 }
 0x5bd   : > { %v3853_v54 = vadd.f32 %v4110_v17, %v3844_v38 }
 0x5bf   : > { %3856 = vst.msk [vmem:[%s358_s17 + $0x8] sm:$0xff] %vm3854_vm9, %v3853_v54 }
 0x5c0 PF: > { %s21_s11 = sadd.s32 1, %s4768_s11  }
 0x5c1   : > { %p18_p5 = scmp.ge.s32.totalorder %s21_s11, 4  }
 0x5c3   :  { %20 = sbr.rel (!%p18_p5) target bundleno = 3 (0x3), region = 112 }

</bundles_post_ra>
